<compile_context>
chip_gen: v5e
topology: v5e:2x2
jax: 0.10.0
libtpu: 0.0.40
codegen_flags: <defaults>
</compile_context>

<pallas_src>
import functools

import jax
import jax.numpy as jnp
from jax.experimental import pallas as pl
from jax.experimental.pallas import tpu as pltpu

TB_MAX = 1024   # largest batch tile (sweep 512/1024/2048 per generation)
TB_MIN = 256    # floor so small B still fills the MXU M dimension


def lancelot_kernel(x_ref,
                    w_in, b_enc, w_mid, w_out, b_out,
                    d_mid, c_mid, d_out, c_out,
                    o_ref, *, frame_dtype):
    f32 = jnp.float32
    bf16 = jnp.bfloat16
    x = x_ref[...]                                      # (TB, 36) bf16

    def mm(h, w):                                       # bf16 MXU matmul, f32 acc
        return jnp.dot(h.astype(bf16), w, preferred_element_type=f32)

    # ---------------- encoder ----------------
    # w_in is zero-padded over input rows 30..35, so the whole x tile feeds
    # the MXU directly (no x[:, :30] lane-slice relayout).
    h = jnp.maximum(mm(x, w_in[...]) + b_enc[0:1, :], 0.0)
    h = jnp.maximum(mm(h, w_mid[0]) + b_enc[1:2, :], 0.0)
    h = jnp.maximum(mm(h, w_mid[1]) + b_enc[2:3, :], 0.0)
    h = jnp.maximum(mm(h, w_mid[2]) + b_enc[3:4, :], 0.0)
    lc = mm(h, w_out[...]) + b_out[...]                 # (TB, 32) f32

    # ------------- local frame (bf16 on v6e/v7x, f32 on v5e) -------------
    fd = frame_dtype
    t = lc[:, 26:29].astype(fd)                         # lc[..., -6:-3]
    n = lc[:, 29:32].astype(fd)                         # lc[..., -3:]
    t = t - jnp.sum(t * n, axis=-1, keepdims=True) * n  # Gram-Schmidt step

    def roll3(v, k):                                    # left-rotate 3 lanes
        return jnp.concatenate([v[:, k:], v[:, :k]], axis=-1)

    # cross(t, n) via 3-lane rolls (no six (TB,1) slice/concat chains)
    b = roll3(t, 1) * roll3(n, 2) - roll3(t, 2) * roll3(n, 1)

    wi = x[:, 30:33].astype(fd)                         # x[..., -6:-3]
    wo = x[:, 33:36].astype(fd)                         # x[..., -3:]
    # (onb^T @ w) with onb rows [t, b, n]  =>  w0*t + w1*b + w2*n
    wi_local = t * wi[:, 0:1] + b * wi[:, 1:2] + n * wi[:, 2:3]
    wo_local = t * wo[:, 0:1] + b * wo[:, 1:2] + n * wo[:, 2:3]

    # ---------------- decoder ----------------
    # Single matmul for layer 1: lane-insert the frame vectors back into lc
    # and use the un-modified d1 (no K=3 side matmuls).
    dec_in = jnp.concatenate(
        [lc[:, :26].astype(fd), wi_local, wo_local], axis=-1)   # (TB, 32)
    h = jnp.maximum(mm(dec_in, d_mid[0]) + c_mid[0:1, :], 0.0)
    h = jnp.maximum(mm(h, d_mid[1]) + c_mid[1:2, :], 0.0)
    h = jnp.maximum(mm(h, d_mid[2]) + c_mid[2:3, :], 0.0)
    o_ref[...] = mm(h, d_out[...]) + c_out[...]         # (TB, 3) f32


def pack_params(params):
    """Pack the 18 logical (f32, (in,out)-layout) params into 9 kernel refs."""
    (w1, b1, w2, b2, w3, b3, w4, b4, w5, b5,
     d1, c1, d2, c2, d3, c3, d4, c4) = params
    bf16 = jnp.bfloat16
    w_in = jnp.zeros((36, 64), jnp.float32).at[:30, :].set(w1).astype(bf16)
    b_enc = jnp.concatenate([b1, b2, b3, b4], axis=0)               # (4,64) f32
    w_mid = jnp.stack([w2, w3, w4], axis=0).astype(bf16)            # (3,64,64)
    w_out = w5.astype(bf16)                                         # (64,32)
    b_out = b5                                                      # (1,32) f32
    d_mid = jnp.stack([d1, d2, d3], axis=0).astype(bf16)            # (3,32,32)
    c_mid = jnp.concatenate([c1, c2, c3], axis=0)                   # (3,32) f32
    d_out = d4.astype(bf16)                                         # (32,3)
    c_out = c4                                                      # (1,3) f32
    return (w_in, b_enc, w_mid, w_out, b_out, d_mid, c_mid, d_out, c_out)


def _frame_dtype():
    """bf16 frame math only where the VPU has native bf16 (v6e / v7x)."""
    try:
        kind = jax.devices()[0].device_kind.lower()
    except Exception:
        return jnp.float32
    if ("v6" in kind) or ("v7" in kind) or ("7x" in kind):
        return jnp.bfloat16
    return jnp.float32          # v5e/v4: no bf16 VALU -> keep f32


def _choose_tb(batch, tb_max=TB_MAX, tb_min=TB_MIN, target_steps=4):
    """Largest tile that still leaves >= target_steps grid steps (megacore)."""
    tb = tb_max
    while tb > tb_min and pl.cdiv(batch, tb) < target_steps:
        tb //= 2
    return tb


def lancelot_forward(x, packed, *, tb=None, frame_dtype=None):
    B, F = x.shape
    assert F == 36
    if tb is None:
        tb = _choose_tb(B)
    if frame_dtype is None:
        frame_dtype = _frame_dtype()

    Bp = pl.cdiv(B, tb) * tb
    xb = x.astype(jnp.bfloat16)          # halve the HBM read stream (72 B/row)
    if Bp != B:
        xb = jnp.concatenate([xb, jnp.zeros((Bp - B, F), xb.dtype)], axis=0)

    def _const_block(p):
        # whole array resident; constant block index across the grid
        return pl.BlockSpec(p.shape, lambda i, nd=p.ndim: (0,) * nd)

    flops = 2 * Bp * (36 * 64 + 3 * 64 * 64 + 64 * 32 + 3 * 32 * 32 + 32 * 3)
    bytes_accessed = Bp * (36 * 2 + 3 * 4) + sum(
        int(p.size) * p.dtype.itemsize for p in packed)

    kernel = functools.partial(lancelot_kernel, frame_dtype=frame_dtype)
    out = pl.pallas_call(
        kernel,
        out_shape=jax.ShapeDtypeStruct((Bp, 3), jnp.float32),
        grid=(Bp // tb,),
        in_specs=[pl.BlockSpec((tb, 36), lambda i: (i, 0))]
                 + [_const_block(p) for p in packed],
        out_specs=pl.BlockSpec((tb, 3), lambda i: (i, 0)),
        compiler_params=pltpu.CompilerParams(
            dimension_semantics=("parallel",)),
        cost_estimate=pl.CostEstimate(flops=flops, transcendentals=0,
                                      bytes_accessed=bytes_accessed),
    )(xb, *packed)
    return out[:B]


def make_params(key):
    """Deterministic synthetic parameters (scaled normal init), (in,out) layout."""
    shapes = [
        (30, 64), (1, 64),     # encoder L1
        (64, 64), (1, 64),     # encoder L2
        (64, 64), (1, 64),     # encoder L3
        (64, 64), (1, 64),     # encoder L4
        (64, 32), (1, 32),     # encoder L5
        (32, 32), (1, 32),     # decoder L1
        (32, 32), (1, 32),     # decoder L2
        (32, 32), (1, 32),     # decoder L3
        (32, 3),  (1, 3),      # decoder L4
    ]
    keys = jax.random.split(key, len(shapes))
    return [0.1 * jax.random.normal(k, s, dtype=jnp.float32)
            for k, s in zip(keys, shapes)]


def ref_forward(x, params):
    """Pure-JAX f32 reference (mirrors the PyTorch forward exactly)."""
    (w1, b1, w2, b2, w3, b3, w4, b4, w5, b5,
     d1, c1, d2, c2, d3, c3, d4, c4) = params
    dot = functools.partial(jnp.dot, precision=jax.lax.Precision.HIGHEST)
    h = jax.nn.relu(dot(x[:, :30], w1) + b1)
    h = jax.nn.relu(dot(h, w2) + b2)
    h = jax.nn.relu(dot(h, w3) + b3)
    h = jax.nn.relu(dot(h, w4) + b4)
    lc = dot(h, w5) + b5
    t, n = lc[:, -6:-3], lc[:, -3:]
    t = t - jnp.sum(t * n, axis=-1, keepdims=True) * n
    b = jnp.cross(t, n)
    onb = jnp.stack([t, b, n], axis=-2)                 # (B, 3, 3)
    wi, wo = x[:, -6:-3], x[:, -3:]
    wi_local = jnp.einsum("bji,bj->bi", onb, wi)
    wo_local = jnp.einsum("bji,bj->bi", onb, wo)
    dec_in = jnp.concatenate([lc[:, :-6], wi_local, wo_local], axis=-1)
    h = jax.nn.relu(dot(dec_in, d1) + c1)
    h = jax.nn.relu(dot(h, d2) + c2)
    h = jax.nn.relu(dot(h, d3) + c3)
    return dot(h, d4) + c4


if __name__ == "__main__":
    key = jax.random.PRNGKey(0)
    k_x, k_p = jax.random.split(key)
    B = 1000                        # non-multiple of the tile -> exercises padding
    x = jax.random.normal(k_x, (B, 36), dtype=jnp.float32)
    params = make_params(k_p)
    packed = pack_params(params)

    out = jax.block_until_ready(lancelot_forward(x, packed))
    assert out.shape == (B, 3) and out.dtype == jnp.float32

    ref = ref_forward(x, params)
    err = float(jnp.max(jnp.abs(out - ref)))
    # bf16 inputs/weights (f32 accumulate) across 9 layers -> small abs error.
    assert jnp.allclose(out, ref, atol=3e-2, rtol=3e-2), f"max abs diff {err}"
    print("KERNEL_OK")
</pallas_src>

<mosaic_0001>
module attributes {stable_mosaic.version = 11 : i64} {
  func.func @lancelot_kernel(%arg0: i32, %arg1: memref<256x36xbf16, #tpu.memory_space<vmem>>, %arg2: memref<36x64xbf16, #tpu.memory_space<vmem>>, %arg3: memref<4x64xf32, #tpu.memory_space<vmem>>, %arg4: memref<3x64x64xbf16, #tpu.memory_space<vmem>>, %arg5: memref<64x32xbf16, #tpu.memory_space<vmem>>, %arg6: memref<1x32xf32, #tpu.memory_space<vmem>>, %arg7: memref<3x32x32xbf16, #tpu.memory_space<vmem>>, %arg8: memref<3x32xf32, #tpu.memory_space<vmem>>, %arg9: memref<32x3xbf16, #tpu.memory_space<vmem>>, %arg10: memref<1x3xf32, #tpu.memory_space<vmem>>, %arg11: memref<256x3xf32, #tpu.memory_space<vmem>>) attributes {dimension_semantics = [#tpu.dimension_semantics<parallel>], iteration_bounds = array<i64: 4>, scalar_prefetch = 0 : i64, scratch_operands = 0 : i64, tpu.core_type = #tpu.core_type<tc>, window_params = [{transform_indices = @transform_0, window_bounds = array<i64: 256, 36>}, {pipeline_mode = #tpu.pipeline_mode<synchronous>, transform_indices = @transform_1, window_bounds = array<i64: 36, 64>}, {pipeline_mode = #tpu.pipeline_mode<synchronous>, transform_indices = @transform_2, window_bounds = array<i64: 4, 64>}, {pipeline_mode = #tpu.pipeline_mode<synchronous>, transform_indices = @transform_3, window_bounds = array<i64: 3, 64, 64>}, {pipeline_mode = #tpu.pipeline_mode<synchronous>, transform_indices = @transform_4, window_bounds = array<i64: 64, 32>}, {pipeline_mode = #tpu.pipeline_mode<synchronous>, transform_indices = @transform_5, window_bounds = array<i64: 1, 32>}, {pipeline_mode = #tpu.pipeline_mode<synchronous>, transform_indices = @transform_6, window_bounds = array<i64: 3, 32, 32>}, {pipeline_mode = #tpu.pipeline_mode<synchronous>, transform_indices = @transform_7, window_bounds = array<i64: 3, 32>}, {pipeline_mode = #tpu.pipeline_mode<synchronous>, transform_indices = @transform_8, window_bounds = array<i64: 32, 3>}, {pipeline_mode = #tpu.pipeline_mode<synchronous>, transform_indices = @transform_9, window_bounds = array<i64: 1, 3>}, {transform_indices = @transform_10, window_bounds = array<i64: 256, 3>}]} {
    %c0 = arith.constant 0 : index
    %c0_0 = arith.constant 0 : index
    %0 = vector.load %arg1[%c0, %c0_0] : memref<256x36xbf16, #tpu.memory_space<vmem>>, vector<256x36xbf16>
    %c0_1 = arith.constant 0 : index
    %c0_2 = arith.constant 0 : index
    %1 = vector.load %arg2[%c0_1, %c0_2] : memref<36x64xbf16, #tpu.memory_space<vmem>>, vector<36x64xbf16>
    %cst = arith.constant dense<0.000000e+00> : vector<256x64xf32>
    %2 = tpu.matmul %0, %1, %cst {dimension_numbers = #tpu.dot_dimension_numbers<[1], [0], [0], [1], [0, 0, 1, 1], [], []>} : vector<256x36xbf16>, vector<36x64xbf16>, vector<256x64xf32> -> vector<256x64xf32>
    %c0_3 = arith.constant 0 : index
    %c0_4 = arith.constant 0 : index
    %3 = vector.load %arg3[%c0_3, %c0_4] : memref<4x64xf32, #tpu.memory_space<vmem>>, vector<1x64xf32>
    %4 = vector.broadcast %3 : vector<1x64xf32> to vector<256x64xf32>
    %5 = arith.addf %2, %4 : vector<256x64xf32>
    %cst_5 = arith.constant 0.000000e+00 : f32
    %6 = vector.broadcast %cst_5 : f32 to vector<256x64xf32>
    %7 = arith.maximumf %5, %6 : vector<256x64xf32>
    %c0_6 = arith.constant 0 : index
    %c0_7 = arith.constant 0 : index
    %c0_8 = arith.constant 0 : index
    %8 = vector.load %arg4[%c0_6, %c0_7, %c0_8] : memref<3x64x64xbf16, #tpu.memory_space<vmem>>, vector<1x64x64xbf16>
    %9 = vector.shape_cast %8 : vector<1x64x64xbf16> to vector<64x64xbf16>
    %10 = arith.truncf %7 : vector<256x64xf32> to vector<256x64xbf16>
    %cst_9 = arith.constant dense<0.000000e+00> : vector<256x64xf32>
    %11 = tpu.matmul %10, %9, %cst_9 {dimension_numbers = #tpu.dot_dimension_numbers<[1], [0], [0], [1], [0, 0, 1, 1], [], []>} : vector<256x64xbf16>, vector<64x64xbf16>, vector<256x64xf32> -> vector<256x64xf32>
    %c1 = arith.constant 1 : index
    %c0_10 = arith.constant 0 : index
    %12 = vector.load %arg3[%c1, %c0_10] : memref<4x64xf32, #tpu.memory_space<vmem>>, vector<1x64xf32>
    %13 = vector.broadcast %12 : vector<1x64xf32> to vector<256x64xf32>
    %14 = arith.addf %11, %13 : vector<256x64xf32>
    %cst_11 = arith.constant 0.000000e+00 : f32
    %15 = vector.broadcast %cst_11 : f32 to vector<256x64xf32>
    %16 = arith.maximumf %14, %15 : vector<256x64xf32>
    %c1_12 = arith.constant 1 : index
    %c0_13 = arith.constant 0 : index
    %c0_14 = arith.constant 0 : index
    %17 = vector.load %arg4[%c1_12, %c0_13, %c0_14] : memref<3x64x64xbf16, #tpu.memory_space<vmem>>, vector<1x64x64xbf16>
    %18 = vector.shape_cast %17 : vector<1x64x64xbf16> to vector<64x64xbf16>
    %19 = arith.truncf %16 : vector<256x64xf32> to vector<256x64xbf16>
    %cst_15 = arith.constant dense<0.000000e+00> : vector<256x64xf32>
    %20 = tpu.matmul %19, %18, %cst_15 {dimension_numbers = #tpu.dot_dimension_numbers<[1], [0], [0], [1], [0, 0, 1, 1], [], []>} : vector<256x64xbf16>, vector<64x64xbf16>, vector<256x64xf32> -> vector<256x64xf32>
    %c2 = arith.constant 2 : index
    %c0_16 = arith.constant 0 : index
    %21 = vector.load %arg3[%c2, %c0_16] : memref<4x64xf32, #tpu.memory_space<vmem>>, vector<1x64xf32>
    %22 = vector.broadcast %21 : vector<1x64xf32> to vector<256x64xf32>
    %23 = arith.addf %20, %22 : vector<256x64xf32>
    %cst_17 = arith.constant 0.000000e+00 : f32
    %24 = vector.broadcast %cst_17 : f32 to vector<256x64xf32>
    %25 = arith.maximumf %23, %24 : vector<256x64xf32>
    %c2_18 = arith.constant 2 : index
    %c0_19 = arith.constant 0 : index
    %c0_20 = arith.constant 0 : index
    %26 = vector.load %arg4[%c2_18, %c0_19, %c0_20] : memref<3x64x64xbf16, #tpu.memory_space<vmem>>, vector<1x64x64xbf16>
    %27 = vector.shape_cast %26 : vector<1x64x64xbf16> to vector<64x64xbf16>
    %28 = arith.truncf %25 : vector<256x64xf32> to vector<256x64xbf16>
    %cst_21 = arith.constant dense<0.000000e+00> : vector<256x64xf32>
    %29 = tpu.matmul %28, %27, %cst_21 {dimension_numbers = #tpu.dot_dimension_numbers<[1], [0], [0], [1], [0, 0, 1, 1], [], []>} : vector<256x64xbf16>, vector<64x64xbf16>, vector<256x64xf32> -> vector<256x64xf32>
    %c3 = arith.constant 3 : index
    %c0_22 = arith.constant 0 : index
    %30 = vector.load %arg3[%c3, %c0_22] : memref<4x64xf32, #tpu.memory_space<vmem>>, vector<1x64xf32>
    %31 = vector.broadcast %30 : vector<1x64xf32> to vector<256x64xf32>
    %32 = arith.addf %29, %31 : vector<256x64xf32>
    %cst_23 = arith.constant 0.000000e+00 : f32
    %33 = vector.broadcast %cst_23 : f32 to vector<256x64xf32>
    %34 = arith.maximumf %32, %33 : vector<256x64xf32>
    %c0_24 = arith.constant 0 : index
    %c0_25 = arith.constant 0 : index
    %35 = vector.load %arg5[%c0_24, %c0_25] : memref<64x32xbf16, #tpu.memory_space<vmem>>, vector<64x32xbf16>
    %36 = arith.truncf %34 : vector<256x64xf32> to vector<256x64xbf16>
    %cst_26 = arith.constant dense<0.000000e+00> : vector<256x32xf32>
    %37 = tpu.matmul %36, %35, %cst_26 {dimension_numbers = #tpu.dot_dimension_numbers<[1], [0], [0], [1], [0, 0, 1, 1], [], []>} : vector<256x64xbf16>, vector<64x32xbf16>, vector<256x32xf32> -> vector<256x32xf32>
    %c0_27 = arith.constant 0 : index
    %c0_28 = arith.constant 0 : index
    %38 = vector.load %arg6[%c0_27, %c0_28] : memref<1x32xf32, #tpu.memory_space<vmem>>, vector<1x32xf32>
    %39 = vector.broadcast %38 : vector<1x32xf32> to vector<256x32xf32>
    %40 = arith.addf %37, %39 : vector<256x32xf32>
    %41 = vector.extract_strided_slice %40 {offsets = [0, 26], sizes = [256, 3], strides = [1, 1]} : vector<256x32xf32> to vector<256x3xf32>
    %42 = vector.extract_strided_slice %40 {offsets = [0, 29], sizes = [256, 3], strides = [1, 1]} : vector<256x32xf32> to vector<256x3xf32>
    %43 = arith.mulf %41, %42 : vector<256x3xf32>
    %cst_29 = arith.constant dense<0.000000e+00> : vector<256xf32>
    %44 = vector.multi_reduction <add>, %43, %cst_29 [1] : vector<256x3xf32> to vector<256xf32>
    %45 = vector.shape_cast %44 : vector<256xf32> to vector<256x1xf32>
    %46 = vector.broadcast %45 : vector<256x1xf32> to vector<256x3xf32>
    %47 = arith.mulf %46, %42 : vector<256x3xf32>
    %48 = arith.subf %41, %47 : vector<256x3xf32>
    %49 = vector.extract_strided_slice %48 {offsets = [0, 1], sizes = [256, 2], strides = [1, 1]} : vector<256x3xf32> to vector<256x2xf32>
    %50 = vector.extract_strided_slice %48 {offsets = [0, 0], sizes = [256, 1], strides = [1, 1]} : vector<256x3xf32> to vector<256x1xf32>
    %51 = tpu.concatenate %49, %50 in 1 : vector<256x2xf32>, vector<256x1xf32> -> vector<256x3xf32>
    %52 = vector.extract_strided_slice %42 {offsets = [0, 2], sizes = [256, 1], strides = [1, 1]} : vector<256x3xf32> to vector<256x1xf32>
    %53 = vector.extract_strided_slice %42 {offsets = [0, 0], sizes = [256, 2], strides = [1, 1]} : vector<256x3xf32> to vector<256x2xf32>
    %54 = tpu.concatenate %52, %53 in 1 : vector<256x1xf32>, vector<256x2xf32> -> vector<256x3xf32>
    %55 = arith.mulf %51, %54 : vector<256x3xf32>
    %56 = vector.extract_strided_slice %48 {offsets = [0, 2], sizes = [256, 1], strides = [1, 1]} : vector<256x3xf32> to vector<256x1xf32>
    %57 = vector.extract_strided_slice %48 {offsets = [0, 0], sizes = [256, 2], strides = [1, 1]} : vector<256x3xf32> to vector<256x2xf32>
    %58 = tpu.concatenate %56, %57 in 1 : vector<256x1xf32>, vector<256x2xf32> -> vector<256x3xf32>
    %59 = vector.extract_strided_slice %42 {offsets = [0, 1], sizes = [256, 2], strides = [1, 1]} : vector<256x3xf32> to vector<256x2xf32>
    %60 = vector.extract_strided_slice %42 {offsets = [0, 0], sizes = [256, 1], strides = [1, 1]} : vector<256x3xf32> to vector<256x1xf32>
    %61 = tpu.concatenate %59, %60 in 1 : vector<256x2xf32>, vector<256x1xf32> -> vector<256x3xf32>
    %62 = arith.mulf %58, %61 : vector<256x3xf32>
    %63 = arith.subf %55, %62 : vector<256x3xf32>
    %64 = vector.extract_strided_slice %0 {offsets = [0, 30], sizes = [256, 3], strides = [1, 1]} : vector<256x36xbf16> to vector<256x3xbf16>
    %65 = arith.extf %64 : vector<256x3xbf16> to vector<256x3xf32>
    %66 = vector.extract_strided_slice %0 {offsets = [0, 33], sizes = [256, 3], strides = [1, 1]} : vector<256x36xbf16> to vector<256x3xbf16>
    %67 = arith.extf %66 : vector<256x3xbf16> to vector<256x3xf32>
    %68 = vector.extract_strided_slice %65 {offsets = [0, 0], sizes = [256, 1], strides = [1, 1]} : vector<256x3xf32> to vector<256x1xf32>
    %69 = vector.broadcast %68 : vector<256x1xf32> to vector<256x3xf32>
    %70 = arith.mulf %48, %69 : vector<256x3xf32>
    %71 = vector.extract_strided_slice %65 {offsets = [0, 1], sizes = [256, 1], strides = [1, 1]} : vector<256x3xf32> to vector<256x1xf32>
    %72 = vector.broadcast %71 : vector<256x1xf32> to vector<256x3xf32>
    %73 = arith.mulf %63, %72 : vector<256x3xf32>
    %74 = arith.addf %70, %73 : vector<256x3xf32>
    %75 = vector.extract_strided_slice %65 {offsets = [0, 2], sizes = [256, 1], strides = [1, 1]} : vector<256x3xf32> to vector<256x1xf32>
    %76 = vector.broadcast %75 : vector<256x1xf32> to vector<256x3xf32>
    %77 = arith.mulf %42, %76 : vector<256x3xf32>
    %78 = arith.addf %74, %77 : vector<256x3xf32>
    %79 = vector.extract_strided_slice %67 {offsets = [0, 0], sizes = [256, 1], strides = [1, 1]} : vector<256x3xf32> to vector<256x1xf32>
    %80 = vector.broadcast %79 : vector<256x1xf32> to vector<256x3xf32>
    %81 = arith.mulf %48, %80 : vector<256x3xf32>
    %82 = vector.extract_strided_slice %67 {offsets = [0, 1], sizes = [256, 1], strides = [1, 1]} : vector<256x3xf32> to vector<256x1xf32>
    %83 = vector.broadcast %82 : vector<256x1xf32> to vector<256x3xf32>
    %84 = arith.mulf %63, %83 : vector<256x3xf32>
    %85 = arith.addf %81, %84 : vector<256x3xf32>
    %86 = vector.extract_strided_slice %67 {offsets = [0, 2], sizes = [256, 1], strides = [1, 1]} : vector<256x3xf32> to vector<256x1xf32>
    %87 = vector.broadcast %86 : vector<256x1xf32> to vector<256x3xf32>
    %88 = arith.mulf %42, %87 : vector<256x3xf32>
    %89 = arith.addf %85, %88 : vector<256x3xf32>
    %90 = vector.extract_strided_slice %40 {offsets = [0, 0], sizes = [256, 26], strides = [1, 1]} : vector<256x32xf32> to vector<256x26xf32>
    %91 = tpu.concatenate %90, %78, %89 in 1 : vector<256x26xf32>, vector<256x3xf32>, vector<256x3xf32> -> vector<256x32xf32>
    %c0_30 = arith.constant 0 : index
    %c0_31 = arith.constant 0 : index
    %c0_32 = arith.constant 0 : index
    %92 = vector.load %arg7[%c0_30, %c0_31, %c0_32] : memref<3x32x32xbf16, #tpu.memory_space<vmem>>, vector<1x32x32xbf16>
    %93 = vector.shape_cast %92 : vector<1x32x32xbf16> to vector<32x32xbf16>
    %94 = arith.truncf %91 : vector<256x32xf32> to vector<256x32xbf16>
    %cst_33 = arith.constant dense<0.000000e+00> : vector<256x32xf32>
    %95 = tpu.matmul %94, %93, %cst_33 {dimension_numbers = #tpu.dot_dimension_numbers<[1], [0], [0], [1], [0, 0, 1, 1], [], []>} : vector<256x32xbf16>, vector<32x32xbf16>, vector<256x32xf32> -> vector<256x32xf32>
    %c0_34 = arith.constant 0 : index
    %c0_35 = arith.constant 0 : index
    %96 = vector.load %arg8[%c0_34, %c0_35] : memref<3x32xf32, #tpu.memory_space<vmem>>, vector<1x32xf32>
    %97 = vector.broadcast %96 : vector<1x32xf32> to vector<256x32xf32>
    %98 = arith.addf %95, %97 : vector<256x32xf32>
    %cst_36 = arith.constant 0.000000e+00 : f32
    %99 = vector.broadcast %cst_36 : f32 to vector<256x32xf32>
    %100 = arith.maximumf %98, %99 : vector<256x32xf32>
    %c1_37 = arith.constant 1 : index
    %c0_38 = arith.constant 0 : index
    %c0_39 = arith.constant 0 : index
    %101 = vector.load %arg7[%c1_37, %c0_38, %c0_39] : memref<3x32x32xbf16, #tpu.memory_space<vmem>>, vector<1x32x32xbf16>
    %102 = vector.shape_cast %101 : vector<1x32x32xbf16> to vector<32x32xbf16>
    %103 = arith.truncf %100 : vector<256x32xf32> to vector<256x32xbf16>
    %cst_40 = arith.constant dense<0.000000e+00> : vector<256x32xf32>
    %104 = tpu.matmul %103, %102, %cst_40 {dimension_numbers = #tpu.dot_dimension_numbers<[1], [0], [0], [1], [0, 0, 1, 1], [], []>} : vector<256x32xbf16>, vector<32x32xbf16>, vector<256x32xf32> -> vector<256x32xf32>
    %c1_41 = arith.constant 1 : index
    %c0_42 = arith.constant 0 : index
    %105 = vector.load %arg8[%c1_41, %c0_42] : memref<3x32xf32, #tpu.memory_space<vmem>>, vector<1x32xf32>
    %106 = vector.broadcast %105 : vector<1x32xf32> to vector<256x32xf32>
    %107 = arith.addf %104, %106 : vector<256x32xf32>
    %cst_43 = arith.constant 0.000000e+00 : f32
    %108 = vector.broadcast %cst_43 : f32 to vector<256x32xf32>
    %109 = arith.maximumf %107, %108 : vector<256x32xf32>
    %c2_44 = arith.constant 2 : index
    %c0_45 = arith.constant 0 : index
    %c0_46 = arith.constant 0 : index
    %110 = vector.load %arg7[%c2_44, %c0_45, %c0_46] : memref<3x32x32xbf16, #tpu.memory_space<vmem>>, vector<1x32x32xbf16>
    %111 = vector.shape_cast %110 : vector<1x32x32xbf16> to vector<32x32xbf16>
    %112 = arith.truncf %109 : vector<256x32xf32> to vector<256x32xbf16>
    %cst_47 = arith.constant dense<0.000000e+00> : vector<256x32xf32>
    %113 = tpu.matmul %112, %111, %cst_47 {dimension_numbers = #tpu.dot_dimension_numbers<[1], [0], [0], [1], [0, 0, 1, 1], [], []>} : vector<256x32xbf16>, vector<32x32xbf16>, vector<256x32xf32> -> vector<256x32xf32>
    %c2_48 = arith.constant 2 : index
    %c0_49 = arith.constant 0 : index
    %114 = vector.load %arg8[%c2_48, %c0_49] : memref<3x32xf32, #tpu.memory_space<vmem>>, vector<1x32xf32>
    %115 = vector.broadcast %114 : vector<1x32xf32> to vector<256x32xf32>
    %116 = arith.addf %113, %115 : vector<256x32xf32>
    %cst_50 = arith.constant 0.000000e+00 : f32
    %117 = vector.broadcast %cst_50 : f32 to vector<256x32xf32>
    %118 = arith.maximumf %116, %117 : vector<256x32xf32>
    %c0_51 = arith.constant 0 : index
    %c0_52 = arith.constant 0 : index
    %119 = vector.load %arg9[%c0_51, %c0_52] : memref<32x3xbf16, #tpu.memory_space<vmem>>, vector<32x3xbf16>
    %120 = arith.truncf %118 : vector<256x32xf32> to vector<256x32xbf16>
    %cst_53 = arith.constant dense<0.000000e+00> : vector<256x3xf32>
    %121 = tpu.matmul %120, %119, %cst_53 {dimension_numbers = #tpu.dot_dimension_numbers<[1], [0], [0], [1], [0, 0, 1, 1], [], []>} : vector<256x32xbf16>, vector<32x3xbf16>, vector<256x3xf32> -> vector<256x3xf32>
    %c0_54 = arith.constant 0 : index
    %c0_55 = arith.constant 0 : index
    %122 = vector.load %arg10[%c0_54, %c0_55] : memref<1x3xf32, #tpu.memory_space<vmem>>, vector<1x3xf32>
    %123 = vector.broadcast %122 : vector<1x3xf32> to vector<256x3xf32>
    %124 = arith.addf %121, %123 : vector<256x3xf32>
    %c0_56 = arith.constant 0 : index
    %c0_57 = arith.constant 0 : index
    %125 = vector.load %arg11[%c0_56, %c0_57] : memref<256x3xf32, #tpu.memory_space<vmem>>, vector<256x3xf32>
    tpu.vector_store %arg11[%c0_56, %c0_57], %124 {strides = array<i32>} : memref<256x3xf32, #tpu.memory_space<vmem>>, vector<256x3xf32>,
    return
  }
  func.func @transform_0(%arg0: i32) -> (i32, i32) {
    %c0_i32 = arith.constant 0 : i32
    %c0_i32_0 = arith.constant 0 : i32
    return %arg0, %c0_i32 : i32, i32
  }
  func.func @transform_1(%arg0: i32) -> (i32, i32) {
    %c0_i32 = arith.constant 0 : i32
    %c0_i32_0 = arith.constant 0 : i32
    %c0_i32_1 = arith.constant 0 : i32
    return %c0_i32, %c0_i32_0 : i32, i32
  }
  func.func @transform_2(%arg0: i32) -> (i32, i32) {
    %c0_i32 = arith.constant 0 : i32
    %c0_i32_0 = arith.constant 0 : i32
    %c0_i32_1 = arith.constant 0 : i32
    return %c0_i32, %c0_i32_0 : i32, i32
  }
  func.func @transform_3(%arg0: i32) -> (i32, i32, i32) {
    %c0_i32 = arith.constant 0 : i32
    %c0_i32_0 = arith.constant 0 : i32
    %c0_i32_1 = arith.constant 0 : i32
    %c0_i32_2 = arith.constant 0 : i32
    return %c0_i32, %c0_i32_0, %c0_i32_1 : i32, i32, i32
  }
  func.func @transform_4(%arg0: i32) -> (i32, i32) {
    %c0_i32 = arith.constant 0 : i32
    %c0_i32_0 = arith.constant 0 : i32
    %c0_i32_1 = arith.constant 0 : i32
    return %c0_i32, %c0_i32_0 : i32, i32
  }
  func.func @transform_5(%arg0: i32) -> (i32, i32) {
    %c0_i32 = arith.constant 0 : i32
    %c0_i32_0 = arith.constant 0 : i32
    %c0_i32_1 = arith.constant 0 : i32
    return %c0_i32, %c0_i32_0 : i32, i32
  }
  func.func @transform_6(%arg0: i32) -> (i32, i32, i32) {
    %c0_i32 = arith.constant 0 : i32
    %c0_i32_0 = arith.constant 0 : i32
    %c0_i32_1 = arith.constant 0 : i32
    %c0_i32_2 = arith.constant 0 : i32
    return %c0_i32, %c0_i32_0, %c0_i32_1 : i32, i32, i32
  }
  func.func @transform_7(%arg0: i32) -> (i32, i32) {
    %c0_i32 = arith.constant 0 : i32
    %c0_i32_0 = arith.constant 0 : i32
    %c0_i32_1 = arith.constant 0 : i32
    return %c0_i32, %c0_i32_0 : i32, i32
  }
  func.func @transform_8(%arg0: i32) -> (i32, i32) {
    %c0_i32 = arith.constant 0 : i32
    %c0_i32_0 = arith.constant 0 : i32
    %c0_i32_1 = arith.constant 0 : i32
    return %c0_i32, %c0_i32_0 : i32, i32
  }
  func.func @transform_9(%arg0: i32) -> (i32, i32) {
    %c0_i32 = arith.constant 0 : i32
    %c0_i32_0 = arith.constant 0 : i32
    %c0_i32_1 = arith.constant 0 : i32
    return %c0_i32, %c0_i32_0 : i32, i32
  }
  func.func @transform_10(%arg0: i32) -> (i32, i32) {
    %c0_i32 = arith.constant 0 : i32
    %c0_i32_0 = arith.constant 0 : i32
    return %arg0, %c0_i32 : i32, i32
  }
}

</mosaic_0001>

<bundles_post_ra>
// kernel: tpu_custom_call.1
= control target key start
LH: loop header
LB: loop body
LE: loop exit
PB: predicated region body
PF: predicated region fallthrough
CT: control target
= control target key end

     0   :  { %s6964_s13 = smov 0   ;;  %s10587_s0 = inlined_call_operand.vmem [shape: bf16[1024,36], index: 0, kind: input, shape index: {}]   ;;  %s10588_s1 = inlined_call_operand.vmem [shape: bf16[36,64], index: 1, kind: input, shape index: {}]   ;;  %s10589_s2 = inlined_call_operand.vmem [shape: f32[4,64], index: 2, kind: input, shape index: {}]   ;;  %s10590_s3 = inlined_call_operand.vmem [shape: bf16[3,64,64], index: 3, kind: input, shape index: {}]   ;;  %s10591_s4 = inlined_call_operand.vmem [shape: bf16[64,32], index: 4, kind: input, shape index: {}]   ;;  %s10592_s5 = inlined_call_operand.vmem [shape: f32[1,32], index: 5, kind: input, shape index: {}]   ;;  %s10593_s6 = inlined_call_operand.vmem [shape: bf16[3,32,32], index: 6, kind: input, shape index: {}]   ;;  %s10594_s7 = inlined_call_operand.vmem [shape: f32[3,32], index: 7, kind: input, shape index: {}]   ;;  %s10595_s8 = inlined_call_operand.vmem [shape: bf16[32,3], index: 8, kind: input, shape index: {}]   ;;  %s10596_s9 = inlined_call_operand.vmem [shape: f32[1,3], index: 9, kind: input, shape index: {}]   ;;  %s10597_s10 = inlined_call_operand.vmem [shape: f32[1024,3], index: 10, kind: output, shape index: {}]  }
   0x1 LB: > { %s5855_s14 = sadd.s32 4294967295, %s6891_s13   ;;  %p5859_p0 = scmp.ge.s32.totalorder %s6891_s13, 1  ;;  %s6891_s13 = sphi %s6964_s13, %s20_s13  }
   0x2   : > { %p313_p1 = scmp.lt.s32.totalorder %s6891_s13, 5 }
   0x4   : > { %p314_p2 = pnand %p5859_p0, %p313_p1 }
   0x6   : > { %317 = sbr.rel (%p314_p2) target bundleno = 3735 (0xe97), region = 60 }
   0xb   : > { %v400_v0 = vld [vmem:[%s10588_s1 + $0x10] sm:$0x3]  ;;  %s5860_s17 = sshll.u32 %s5855_s14, 5  ;;  %vm547_vm0 = vcmask 1041408   ;;  %v6219_v4 = vld [vmem:[%s10588_s1 + $0x8] sm:$0xff]  ;;  %v6218_v5 = vld [vmem:[%s10588_s1] sm:$0xff] }
   0xc   : > { %v492_v1 = vunpack.c.l.b16 %v400_v0  ;;  %p352_p3 = scmp.lt.s32.totalorder %s5860_s17, 127  ;;  %vm498_vm1 = vcmask 293888   ;;  %v6223_v9 = vld [vmem:[%s10590_s3 + $0x18] sm:$0xff]  ;;  %v6222_v10 = vld [vmem:[%s10590_s3 + $0x10] sm:$0xff]  ;;  %v6221_v11 = vld [vmem:[%s10590_s3 + $0x8] sm:$0xff]  ;;  %vm722_vm2 = vcmask 523264  }
   0xd   : > { %v6220_v15 = vld [vmem:[%s10590_s3] sm:$0xff]  ;;  %v6227_v47 = vld [vmem:[%s10590_s3 + $0x38] sm:$0xff]  ;;  %v6226_v58 = vld [vmem:[%s10590_s3 + $0x30] sm:$0xff]  ;;  %s6899_s14 = smov 101   ;;  %s6900_s15 = smov 100   ;;  %vm1809_vm3 = vcmask 23552  }
   0xe   : > { %v495_v2 = vpack.c.b16 %v492_v1, %v492_v1  ;;  %s11452_s17 = smov (!%p352_p3, %s5860_s17), 127  ;;  %v7026_v22 = vld [vmem:[%s10589_s2] ss:$0 sm:$0xff]  ;;  %s6901_s16 = smov 125   ;;  %vm2547_vm4 = vcmask 7168   ;;  %vm2322_vm5 = vcmask 15360  }
   0xf   : > { %s5861_s20 = sshll.u32 %s11452_s17, 2  ;;  %s6902_s18 = smov 98   ;;  %vm4949_vm6 = vcmask 236544   ;;  %vm4916_vm7 = vcmask 211968   ;;  %vm5016_vm8 = vcmask 261120  }
  0x10   : > { %v549_v3 = vsel %vm547_vm0, %v495_v2, 0  ;;  %s6987_s25 = scalar_lea.vmem %s10587_s0, %s5861_s20  ;;  %v6225_v2 = vld [vmem:[%s10590_s3 + $0x28] sm:$0xff]  ;;  %s6903_s19 = smov 97  }
  0x11   : > { %556 = vmatpush.bf16.msra.mxu0 %v549_v3  ;;  %6244 = vmatpush.bf16.msra.mxu1 %v549_v3  ;;  %v6202_v6 = vld [vmem:[%s6987_s25] sm:$0xff]  ;;  %v6203_v7 = vld [vmem:[%s6987_s25 + $0x8] sm:$0xff]  ;;  %v6204_v12 = vld [vmem:[%s6987_s25 + $0x10] sm:$0xff]  ;;  %s6904_s20 = smov 102   ;;  %s6906_s21 = smov 104  }
  0x12   : > { %6245 = vmatpush.bf16.msra.mxu2 %v549_v3  ;;  %6246 = vmatpush.bf16.msra.mxu3 %v549_v3  ;;  %v6206_v8 = vld [vmem:[%s6987_s25 + $0x20] sm:$0xff]  ;;  %v6207_v13 = vld [vmem:[%s6987_s25 + $0x28] sm:$0xff]  ;;  %v6205_v16 = vld [vmem:[%s6987_s25 + $0x18] sm:$0xff]  ;;  %s6907_s22 = smov 26   ;;  %s6908_s23 = smov 3  }
  0x13   : > { %v6210_v14 = vld [vmem:[%s6987_s25 + $0x40] sm:$0xff]  ;;  %v6208_v17 = vld [vmem:[%s6987_s25 + $0x30] sm:$0xff]  ;;  %v6209_v18 = vld [vmem:[%s6987_s25 + $0x38] sm:$0xff] }
  0x14   : > { %v6211_v19 = vld [vmem:[%s6987_s25 + $0x48] sm:$0xff]  ;;  %v6212_v20 = vld [vmem:[%s6987_s25 + $0x50] sm:$0xff]  ;;  %v6213_v28 = vld [vmem:[%s6987_s25 + $0x58] sm:$0xff] }
  0x15   : > { %557 = vmatpush.bf16.msra.mxu0 %v6219_v4  ;;  %6247 = vmatpush.bf16.msra.mxu1 %v6219_v4  ;;  %v6214_v36 = vld [vmem:[%s6987_s25 + $0x60] sm:$0xff]  ;;  %v6215_v43 = vld [vmem:[%s6987_s25 + $0x68] sm:$0xff]  ;;  %v6216_v54 = vld [vmem:[%s6987_s25 + $0x70] sm:$0xff] }
  0x16   : > { %6248 = vmatpush.bf16.msra.mxu2 %v6219_v4  ;;  %6249 = vmatpush.bf16.msra.mxu3 %v6219_v4  ;;  %v6217_v0 = vld [vmem:[%s6987_s25 + $0x78] sm:$0xff] }
  0x19   : > { %558 = vmatpush.bf16.msra.mxu0 %v6218_v5  ;;  %6250 = vmatpush.bf16.msra.mxu1 %v6218_v5 }
  0x1a   : > { %6251 = vmatpush.bf16.msra.mxu2 %v6218_v5  ;;  %6252 = vmatpush.bf16.msra.mxu3 %v6218_v5 }
  0x1c   : > { %5936 = vmatmul.msk.bf16.vlgmr.msra.gmra.mxu0 %vm498_vm1, %v6202_v6  ;;  %5940 = vmatmul.msk.bf16.vlgmr.msra.gmra.mxu1 %vm498_vm1, %v6206_v8 }
  0x1d   : > { %775 = vmatpush.bf16.msrb.mxu1 %v6223_v9  ;;  %5944 = vmatmul.msk.bf16.vlgmr.msra.gmra.mxu2 %vm498_vm1, %v6210_v14 }
  0x1e   : > { %5948 = vmatmul.msk.bf16.vlgmr.msra.gmra.mxu3 %vm498_vm1, %v6214_v36  ;;  %995 = vmatpush.bf16.msrb.mxu2 %v6227_v47 }
  0x21   : > { %776 = vmatpush.bf16.msrb.mxu1 %v6222_v10  ;;  %v6224_v10 = vld [vmem:[%s10590_s3 + $0x20] sm:$0xff] }
  0x22   : > { %996 = vmatpush.bf16.msrb.mxu2 %v6226_v58 }
  0x25   : > { %777 = vmatpush.bf16.msrb.mxu1 %v6221_v11 }
  0x26   : > { %997 = vmatpush.bf16.msrb.mxu2 %v6225_v2 }
  0x29   : > { %778 = vmatpush.bf16.msrb.mxu1 %v6220_v15 }
  0x2a   : > { %998 = vmatpush.bf16.msrb.mxu2 %v6224_v10 }
  0x2c   : > { %5937 = vmatmul.msk.bf16.gmra.mxu0 %vm498_vm1, %v6203_v7  ;;  %5941 = vmatmul.msk.bf16.gmra.mxu1 %vm498_vm1, %v6207_v13 }
  0x2d   : > { %5945 = vmatmul.msk.bf16.gmra.mxu2 %vm498_vm1, %v6211_v19 }
  0x2e   : > { %5949 = vmatmul.msk.bf16.gmra.mxu3 %vm498_vm1, %v6215_v43 }
  0x3c   : > { %5938 = vmatmul.msk.bf16.gmra.mxu0 %vm498_vm1, %v6204_v12  ;;  %5942 = vmatmul.msk.bf16.gmra.mxu1 %vm498_vm1, %v6208_v17 }
  0x3d   : > { %5946 = vmatmul.msk.bf16.gmra.mxu2 %vm498_vm1, %v6212_v20 }
  0x3e   : > { %5950 = vmatmul.msk.bf16.gmra.mxu3 %vm498_vm1, %v6216_v54 }
  0x4c   : > { %5939 = vmatmul.msk.bf16.gmra.mxu0 %vm498_vm1, %v6205_v16  ;;  %5943 = vmatmul.msk.bf16.gmra.mxu1 %vm498_vm1, %v6209_v18 }
  0x4d   : > { %5947 = vmatmul.msk.bf16.gmra.mxu2 %vm498_vm1, %v6213_v28 }
  0x4e   : > { %5951 = vmatmul.msk.bf16.gmra.mxu3 %vm498_vm1, %v6217_v0 }
  0x99   : > { %v560_v21 = vpop.f32.mrf.mxu0  ;;  %v580_v44 = vpop.f32.mrf.mxu1 }
  0x9a   : > { %v561_v23 = vadd.f32 %v7026_v22, %v560_v21  ;;  %v581_v59 = vadd.f32 %v7026_v22, %v580_v44 }
  0x9c   : > { %v640_v26 = vmax.f32 %v561_v23, 0.0  ;;  %v648_v61 = vmax.f32 %v581_v59, 0.0 }
  0xa0   : > { %v600_v16 = vpop.f32.mrf.mxu2 }
  0xa1   : > { %v562_v24 = vpop.f32.mrf.mxu0  ;;  %v582_v49 = vpop.f32.mrf.mxu1 }
  0xa2   : > { %v563_v25 = vadd.f32 %v7026_v22, %v562_v24  ;;  %v583_v60 = vadd.f32 %v7026_v22, %v582_v49 }
  0xa4   : > { %v641_v27 = vmax.f32 %v563_v25, 0.0  ;;  %v649_v62 = vmax.f32 %v583_v60, 0.0  ;;  %v620_v60 = vpop.f32.mrf.mxu3 }
  0xa6   : > { %v680_v29 = vpack.c.bf16 %v641_v27, %v640_v26  ;;  %v684_v1 = vpack.c.bf16 %v649_v62, %v648_v61  ;;  %v601_v27 = vadd.f32 %v7026_v22, %v600_v16 }
  0xa8   : > { %5968 = vmatmul.msk.bf16.vlgmr.msrb.gmra.mxu1 %vm722_vm2, %v680_v29  ;;  %v602_v21 = vpop.f32.mrf.mxu2  ;;  %v656_v29 = vmax.f32 %v601_v27, 0.0 }
  0xa9   : > { %v565_v30 = vpop.f32.mrf.mxu0  ;;  %v585_v57 = vpop.f32.mrf.mxu1  ;;  %v603_v28 = vadd.f32 %v7026_v22, %v602_v21 }
  0xaa   : > { %v566_v31 = vadd.f32 %v7026_v22, %v565_v30  ;;  %v586_v4 = vadd.f32 %v7026_v22, %v585_v57 }
  0xab   : > { %v657_v30 = vmax.f32 %v603_v28, 0.0  ;;  %v6231_v28 = vld [vmem:[%s10590_s3 + $0x58] sm:$0xff] }
  0xac   : > { %v642_v33 = vmax.f32 %v566_v31, 0.0  ;;  %v650_v6 = vmax.f32 %v586_v4, 0.0  ;;  %v622_v4 = vpop.f32.mrf.mxu3  ;;  %1215 = vmatpush.bf16.msrb.mxu3 %v6231_v28  ;;  %v7147_v28 = vld [vmem:[%s10589_s2 + $0x2] ss:$0 sm:$0xff] }
  0xad   : > { %v623_v16 = vadd.f32 %v7026_v22, %v622_v4 }
  0xb0   : > { %v605_v26 = vpop.f32.mrf.mxu2 }
  0xb1   : > { %v567_v32 = vpop.f32.mrf.mxu0  ;;  %v587_v63 = vpop.f32.mrf.mxu1 }
  0xb2   : > { %v568_v34 = vadd.f32 %v7026_v22, %v567_v32  ;;  %v588_v5 = vadd.f32 %v7026_v22, %v587_v63  ;;  %v688_v32 = vpack.c.bf16 %v657_v30, %v656_v29 }
  0xb4   : > { %v643_v35 = vmax.f32 %v568_v34, 0.0  ;;  %v651_v7 = vmax.f32 %v588_v5, 0.0  ;;  %v7079_v34 = vld [vmem:[%s10589_s2 + $0x1] ss:$0 sm:$0xff] }
  0xb6   : > { %v681_v37 = vpack.c.bf16 %v643_v35, %v642_v33  ;;  %v685_v8 = vpack.c.bf16 %v651_v7, %v650_v6 }
  0xb8   : > { %5969 = vmatmul.msk.bf16.gmra.mxu1 %vm722_vm2, %v681_v37  ;;  %v607_v31 = vpop.f32.mrf.mxu2  ;;  %v606_v37 = vadd.f32 %v7026_v22, %v605_v26 }
  0xb9   : > { %v570_v38 = vpop.f32.mrf.mxu0  ;;  %v590_v3 = vpop.f32.mrf.mxu1 }
  0xba   : > { %v571_v39 = vadd.f32 %v7026_v22, %v570_v38  ;;  %v591_v11 = vadd.f32 %v7026_v22, %v590_v3  ;;  %v608_v38 = vadd.f32 %v7026_v22, %v607_v31 }
  0xbc   : > { %v644_v41 = vmax.f32 %v571_v39, 0.0  ;;  %v652_v14 = vmax.f32 %v591_v11, 0.0  ;;  %v659_v44 = vmax.f32 %v608_v38, 0.0 }
  0xc0   : > { %v610_v35 = vpop.f32.mrf.mxu2 }
  0xc1   : > { %v572_v40 = vpop.f32.mrf.mxu0  ;;  %v592_v9 = vpop.f32.mrf.mxu1 }
  0xc2   : > { %v573_v42 = vadd.f32 %v7026_v22, %v572_v40  ;;  %v593_v12 = vadd.f32 %v7026_v22, %v592_v9 }
  0xc4   : > { %v645_v45 = vmax.f32 %v573_v42, 0.0  ;;  %v653_v15 = vmax.f32 %v593_v12, 0.0  ;;  %v658_v42 = vmax.f32 %v606_v37, 0.0 }
  0xc6   : > { %v682_v46 = vpack.c.bf16 %v645_v45, %v644_v41  ;;  %v686_v17 = vpack.c.bf16 %v653_v15, %v652_v14  ;;  %v621_v15 = vadd.f32 %v7026_v22, %v620_v60 }
  0xc8   : > { %5970 = vmatmul.msk.bf16.gmra.mxu1 %vm722_vm2, %v682_v46  ;;  %v689_v46 = vpack.c.bf16 %v659_v44, %v658_v42  ;;  %v6230_v44 = vld [vmem:[%s10590_s3 + $0x50] sm:$0xff] }
  0xc9   : > { %v575_v48 = vpop.f32.mrf.mxu0  ;;  %v595_v13 = vpop.f32.mrf.mxu1  ;;  %1216 = vmatpush.bf16.msrb.mxu3 %v6230_v44 }
  0xca   : > { %v576_v50 = vadd.f32 %v7026_v22, %v575_v48  ;;  %v596_v19 = vadd.f32 %v7026_v22, %v595_v13  ;;  %v612_v48 = vpop.f32.mrf.mxu2  ;;  %v625_v13 = vpop.f32.mrf.mxu3 }
  0xcb   : > { %v626_v31 = vadd.f32 %v7026_v22, %v625_v13 }
  0xcc   : > { %v646_v52 = vmax.f32 %v576_v50, 0.0  ;;  %v654_v23 = vmax.f32 %v596_v19, 0.0  ;;  %v611_v50 = vadd.f32 %v7026_v22, %v610_v35 }
  0xcd   : > { %v666_v37 = vmax.f32 %v626_v31, 0.0 }
  0xd1   : > { %v577_v51 = vpop.f32.mrf.mxu0  ;;  %v597_v18 = vpop.f32.mrf.mxu1 }
  0xd2   : > { %v578_v53 = vadd.f32 %v7026_v22, %v577_v51  ;;  %v598_v20 = vadd.f32 %v7026_v22, %v597_v18  ;;  %v613_v51 = vadd.f32 %v7026_v22, %v612_v48 }
  0xd4   : > { %v647_v55 = vmax.f32 %v578_v53, 0.0  ;;  %v655_v24 = vmax.f32 %v598_v20, 0.0  ;;  %v661_v58 = vmax.f32 %v613_v51, 0.0  ;;  %v664_v20 = vmax.f32 %v621_v15, 0.0 }
  0xd6   : > { %v683_v56 = vpack.c.bf16 %v647_v55, %v646_v52  ;;  %v687_v25 = vpack.c.bf16 %v655_v24, %v654_v23  ;;  %v615_v55 = vpop.f32.mrf.mxu2  ;;  %v665_v23 = vmax.f32 %v623_v16, 0.0  ;;  %v627_v24 = vpop.f32.mrf.mxu3 }
  0xd8   : > { %5971 = vmatmul.msk.bf16.gmra.mxu1 %vm722_vm2, %v683_v56  ;;  %v660_v56 = vmax.f32 %v611_v50, 0.0  ;;  %v692_v26 = vpack.c.bf16 %v665_v23, %v664_v20 }
  0xda   : > { %v690_v61 = vpack.c.bf16 %v661_v58, %v660_v56  ;;  %v6229_v58 = vld [vmem:[%s10590_s3 + $0x48] sm:$0xff] }
  0xdb   : > { %1217 = vmatpush.bf16.msrb.mxu3 %v6229_v58 }
  0xde   : > { %v617_v63 = vpop.f32.mrf.mxu2  ;;  %v630_v29 = vpop.f32.mrf.mxu3 }
  0xdf   : > { %v618_v2 = vadd.f32 %v7026_v22, %v617_v63 }
  0xe1   : > { %v663_v9 = vmax.f32 %v618_v2, 0.0 }
  0xe8   : > { %5972 = vmatmul.msk.bf16.gmra.mxu1 %vm722_vm2, %v684_v1  ;;  %v616_v1 = vadd.f32 %v7026_v22, %v615_v55 }
  0xea   : > { %v662_v7 = vmax.f32 %v616_v1, 0.0 }
  0xec   : > { %v691_v11 = vpack.c.bf16 %v663_v9, %v662_v7 }
  0xf8   : > { %5973 = vmatmul.msk.bf16.gmra.mxu1 %vm722_vm2, %v685_v8 }
 0x108   : > { %5974 = vmatmul.msk.bf16.gmra.mxu1 %vm722_vm2, %v686_v17 }
 0x118   : > { %5975 = vmatmul.msk.bf16.gmra.mxu1 %vm722_vm2, %v687_v25 }
 0x125   : > { %v780_v33 = vpop.f32.mrf.mxu1 }
 0x126   : > { %v781_v36 = vadd.f32 %v7079_v34, %v780_v33 }
 0x128   : > { %5976 = vmatmul.msk.bf16.gmra.mxu1 %vm722_vm2, %v688_v32  ;;  %v860_v41 = vmax.f32 %v781_v36, 0.0  ;;  %v628_v32 = vadd.f32 %v7026_v22, %v627_v24  ;;  %v364_v24 = vld [vmem:[%s6987_s25] sm:$0xff]  }
 0x12d   : > { %v782_v39 = vpop.f32.mrf.mxu1 }
 0x12e   : > { %v783_v40 = vadd.f32 %v7079_v34, %v782_v39  ;;  %v667_v39 = vmax.f32 %v628_v32, 0.0 }
 0x130   : > { %v861_v43 = vmax.f32 %v783_v40, 0.0 }
 0x132   : > { %v901_v45 = vpack.c.bf16 %v861_v43, %v860_v41  ;;  %v693_v41 = vpack.c.bf16 %v667_v39, %v666_v37  ;;  %v632_v43 = vpop.f32.mrf.mxu3  ;;  %v374_v39 = vld [vmem:[%s6987_s25 + $0x28] sm:$0xff]  }
 0x134   : > { %6008 = vmatmul.msk.bf16.vlgmr.msrb.gmra.mxu2 %vm722_vm2, %v901_v45 }
 0x135   : > { %v785_v47 = vpop.f32.mrf.mxu1 }
 0x136   : > { %v786_v49 = vadd.f32 %v7079_v34, %v785_v47  ;;  %v633_v47 = vadd.f32 %v7026_v22, %v632_v43 }
 0x138   : > { %5977 = vmatmul.msk.bf16.gmra.mxu1 %vm722_vm2, %v689_v46  ;;  %v862_v53 = vmax.f32 %v786_v49, 0.0  ;;  %v631_v46 = vadd.f32 %v7026_v22, %v630_v29  ;;  %v6893_v29 = vmov 30  }
 0x139   : > { %6277 = vset.pattern.permute.xlu0 %v6893_v29  ;;  %6289 = vset.pattern.permute.xlu1 %v6893_v29 }
 0x13a   : > { %v635_v50 = vpop.f32.mrf.mxu3  ;;  %6283 = vset.pattern.permute.xlu2 %v6893_v29  ;;  %v392_v29 = vld [vmem:[%s6987_s25 + $0x70] sm:$0xff]  }
 0x13d   : > { %v787_v52 = vpop.f32.mrf.mxu1 }
 0x13e   : > { %v788_v54 = vadd.f32 %v7079_v34, %v787_v52  ;;  %v668_v52 = vmax.f32 %v631_v46, 0.0 }
 0x140   : > { %v863_v57 = vmax.f32 %v788_v54, 0.0  ;;  %v669_v54 = vmax.f32 %v633_v47, 0.0 }
 0x142   : > { %v902_v59 = vpack.c.bf16 %v863_v57, %v862_v53  ;;  %v694_v56 = vpack.c.bf16 %v669_v54, %v668_v52  ;;  %v380_v54 = vld [vmem:[%s6987_s25 + $0x40] sm:$0xff]  }
 0x143   : > { %v3141_v58 = vunpack.c.h.bf16 %v380_v54 }
 0x144   : > { %6009 = vmatmul.msk.bf16.gmra.mxu2 %vm722_vm2, %v902_v59  ;;  %v637_v59 = vpop.f32.mrf.mxu3 }
 0x145   : > { %v790_v62 = vpop.f32.mrf.mxu1 }
 0x146   : > { %v791_v0 = vadd.f32 %v7079_v34, %v790_v62  ;;  %v638_v62 = vadd.f32 %v7026_v22, %v637_v59 }
 0x148   : > { %5978 = vmatmul.msk.bf16.gmra.mxu1 %vm722_vm2, %v690_v61  ;;  %v864_v5 = vmax.f32 %v791_v0, 0.0  ;;  %v636_v61 = vadd.f32 %v7026_v22, %v635_v50  ;;  %v671_v4 = vmax.f32 %v638_v62, 0.0 }
 0x14a   : > { %v670_v2 = vmax.f32 %v636_v61, 0.0 }
 0x14d   : > { %v792_v3 = vpop.f32.mrf.mxu1 }
 0x14e   : > { %v793_v6 = vadd.f32 %v7079_v34, %v792_v3 }
 0x150   : > { %v865_v8 = vmax.f32 %v793_v6, 0.0  ;;  %v695_v6 = vpack.c.bf16 %v671_v4, %v670_v2 }
 0x152   : > { %v903_v10 = vpack.c.bf16 %v865_v8, %v864_v5  ;;  %v6228_v8 = vld [vmem:[%s10590_s3 + $0x40] sm:$0xff] }
 0x153   : > { %1218 = vmatpush.bf16.msrb.mxu3 %v6228_v8 }
 0x154   : > { %6010 = vmatmul.msk.bf16.gmra.mxu2 %vm722_vm2, %v903_v10 }
 0x155   : > { %v795_v12 = vpop.f32.mrf.mxu1 }
 0x156   : > { %v796_v14 = vadd.f32 %v7079_v34, %v795_v12 }
 0x158   : > { %5979 = vmatmul.msk.bf16.gmra.mxu1 %vm722_vm2, %v691_v11  ;;  %v866_v18 = vmax.f32 %v796_v14, 0.0 }
 0x15d   : > { %v797_v17 = vpop.f32.mrf.mxu1 }
 0x15e   : > { %v798_v19 = vadd.f32 %v7079_v34, %v797_v17 }
 0x160   : > { %v867_v21 = vmax.f32 %v798_v19, 0.0 }
 0x162   : > { %v904_v25 = vpack.c.bf16 %v867_v21, %v866_v18 }
 0x164   : > { %6011 = vmatmul.msk.bf16.gmra.mxu2 %vm722_vm2, %v904_v25  ;;  %v3124_v25 = vunpack.c.l.bf16 %v364_v24 }
 0x165   : > { %v800_v27 = vpop.f32.mrf.mxu1 }
 0x166   : > { %v801_v30 = vadd.f32 %v7079_v34, %v800_v27 }
 0x168   : > { %5980 = vmatmul.msk.bf16.gmra.mxu1 %vm722_vm2, %v692_v26  ;;  %v868_v36 = vmax.f32 %v801_v30, 0.0  ;;  %v3125_v26 = vunpack.c.h.bf16 %v364_v24 }
 0x16a   : > { %v7149_v30 = vpack.i.bf16 %v3125_v26, %v3124_v25 }
 0x16c   : > { %6279 = vperm.xlu0 %6277, %v7149_v30  }
 0x16d   : > { %v802_v33 = vpop.f32.mrf.mxu1 }
 0x16e   : > { %v803_v35 = vadd.f32 %v7079_v34, %v802_v33 }
 0x170   : > { %v869_v38 = vmax.f32 %v803_v35, 0.0 }
 0x172   : > { %v905_v40 = vpack.c.bf16 %v869_v38, %v868_v36 }
 0x174   : > { %6012 = vmatmul.msk.bf16.gmra.mxu2 %vm722_vm2, %v905_v40  ;;  %v3134_v40 = vunpack.c.l.bf16 %v374_v39 }
 0x175   : > { %v805_v42 = vpop.f32.mrf.mxu1 }
 0x176   : > { %v806_v45 = vadd.f32 %v7079_v34, %v805_v42 }
 0x178   : > { %5981 = vmatmul.msk.bf16.gmra.mxu1 %vm722_vm2, %v693_v41  ;;  %v870_v51 = vmax.f32 %v806_v45, 0.0  ;;  %v3135_v41 = vunpack.c.h.bf16 %v374_v39  ;;  %v368_v45 = vld [vmem:[%s6987_s25 + $0x10] sm:$0xff]  }
 0x179   : > { %v3128_v47 = vunpack.c.l.bf16 %v368_v45 }
 0x17a   : > { %v7157_v46 = vpack.i.bf16 %v3135_v41, %v3134_v40 }
 0x17c   : > { %10811 = vst [vmem:[#allocation2_spill] sm:$0xff] %v7157_v46  ;;  %6306 = vperm.xlu0 %6277, %v7157_v46  }
 0x17d   : > { %v807_v48 = vpop.f32.mrf.mxu1 }
 0x17e   : > { %v808_v49 = vadd.f32 %v7079_v34, %v807_v48  ;;  %v3129_v48 = vunpack.c.h.bf16 %v368_v45 }
 0x180   : > { %v871_v53 = vmax.f32 %v808_v49, 0.0 }
 0x182   : > { %v906_v55 = vpack.c.bf16 %v871_v53, %v870_v51  ;;  %v7161_v51 = vpack.i.bf16 %v3129_v48, %v3128_v47  ;;  %v366_v53 = vld [vmem:[%s6987_s25 + $0x8] sm:$0xff]  }
 0x184   : > { %6013 = vmatmul.msk.bf16.gmra.mxu2 %vm722_vm2, %v906_v55  ;;  %6291 = vperm.xlu1 %6289, %v7161_v51   ;;  %v3126_v55 = vunpack.c.l.bf16 %v366_v53 }
 0x185   : > { %v810_v57 = vpop.f32.mrf.mxu1 }
 0x186   : > { %v811_v60 = vadd.f32 %v7079_v34, %v810_v57  ;;  %v3140_v57 = vunpack.c.l.bf16 %v380_v54 }
 0x188   : > { %5982 = vmatmul.msk.bf16.gmra.mxu1 %vm722_vm2, %v694_v56  ;;  %v872_v1 = vmax.f32 %v811_v60, 0.0  ;;  %v3127_v56 = vunpack.c.h.bf16 %v366_v53  ;;  %v372_v60 = vld [vmem:[%s6987_s25 + $0x20] sm:$0xff]   ;;  %v7171_v62 = vpack.i.bf16 %v3141_v58, %v3140_v57  ;;  %v382_v53 = vld [vmem:[%s6987_s25 + $0x48] sm:$0xff]  }
 0x189   : > { %v3142_v54 = vunpack.c.l.bf16 %v382_v53  ;;  %v390_v58 = vld [vmem:[%s6987_s25 + $0x68] sm:$0xff]  }
 0x18a   : > { %v7169_v61 = vpack.i.bf16 %v3127_v56, %v3126_v55  ;;  %10812 = vst [vmem:[#allocation3_spill] sm:$0xff] %v7171_v62  ;;  %6321 = vperm.xlu0 %6277, %v7171_v62   ;;  %v3143_v55 = vunpack.c.h.bf16 %v382_v53 }
 0x18c   : > { %6285 = vperm.xlu2 %6283, %v7169_v61  }
 0x18d   : > { %v812_v63 = vpop.f32.mrf.mxu1 }
 0x18e   : > { %v813_v0 = vadd.f32 %v7079_v34, %v812_v63  ;;  %v3132_v63 = vunpack.c.l.bf16 %v372_v60 }
 0x190   : > { %v873_v3 = vmax.f32 %v813_v0, 0.0  ;;  %v3133_v0 = vunpack.c.h.bf16 %v372_v60  ;;  %v3150_v60 = vunpack.c.l.bf16 %v390_v58 }
 0x192   : > { %v907_v5 = vpack.c.bf16 %v873_v3, %v872_v1  ;;  %v7176_v3 = vpack.i.bf16 %v3133_v0, %v3132_v63  ;;  %v3151_v63 = vunpack.c.h.bf16 %v390_v58 }
 0x194   : > { %6014 = vmatmul.msk.bf16.gmra.mxu2 %vm722_vm2, %v907_v5  ;;  %6301 = vperm.xlu1 %6289, %v7176_v3  }
 0x195   : > { %v815_v7 = vpop.f32.mrf.mxu1 }
 0x196   : > { %v816_v22 = vadd.f32 %v7079_v34, %v815_v7 }
 0x198   : > { %5983 = vmatmul.msk.bf16.gmra.mxu1 %vm722_vm2, %v695_v6  ;;  %v874_v11 = vmax.f32 %v816_v22, 0.0 }
 0x19d   : > { %v817_v9 = vpop.f32.mrf.mxu1 }
 0x19e   : > { %v818_v10 = vadd.f32 %v7079_v34, %v817_v9  ;;  %v370_v9 = vld [vmem:[%s6987_s25 + $0x18] sm:$0xff]  }
 0x1a0   : > { %v875_v12 = vmax.f32 %v818_v10, 0.0  ;;  %v386_v10 = vld [vmem:[%s6987_s25 + $0x58] sm:$0xff]  }
 0x1a2   : > { %v908_v13 = vpack.c.bf16 %v875_v12, %v874_v11  ;;  %v3130_v11 = vunpack.c.l.bf16 %v370_v9  ;;  %v3131_v12 = vunpack.c.h.bf16 %v370_v9 }
 0x1a4   : > { %6015 = vmatmul.msk.bf16.gmra.mxu2 %vm722_vm2, %v908_v13  ;;  %v3146_v13 = vunpack.c.l.bf16 %v386_v10 }
 0x1a5   : > { %v820_v14 = vpop.f32.mrf.mxu1 }
 0x1a6   : > { %v821_v15 = vadd.f32 %v7079_v34, %v820_v14  ;;  %v3147_v14 = vunpack.c.h.bf16 %v386_v10 }
 0x1a8   : > { %v876_v17 = vmax.f32 %v821_v15, 0.0 }
 0x1ad   : > { %v822_v16 = vpop.f32.mrf.mxu1 }
 0x1ae   : > { %v823_v18 = vadd.f32 %v7079_v34, %v822_v16 }
 0x1b0   : > { %v877_v19 = vmax.f32 %v823_v18, 0.0  ;;  %v7184_v18 = vpack.i.bf16 %v3131_v12, %v3130_v11 }
 0x1b2   : > { %v909_v20 = vpack.c.bf16 %v877_v19, %v876_v17  ;;  %v378_v17 = vld [vmem:[%s6987_s25 + $0x38] sm:$0xff]   ;;  %v7186_v19 = vpack.i.bf16 %v3147_v14, %v3146_v13  ;;  %6296 = vperm.xlu2 %6283, %v7184_v18  }
 0x1b4   : > { %6016 = vmatmul.msk.bf16.gmra.mxu2 %vm722_vm2, %v909_v20  ;;  %10813 = vst [vmem:[#allocation4_spill] sm:$0xff] %v7186_v19  ;;  %v3138_v20 = vunpack.c.l.bf16 %v378_v17  ;;  %6336 = vperm.xlu0 %6277, %v7186_v19  }
 0x1b5   : > { %v825_v21 = vpop.f32.mrf.mxu1 }
 0x1b6   : > { %v826_v27 = vadd.f32 %v7079_v34, %v825_v21  ;;  %v3139_v21 = vunpack.c.h.bf16 %v378_v17 }
 0x1b7   : > { %v1000_v23 = vpop.f32.mrf.mxu2 }
 0x1b8   : > { %v878_v32 = vmax.f32 %v826_v27, 0.0  ;;  %v1001_v33 = vadd.f32 %v7147_v28, %v1000_v23  ;;  %v7191_v25 = vpack.i.bf16 %v3139_v21, %v3138_v20  ;;  %v376_v27 = vld [vmem:[%s6987_s25 + $0x30] sm:$0xff]   ;;  %v394_v20 = vld [vmem:[%s6987_s25 + $0x78] sm:$0xff]  }
 0x1b9   : > { %v3154_v21 = vunpack.c.l.bf16 %v394_v20 }
 0x1ba   : > { %v1080_v42 = vmax.f32 %v1001_v33, 0.0  ;;  %10814 = vst [vmem:[#allocation5_spill] sm:$0xff] %v7191_v25  ;;  %6316 = vperm.xlu1 %6289, %v7191_v25   ;;  %v3152_v33 = vunpack.c.l.bf16 %v392_v29 }
 0x1bd   : > { %v827_v31 = vpop.f32.mrf.mxu1 }
 0x1be   : > { %v828_v35 = vadd.f32 %v7079_v34, %v827_v31  ;;  %v3136_v31 = vunpack.c.l.bf16 %v376_v27 }
 0x1bf   : > { %v1002_v36 = vpop.f32.mrf.mxu2 }
 0x1c0   : > { %v879_v37 = vmax.f32 %v828_v35, 0.0  ;;  %v1003_v38 = vadd.f32 %v7147_v28, %v1002_v36  ;;  %v3153_v35 = vunpack.c.h.bf16 %v392_v29 }
 0x1c2   : > { %v910_v43 = vpack.c.bf16 %v879_v37, %v878_v32  ;;  %v1081_v44 = vmax.f32 %v1003_v38, 0.0  ;;  %v3137_v32 = vunpack.c.h.bf16 %v376_v27  ;;  %v384_v37 = vld [vmem:[%s6987_s25 + $0x50] sm:$0xff]   ;;  %v7201_v39 = vpack.i.bf16 %v3153_v35, %v3152_v33  ;;  %v6235_v35 = vld [vmem:[%s10591_s4 + $0x18] sm:$0xff] }
 0x1c3   : > { %v3144_v40 = vunpack.c.l.bf16 %v384_v37  ;;  %v3145_v41 = vunpack.c.h.bf16 %v384_v37  ;;  %1436 = vmatpush.bf16.msrb.mxu0 %v6235_v35 }
 0x1c4   : > { %v1121_v49 = vpack.c.bf16 %v1081_v44, %v1080_v42  ;;  %6017 = vmatmul.msk.bf16.gmra.mxu2 %vm722_vm2, %v910_v43  ;;  %v7199_v38 = vpack.i.bf16 %v3137_v32, %v3136_v31  ;;  %10815 = vst [vmem:[#allocation6_spill] sm:$0xff] %v7201_v39  ;;  %6351 = vperm.xlu0 %6277, %v7201_v39  }
 0x1c5   : > { %v830_v50 = vpop.f32.mrf.mxu1  ;;  %v7206_v44 = vpack.i.bf16 %v3145_v41, %v3144_v40 }
 0x1c6   : > { %6048 = vmatmul.msk.bf16.vlgmr.msrb.gmra.mxu3 %vm722_vm2, %v1121_v49  ;;  %v831_v59 = vadd.f32 %v7079_v34, %v830_v50  ;;  %6311 = vperm.xlu2 %6283, %v7199_v38  }
 0x1c7   : > { %v1005_v52 = vpop.f32.mrf.mxu2  ;;  %10816 = vst [vmem:[#allocation7_spill] sm:$0xff] %v7206_v44  ;;  %6331 = vperm.xlu1 %6289, %v7206_v44  }
 0x1c8   : > { %v1006_v1 = vadd.f32 %v7147_v28, %v1005_v52  ;;  %v880_v4 = vmax.f32 %v831_v59, 0.0  ;;  %v7213_v59 = vpack.i.bf16 %v3143_v55, %v3142_v54  ;;  %v6234_v55 = vld [vmem:[%s10591_s4 + $0x10] sm:$0xff] }
 0x1c9   : > { %1437 = vmatpush.bf16.msrb.mxu0 %v6234_v55 }
 0x1ca   : > { %v1082_v7 = vmax.f32 %v1006_v1, 0.0  ;;  %10817 = vst [vmem:[#allocation8_spill] sm:$0xff] %v7213_v59 }
 0x1cd   : > { %v832_v2 = vpop.f32.mrf.mxu1 }
 0x1ce   : > { %v833_v5 = vadd.f32 %v7079_v34, %v832_v2  ;;  %6326 = vperm.xlu2 %6283, %v7213_v59   ;;  %v6894_v2 = vmov 31  }
 0x1cf   : > { %v1007_v6 = vpop.f32.mrf.mxu2  ;;  %6366 = vset.pattern.permute.xlu0 %v6894_v2 }
 0x1d0   : > { %v881_v8 = vmax.f32 %v833_v5, 0.0  ;;  %v1008_v22 = vadd.f32 %v7147_v28, %v1007_v6  ;;  %6368 = vperm.xlu0 %6366, %v7169_v61   ;;  %v388_v6 = vld [vmem:[%s6987_s25 + $0x60] sm:$0xff]   ;;  %s6905_s25 = smov 103  }
 0x1d2   : > { %v911_v15 = vpack.c.bf16 %v881_v8, %v880_v4  ;;  %v1083_v16 = vmax.f32 %v1008_v22, 0.0  ;;  %v7217_v4 = vpack.i.bf16 %v3151_v63, %v3150_v60  ;;  %v3149_v8 = vunpack.c.h.bf16 %v388_v6 }
 0x1d4   : > { %6018 = vmatmul.msk.bf16.gmra.mxu2 %vm722_vm2, %v911_v15  ;;  %v1122_v23 = vpack.c.bf16 %v1083_v16, %v1082_v7  ;;  %10818 = vst [vmem:[#allocation9_spill] sm:$0xff] %v7217_v4  ;;  %6346 = vperm.xlu1 %6289, %v7217_v4   ;;  %v3148_v7 = vunpack.c.l.bf16 %v388_v6 }
 0x1d5   : > { %v835_v24 = vpop.f32.mrf.mxu1 }
 0x1d6   : > { %6049 = vmatmul.msk.bf16.gmra.mxu3 %vm722_vm2, %v1122_v23  ;;  %v836_v36 = vadd.f32 %v7079_v34, %v835_v24  ;;  %v7224_v9 = vpack.i.bf16 %v3149_v8, %v3148_v7  ;;  %v3155_v23 = vunpack.c.h.bf16 %v394_v20 }
 0x1d7   : > { %v1010_v26 = vpop.f32.mrf.mxu2 }
 0x1d8   : > { %v1011_v42 = vadd.f32 %v7147_v28, %v1010_v26  ;;  %v882_v45 = vmax.f32 %v836_v36, 0.0  ;;  %10819 = vst [vmem:[#allocation10_spill] sm:$0xff] %v7224_v9  ;;  %6341 = vperm.xlu2 %6283, %v7224_v9   ;;  %6394 = vperm.xlu0 %6366, %v7199_v38   ;;  %v7233_v27 = vpack.i.bf16 %v3155_v23, %v3154_v21 }
 0x1da   : > { %v1084_v49 = vmax.f32 %v1011_v42, 0.0  ;;  %10820 = vst [vmem:[#allocation11_spill] sm:$0xff] %v7233_v27 }
 0x1dc   : > { %6360 = vset.pattern.permute.xlu1 %v6894_v2 }
 0x1dd   : > { %v837_v43 = vpop.f32.mrf.mxu1  ;;  %6362 = vperm.xlu1 %6360, %v7149_v30  }
 0x1de   : > { %v838_v47 = vadd.f32 %v7079_v34, %v837_v43 }
 0x1df   : > { %v1012_v48 = vpop.f32.mrf.mxu2 }
 0x1e0   : > { %v883_v50 = vmax.f32 %v838_v47, 0.0  ;;  %v1013_v52 = vadd.f32 %v7147_v28, %v1012_v48  ;;  %6356 = vperm.xlu2 %6283, %v7233_v27   ;;  %6409 = vperm.xlu0 %6366, %v7213_v59  }
 0x1e2   : > { %v912_v56 = vpack.c.bf16 %v883_v50, %v882_v45  ;;  %v1085_v57 = vmax.f32 %v1013_v52, 0.0 }
 0x1e4   : > { %6019 = vmatmul.msk.bf16.gmra.mxu2 %vm722_vm2, %v912_v56  ;;  %v1123_v0 = vpack.c.bf16 %v1085_v57, %v1084_v49 }
 0x1e5   : > { %v840_v1 = vpop.f32.mrf.mxu1  ;;  %6379 = vperm.xlu1 %6360, %v7184_v18  }
 0x1e6   : > { %6050 = vmatmul.msk.bf16.gmra.mxu3 %vm722_vm2, %v1123_v0  ;;  %v841_v22 = vadd.f32 %v7079_v34, %v840_v1  ;;  %v6895_v0 = vmov 32  }
 0x1e7   : > { %v1015_v5 = vpop.f32.mrf.mxu2 }
 0x1e8   : > { %v1016_v10 = vadd.f32 %v7147_v28, %v1015_v5  ;;  %v884_v12 = vmax.f32 %v841_v22, 0.0  ;;  %6372 = vset.pattern.permute.xlu2 %v6894_v2  ;;  %6424 = vperm.xlu0 %6366, %v7224_v9  }
 0x1e9   : > { %6374 = vperm.xlu2 %6372, %v7161_v51  }
 0x1ea   : > { %v1086_v15 = vmax.f32 %v1016_v10, 0.0 }
 0x1ed   : > { %v842_v11 = vpop.f32.mrf.mxu1  ;;  %6389 = vperm.xlu1 %6360, %v7157_v46  }
 0x1ee   : > { %v843_v13 = vadd.f32 %v7079_v34, %v842_v11 }
 0x1ef   : > { %v1017_v14 = vpop.f32.mrf.mxu2 }
 0x1f0   : > { %v885_v16 = vmax.f32 %v843_v13, 0.0  ;;  %v1018_v17 = vadd.f32 %v7147_v28, %v1017_v14  ;;  %6439 = vperm.xlu0 %6366, %v7233_v27  }
 0x1f1   : > { %6384 = vperm.xlu2 %6372, %v7176_v3  }
 0x1f2   : > { %v913_v24 = vpack.c.bf16 %v885_v16, %v884_v12  ;;  %v1087_v26 = vmax.f32 %v1018_v17, 0.0  ;;  %v6233_v12 = vld [vmem:[%s10591_s4 + $0x8] sm:$0xff] }
 0x1f3   : > { %1438 = vmatpush.bf16.msrb.mxu0 %v6233_v12 }
 0x1f4   : > { %6020 = vmatmul.msk.bf16.gmra.mxu2 %vm722_vm2, %v913_v24  ;;  %v1124_v29 = vpack.c.bf16 %v1087_v26, %v1086_v15 }
 0x1f5   : > { %v845_v31 = vpop.f32.mrf.mxu1  ;;  %6404 = vperm.xlu1 %6360, %v7171_v62  }
 0x1f6   : > { %6051 = vmatmul.msk.bf16.gmra.mxu3 %vm722_vm2, %v1124_v29  ;;  %v846_v33 = vadd.f32 %v7079_v34, %v845_v31  ;;  %v6232_v31 = vld [vmem:[%s10591_s4] sm:$0xff] }
 0x1f7   : > { %v1020_v32 = vpop.f32.mrf.mxu2  ;;  %1439 = vmatpush.bf16.msrb.mxu0 %v6232_v31 }
 0x1f8   : > { %v886_v37 = vmax.f32 %v846_v33, 0.0  ;;  %v1021_v40 = vadd.f32 %v7147_v28, %v1020_v32  ;;  %6443 = vset.pattern.permute.xlu0 %v6895_v0 }
 0x1f9   : > { %6399 = vperm.xlu2 %6372, %v7191_v25   ;;  %6445 = vperm.xlu0 %6443, %v7149_v30  }
 0x1fa   : > { %v1088_v47 = vmax.f32 %v1021_v40, 0.0 }
 0x1fd   : > { %v847_v36 = vpop.f32.mrf.mxu1  ;;  %6419 = vperm.xlu1 %6360, %v7186_v19  }
 0x1fe   : > { %v848_v41 = vadd.f32 %v7079_v34, %v847_v36 }
 0x1ff   : > { %v1022_v42 = vpop.f32.mrf.mxu2 }
 0x200   : > { %v887_v43 = vmax.f32 %v848_v41, 0.0  ;;  %v1023_v45 = vadd.f32 %v7147_v28, %v1022_v42  ;;  %v7295_v42 = vpop.permute.xlu0 %6279 }
 0x201   : > { %6414 = vperm.xlu2 %6372, %v7206_v44   ;;  %6472 = vperm.xlu0 %6443, %v7157_v46   ;;  %10821 = vst [vmem:[#allocation12_spill] sm:$0xff] %v7295_v42 }
 0x202   : > { %v914_v48 = vpack.c.bf16 %v887_v43, %v886_v37  ;;  %v1089_v49 = vmax.f32 %v1023_v45, 0.0  ;;  %v10600_v43 = vmov 33  }
 0x204   : > { %6021 = vmatmul.msk.bf16.gmra.mxu2 %vm722_vm2, %v914_v48  ;;  %v1125_v50 = vpack.c.bf16 %v1089_v49, %v1088_v47 }
 0x205   : > { %v850_v52 = vpop.f32.mrf.mxu1  ;;  %6434 = vperm.xlu1 %6360, %v7201_v39  }
 0x206   : > { %6052 = vmatmul.msk.bf16.gmra.mxu3 %vm722_vm2, %v1125_v50  ;;  %v851_v54 = vadd.f32 %v7079_v34, %v850_v52  ;;  %v10602_v52 = vmov 35  }
 0x207   : > { %v1025_v53 = vpop.f32.mrf.mxu2 }
 0x208   : > { %v888_v57 = vmax.f32 %v851_v54, 0.0  ;;  %v1026_v58 = vadd.f32 %v7147_v28, %v1025_v53  ;;  %v7305_v53 = vpop.permute.xlu0 %6306 }
 0x209   : > { %6429 = vperm.xlu2 %6372, %v7217_v4   ;;  %6487 = vperm.xlu0 %6443, %v7171_v62   ;;  %10822 = vst [vmem:[#allocation13_spill] sm:$0xff] %v7305_v53 }
 0x20a   : > { %v1090_v5 = vmax.f32 %v1026_v58, 0.0 }
 0x20d   : > { %v852_v56 = vpop.f32.mrf.mxu1  ;;  %6455 = vset.pattern.permute.xlu1 %v6895_v0 }
 0x20e   : > { %v853_v60 = vadd.f32 %v7079_v34, %v852_v56  ;;  %6457 = vperm.xlu1 %6455, %v7161_v51  }
 0x20f   : > { %v1027_v63 = vpop.f32.mrf.mxu2 }
 0x210   : > { %v889_v1 = vmax.f32 %v853_v60, 0.0  ;;  %v1028_v2 = vadd.f32 %v7147_v28, %v1027_v63  ;;  %v7316_v60 = vld [vmem:[%s10589_s2 + $0x3] ss:$0 sm:$0xff]  ;;  %v7318_v63 = vpop.permute.xlu0 %6321 }
 0x211   : > { %6449 = vset.pattern.permute.xlu2 %v6895_v0  ;;  %6502 = vperm.xlu0 %6443, %v7186_v19   ;;  %10823 = vst [vmem:[#allocation14_spill] sm:$0xff] %v7318_v63 }
 0x212   : > { %v915_v6 = vpack.c.bf16 %v889_v1, %v888_v57  ;;  %v1091_v7 = vmax.f32 %v1028_v2, 0.0  ;;  %6451 = vperm.xlu2 %6449, %v7169_v61   ;;  %v10598_v57 = vmov 34  }
 0x214   : > { %6022 = vmatmul.msk.bf16.gmra.mxu2 %vm722_vm2, %v915_v6  ;;  %v1126_v8 = vpack.c.bf16 %v1091_v7, %v1090_v5 }
 0x215   : > { %v855_v22 = vpop.f32.mrf.mxu1 }
 0x216   : > { %6053 = vmatmul.msk.bf16.gmra.mxu3 %vm722_vm2, %v1126_v8  ;;  %v856_v11 = vadd.f32 %v7079_v34, %v855_v22  ;;  %6467 = vperm.xlu1 %6455, %v7176_v3  }
 0x217   : > { %v1030_v10 = vpop.f32.mrf.mxu2 }
 0x218   : > { %v890_v14 = vmax.f32 %v856_v11, 0.0  ;;  %v1031_v15 = vadd.f32 %v7147_v28, %v1030_v10 }
 0x219   : > { %6517 = vperm.xlu0 %6443, %v7201_v39  }
 0x21a   : > { %v1092_v23 = vmax.f32 %v1031_v15, 0.0  ;;  %6462 = vperm.xlu2 %6449, %v7184_v18  }
 0x21d   : > { %v857_v13 = vpop.f32.mrf.mxu1 }
 0x21e   : > { %v858_v16 = vadd.f32 %v7079_v34, %v857_v13  ;;  %6482 = vperm.xlu1 %6455, %v7191_v25  }
 0x21f   : > { %v1032_v17 = vpop.f32.mrf.mxu2 }
 0x220   : > { %v891_v20 = vmax.f32 %v858_v16, 0.0  ;;  %v1033_v21 = vadd.f32 %v7147_v28, %v1032_v17  ;;  %v7333_v16 = vpop.permute.xlu1 %6291 }
 0x221   : > { %6554 = vset.pattern.permute.xlu0 %v10600_v43  ;;  %10825 = vst [vmem:[#allocation16_spill] sm:$0xff] %v7333_v16 }
 0x222   : > { %v916_v24 = vpack.c.bf16 %v891_v20, %v890_v14  ;;  %v1093_v26 = vmax.f32 %v1033_v21, 0.0  ;;  %6477 = vperm.xlu2 %6449, %v7199_v38   ;;  %6556 = vperm.xlu0 %6554, %v7149_v30  }
 0x224   : > { %6023 = vmatmul.msk.bf16.gmra.mxu2 %vm722_vm2, %v916_v24  ;;  %v1127_v29 = vpack.c.bf16 %v1093_v26, %v1092_v23 }
 0x226   : > { %6054 = vmatmul.msk.bf16.gmra.mxu3 %vm722_vm2, %v1127_v29  ;;  %6497 = vperm.xlu1 %6455, %v7206_v44   ;;  %v7327_v13 = vpop.permute.xlu0 %6336 }
 0x227   : > { %v1035_v34 = vpop.f32.mrf.mxu2  ;;  %10824 = vst [vmem:[#allocation15_spill] sm:$0xff] %v7327_v13 }
 0x228   : > { %v1036_v32 = vadd.f32 %v7147_v28, %v1035_v34 }
 0x22a   : > { %v1094_v36 = vmax.f32 %v1036_v32, 0.0  ;;  %6492 = vperm.xlu2 %6449, %v7213_v59   ;;  %6560 = vset.pattern.permute.xlu0 %v10602_v52 }
 0x22b   : > { %6562 = vperm.xlu0 %6560, %v7149_v30  }
 0x22e   : > { %6512 = vperm.xlu1 %6455, %v7217_v4  }
 0x22f   : > { %v1037_v33 = vpop.f32.mrf.mxu2 }
 0x230   : > { %v1038_v35 = vadd.f32 %v7147_v28, %v1037_v33 }
 0x232   : > { %v1095_v37 = vmax.f32 %v1038_v35, 0.0  ;;  %6507 = vperm.xlu2 %6449, %v7224_v9  }
 0x233   : > { %6585 = vperm.xlu0 %6560, %v7176_v3  }
 0x234   : > { %v1128_v40 = vpack.c.bf16 %v1095_v37, %v1094_v36  ;;  %v7343_v36 = vpop.permute.xlu2 %6285 }
 0x235   : > { %10827 = vst [vmem:[#allocation18_spill] sm:$0xff] %v7343_v36 }
 0x236   : > { %6055 = vmatmul.msk.bf16.gmra.mxu3 %vm722_vm2, %v1128_v40  ;;  %6526 = vset.pattern.permute.xlu1 %v10598_v57  ;;  %v7337_v26 = vpop.permute.xlu0 %6351  ;;  %v7345_v40 = vpop.permute.xlu1 %6301 }
 0x237   : > { %v1040_v41 = vpop.f32.mrf.mxu2  ;;  %6528 = vperm.xlu1 %6526, %v7149_v30   ;;  %10826 = vst [vmem:[#allocation17_spill] sm:$0xff] %v7337_v26 }
 0x238   : > { %v1041_v45 = vadd.f32 %v7147_v28, %v1040_v41  ;;  %10828 = vst [vmem:[#allocation19_spill] sm:$0xff] %v7345_v40 }
 0x23a   : > { %v1096_v48 = vmax.f32 %v1041_v45, 0.0  ;;  %6522 = vperm.xlu2 %6449, %v7233_v27  }
 0x23b   : > { %6589 = vset.pattern.permute.xlu0 %v10598_v57 }
 0x23c   : > { %6591 = vperm.xlu0 %6589, %v7184_v18  }
 0x23f   : > { %v1042_v47 = vpop.f32.mrf.mxu2  ;;  %6538 = vset.pattern.permute.xlu1 %v10602_v52 }
 0x240   : > { %v1043_v49 = vadd.f32 %v7147_v28, %v1042_v47  ;;  %6540 = vperm.xlu1 %6538, %v7169_v61  }
 0x242   : > { %v1097_v50 = vmax.f32 %v1043_v49, 0.0  ;;  %6532 = vset.pattern.permute.xlu2 %v10598_v57  ;;  %v7351_v45 = vpop.permute.xlu0 %6368 }
 0x243   : > { %6534 = vperm.xlu2 %6532, %v7169_v61  }
 0x244   : > { %v1129_v54 = vpack.c.bf16 %v1097_v50, %v1096_v48  ;;  %6620 = vperm.xlu0 %6589, %v7199_v38  }
 0x246   : > { %6056 = vmatmul.msk.bf16.gmra.mxu3 %vm722_vm2, %v1129_v54 }
 0x247   : > { %v1045_v55 = vpop.f32.mrf.mxu2 }
 0x248   : > { %v1046_v58 = vadd.f32 %v7147_v28, %v1045_v55  ;;  %v7356_v55 = vpop.permute.xlu2 %6296  ;;  %6550 = vperm.xlu1 %6538, %v7161_v51  }
 0x249   : > { %v1220_v56 = vpop.f32.mrf.mxu3  ;;  %10829 = vst [vmem:[#allocation20_spill] sm:$0xff] %v7356_v55 }
 0x24a   : > { %v1098_v1 = vmax.f32 %v1046_v58, 0.0  ;;  %v1221_v2 = vadd.f32 %v7316_v60, %v1220_v56 }
 0x24b   : > { %6545 = vperm.xlu2 %6532, %v7161_v51  }
 0x24c   : > { %v1300_v8 = vmax.f32 %v1221_v2, 0.0  ;;  %6637 = vperm.xlu0 %6589, %v7191_v25  }
 0x24f   : > { %v1047_v0 = vpop.f32.mrf.mxu2 }
 0x250   : > { %v1048_v5 = vadd.f32 %v7147_v28, %v1047_v0  ;;  %v7358_v0 = vpop.permute.xlu1 %6316  ;;  %6572 = vset.pattern.permute.xlu1 %v10600_v43 }
 0x251   : > { %v1222_v6 = vpop.f32.mrf.mxu3  ;;  %10830 = vst [vmem:[#allocation21_spill] sm:$0xff] %v7358_v0  ;;  %6574 = vperm.xlu1 %6572, %v7169_v61  }
 0x252   : > { %v1099_v7 = vmax.f32 %v1048_v5, 0.0  ;;  %v1223_v30 = vadd.f32 %v7316_v60, %v1222_v6 }
 0x253   : > { %6566 = vset.pattern.permute.xlu2 %v10602_v52 }
 0x254   : > { %v1130_v22 = vpack.c.bf16 %v1099_v7, %v1098_v1  ;;  %v1301_v10 = vmax.f32 %v1223_v30, 0.0  ;;  %6568 = vperm.xlu2 %6566, %v7184_v18   ;;  %v7363_v7 = vpop.permute.xlu0 %6394  ;;  %6648 = vperm.xlu0 %6589, %v7171_v62  }
 0x255   : > { %10831 = vst [vmem:[#allocation22_spill] sm:$0xff] %v7363_v7 }
 0x256   : > { %v1340_v11 = vpack.c.bf16 %v1301_v10, %v1300_v8  ;;  %6057 = vmatmul.msk.bf16.gmra.mxu3 %vm722_vm2, %v1130_v22  ;;  %v7368_v10 = vpop.permute.xlu2 %6311 }
 0x257   : > { %v1050_v12 = vpop.f32.mrf.mxu2  ;;  %10832 = vst [vmem:[#allocation23_spill] sm:$0xff] %v7368_v10 }
 0x258   : > { %6080 = vmatmul.msk.bf16.vlgmr.msrb.gmra.mxu0 %vm722_vm2, %v1340_v11  ;;  %v1051_v15 = vadd.f32 %v7147_v28, %v1050_v12  ;;  %v7371_v11 = vpop.permute.xlu1 %6331 }
 0x259   : > { %v1225_v14 = vpop.f32.mrf.mxu3  ;;  %10833 = vst [vmem:[#allocation24_spill] sm:$0xff] %v7371_v11  ;;  %6578 = vset.pattern.permute.xlu1 %v10598_v57 }
 0x25a   : > { %v1100_v20 = vmax.f32 %v1051_v15, 0.0  ;;  %v1226_v21 = vadd.f32 %v7316_v60, %v1225_v14  ;;  %6580 = vperm.xlu1 %6578, %v7176_v3  }
 0x25c   : > { %v1302_v31 = vmax.f32 %v1226_v21, 0.0  ;;  %6595 = vset.pattern.permute.xlu2 %v10600_v43 }
 0x25d   : > { %6597 = vperm.xlu2 %6595, %v7161_v51  }
 0x25f   : > { %v1052_v17 = vpop.f32.mrf.mxu2 }
 0x260   : > { %v1053_v23 = vadd.f32 %v7147_v28, %v1052_v17  ;;  %v7376_v17 = vpop.permute.xlu0 %6409 }
 0x261   : > { %v1227_v24 = vpop.f32.mrf.mxu3  ;;  %10834 = vst [vmem:[#allocation25_spill] sm:$0xff] %v7376_v17 }
 0x262   : > { %v1101_v29 = vmax.f32 %v1053_v23, 0.0  ;;  %v1228_v34 = vadd.f32 %v7316_v60, %v1227_v24  ;;  %6607 = vset.pattern.permute.xlu1 %v10602_v52 }
 0x263   : > { %6609 = vperm.xlu1 %6607, %v7157_v46  }
 0x264   : > { %v1131_v32 = vpack.c.bf16 %v1101_v29, %v1100_v20  ;;  %v1303_v33 = vmax.f32 %v1228_v34, 0.0 }
 0x265   : > { %6601 = vset.pattern.permute.xlu2 %v10598_v57 }
 0x266   : > { %6058 = vmatmul.msk.bf16.gmra.mxu3 %vm722_vm2, %v1131_v32  ;;  %v1341_v35 = vpack.c.bf16 %v1303_v33, %v1302_v31  ;;  %6603 = vperm.xlu2 %6601, %v7157_v46   ;;  %v7383_v32 = vpop.permute.xlu2 %6326  ;;  %v7386_v33 = vpop.permute.xlu1 %6346 }
 0x267   : > { %v1055_v37 = vpop.f32.mrf.mxu2  ;;  %10835 = vst [vmem:[#allocation26_spill] sm:$0xff] %v7383_v32 }
 0x268   : > { %6081 = vmatmul.msk.bf16.gmra.mxu0 %vm722_vm2, %v1341_v35  ;;  %v1056_v47 = vadd.f32 %v7147_v28, %v1055_v37  ;;  %10836 = vst [vmem:[#allocation27_spill] sm:$0xff] %v7386_v33 }
 0x269   : > { %v1230_v41 = vpop.f32.mrf.mxu3 }
 0x26a   : > { %v1231_v48 = vadd.f32 %v7316_v60, %v1230_v41  ;;  %v1102_v50 = vmax.f32 %v1056_v47, 0.0  ;;  %v7390_v41 = vpop.permute.xlu0 %6424 }
 0x26b   : > { %10837 = vst [vmem:[#allocation28_spill] sm:$0xff] %v7390_v41 }
 0x26c   : > { %v1304_v58 = vmax.f32 %v1231_v48, 0.0 }
 0x26e   : > { %6613 = vset.pattern.permute.xlu2 %v10600_v43  ;;  %v7397_v48 = vpop.permute.xlu2 %6341 }
 0x26f   : > { %v1057_v49 = vpop.f32.mrf.mxu2  ;;  %6615 = vperm.xlu2 %6613, %v7184_v18   ;;  %10838 = vst [vmem:[#allocation29_spill] sm:$0xff] %v7397_v48 }
 0x270   : > { %v1058_v54 = vadd.f32 %v7147_v28, %v1057_v49 }
 0x271   : > { %v1232_v56 = vpop.f32.mrf.mxu3 }
 0x272   : > { %v1103_v1 = vmax.f32 %v1058_v54, 0.0  ;;  %v1233_v2 = vadd.f32 %v7316_v60, %v1232_v56 }
 0x274   : > { %v1132_v5 = vpack.c.bf16 %v1103_v1, %v1102_v50  ;;  %v1305_v6 = vmax.f32 %v1233_v2, 0.0  ;;  %v7399_v50 = vpop.permute.xlu1 %6362 }
 0x276   : > { %6059 = vmatmul.msk.bf16.gmra.mxu3 %vm722_vm2, %v1132_v5  ;;  %v1342_v30 = vpack.c.bf16 %v1305_v6, %v1304_v58  ;;  %v7405_v6 = vpop.permute.xlu0 %6439 }
 0x277   : > { %v1060_v8 = vpop.f32.mrf.mxu2  ;;  %6624 = vset.pattern.permute.xlu2 %v10602_v52  ;;  %10839 = vst [vmem:[#allocation30_spill] sm:$0xff] %v7405_v6 }
 0x278   : > { %6082 = vmatmul.msk.bf16.gmra.mxu0 %vm722_vm2, %v1342_v30  ;;  %v1061_v12 = vadd.f32 %v7147_v28, %v1060_v8  ;;  %6626 = vperm.xlu2 %6624, %v7199_v38  }
 0x279   : > { %v1235_v22 = vpop.f32.mrf.mxu3 }
 0x27a   : > { %v1236_v14 = vadd.f32 %v7316_v60, %v1235_v22  ;;  %v1104_v20 = vmax.f32 %v1061_v12, 0.0 }
 0x27c   : > { %v1306_v23 = vmax.f32 %v1236_v14, 0.0 }
 0x27f   : > { %v1062_v15 = vpop.f32.mrf.mxu2 }
 0x280   : > { %v1063_v21 = vadd.f32 %v7147_v28, %v1062_v15  ;;  %6630 = vset.pattern.permute.xlu2 %v10600_v43  ;;  %v7413_v15 = vpop.permute.xlu2 %6356 }
 0x281   : > { %v1237_v51 = vpop.f32.mrf.mxu3  ;;  %6632 = vperm.xlu2 %6630, %v7176_v3   ;;  %10840 = vst [vmem:[#allocation31_spill] sm:$0xff] %v7413_v15 }
 0x282   : > { %v1105_v24 = vmax.f32 %v1063_v21, 0.0  ;;  %v1238_v29 = vadd.f32 %v7316_v60, %v1237_v51  ;;  %v7415_v21 = vpop.permute.xlu1 %6379 }
 0x283   : > { %10841 = vst [vmem:[#allocation32_spill] sm:$0xff] %v7415_v21 }
 0x284   : > { %v1133_v34 = vpack.c.bf16 %v1105_v24, %v1104_v20  ;;  %v1307_v31 = vmax.f32 %v1238_v29, 0.0 }
 0x286   : > { %6060 = vmatmul.msk.bf16.gmra.mxu3 %vm722_vm2, %v1133_v34  ;;  %v1343_v35 = vpack.c.bf16 %v1307_v31, %v1306_v23  ;;  %v7418_v23 = vpop.permute.xlu0 %6445 }
 0x287   : > { %v1065_v37 = vpop.f32.mrf.mxu2 }
 0x288   : > { %6083 = vmatmul.msk.bf16.gmra.mxu0 %vm722_vm2, %v1343_v35  ;;  %v1066_v47 = vadd.f32 %v7147_v28, %v1065_v37  ;;  %v7425_v18 = vpop.permute.xlu2 %6374 }
 0x289   : > { %v1240_v61 = vpop.f32.mrf.mxu3  ;;  %6641 = vset.pattern.permute.xlu2 %v10602_v52  ;;  %10842 = vst [vmem:[#allocation33_spill] sm:$0xff] %v7425_v18 }
 0x28a   : > { %v1106_v54 = vmax.f32 %v1066_v47, 0.0  ;;  %v1241_v56 = vadd.f32 %v7316_v60, %v1240_v61  ;;  %6643 = vperm.xlu2 %6641, %v7191_v25   ;;  %v7428_v61 = vpop.permute.xlu1 %6389 }
 0x28b   : > { %10843 = vst [vmem:[#allocation34_spill] sm:$0xff] %v7428_v61 }
 0x28c   : > { %v1308_v30 = vmax.f32 %v1241_v56, 0.0 }
 0x28f   : > { %v1067_v49 = vpop.f32.mrf.mxu2 }
 0x290   : > { %v1068_v58 = vadd.f32 %v7147_v28, %v1067_v49 }
 0x291   : > { %v1242_v1 = vpop.f32.mrf.mxu3 }
 0x292   : > { %v1107_v2 = vmax.f32 %v1068_v58, 0.0  ;;  %v1243_v5 = vadd.f32 %v7316_v60, %v1242_v1  ;;  %v7431_v1 = vpop.permute.xlu0 %6472  ;;  %6653 = vperm.xlu2 %6641, %v7171_v62  }
 0x293   : > { %10844 = vst [vmem:[#allocation35_spill] sm:$0xff] %v7431_v1 }
 0x294   : > { %v1134_v8 = vpack.c.bf16 %v1107_v2, %v1106_v54  ;;  %v1309_v22 = vmax.f32 %v1243_v5, 0.0  ;;  %v7436_v5 = vpop.permute.xlu2 %6384 }
 0x295   : > { %10845 = vst [vmem:[#allocation36_spill] sm:$0xff] %v7436_v5 }
 0x296   : > { %6061 = vmatmul.msk.bf16.gmra.mxu3 %vm722_vm2, %v1134_v8  ;;  %v1344_v12 = vpack.c.bf16 %v1309_v22, %v1308_v30  ;;  %v7439_v8 = vpop.permute.xlu1 %6404 }
 0x297   : > { %v1070_v14 = vpop.f32.mrf.mxu2  ;;  %10846 = vst [vmem:[#allocation37_spill] sm:$0xff] %v7439_v8 }
 0x298   : > { %6084 = vmatmul.msk.bf16.gmra.mxu0 %vm722_vm2, %v1344_v12  ;;  %v1071_v51 = vadd.f32 %v7147_v28, %v1070_v14 }
 0x299   : > { %v1245_v20 = vpop.f32.mrf.mxu3 }
 0x29a   : > { %v1108_v29 = vmax.f32 %v1071_v51, 0.0  ;;  %v1246_v34 = vadd.f32 %v7316_v60, %v1245_v20  ;;  %6657 = vset.pattern.permute.xlu2 %v10600_v43 }
 0x29b   : > { %6659 = vperm.xlu2 %6657, %v7199_v38  }
 0x29c   : > { %v1310_v47 = vmax.f32 %v1246_v34, 0.0 }
 0x29f   : > { %v1072_v24 = vpop.f32.mrf.mxu2 }
 0x2a0   : > { %v1073_v3 = vadd.f32 %v7147_v28, %v1072_v24  ;;  %v7444_v24 = vpop.permute.xlu0 %6487 }
 0x2a1   : > { %v1247_v31 = vpop.f32.mrf.mxu3  ;;  %10847 = vst [vmem:[#allocation38_spill] sm:$0xff] %v7444_v24 }
 0x2a2   : > { %v1109_v35 = vmax.f32 %v1073_v3, 0.0  ;;  %v1248_v37 = vadd.f32 %v7316_v60, %v1247_v31 }
 0x2a4   : > { %v1135_v49 = vpack.c.bf16 %v1109_v35, %v1108_v29  ;;  %v1311_v54 = vmax.f32 %v1248_v37, 0.0  ;;  %v7449_v37 = vpop.permute.xlu2 %6399 }
 0x2a5   : > { %10848 = vst [vmem:[#allocation39_spill] sm:$0xff] %v7449_v37 }
 0x2a6   : > { %6062 = vmatmul.msk.bf16.gmra.mxu3 %vm722_vm2, %v1135_v49  ;;  %v1345_v56 = vpack.c.bf16 %v1311_v54, %v1310_v47  ;;  %v7452_v47 = vpop.permute.xlu1 %6419 }
 0x2a7   : > { %v1075_v58 = vpop.f32.mrf.mxu2  ;;  %10849 = vst [vmem:[#allocation40_spill] sm:$0xff] %v7452_v47 }
 0x2a8   : > { %6085 = vmatmul.msk.bf16.gmra.mxu0 %vm722_vm2, %v1345_v56  ;;  %v1076_v30 = vadd.f32 %v7147_v28, %v1075_v58  ;;  %v7455_v54 = vpop.permute.xlu0 %6502 }
 0x2a9   : > { %v1250_v2 = vpop.f32.mrf.mxu3  ;;  %10850 = vst [vmem:[#allocation41_spill] sm:$0xff] %v7455_v54 }
 0x2aa   : > { %v1110_v12 = vmax.f32 %v1076_v30, 0.0  ;;  %v1251_v14 = vadd.f32 %v7316_v60, %v1250_v2 }
 0x2ac   : > { %v1312_v3 = vmax.f32 %v1251_v14, 0.0  ;;  %v7457_v38 = vpop.permute.xlu2 %6414 }
 0x2ad   : > { %10851 = vst [vmem:[#allocation42_spill] sm:$0xff] %v7457_v38 }
 0x2ae   : > { %v7460_v2 = vpop.permute.xlu1 %6434 }
 0x2af   : > { %v1077_v22 = vpop.f32.mrf.mxu2  ;;  %10852 = vst [vmem:[#allocation43_spill] sm:$0xff] %v7460_v2 }
 0x2b0   : > { %v1078_v20 = vadd.f32 %v7147_v28, %v1077_v22  ;;  %v7463_v14 = vpop.permute.xlu0 %6517 }
 0x2b1   : > { %v1252_v51 = vpop.f32.mrf.mxu3  ;;  %10853 = vst [vmem:[#allocation44_spill] sm:$0xff] %v7463_v14 }
 0x2b2   : > { %v1111_v29 = vmax.f32 %v1078_v20, 0.0  ;;  %v1253_v34 = vadd.f32 %v7316_v60, %v1252_v51 }
 0x2b4   : > { %v1136_v31 = vpack.c.bf16 %v1111_v29, %v1110_v12  ;;  %v1313_v35 = vmax.f32 %v1253_v34, 0.0  ;;  %v7466_v51 = vpop.permute.xlu2 %6429 }
 0x2b5   : > { %10854 = vst [vmem:[#allocation45_spill] sm:$0xff] %v7466_v51 }
 0x2b6   : > { %6063 = vmatmul.msk.bf16.gmra.mxu3 %vm722_vm2, %v1136_v31  ;;  %v1346_v28 = vpack.c.bf16 %v1313_v35, %v1312_v3  ;;  %v7468_v34 = vpop.permute.xlu1 %6457 }
 0x2b8   : > { %6086 = vmatmul.msk.bf16.gmra.mxu0 %vm722_vm2, %v1346_v28  ;;  %v7470_v3 = vpop.permute.xlu0 %6556 }
 0x2b9   : > { %v1255_v49 = vpop.f32.mrf.mxu3  ;;  %10855 = vst [vmem:[#allocation46_spill] sm:$0xff] %v7470_v3 }
 0x2ba   : > { %v1256_v56 = vadd.f32 %v7316_v60, %v1255_v49 }
 0x2bc   : > { %v1314_v22 = vmax.f32 %v1256_v56, 0.0  ;;  %v7477_v56 = vld [vmem:[%s10592_s5] ss:$0 sm:$0xff] }
 0x2c1   : > { %v1257_v58 = vpop.f32.mrf.mxu3 }
 0x2c2   : > { %v1258_v30 = vadd.f32 %v7316_v60, %v1257_v58  ;;  %v7479_v58 = vpop.permute.xlu2 %6451 }
 0x2c4   : > { %v1315_v12 = vmax.f32 %v1258_v30, 0.0 }
 0x2c6   : > { %v1347_v20 = vpack.c.bf16 %v1315_v12, %v1314_v22  ;;  %v7481_v12 = vpop.permute.xlu1 %6467 }
 0x2c7   : > { %10856 = vst [vmem:[#allocation47_spill] sm:$0xff] %v7481_v12 }
 0x2c8   : > { %6087 = vmatmul.msk.bf16.gmra.mxu0 %vm722_vm2, %v1347_v20 }
 0x2c9   : > { %v1260_v29 = vpop.f32.mrf.mxu3 }
 0x2ca   : > { %v1261_v31 = vadd.f32 %v7316_v60, %v1260_v29  ;;  %v6563_v29 = vpop.permute.xlu0 %6562 }
 0x2cb   : > { %v6565_v13 = vunpack.i.h.bf16 %v6563_v29 }
 0x2cc   : > { %v1316_v28 = vmax.f32 %v1261_v31, 0.0 }
 0x2d1   : > { %v1262_v35 = vpop.f32.mrf.mxu3 }
 0x2d2   : > { %v1263_v49 = vadd.f32 %v7316_v60, %v1262_v35  ;;  %v6564_v35 = vunpack.i.l.bf16 %v6563_v29  ;;  %v6453_v29 = vunpack.i.l.bf16 %v7479_v58  ;;  %v6586_v27 = vpop.permute.xlu0 %6585 }
 0x2d3   : > { %v6587_v16 = vunpack.i.l.bf16 %v6586_v27 }
 0x2d4   : > { %v1317_v30 = vmax.f32 %v1263_v49, 0.0 }
 0x2d5   : > { %v1441_v22 = vpop.f32.mrf.mxu0 }
 0x2d6   : > { %v1348_v20 = vpack.c.bf16 %v1317_v30, %v1316_v28  ;;  %v7484_v57 = vadd.f32 %v7477_v56, %v1441_v22  ;;  %v7493_v28 = vpop.permute.xlu2 %6462  ;;  %v7497_v22 = vpop.permute.xlu1 %6482 }
 0x2d7   : > { %10858 = vst [vmem:[#allocation49_spill] sm:$0xff] %v7497_v22 }
 0x2d8   : > { %10857 = vst [vmem:[#allocation48_spill] sm:$0xff] %v7484_v57  ;;  %6088 = vmatmul.msk.bf16.gmra.mxu0 %vm722_vm2, %v1348_v20  ;;  %2932 = vrot.lane.b32.xlu2 %v7484_v57, %s6899_s14  ;;  %v4596_v30 = vmul.f32 %v6564_v35, %v7484_v57  ;;  %v6447_v35 = vunpack.i.l.bf16 %v7418_v23 }
 0x2d9   : > { %2451 = vrot.lane.b32.xlu1 %v7484_v57, %s6900_s15  ;;  %1553 = vrot.lane.b32.xlu0 %v7484_v57, %s6901_s16  ;;  %v1265_v31 = vpop.f32.mrf.mxu3 }
 0x2da   : > { %v1266_v49 = vadd.f32 %v7316_v60, %v1265_v31  ;;  %v3796_v48 = vmul.f32 %v6447_v35, %v7484_v57 }
 0x2dc   : > { %v1318_v52 = vmax.f32 %v1266_v49, 0.0 }
 0x2dd   : > { %v1443_v20 = vpop.f32.mrf.mxu0 }
 0x2de   : > { %v7507_v26 = vadd.f32 %v7477_v56, %v1443_v20  ;;  %v7509_v33 = vpop.permute.xlu2 %6477 }
 0x2df   : > { %10860 = vst [vmem:[#allocation51_spill] sm:$0xff] %v7509_v33 }
 0x2e0   : > { %4660 = vrot.lane.b32.xlu2 %v4596_v30, %s6901_s16  ;;  %10859 = vst [vmem:[#allocation50_spill] sm:$0xff] %v7507_v26  ;;  %v4597_v11 = vmul.f32 %v6565_v13, %v7507_v26 }
 0x2e1   : > { %2836 = vrot.lane.b32.xlu1 %v7484_v57, %s6902_s18  ;;  %2355 = vrot.lane.b32.xlu0 %v7484_v57, %s6903_s19  ;;  %v1267_v43 = vpop.f32.mrf.mxu3 }
 0x2e2   : > { %v1268_v15 = vadd.f32 %v7316_v60, %v1267_v43 }
 0x2e4   : > { %v1319_v31 = vmax.f32 %v1268_v15, 0.0  ;;  %v7518_v15 = vpop.permute.xlu1 %6497 }
 0x2e5   : > { %10861 = vst [vmem:[#allocation52_spill] sm:$0xff] %v7518_v15  ;;  %v1446_v49 = vpop.f32.mrf.mxu0 }
 0x2e6   : > { %v1349_v30 = vpack.c.bf16 %v1319_v31, %v1318_v52  ;;  %v7521_v52 = vadd.f32 %v7477_v56, %v1446_v49  ;;  %v7526_v31 = vpop.permute.xlu2 %6492 }
 0x2e7   : > { %10863 = vst [vmem:[#allocation54_spill] sm:$0xff] %v7526_v31 }
 0x2e8   : > { %6089 = vmatmul.msk.bf16.gmra.mxu0 %vm722_vm2, %v1349_v30  ;;  %2357 = vrot.lane.b32.xlu2 %v7507_v26, %s6903_s19  ;;  %10862 = vst [vmem:[#allocation53_spill] sm:$0xff] %v7521_v52 }
 0x2e9   : > { %1555 = vrot.lane.b32.xlu0 %v7507_v26, %s6901_s16  ;;  %3860 = vrot.lane.b32.xlu1 %v3796_v48, %s6901_s16  ;;  %v1270_v43 = vpop.f32.mrf.mxu3 }
 0x2ea   : > { %v1271_v20 = vadd.f32 %v7316_v60, %v1270_v43 }
 0x2ec   : > { %v1320_v35 = vmax.f32 %v1271_v20, 0.0  ;;  %v7533_v49 = vpop.permute.xlu1 %6512 }
 0x2ed   : > { %10864 = vst [vmem:[#allocation55_spill] sm:$0xff] %v7533_v49 }
 0x2ee   : > { %v7542_v32 = vpop.permute.xlu2 %6507 }
 0x2ef   : > { %10865 = vst [vmem:[#allocation56_spill] sm:$0xff] %v7542_v32 }
 0x2f0   : > { %2455 = vrot.lane.b32.xlu2 %v7521_v52, %s6900_s15 }
 0x2f1   : > { %2453 = vrot.lane.b32.xlu0 %v7507_v26, %s6900_s15  ;;  %2934 = vrot.lane.b32.xlu1 %v7507_v26, %s6899_s14  ;;  %v1272_v48 = vpop.f32.mrf.mxu3 }
 0x2f2   : > { %v1273_v30 = vadd.f32 %v7316_v60, %v1272_v48  ;;  %v6448_v48 = vunpack.i.h.bf16 %v7418_v23  ;;  %v1448_v23 = vpop.f32.mrf.mxu0 }
 0x2f4   : > { %v1321_v14 = vmax.f32 %v1273_v30, 0.0  ;;  %v3797_v30 = vmul.f32 %v6448_v48, %v7507_v26 }
 0x2f6   : > { %v1350_v43 = vpack.c.bf16 %v1321_v14, %v1320_v35  ;;  %v7546_v14 = vpop.permute.xlu1 %6528  ;;  %v3798_v35 = vmul.f32 %v6453_v29, %v7521_v52  ;;  %v7556_v63 = vpop.permute.xlu2 %6522 }
 0x2f7   : > { %10866 = vst [vmem:[#allocation57_spill] sm:$0xff] %v7556_v63 }
 0x2f8   : > { %6090 = vmatmul.msk.bf16.gmra.mxu0 %vm722_vm2, %v1350_v43  ;;  %2840 = vrot.lane.b32.xlu2 %v7521_v52, %s6902_s18 }
 0x2f9   : > { %2838 = vrot.lane.b32.xlu0 %v7507_v26, %s6902_s18  ;;  %4662 = vrot.lane.b32.xlu1 %v4597_v11, %s6901_s16  ;;  %v1275_v20 = vpop.f32.mrf.mxu3 }
 0x2fa   : > { %v1276_v13 = vadd.f32 %v7316_v60, %v1275_v20  ;;  %v7559_v20 = vadd.f32 %v7477_v56, %v1448_v23 }
 0x2fc   : > { %v1322_v43 = vmax.f32 %v1276_v13, 0.0  ;;  %10867 = vst [vmem:[#allocation58_spill] sm:$0xff] %v7559_v20 }
 0x2fe   : > { %v6541_v48 = vpop.permute.xlu1 %6540 }
 0x300   : > { %3864 = vrot.lane.b32.xlu2 %v3798_v35, %s6901_s16  ;;  %v6542_v35 = vunpack.i.l.bf16 %v6541_v48 }
 0x301   : > { %3862 = vrot.lane.b32.xlu0 %v3797_v30, %s6901_s16  ;;  %1557 = vrot.lane.b32.xlu1 %v7521_v52, %s6901_s16  ;;  %v1277_v11 = vpop.f32.mrf.mxu3  ;;  %v7568_v30 = vpop.permute.xlu2 %6534 }
 0x302   : > { %v1278_v49 = vadd.f32 %v7316_v60, %v1277_v11  ;;  %10868 = vst [vmem:[#allocation59_spill] sm:$0xff] %v7568_v30 }
 0x304   : > { %v1323_v32 = vmax.f32 %v1278_v49, 0.0  ;;  %v6543_v49 = vunpack.i.h.bf16 %v6541_v48  ;;  %v1451_v48 = vpop.f32.mrf.mxu0 }
 0x305   : > { %v7579_v0 = vadd.f32 %v7477_v56, %v1451_v48  ;;  %v6454_v48 = vunpack.i.h.bf16 %v7479_v58  ;;  %v6459_v58 = vunpack.i.l.bf16 %v7468_v34 }
 0x306   : > { %v1351_v29 = vpack.c.bf16 %v1323_v32, %v1322_v43  ;;  %v4599_v32 = vmul.f32 %v6543_v49, %v7559_v20  ;;  %v4598_v43 = vmul.f32 %v6542_v35, %v7521_v52 }
 0x307   : > { %10869 = vst [vmem:[#allocation60_spill] sm:$0xff] %v7579_v0  ;;  %v3799_v31 = vmul.f32 %v6454_v48, %v7559_v20 }
 0x308   : > { %6091 = vmatmul.msk.bf16.gmra.mxu0 %vm722_vm2, %v1351_v29  ;;  %2938 = vrot.lane.b32.xlu2 %v7559_v20, %s6899_s14 }
 0x309   : > { %2936 = vrot.lane.b32.xlu0 %v7521_v52, %s6899_s14  ;;  %2359 = vrot.lane.b32.xlu1 %v7521_v52, %s6903_s19  ;;  %v1280_v13 = vpop.f32.mrf.mxu3  ;;  %v7581_v49 = vpop.permute.xlu2 %6545 }
 0x30a   : > { %v1281_v11 = vadd.f32 %v7316_v60, %v1280_v13  ;;  %10870 = vst [vmem:[#allocation61_spill] sm:$0xff] %v7581_v49 }
 0x30c   : > { %v1324_v29 = vmax.f32 %v1281_v11, 0.0 }
 0x310   : > { %4666 = vrot.lane.b32.xlu2 %v4599_v32, %s6901_s16 }
 0x311   : > { %4664 = vrot.lane.b32.xlu0 %v4598_v43, %s6901_s16  ;;  %1559 = vrot.lane.b32.xlu1 %v7559_v20, %s6901_s16  ;;  %v1282_v23 = vpop.f32.mrf.mxu3 }
 0x312   : > { %v1283_v63 = vadd.f32 %v7316_v60, %v1282_v23  ;;  %v1453_v23 = vpop.f32.mrf.mxu0 }
 0x314   : > { %v1325_v15 = vmax.f32 %v1283_v63, 0.0 }
 0x316   : > { %v1352_v13 = vpack.c.bf16 %v1325_v15, %v1324_v29  ;;  %v7593_v15 = vpop.permute.xlu2 %6568 }
 0x317   : > { %v6571_v40 = vunpack.i.h.bf16 %v7593_v15 }
 0x318   : > { %6092 = vmatmul.msk.bf16.gmra.mxu0 %vm722_vm2, %v1352_v13  ;;  %1561 = vrot.lane.b32.xlu2 %v7579_v0, %s6901_s16  ;;  %v7602_v13 = vadd.f32 %v7477_v56, %v1453_v23  ;;  %v6551_v23 = vpop.permute.xlu1 %6550 }
 0x319   : > { %2361 = vrot.lane.b32.xlu0 %v7559_v20, %s6903_s19  ;;  %2457 = vrot.lane.b32.xlu1 %v7559_v20, %s6900_s15  ;;  %v1285_v35 = vpop.f32.mrf.mxu3 }
 0x31a   : > { %v1286_v63 = vadd.f32 %v7316_v60, %v1285_v35  ;;  %10871 = vst [vmem:[#allocation62_spill] sm:$0xff] %v7602_v13 }
 0x31c   : > { %v1326_v32 = vmax.f32 %v1286_v63, 0.0 }
 0x320   : > { %2363 = vrot.lane.b32.xlu2 %v7579_v0, %s6903_s19 }
 0x321   : > { %2459 = vrot.lane.b32.xlu0 %v7579_v0, %s6900_s15  ;;  %2842 = vrot.lane.b32.xlu1 %v7559_v20, %s6902_s18  ;;  %v1287_v11 = vpop.f32.mrf.mxu3 }
 0x322   : > { %v1288_v43 = vadd.f32 %v7316_v60, %v1287_v11  ;;  %v7611_v11 = vpop.permute.xlu2 %6597 }
 0x323   : > { %10872 = vst [vmem:[#allocation63_spill] sm:$0xff] %v7611_v11 }
 0x324   : > { %v1327_v29 = vmax.f32 %v1288_v43, 0.0 }
 0x326   : > { %v1353_v35 = vpack.c.bf16 %v1327_v29, %v1326_v32  ;;  %v3800_v32 = vmul.f32 %v6459_v58, %v7579_v0 }
 0x328   : > { %6093 = vmatmul.msk.bf16.gmra.mxu0 %vm722_vm2, %v1353_v35  ;;  %1563 = vrot.lane.b32.xlu2 %v7602_v13, %s6901_s16  ;;  %v6552_v35 = vunpack.i.l.bf16 %v6551_v23 }
 0x329   : > { %2844 = vrot.lane.b32.xlu0 %v7579_v0, %s6902_s18  ;;  %3866 = vrot.lane.b32.xlu1 %v3799_v31, %s6901_s16  ;;  %v1290_v63 = vpop.f32.mrf.mxu3 }
 0x32a   : > { %v1291_v43 = vadd.f32 %v7316_v60, %v1290_v63  ;;  %v7622_v53 = vpop.permute.xlu2 %6603  ;;  %v4600_v58 = vmul.f32 %v6552_v35, %v7579_v0 }
 0x32b   : > { %10873 = vst [vmem:[#allocation64_spill] sm:$0xff] %v7622_v53 }
 0x32c   : > { %v1328_v31 = vmax.f32 %v1291_v43, 0.0 }
 0x330   : > { %2461 = vrot.lane.b32.xlu2 %v7602_v13, %s6900_s15 }
 0x331   : > { %3868 = vrot.lane.b32.xlu0 %v3800_v32, %s6901_s16  ;;  %2940 = vrot.lane.b32.xlu1 %v7579_v0, %s6899_s14  ;;  %v1292_v29 = vpop.f32.mrf.mxu3  ;;  %v6553_v32 = vunpack.i.h.bf16 %v6551_v23 }
 0x332   : > { %v1293_v48 = vadd.f32 %v7316_v60, %v1292_v29  ;;  %v6460_v29 = vunpack.i.h.bf16 %v7468_v34 }
 0x333   : > { %v4601_v35 = vmul.f32 %v6553_v32, %v7602_v13 }
 0x334   : > { %v1329_v10 = vmax.f32 %v1293_v48, 0.0  ;;  %v1456_v48 = vpop.f32.mrf.mxu0 }
 0x336   : > { %v1354_v63 = vpack.c.bf16 %v1329_v10, %v1328_v31  ;;  %v3801_v10 = vmul.f32 %v6460_v29, %v7602_v13  ;;  %v7634_v31 = vpop.permute.xlu2 %6615 }
 0x337   : > { %10874 = vst [vmem:[#allocation65_spill] sm:$0xff] %v7634_v31 }
 0x338   : > { %6094 = vmatmul.msk.bf16.gmra.mxu0 %vm722_vm2, %v1354_v63  ;;  %2846 = vrot.lane.b32.xlu2 %v7602_v13, %s6902_s18 }
 0x339   : > { %2942 = vrot.lane.b32.xlu0 %v7602_v13, %s6899_s14  ;;  %4668 = vrot.lane.b32.xlu1 %v4600_v58, %s6901_s16  ;;  %v1295_v43 = vpop.f32.mrf.mxu3 }
 0x33a   : > { %v1296_v54 = vadd.f32 %v7316_v60, %v1295_v43  ;;  %v7643_v43 = vadd.f32 %v7477_v56, %v1456_v48 }
 0x33c   : > { %v1330_v23 = vmax.f32 %v1296_v54, 0.0  ;;  %10875 = vst [vmem:[#allocation66_spill] sm:$0xff] %v7643_v43  ;;  %v1458_v24 = vpop.f32.mrf.mxu0  ;;  %v7655_v54 = vpop.permute.xlu1 %6574 }
 0x33d   : > { %10877 = vst [vmem:[#allocation68_spill] sm:$0xff] %v7655_v54 }
 0x33e   : > { %v7648_v32 = vpop.permute.xlu2 %6626 }
 0x33f   : > { %10876 = vst [vmem:[#allocation67_spill] sm:$0xff] %v7648_v32 }
 0x340   : > { %3870 = vrot.lane.b32.xlu2 %v3801_v10, %s6901_s16 }
 0x341   : > { %4670 = vrot.lane.b32.xlu0 %v4601_v35, %s6901_s16  ;;  %2365 = vrot.lane.b32.xlu1 %v7602_v13, %s6903_s19  ;;  %v1297_v63 = vpop.f32.mrf.mxu3 }
 0x342   : > { %v1298_v34 = vadd.f32 %v7316_v60, %v1297_v63  ;;  %v6570_v60 = vunpack.i.l.bf16 %v7593_v15  ;;  %v6464_v63 = vunpack.i.l.bf16 %v7493_v28 }
 0x344   : > { %v1331_v58 = vmax.f32 %v1298_v34, 0.0  ;;  %v4602_v48 = vmul.f32 %v6570_v60, %v7643_v43  ;;  %v7665_v35 = vpop.permute.xlu1 %6580  ;;  %v3802_v34 = vmul.f32 %v6464_v63, %v7643_v43 }
 0x345   : > { %10879 = vst [vmem:[#allocation70_spill] sm:$0xff] %v7665_v35 }
 0x346   : > { %v1355_v29 = vpack.c.bf16 %v1331_v58, %v1330_v23  ;;  %v7663_v10 = vpop.permute.xlu2 %6632  ;;  %v7669_v23 = vadd.f32 %v7477_v56, %v1458_v24  ;;  %v1461_v58 = vpop.f32.mrf.mxu0  ;;  %v6465_v24 = vunpack.i.h.bf16 %v7493_v28 }
 0x347   : > { %10878 = vst [vmem:[#allocation69_spill] sm:$0xff] %v7663_v10  ;;  %v7680_v60 = vadd.f32 %v7477_v56, %v1461_v58 }
 0x348   : > { %6095 = vmatmul.msk.bf16.gmra.mxu0 %vm722_vm2, %v1355_v29  ;;  %2944 = vrot.lane.b32.xlu2 %v7643_v43, %s6899_s14  ;;  %10880 = vst [vmem:[#allocation71_spill] sm:$0xff] %v7669_v23  ;;  %v3803_v58 = vmul.f32 %v6465_v24, %v7669_v23  ;;  %v4603_v55 = vmul.f32 %v6571_v40, %v7669_v23  ;;  %v6469_v24 = vunpack.i.l.bf16 %v7481_v12  ;;  %v7717_v40 = vpop.permute.xlu0 %6591 }
 0x349   : > { %1565 = vrot.lane.b32.xlu0 %v7643_v43, %s6901_s16  ;;  %2463 = vrot.lane.b32.xlu1 %v7643_v43, %s6900_s15  ;;  %10882 = vst [vmem:[#allocation73_spill] sm:$0xff] %v7680_v60 }
 0x34a   : > { %v3804_v15 = vmul.f32 %v6469_v24, %v7680_v60  ;;  %10886 = vst [vmem:[#allocation77_spill] sm:$0xff] %v7717_v40  ;;  %v4604_v24 = vmul.f32 %v6587_v16, %v7680_v60 }
 0x34e   : > { %v7677_v29 = vpop.permute.xlu2 %6643 }
 0x34f   : > { %10881 = vst [vmem:[#allocation72_spill] sm:$0xff] %v7677_v29 }
 0x350   : > { %4672 = vrot.lane.b32.xlu2 %v4602_v48, %s6901_s16  ;;  %v7682_v48 = vpop.permute.xlu1 %6609 }
 0x351   : > { %2367 = vrot.lane.b32.xlu0 %v7643_v43, %s6903_s19  ;;  %2848 = vrot.lane.b32.xlu1 %v7643_v43, %s6902_s18 }
 0x358   : > { %2369 = vrot.lane.b32.xlu2 %v7669_v23, %s6903_s19  ;;  %v7691_v63 = vpop.permute.xlu1 %2451 }
 0x359   : > { %2465 = vrot.lane.b32.xlu0 %v7669_v23, %s6900_s15  ;;  %3872 = vrot.lane.b32.xlu1 %v3802_v34, %s6901_s16  ;;  %v7693_v34 = vpop.permute.xlu2 %6653 }
 0x35a   : > { %10883 = vst [vmem:[#allocation74_spill] sm:$0xff] %v7693_v34 }
 0x360   : > { %1569 = vrot.lane.b32.xlu2 %v7680_v60, %s6901_s16  ;;  %v7703_v28 = vpop.permute.xlu1 %2836 }
 0x361   : > { %2850 = vrot.lane.b32.xlu0 %v7669_v23, %s6902_s18  ;;  %1567 = vrot.lane.b32.xlu1 %v7669_v23, %s6901_s16  ;;  %v7707_v39 = vpop.permute.xlu2 %6659 }
 0x362   : > { %10884 = vst [vmem:[#allocation75_spill] sm:$0xff] %v7707_v39 }
 0x368   : > { %2467 = vrot.lane.b32.xlu2 %v7680_v60, %s6900_s15  ;;  %v7724_v4 = vpop.permute.xlu1 %3860 }
 0x369   : > { %3874 = vrot.lane.b32.xlu0 %v3803_v58, %s6901_s16  ;;  %2946 = vrot.lane.b32.xlu1 %v7669_v23, %s6899_s14  ;;  %v1463_v58 = vpop.f32.mrf.mxu0  ;;  %10887 = vst [vmem:[#allocation78_spill] sm:$0xff] %v7724_v4 }
 0x36a   : > { %v7715_v22 = vadd.f32 %v7477_v56, %v1463_v58  ;;  %v7730_v58 = vpop.permute.xlu0 %6620 }
 0x36b   : > { %10888 = vst [vmem:[#allocation79_spill] sm:$0xff] %v7730_v58 }
 0x36c   : > { %10885 = vst [vmem:[#allocation76_spill] sm:$0xff] %v7715_v22 }
 0x370   : > { %2852 = vrot.lane.b32.xlu2 %v7680_v60, %s6902_s18  ;;  %v7736_v9 = vpop.permute.xlu1 %2934 }
 0x371   : > { %2948 = vrot.lane.b32.xlu0 %v7680_v60, %s6899_s14  ;;  %4674 = vrot.lane.b32.xlu1 %v4603_v55, %s6901_s16  ;;  %v7726_v55 = vpop.permute.xlu2 %2932  ;;  %10889 = vst [vmem:[#allocation80_spill] sm:$0xff] %v7736_v9 }
 0x372   : > { %v7749_v16 = vpop.permute.xlu0 %6637 }
 0x373   : > { %10892 = vst [vmem:[#allocation83_spill] sm:$0xff] %v7749_v16 }
 0x378   : > { %3876 = vrot.lane.b32.xlu2 %v3804_v15, %s6901_s16  ;;  %v1466_v15 = vpop.f32.mrf.mxu0  ;;  %v7751_v19 = vpop.permute.xlu1 %4662 }
 0x379   : > { %1571 = vrot.lane.b32.xlu0 %v7715_v22, %s6901_s16  ;;  %2371 = vrot.lane.b32.xlu1 %v7680_v60, %s6903_s19  ;;  %v7738_v6 = vpop.permute.xlu2 %4660  ;;  %v7741_v36 = vadd.f32 %v7477_v56, %v1466_v15  ;;  %10893 = vst [vmem:[#allocation84_spill] sm:$0xff] %v7751_v19  ;;  %v6611_v15 = vunpack.i.l.bf16 %v7682_v48 }
 0x37a   : > { %10890 = vst [vmem:[#allocation81_spill] sm:$0xff] %v7738_v6  ;;  %v7762_v2 = vpop.permute.xlu0 %6648 }
 0x37b   : > { %10891 = vst [vmem:[#allocation82_spill] sm:$0xff] %v7741_v36 }
 0x37c   : > { %10895 = vst [vmem:[#allocation86_spill] sm:$0xff] %v7762_v2 }
 0x380   : > { %4676 = vrot.lane.b32.xlu2 %v4604_v24, %s6901_s16  ;;  %v6588_v24 = vunpack.i.h.bf16 %v6586_v27  ;;  %v1468_v33 = vpop.f32.mrf.mxu0  ;;  %v4606_v27 = vmul.f32 %v6611_v15, %v7741_v36  ;;  %v7768_v34 = vpop.permute.xlu1 %1557 }
 0x381   : > { %2373 = vrot.lane.b32.xlu0 %v7715_v22, %s6903_s19  ;;  %2469 = vrot.lane.b32.xlu1 %v7715_v22, %s6900_s15  ;;  %v7753_v39 = vpop.permute.xlu2 %2357  ;;  %v7766_v31 = vadd.f32 %v7477_v56, %v1468_v33  ;;  %v1651_v53 = vmul.f32 %v7768_v34, %v7521_v52 }
 0x382   : > { %10894 = vst [vmem:[#allocation85_spill] sm:$0xff] %v7753_v39  ;;  %v4605_v62 = vmul.f32 %v6588_v24, %v7715_v22  ;;  %v1554_v15 = vpop.permute.xlu0 %1553 }
 0x383   : > { %10896 = vst [vmem:[#allocation87_spill] sm:$0xff] %v7766_v31  ;;  %v1649_v44 = vmul.f32 %v1554_v15, %v7484_v57 }
 0x388   : > { %2950 = vrot.lane.b32.xlu2 %v7715_v22, %s6899_s14  ;;  %v7786_v33 = vpop.permute.xlu1 %2359 }
 0x389   : > { %2471 = vrot.lane.b32.xlu0 %v7741_v36, %s6900_s15  ;;  %2854 = vrot.lane.b32.xlu1 %v7715_v22, %s6902_s18  ;;  %v7771_v24 = vpop.permute.xlu2 %2455 }
 0x38a   : > { %v7792_v46 = vpop.permute.xlu0 %2355 }
 0x390   : > { %2375 = vrot.lane.b32.xlu2 %v7741_v36, %s6903_s19  ;;  %v7799_v51 = vpop.permute.xlu1 %1559 }
 0x391   : > { %2856 = vrot.lane.b32.xlu0 %v7741_v36, %s6902_s18  ;;  %4678 = vrot.lane.b32.xlu1 %v4605_v62, %s6901_s16  ;;  %v1471_v62 = vpop.f32.mrf.mxu0 }
 0x392   : > { %v7778_v2 = vadd.f32 %v7477_v56, %v1471_v62  ;;  %v6612_v62 = vunpack.i.h.bf16 %v7682_v48  ;;  %v1556_v42 = vpop.permute.xlu0 %1555 }
 0x393   : > { %v1650_v32 = vmul.f32 %v1556_v42, %v7507_v26 }
 0x394   : > { %10897 = vst [vmem:[#allocation88_spill] sm:$0xff] %v7778_v2  ;;  %v4607_v1 = vmul.f32 %v6612_v62, %v7766_v31 }
 0x398   : > { %4680 = vrot.lane.b32.xlu2 %v4606_v27, %s6901_s16  ;;  %v7788_v27 = vpop.permute.xlu2 %2840  ;;  %v7812_v48 = vpop.permute.xlu1 %2457 }
 0x399   : > { %2954 = vrot.lane.b32.xlu0 %v7766_v31, %s6899_s14  ;;  %1573 = vrot.lane.b32.xlu1 %v7741_v36, %s6901_s16  ;;  %v1473_v11 = vpop.f32.mrf.mxu0  ;;  %10900 = vst [vmem:[#allocation91_spill] sm:$0xff] %v7812_v48 }
 0x39a   : > { %v7804_v41 = vadd.f32 %v7477_v56, %v1473_v11  ;;  %v7822_v62 = vpop.permute.xlu0 %2453 }
 0x39b   : > { %10902 = vst [vmem:[#allocation93_spill] sm:$0xff] %v7822_v62 }
 0x39c   : > { %10899 = vst [vmem:[#allocation90_spill] sm:$0xff] %v7804_v41 }
 0x3a0   : > { %1575 = vrot.lane.b32.xlu2 %v7766_v31, %s6901_s16  ;;  %v7801_v4 = vpop.permute.xlu2 %3864 }
 0x3a1   : > { %1577 = vrot.lane.b32.xlu0 %v7778_v2, %s6901_s16  ;;  %2952 = vrot.lane.b32.xlu1 %v7741_v36, %s6899_s14  ;;  %10898 = vst [vmem:[#allocation89_spill] sm:$0xff] %v7801_v4  ;;  %v1476_v11 = vpop.f32.mrf.mxu0 }
 0x3a2   : > { %v7825_v4 = vadd.f32 %v7477_v56, %v1476_v11  ;;  %v7840_v10 = vpop.permute.xlu0 %2838 }
 0x3a3   : > { %10907 = vst [vmem:[#allocation98_spill] sm:$0xff] %v7840_v10 }
 0x3a4   : > { %10903 = vst [vmem:[#allocation94_spill] sm:$0xff] %v7825_v4 }
 0x3a8   : > { %2473 = vrot.lane.b32.xlu2 %v7766_v31, %s6900_s15  ;;  %v7814_v54 = vpop.permute.xlu2 %2938 }
 0x3a9   : > { %2379 = vrot.lane.b32.xlu0 %v7778_v2, %s6903_s19  ;;  %2377 = vrot.lane.b32.xlu1 %v7766_v31, %s6903_s19  ;;  %10901 = vst [vmem:[#allocation92_spill] sm:$0xff] %v7814_v54  ;;  %v1478_v25 = vpop.f32.mrf.mxu0 }
 0x3aa   : > { %v7838_v47 = vadd.f32 %v7477_v56, %v1478_v25  ;;  %v7852_v12 = vpop.permute.xlu0 %3862 }
 0x3ab   : > { %10909 = vst [vmem:[#allocation100_spill] sm:$0xff] %v7852_v12 }
 0x3ac   : > { %10906 = vst [vmem:[#allocation97_spill] sm:$0xff] %v7838_v47 }
 0x3b0   : > { %2858 = vrot.lane.b32.xlu2 %v7766_v31, %s6902_s18  ;;  %v7831_v29 = vpop.permute.xlu2 %4666 }
 0x3b1   : > { %2477 = vrot.lane.b32.xlu0 %v7804_v41, %s6900_s15  ;;  %4682 = vrot.lane.b32.xlu1 %v4607_v1, %s6901_s16  ;;  %v7827_v1 = vpop.permute.xlu1 %2842  ;;  %10905 = vst [vmem:[#allocation96_spill] sm:$0xff] %v7831_v29  ;;  %v1481_v12 = vpop.f32.mrf.mxu0 }
 0x3b2   : > { %10904 = vst [vmem:[#allocation95_spill] sm:$0xff] %v7827_v1  ;;  %v7874_v16 = vadd.f32 %v7477_v56, %v1481_v12 }
 0x3b4   : > { %10913 = vst [vmem:[#allocation104_spill] sm:$0xff] %v7874_v16 }
 0x3b8   : > { %2956 = vrot.lane.b32.xlu2 %v7778_v2, %s6899_s14  ;;  %v1562_v29 = vpop.permute.xlu2 %1561 }
 0x3b9   : > { %2862 = vrot.lane.b32.xlu0 %v7804_v41, %s6902_s18  ;;  %2475 = vrot.lane.b32.xlu1 %v7778_v2, %s6900_s15  ;;  %v7848_v11 = vpop.permute.xlu1 %3866  ;;  %v1653_v58 = vmul.f32 %v1562_v29, %v7579_v0 }
 0x3ba   : > { %10908 = vst [vmem:[#allocation99_spill] sm:$0xff] %v7848_v11  ;;  %v7868_v11 = vpop.permute.xlu0 %2936 }
 0x3c0   : > { %2381 = vrot.lane.b32.xlu2 %v7804_v41, %s6903_s19  ;;  %v7860_v17 = vpop.permute.xlu2 %2363 }
 0x3c1   : > { %2960 = vrot.lane.b32.xlu0 %v7825_v4, %s6899_s14  ;;  %2860 = vrot.lane.b32.xlu1 %v7778_v2, %s6902_s18  ;;  %v7858_v25 = vpop.permute.xlu1 %2940  ;;  %10911 = vst [vmem:[#allocation102_spill] sm:$0xff] %v7860_v17 }
 0x3c2   : > { %10910 = vst [vmem:[#allocation101_spill] sm:$0xff] %v7858_v25 }
 0x3c8   : > { %1581 = vrot.lane.b32.xlu2 %v7825_v4, %s6901_s16  ;;  %v7876_v42 = vpop.permute.xlu2 %1563 }
 0x3c9   : > { %1583 = vrot.lane.b32.xlu0 %v7838_v47, %s6901_s16  ;;  %1579 = vrot.lane.b32.xlu1 %v7804_v41, %s6901_s16  ;;  %v7871_v38 = vpop.permute.xlu1 %4668 }
 0x3ca   : > { %10912 = vst [vmem:[#allocation103_spill] sm:$0xff] %v7871_v38 }
 0x3d0   : > { %2479 = vrot.lane.b32.xlu2 %v7825_v4, %s6900_s15  ;;  %v7889_v15 = vpop.permute.xlu2 %2461 }
 0x3d1   : > { %2385 = vrot.lane.b32.xlu0 %v7838_v47, %s6903_s19  ;;  %2958 = vrot.lane.b32.xlu1 %v7804_v41, %s6899_s14  ;;  %v7885_v8 = vpop.permute.xlu1 %2365 }
 0x3d8   : > { %2864 = vrot.lane.b32.xlu2 %v7825_v4, %s6902_s18  ;;  %v7908_v7 = vpop.permute.xlu2 %2846 }
 0x3d9   : > { %1715 = vrot.lane.b32.xlu0 %v1650_v32, %s6904_s20  ;;  %2383 = vrot.lane.b32.xlu1 %v7825_v4, %s6903_s19  ;;  %v7883_v32 = vpop.permute.xlu0 %4664 }
 0x3da   : > { %10914 = vst [vmem:[#allocation105_spill] sm:$0xff] %v7883_v32  ;;  %v7906_v32 = vpop.permute.xlu1 %2463 }
 0x3db   : > { %10917 = vst [vmem:[#allocation108_spill] sm:$0xff] %v7906_v32 }
 0x3e0   : > { %1713 = vrot.lane.b32.xlu2 %v1649_v44, %s6904_s20  ;;  %v1483_v44 = vpop.f32.mrf.mxu0  ;;  %v7923_v3 = vpop.permute.xlu2 %3870 }
 0x3e1   : > { %2483 = vrot.lane.b32.xlu0 %v7874_v16, %s6900_s15  ;;  %2481 = vrot.lane.b32.xlu1 %v7838_v47, %s6900_s15  ;;  %v7896_v12 = vadd.f32 %v7477_v56, %v1483_v44  ;;  %v7898_v38 = vpop.permute.xlu0 %2361  ;;  %10921 = vst [vmem:[#allocation112_spill] sm:$0xff] %v7923_v3 }
 0x3e2   : > { %10916 = vst [vmem:[#allocation107_spill] sm:$0xff] %v7898_v38  ;;  %v7921_v59 = vpop.permute.xlu1 %2848 }
 0x3e3   : > { %10915 = vst [vmem:[#allocation106_spill] sm:$0xff] %v7896_v12 }
 0x3e4   : > { %10920 = vst [vmem:[#allocation111_spill] sm:$0xff] %v7921_v59 }
 0x3e8   : > { %2962 = vrot.lane.b32.xlu2 %v7838_v47, %s6899_s14  ;;  %v1486_v6 = vpop.f32.mrf.mxu0  ;;  %v7937_v61 = vpop.permute.xlu2 %2944 }
 0x3e9   : > { %2868 = vrot.lane.b32.xlu0 %v7874_v16, %s6902_s18  ;;  %2866 = vrot.lane.b32.xlu1 %v7838_v47, %s6902_s18  ;;  %v7911_v19 = vadd.f32 %v7477_v56, %v1486_v6  ;;  %v7915_v44 = vpop.permute.xlu0 %2459  ;;  %10924 = vst [vmem:[#allocation115_spill] sm:$0xff] %v7937_v61 }
 0x3ea   : > { %10919 = vst [vmem:[#allocation110_spill] sm:$0xff] %v7915_v44  ;;  %v7934_v37 = vpop.permute.xlu1 %3872  ;;  %v1654_v44 = vmul.f32 %v7876_v42, %v7602_v13 }
 0x3eb   : > { %10918 = vst [vmem:[#allocation109_spill] sm:$0xff] %v7911_v19 }
 0x3ec   : > { %10923 = vst [vmem:[#allocation114_spill] sm:$0xff] %v7934_v37 }
 0x3f0   : > { %2387 = vrot.lane.b32.xlu2 %v7874_v16, %s6903_s19  ;;  %v1488_v34 = vpop.f32.mrf.mxu0  ;;  %v7952_v21 = vpop.permute.xlu2 %4672 }
 0x3f1   : > { %2966 = vrot.lane.b32.xlu0 %v7896_v12, %s6899_s14  ;;  %1585 = vrot.lane.b32.xlu1 %v7874_v16, %s6901_s16  ;;  %v7932_v6 = vpop.permute.xlu0 %2844  ;;  %v7949_v37 = vadd.f32 %v7477_v56, %v1488_v34  ;;  %10927 = vst [vmem:[#allocation118_spill] sm:$0xff] %v7952_v21 }
 0x3f2   : > { %10922 = vst [vmem:[#allocation113_spill] sm:$0xff] %v7932_v6  ;;  %v1568_v29 = vpop.permute.xlu1 %1567 }
 0x3f3   : > { %10926 = vst [vmem:[#allocation117_spill] sm:$0xff] %v7949_v37  ;;  %v1656_v6 = vmul.f32 %v1568_v29, %v7669_v23 }
 0x3f8   : > { %1587 = vrot.lane.b32.xlu2 %v7896_v12, %s6901_s16 }
 0x3f9   : > { %1589 = vrot.lane.b32.xlu0 %v7911_v19, %s6901_s16  ;;  %2964 = vrot.lane.b32.xlu1 %v7874_v16, %s6899_s14  ;;  %v7944_v3 = vpop.permute.xlu0 %3868 }
 0x3fa   : > { %10925 = vst [vmem:[#allocation116_spill] sm:$0xff] %v7944_v3  ;;  %v7966_v34 = vpop.permute.xlu1 %2946 }
 0x3fb   : > { %10928 = vst [vmem:[#allocation119_spill] sm:$0xff] %v7966_v34 }
 0x400   : > { %2485 = vrot.lane.b32.xlu2 %v7896_v12, %s6900_s15 }
 0x401   : > { %2391 = vrot.lane.b32.xlu0 %v7911_v19, %s6903_s19  ;;  %1717 = vrot.lane.b32.xlu1 %v1651_v53, %s6904_s20  ;;  %v1652_v53 = vmul.f32 %v7799_v51, %v7559_v20  ;;  %v1491_v51 = vpop.f32.mrf.mxu0 }
 0x402   : > { %v7971_v3 = vadd.f32 %v7477_v56, %v1491_v51  ;;  %v7981_v61 = vpop.permute.xlu1 %4674 }
 0x403   : > { %10932 = vst [vmem:[#allocation123_spill] sm:$0xff] %v7981_v61 }
 0x404   : > { %10930 = vst [vmem:[#allocation121_spill] sm:$0xff] %v7971_v3 }
 0x408   : > { %2870 = vrot.lane.b32.xlu2 %v7896_v12, %s6902_s18 }
 0x409   : > { %1721 = vrot.lane.b32.xlu0 %v1653_v58, %s6904_s20  ;;  %2389 = vrot.lane.b32.xlu1 %v7896_v12, %s6903_s19  ;;  %v7958_v58 = vpop.permute.xlu0 %2942  ;;  %v1493_v59 = vpop.f32.mrf.mxu0 }
 0x40a   : > { %v7984_v17 = vadd.f32 %v7477_v56, %v1493_v59 }
 0x40c   : > { %10933 = vst [vmem:[#allocation124_spill] sm:$0xff] %v7984_v17 }
 0x410   : > { %1719 = vrot.lane.b32.xlu2 %v1652_v53, %s6904_s20  ;;  %v7968_v53 = vpop.permute.xlu2 %2369 }
 0x411   : > { %2489 = vrot.lane.b32.xlu0 %v7949_v37, %s6900_s15  ;;  %2487 = vrot.lane.b32.xlu1 %v7911_v19, %s6900_s15  ;;  %10929 = vst [vmem:[#allocation120_spill] sm:$0xff] %v7968_v53  ;;  %v7975_v21 = vpop.permute.xlu0 %4670  ;;  %v1496_v49 = vpop.f32.mrf.mxu0 }
 0x412   : > { %10931 = vst [vmem:[#allocation122_spill] sm:$0xff] %v7975_v21  ;;  %v7992_v21 = vpop.permute.xlu1 %2371 }
 0x413   : > { %10934 = vst [vmem:[#allocation125_spill] sm:$0xff] %v7992_v21 }
 0x418   : > { %2968 = vrot.lane.b32.xlu2 %v7911_v19, %s6899_s14  ;;  %v1570_v32 = vpop.permute.xlu2 %1569 }
 0x419   : > { %2874 = vrot.lane.b32.xlu0 %v7949_v37, %s6902_s18  ;;  %2872 = vrot.lane.b32.xlu1 %v7911_v19, %s6902_s18  ;;  %v1566_v51 = vpop.permute.xlu0 %1565 }
 0x41a   : > { %v8006_v25 = vpop.permute.xlu1 %2469  ;;  %v1655_v35 = vmul.f32 %v1566_v51, %v7643_v43 }
 0x41b   : > { %10937 = vst [vmem:[#allocation128_spill] sm:$0xff] %v8006_v25 }
 0x420   : > { %2393 = vrot.lane.b32.xlu2 %v7949_v37, %s6903_s19  ;;  %v7996_v61 = vpop.permute.xlu2 %2467 }
 0x421   : > { %2972 = vrot.lane.b32.xlu0 %v7971_v3, %s6899_s14  ;;  %1591 = vrot.lane.b32.xlu1 %v7949_v37, %s6901_s16  ;;  %10935 = vst [vmem:[#allocation126_spill] sm:$0xff] %v7996_v61  ;;  %v8003_v59 = vpop.permute.xlu0 %2367 }
 0x422   : > { %10936 = vst [vmem:[#allocation127_spill] sm:$0xff] %v8003_v59  ;;  %v8026_v29 = vpop.permute.xlu1 %2854 }
 0x423   : > { %10941 = vst [vmem:[#allocation132_spill] sm:$0xff] %v8026_v29 }
 0x428   : > { %1593 = vrot.lane.b32.xlu2 %v7971_v3, %s6901_s16  ;;  %v8010_v42 = vpop.permute.xlu2 %2852 }
 0x429   : > { %1595 = vrot.lane.b32.xlu0 %v7984_v17, %s6901_s16  ;;  %2970 = vrot.lane.b32.xlu1 %v7949_v37, %s6899_s14  ;;  %10938 = vst [vmem:[#allocation129_spill] sm:$0xff] %v8010_v42  ;;  %v8019_v59 = vpop.permute.xlu0 %2465 }
 0x42a   : > { %10940 = vst [vmem:[#allocation131_spill] sm:$0xff] %v8019_v59 }
 0x430   : > { %2491 = vrot.lane.b32.xlu2 %v7971_v3, %s6900_s15  ;;  %v8028_v25 = vpop.permute.xlu2 %3876 }
 0x431   : > { %2397 = vrot.lane.b32.xlu0 %v7984_v17, %s6903_s19  ;;  %1723 = vrot.lane.b32.xlu1 %v1654_v44, %s6904_s20  ;;  %v8017_v44 = vadd.f32 %v7477_v56, %v1496_v49  ;;  %10942 = vst [vmem:[#allocation133_spill] sm:$0xff] %v8028_v25  ;;  %v1498_v49 = vpop.f32.mrf.mxu0 }
 0x432   : > { %v8043_v29 = vadd.f32 %v7477_v56, %v1498_v49 }
 0x433   : > { %10939 = vst [vmem:[#allocation130_spill] sm:$0xff] %v8017_v44 }
 0x434   : > { %10946 = vst [vmem:[#allocation137_spill] sm:$0xff] %v8043_v29 }
 0x438   : > { %2876 = vrot.lane.b32.xlu2 %v7971_v3, %s6902_s18  ;;  %v8040_v51 = vpop.permute.xlu2 %4676 }
 0x439   : > { %2395 = vrot.lane.b32.xlu1 %v7971_v3, %s6903_s19  ;;  %1727 = vrot.lane.b32.xlu0 %v1656_v6, %s6904_s20  ;;  %v8032_v6 = vpop.permute.xlu0 %2850  ;;  %10945 = vst [vmem:[#allocation136_spill] sm:$0xff] %v8040_v51  ;;  %v1501_v5 = vpop.f32.mrf.mxu0 }
 0x43a   : > { %10943 = vst [vmem:[#allocation134_spill] sm:$0xff] %v8032_v6 }
 0x440   : > { %1725 = vrot.lane.b32.xlu2 %v1655_v35, %s6904_s20  ;;  %v8038_v35 = vpop.permute.xlu1 %4678  ;;  %v8056_v51 = vpop.permute.xlu2 %2950 }
 0x441   : > { %2493 = vrot.lane.b32.xlu1 %v7984_v17, %s6900_s15  ;;  %2495 = vrot.lane.b32.xlu0 %v8017_v44, %s6900_s15  ;;  %10944 = vst [vmem:[#allocation135_spill] sm:$0xff] %v8038_v35  ;;  %v8051_v25 = vpop.permute.xlu0 %3874  ;;  %v8054_v35 = vadd.f32 %v7477_v56, %v1501_v5 }
 0x442   : > { %10947 = vst [vmem:[#allocation138_spill] sm:$0xff] %v8051_v25  ;;  %v1657_v25 = vmul.f32 %v1570_v32, %v7680_v60 }
 0x443   : > { %10948 = vst [vmem:[#allocation139_spill] sm:$0xff] %v8054_v35 }
 0x444   : > { %10949 = vst [vmem:[#allocation140_spill] sm:$0xff] %v8056_v51 }
 0x448   : > { %2974 = vrot.lane.b32.xlu2 %v7984_v17, %s6899_s14  ;;  %v1574_v21 = vpop.permute.xlu1 %1573  ;;  %v8071_v5 = vpop.permute.xlu2 %2375 }
 0x449   : > { %2878 = vrot.lane.b32.xlu1 %v7984_v17, %s6902_s18  ;;  %2880 = vrot.lane.b32.xlu0 %v8017_v44, %s6902_s18  ;;  %v8064_v49 = vpop.permute.xlu0 %2948  ;;  %10952 = vst [vmem:[#allocation143_spill] sm:$0xff] %v8071_v5  ;;  %v1659_v42 = vmul.f32 %v1574_v21, %v7741_v36  ;;  %v1503_v5 = vpop.f32.mrf.mxu0 }
 0x44a   : > { %10950 = vst [vmem:[#allocation141_spill] sm:$0xff] %v8064_v49  ;;  %v8088_v49 = vadd.f32 %v7477_v56, %v1503_v5 }
 0x44c   : > { %10955 = vst [vmem:[#allocation146_spill] sm:$0xff] %v8088_v49 }
 0x450   : > { %2399 = vrot.lane.b32.xlu2 %v8017_v44, %s6903_s19  ;;  %v8067_v61 = vpop.permute.xlu1 %2952 }
 0x451   : > { %1597 = vrot.lane.b32.xlu1 %v8017_v44, %s6901_s16  ;;  %2978 = vrot.lane.b32.xlu0 %v8043_v29, %s6899_s14  ;;  %10951 = vst [vmem:[#allocation142_spill] sm:$0xff] %v8067_v61  ;;  %v1572_v51 = vpop.permute.xlu0 %1571  ;;  %v8084_v61 = vpop.permute.xlu2 %4680 }
 0x452   : > { %10954 = vst [vmem:[#allocation145_spill] sm:$0xff] %v8084_v61 }
 0x458   : > { %1599 = vrot.lane.b32.xlu2 %v8043_v29, %s6901_s16  ;;  %v8082_v32 = vpop.permute.xlu1 %2377 }
 0x459   : > { %2976 = vrot.lane.b32.xlu1 %v8017_v44, %s6899_s14  ;;  %1601 = vrot.lane.b32.xlu0 %v8054_v35, %s6901_s16  ;;  %10953 = vst [vmem:[#allocation144_spill] sm:$0xff] %v8082_v32  ;;  %v8091_v21 = vpop.permute.xlu0 %2373  ;;  %v1576_v32 = vpop.permute.xlu2 %1575 }
 0x45a   : > { %10956 = vst [vmem:[#allocation147_spill] sm:$0xff] %v8091_v21 }
 0x460   : > { %2497 = vrot.lane.b32.xlu2 %v8043_v29, %s6900_s15 }
 0x461   : > { %1729 = vrot.lane.b32.xlu1 %v1657_v25, %s6904_s20  ;;  %2403 = vrot.lane.b32.xlu0 %v8054_v35, %s6903_s19  ;;  %v1658_v25 = vmul.f32 %v1572_v51, %v7715_v22  ;;  %v1506_v51 = vpop.f32.mrf.mxu0  ;;  %v8105_v5 = vpop.permute.xlu0 %2471 }
 0x462   : > { %10958 = vst [vmem:[#allocation149_spill] sm:$0xff] %v8105_v5  ;;  %v8110_v61 = vadd.f32 %v7477_v56, %v1506_v51  ;;  %v8112_v21 = vpop.permute.xlu2 %2473 }
 0x463   : > { %10961 = vst [vmem:[#allocation152_spill] sm:$0xff] %v8112_v21  ;;  %v1660_v21 = vmul.f32 %v1576_v32, %v7766_v31 }
 0x464   : > { %10960 = vst [vmem:[#allocation151_spill] sm:$0xff] %v8110_v61 }
 0x468   : > { %2882 = vrot.lane.b32.xlu2 %v8043_v29, %s6902_s18 }
 0x469   : > { %2401 = vrot.lane.b32.xlu1 %v8043_v29, %s6903_s19  ;;  %1733 = vrot.lane.b32.xlu0 %v1659_v42, %s6904_s20  ;;  %v8097_v42 = vpop.permute.xlu1 %4682  ;;  %v8120_v1 = vpop.permute.xlu0 %2856 }
 0x46a   : > { %10957 = vst [vmem:[#allocation148_spill] sm:$0xff] %v8097_v42  ;;  %v1508_v42 = vpop.f32.mrf.mxu0  ;;  %v8129_v51 = vpop.permute.xlu2 %2858 }
 0x46b   : > { %10962 = vst [vmem:[#allocation153_spill] sm:$0xff] %v8120_v1  ;;  %v8123_v5 = vadd.f32 %v7477_v56, %v1508_v42 }
 0x46c   : > { %10965 = vst [vmem:[#allocation156_spill] sm:$0xff] %v8129_v51 }
 0x46d   : > { %10963 = vst [vmem:[#allocation154_spill] sm:$0xff] %v8123_v5 }
 0x470   : > { %1731 = vrot.lane.b32.xlu2 %v1658_v25, %s6904_s20 }
 0x471   : > { %2499 = vrot.lane.b32.xlu1 %v8054_v35, %s6900_s15  ;;  %2501 = vrot.lane.b32.xlu0 %v8088_v49, %s6900_s15  ;;  %v8107_v25 = vpop.permute.xlu1 %2475  ;;  %v8136_v54 = vpop.permute.xlu0 %2954 }
 0x472   : > { %10959 = vst [vmem:[#allocation150_spill] sm:$0xff] %v8107_v25  ;;  %v1511_v32 = vpop.f32.mrf.mxu0 }
 0x473   : > { %10966 = vst [vmem:[#allocation157_spill] sm:$0xff] %v8136_v54 }
 0x478   : > { %2980 = vrot.lane.b32.xlu2 %v8054_v35, %s6899_s14 }
 0x479   : > { %2884 = vrot.lane.b32.xlu1 %v8054_v35, %s6902_s18  ;;  %2886 = vrot.lane.b32.xlu0 %v8088_v49, %s6902_s18  ;;  %v8125_v25 = vpop.permute.xlu1 %2860  ;;  %v1578_v51 = vpop.permute.xlu0 %1577 }
 0x47a   : > { %10964 = vst [vmem:[#allocation155_spill] sm:$0xff] %v8125_v25  ;;  %v8143_v25 = vpop.permute.xlu2 %2956  ;;  %v1661_v38 = vmul.f32 %v1578_v51, %v7778_v2 }
 0x47b   : > { %10967 = vst [vmem:[#allocation158_spill] sm:$0xff] %v8143_v25  ;;  %v8157_v25 = vadd.f32 %v7477_v56, %v1511_v32 }
 0x47d   : > { %10970 = vst [vmem:[#allocation161_spill] sm:$0xff] %v8157_v25 }
 0x480   : > { %2405 = vrot.lane.b32.xlu2 %v8088_v49, %s6903_s19 }
 0x481   : > { %1603 = vrot.lane.b32.xlu1 %v8088_v49, %s6901_s16  ;;  %2984 = vrot.lane.b32.xlu0 %v8110_v61, %s6899_s14  ;;  %v1580_v42 = vpop.permute.xlu1 %1579 }
 0x482   : > { %v1662_v1 = vmul.f32 %v1580_v42, %v7804_v41  ;;  %v8164_v42 = vpop.permute.xlu0 %2379 }
 0x483   : > { %10971 = vst [vmem:[#allocation162_spill] sm:$0xff] %v8164_v42 }
 0x488   : > { %1605 = vrot.lane.b32.xlu2 %v8110_v61, %s6901_s16 }
 0x489   : > { %2982 = vrot.lane.b32.xlu1 %v8088_v49, %s6899_s14  ;;  %1607 = vrot.lane.b32.xlu0 %v8123_v5, %s6901_s16  ;;  %v8151_v54 = vpop.permute.xlu1 %2958 }
 0x48a   : > { %10968 = vst [vmem:[#allocation159_spill] sm:$0xff] %v8151_v54  ;;  %v8174_v51 = vpop.permute.xlu0 %2477 }
 0x48b   : > { %10973 = vst [vmem:[#allocation164_spill] sm:$0xff] %v8174_v51 }
 0x490   : > { %2503 = vrot.lane.b32.xlu2 %v8110_v61, %s6900_s15 }
 0x491   : > { %1735 = vrot.lane.b32.xlu1 %v1660_v21, %s6904_s20  ;;  %2409 = vrot.lane.b32.xlu0 %v8123_v5, %s6903_s19  ;;  %v8153_v21 = vpop.permute.xlu2 %2381 }
 0x492   : > { %10969 = vst [vmem:[#allocation160_spill] sm:$0xff] %v8153_v21  ;;  %v8192_v51 = vpop.permute.xlu0 %2862 }
 0x493   : > { %10978 = vst [vmem:[#allocation169_spill] sm:$0xff] %v8192_v51 }
 0x498   : > { %2888 = vrot.lane.b32.xlu2 %v8110_v61, %s6902_s18 }
 0x499   : > { %2407 = vrot.lane.b32.xlu1 %v8110_v61, %s6903_s19  ;;  %1739 = vrot.lane.b32.xlu0 %v1662_v1, %s6904_s20  ;;  %v8166_v1 = vpop.permute.xlu1 %2383  ;;  %v1582_v54 = vpop.permute.xlu2 %1581 }
 0x49a   : > { %10972 = vst [vmem:[#allocation163_spill] sm:$0xff] %v8166_v1 }
 0x4a0   : > { %1737 = vrot.lane.b32.xlu2 %v1661_v38, %s6904_s20  ;;  %v1513_v38 = vpop.f32.mrf.mxu0 }
 0x4a1   : > { %2505 = vrot.lane.b32.xlu1 %v8123_v5, %s6900_s15  ;;  %2507 = vrot.lane.b32.xlu0 %v8157_v25, %s6900_s15  ;;  %v8177_v32 = vadd.f32 %v7477_v56, %v1513_v38  ;;  %v8179_v21 = vpop.permute.xlu1 %2481  ;;  %v8183_v42 = vpop.permute.xlu2 %2479 }
 0x4a2   : > { %10975 = vst [vmem:[#allocation166_spill] sm:$0xff] %v8179_v21 }
 0x4a3   : > { %10974 = vst [vmem:[#allocation165_spill] sm:$0xff] %v8177_v32 }
 0x4a4   : > { %10976 = vst [vmem:[#allocation167_spill] sm:$0xff] %v8183_v42  ;;  %v1663_v42 = vmul.f32 %v1582_v54, %v7825_v4 }
 0x4a8   : > { %2986 = vrot.lane.b32.xlu2 %v8123_v5, %s6899_s14  ;;  %v1516_v1 = vpop.f32.mrf.mxu0 }
 0x4a9   : > { %2890 = vrot.lane.b32.xlu1 %v8123_v5, %s6902_s18  ;;  %2892 = vrot.lane.b32.xlu0 %v8157_v25, %s6902_s18  ;;  %v8190_v48 = vadd.f32 %v7477_v56, %v1516_v1  ;;  %v8200_v38 = vpop.permute.xlu1 %2866  ;;  %v8202_v21 = vpop.permute.xlu2 %2864 }
 0x4aa   : > { %10979 = vst [vmem:[#allocation170_spill] sm:$0xff] %v8200_v38  ;;  %v8207_v1 = vpop.permute.xlu0 %2960 }
 0x4ab   : > { %10977 = vst [vmem:[#allocation168_spill] sm:$0xff] %v8190_v48 }
 0x4ac   : > { %10980 = vst [vmem:[#allocation171_spill] sm:$0xff] %v8202_v21 }
 0x4ad   : > { %10981 = vst [vmem:[#allocation172_spill] sm:$0xff] %v8207_v1 }
 0x4b0   : > { %2411 = vrot.lane.b32.xlu2 %v8157_v25, %s6903_s19  ;;  %v1518_v38 = vpop.f32.mrf.mxu0 }
 0x4b1   : > { %1609 = vrot.lane.b32.xlu1 %v8157_v25, %s6901_s16  ;;  %2990 = vrot.lane.b32.xlu0 %v8177_v32, %s6899_s14  ;;  %v1586_v51 = vpop.permute.xlu1 %1585  ;;  %v1714_v40 = vpop.permute.xlu2 %1713 }
 0x4b2   : > { %v1665_v30 = vmul.f32 %v1586_v51, %v7874_v16  ;;  %v1584_v54 = vpop.permute.xlu0 %1583 }
 0x4b3   : > { %v1664_v21 = vmul.f32 %v1584_v54, %v7838_v47 }
 0x4b8   : > { %1611 = vrot.lane.b32.xlu2 %v8177_v32, %s6901_s16 }
 0x4b9   : > { %2988 = vrot.lane.b32.xlu1 %v8157_v25, %s6899_s14  ;;  %1613 = vrot.lane.b32.xlu0 %v8190_v48, %s6901_s16  ;;  %v8222_v1 = vpop.permute.xlu2 %2962 }
 0x4ba   : > { %10983 = vst [vmem:[#allocation174_spill] sm:$0xff] %v8222_v1  ;;  %v8238_v1 = vpop.permute.xlu0 %2385 }
 0x4bb   : > { %10987 = vst [vmem:[#allocation178_spill] sm:$0xff] %v8238_v1 }
 0x4c0   : > { %2509 = vrot.lane.b32.xlu2 %v8177_v32, %s6900_s15 }
 0x4c1   : > { %1741 = vrot.lane.b32.xlu1 %v1663_v42, %s6904_s20  ;;  %2415 = vrot.lane.b32.xlu0 %v8190_v48, %s6903_s19  ;;  %v8220_v42 = vadd.f32 %v7477_v56, %v1518_v38  ;;  %v8229_v51 = vpop.permute.xlu2 %2387 }
 0x4c2   : > { %10984 = vst [vmem:[#allocation175_spill] sm:$0xff] %v8229_v51  ;;  %v1716_v51 = vpop.permute.xlu0 %1715 }
 0x4c3   : > { %10982 = vst [vmem:[#allocation173_spill] sm:$0xff] %v8220_v42  ;;  %v1813_v34 = vsel %vm1809_vm3, %v1716_v51, 0.0 }
 0x4c8   : > { %2894 = vrot.lane.b32.xlu2 %v8177_v32, %s6902_s18 }
 0x4c9   : > { %2413 = vrot.lane.b32.xlu1 %v8177_v32, %s6903_s19  ;;  %1745 = vrot.lane.b32.xlu0 %v1665_v30, %s6904_s20  ;;  %v8233_v30 = vpop.permute.xlu1 %2964  ;;  %v1588_v54 = vpop.permute.xlu2 %1587 }
 0x4ca   : > { %10985 = vst [vmem:[#allocation176_spill] sm:$0xff] %v8233_v30 }
 0x4d0   : > { %1743 = vrot.lane.b32.xlu2 %v1664_v21, %s6904_s20  ;;  %v1810_v21 = vsel %vm1809_vm3, %v1714_v40, 0.0  ;;  %v8250_v40 = vpop.permute.xlu0 %2483 }
 0x4d1   : > { %2513 = vrot.lane.b32.xlu0 %v8220_v42, %s6900_s15  ;;  %v1718_v56 = vpop.permute.xlu1 %1717  ;;  %v8235_v38 = vpop.permute.xlu2 %2485  ;;  %10992 = vst [vmem:[#allocation183_spill] sm:$0xff] %v8250_v40 }
 0x4d2   : > { %10986 = vst [vmem:[#allocation177_spill] sm:$0xff] %v8235_v38  ;;  %v1816_v39 = vsel %vm1809_vm3, %v1718_v56, 0.0 }
 0x4d8   : > { %2992 = vrot.lane.b32.xlu2 %v8190_v48, %s6899_s14 }
 0x4d9   : > { %2898 = vrot.lane.b32.xlu0 %v8220_v42, %s6902_s18  ;;  %v8240_v53 = vpop.permute.xlu1 %2389  ;;  %v8242_v59 = vpop.permute.xlu2 %2870 }
 0x4da   : > { %10988 = vst [vmem:[#allocation179_spill] sm:$0xff] %v8240_v53  ;;  %v8256_v53 = vpop.permute.xlu0 %2868 }
 0x4db   : > { %10989 = vst [vmem:[#allocation180_spill] sm:$0xff] %v8242_v59 }
 0x4dc   : > { %10994 = vst [vmem:[#allocation185_spill] sm:$0xff] %v8256_v53 }
 0x4e1   : > { %v8244_v6 = vpop.permute.xlu1 %2487  ;;  %v1720_v30 = vpop.permute.xlu2 %1719 }
 0x4e2   : > { %10990 = vst [vmem:[#allocation181_spill] sm:$0xff] %v8244_v6  ;;  %v1819_v10 = vsel %vm1809_vm3, %v1720_v30, 0.0 }
 0x4e9   : > { %v8248_v38 = vpop.permute.xlu1 %2872  ;;  %v8252_v1 = vpop.permute.xlu2 %2968 }
 0x4ea   : > { %10991 = vst [vmem:[#allocation182_spill] sm:$0xff] %v8248_v38 }
 0x4eb   : > { %10993 = vst [vmem:[#allocation184_spill] sm:$0xff] %v8252_v1 }
 0x4f1   : > { %v8260_v51 = vpop.permute.xlu2 %2393 }
 0x4f2   : > { %10995 = vst [vmem:[#allocation186_spill] sm:$0xff] %v8260_v51 }
 0x4f3   : > { %1811 = vadd.xlane.f32.xlu1 %v1810_v21  ;;  %v1592_v21 = vpop.permute.xlu1 %1591 }
 0x4f9   : > { %v1594_v40 = vpop.permute.xlu2 %1593 }
 0x4fb   : > { %v8270_v56 = vpop.permute.xlu1 %2970 }
 0x4fc   : > { %10997 = vst [vmem:[#allocation188_spill] sm:$0xff] %v8270_v56 }
 0x501   : > { %1814 = vadd.xlane.f32.xlu2 %v1813_v34  ;;  %v1668_v34 = vmul.f32 %v1592_v21, %v7949_v37  ;;  %v8274_v38 = vpop.permute.xlu2 %2491  ;;  %v1666_v21 = vmul.f32 %v1588_v54, %v7896_v12 }
 0x502   : > { %10998 = vst [vmem:[#allocation189_spill] sm:$0xff] %v8274_v38 }
 0x503   : > { %1817 = vadd.xlane.f32.xlu0 %v1816_v39  ;;  %v8268_v39 = vpop.permute.xlu0 %2966  ;;  %v1724_v51 = vpop.permute.xlu1 %1723 }
 0x504   : > { %10996 = vst [vmem:[#allocation187_spill] sm:$0xff] %v8268_v39 }
 0x509   : > { %v8282_v6 = vpop.permute.xlu2 %2876 }
 0x50a   : > { %11001 = vst [vmem:[#allocation192_spill] sm:$0xff] %v8282_v6 }
 0x50b   : > { %v1590_v53 = vpop.permute.xlu0 %1589  ;;  %v8280_v1 = vpop.permute.xlu1 %2395 }
 0x50c   : > { %2511 = vrot.lane.b32.xlu1 %v8190_v48, %s6900_s15  ;;  %11000 = vst [vmem:[#allocation191_spill] sm:$0xff] %v8280_v1 }
 0x511   : > { %v1726_v39 = vpop.permute.xlu2 %1725 }
 0x512   : > { %v1828_v62 = vsel %vm1809_vm3, %v1726_v39, 0.0 }
 0x513   : > { %v8284_v56 = vpop.permute.xlu1 %2493 }
 0x514   : > { %2896 = vrot.lane.b32.xlu1 %v8190_v48, %s6902_s18  ;;  %11002 = vst [vmem:[#allocation193_spill] sm:$0xff] %v8284_v56 }
 0x517   : > { %1751 = vrot.lane.b32.xlu0 %v1668_v34, %s6904_s20  ;;  %v8278_v34 = vpop.permute.xlu0 %2391 }
 0x518   : > { %10999 = vst [vmem:[#allocation190_spill] sm:$0xff] %v8278_v34 }
 0x519   : > { %2417 = vrot.lane.b32.xlu2 %v8220_v42, %s6903_s19 }
 0x51b   : > { %v8290_v54 = vpop.permute.xlu1 %2878 }
 0x51c   : > { %1615 = vrot.lane.b32.xlu1 %v8220_v42, %s6901_s16  ;;  %11004 = vst [vmem:[#allocation195_spill] sm:$0xff] %v8290_v54 }
 0x51f   : > { %v1722_v59 = vpop.permute.xlu0 %1721 }
 0x523   : > { %v1598_v1 = vpop.permute.xlu1 %1597 }
 0x524   : > { %2994 = vrot.lane.b32.xlu1 %v8220_v42, %s6899_s14  ;;  %v1671_v56 = vmul.f32 %v1598_v1, %v8017_v44  ;;  %v1669_v1 = vmul.f32 %v1594_v40, %v7971_v3 }
 0x527   : > { %v8288_v38 = vpop.permute.xlu0 %2489 }
 0x528   : > { %11003 = vst [vmem:[#allocation194_spill] sm:$0xff] %v8288_v38 }
 0x52b   : > { %v8305_v39 = vpop.permute.xlu1 %2976 }
 0x52c   : > { %1747 = vrot.lane.b32.xlu1 %v1666_v21, %s6904_s20  ;;  %v8292_v21 = vpop.permute.xlu2 %2974  ;;  %11009 = vst [vmem:[#allocation200_spill] sm:$0xff] %v8305_v39 }
 0x52d   : > { %11005 = vst [vmem:[#allocation196_spill] sm:$0xff] %v8292_v21 }
 0x52f   : > { %v8294_v34 = vpop.permute.xlu0 %2874 }
 0x530   : > { %11006 = vst [vmem:[#allocation197_spill] sm:$0xff] %v8294_v34 }
 0x533   : > { %v1730_v54 = vpop.permute.xlu1 %1729 }
 0x534   : > { %v8296_v6 = vpop.permute.xlu2 %2399 }
 0x535   : > { %11007 = vst [vmem:[#allocation198_spill] sm:$0xff] %v8296_v6 }
 0x537   : > { %v8302_v30 = vpop.permute.xlu0 %2972 }
 0x538   : > { %11008 = vst [vmem:[#allocation199_spill] sm:$0xff] %v8302_v30 }
 0x53c   : > { %v1600_v38 = vpop.permute.xlu2 %1599 }
 0x53f   : > { %v1596_v34 = vpop.permute.xlu0 %1595 }
 0x541   : > { %1829 = vadd.xlane.f32.xlu0 %v1828_v62  ;;  %v1822_v62 = vsel %vm1809_vm3, %v1722_v59, 0.0  ;;  %v8313_v59 = vpop.permute.xlu1 %2401 }
 0x542   : > { %1820 = vadd.xlane.f32.xlu2 %v1819_v10  ;;  %v1667_v10 = vmul.f32 %v1590_v53, %v7911_v19  ;;  %11012 = vst [vmem:[#allocation203_spill] sm:$0xff] %v8313_v59 }
 0x544   : > { %v8307_v21 = vpop.permute.xlu2 %2497 }
 0x545   : > { %11010 = vst [vmem:[#allocation201_spill] sm:$0xff] %v8307_v21  ;;  %v1825_v21 = vsel %vm1809_vm3, %v1724_v51, 0.0  ;;  %v1670_v51 = vmul.f32 %v1596_v34, %v7984_v17 }
 0x547   : > { %v8310_v6 = vpop.permute.xlu0 %2397 }
 0x548   : > { %11011 = vst [vmem:[#allocation202_spill] sm:$0xff] %v8310_v6 }
 0x54c   : > { %v8315_v53 = vpop.permute.xlu2 %2882 }
 0x54d   : > { %11013 = vst [vmem:[#allocation204_spill] sm:$0xff] %v8315_v53 }
 0x555   : > { %1757 = vrot.lane.b32.xlu0 %v1671_v56, %s6904_s20  ;;  %v1728_v56 = vpop.permute.xlu0 %1727 }
 0x556   : > { %1823 = vadd.xlane.f32.xlu1 %v1822_v62  ;;  %v8317_v62 = vpop.permute.xlu1 %2499 }
 0x557   : > { %11014 = vst [vmem:[#allocation205_spill] sm:$0xff] %v8317_v62 }
 0x55a   : > { %1749 = vrot.lane.b32.xlu2 %v1667_v10, %s6904_s20  ;;  %v1732_v10 = vpop.permute.xlu2 %1731 }
 0x55b   : > { %v1837_v39 = vsel %vm1809_vm3, %v1732_v10, 0.0 }
 0x55d   : > { %v8320_v30 = vpop.permute.xlu0 %2495 }
 0x55e   : > { %11015 = vst [vmem:[#allocation206_spill] sm:$0xff] %v8320_v30  ;;  %v8323_v40 = vpop.permute.xlu1 %2884 }
 0x55f   : > { %11016 = vst [vmem:[#allocation207_spill] sm:$0xff] %v8323_v40 }
 0x562   : > { %v8325_v6 = vpop.permute.xlu2 %2980 }
 0x563   : > { %11017 = vst [vmem:[#allocation208_spill] sm:$0xff] %v8325_v6 }
 0x566   : > { %v1604_v59 = vpop.permute.xlu1 %1603 }
 0x567   : > { %v1674_v62 = vmul.f32 %v1604_v59, %v8088_v49 }
 0x56a   : > { %v8329_v53 = vpop.permute.xlu2 %2405 }
 0x56b   : > { %11019 = vst [vmem:[#allocation210_spill] sm:$0xff] %v8329_v53 }
 0x56f   : > { %1753 = vrot.lane.b32.xlu1 %v1669_v1, %s6904_s20  ;;  %v8327_v1 = vpop.permute.xlu0 %2880 }
 0x570   : > { %11018 = vst [vmem:[#allocation209_spill] sm:$0xff] %v8327_v1 }
 0x572   : > { %v1606_v30 = vpop.permute.xlu2 %1605 }
 0x577   : > { %v8333_v10 = vpop.permute.xlu0 %2978 }
 0x578   : > { %11020 = vst [vmem:[#allocation211_spill] sm:$0xff] %v8333_v10 }
 0x57a   : > { %v8340_v6 = vpop.permute.xlu2 %2503 }
 0x57b   : > { %11022 = vst [vmem:[#allocation213_spill] sm:$0xff] %v8340_v6 }
 0x57f   : > { %1838 = vadd.xlane.f32.xlu0 %v1837_v39  ;;  %v1831_v39 = vsel %vm1809_vm3, %v1728_v56, 0.0  ;;  %v1602_v1 = vpop.permute.xlu0 %1601  ;;  %v1672_v56 = vmul.f32 %v1600_v38, %v8043_v29 }
 0x583   : > { %1826 = vadd.xlane.f32.xlu2 %v1825_v21  ;;  %v8337_v21 = vpop.permute.xlu1 %2982 }
 0x584   : > { %11021 = vst [vmem:[#allocation212_spill] sm:$0xff] %v8337_v21 }
 0x587   : > { %v8342_v53 = vpop.permute.xlu0 %2403 }
 0x588   : > { %11023 = vst [vmem:[#allocation214_spill] sm:$0xff] %v8342_v53  ;;  %v1834_v53 = vsel %vm1809_vm3, %v1730_v54, 0.0 }
 0x58b   : > { %v1736_v40 = vpop.permute.xlu1 %1735 }
 0x58f   : > { %v1734_v34 = vpop.permute.xlu0 %1733 }
 0x590   : > { %v1840_v54 = vsel %vm1809_vm3, %v1734_v34, 0.0 }
 0x593   : > { %1763 = vrot.lane.b32.xlu0 %v1674_v62, %s6904_s20  ;;  %v8344_v59 = vpop.permute.xlu1 %2407  ;;  %v8346_v62 = vpop.permute.xlu2 %2888 }
 0x594   : > { %11024 = vst [vmem:[#allocation215_spill] sm:$0xff] %v8344_v59 }
 0x595   : > { %11025 = vst [vmem:[#allocation216_spill] sm:$0xff] %v8346_v62 }
 0x597   : > { %v8353_v10 = vpop.permute.xlu0 %2501 }
 0x598   : > { %11027 = vst [vmem:[#allocation218_spill] sm:$0xff] %v8353_v10  ;;  %v1673_v10 = vmul.f32 %v1602_v1, %v8054_v35  ;;  %v1675_v1 = vmul.f32 %v1606_v30, %v8110_v61 }
 0x599   : > { %1832 = vadd.xlane.f32.xlu1 %v1831_v39 }
 0x59b   : > { %1755 = vrot.lane.b32.xlu2 %v1670_v51, %s6904_s20  ;;  %v8350_v39 = vpop.permute.xlu1 %2505  ;;  %v1738_v21 = vpop.permute.xlu2 %1737 }
 0x59c   : > { %11026 = vst [vmem:[#allocation217_spill] sm:$0xff] %v8350_v39  ;;  %v1846_v51 = vsel %vm1809_vm3, %v1738_v21, 0.0 }
 0x59f   : > { %v8360_v62 = vpop.permute.xlu0 %2886 }
 0x5a0   : > { %11030 = vst [vmem:[#allocation221_spill] sm:$0xff] %v8360_v62 }
 0x5a3   : > { %v8355_v6 = vpop.permute.xlu1 %2890  ;;  %v8358_v59 = vpop.permute.xlu2 %2986 }
 0x5a4   : > { %11028 = vst [vmem:[#allocation219_spill] sm:$0xff] %v8355_v6 }
 0x5a5   : > { %11029 = vst [vmem:[#allocation220_spill] sm:$0xff] %v8358_v59 }
 0x5a7   : > { %v8366_v21 = vpop.permute.xlu0 %2984 }
 0x5a8   : > { %11032 = vst [vmem:[#allocation223_spill] sm:$0xff] %v8366_v21 }
 0x5ab   : > { %v1610_v38 = vpop.permute.xlu1 %1609 }
 0x5ac   : > { %v1677_v39 = vmul.f32 %v1610_v38, %v8157_v25 }
 0x5af   : > { %v1608_v59 = vpop.permute.xlu0 %1607 }
 0x5b2   : > { %1759 = vrot.lane.b32.xlu1 %v1672_v56, %s6904_s20  ;;  %v8362_v56 = vpop.permute.xlu2 %2411 }
 0x5b3   : > { %11031 = vst [vmem:[#allocation222_spill] sm:$0xff] %v8362_v56  ;;  %v8369_v6 = vpop.permute.xlu1 %2988 }
 0x5b4   : > { %11033 = vst [vmem:[#allocation224_spill] sm:$0xff] %v8369_v6 }
 0x5b7   : > { %v8375_v62 = vpop.permute.xlu0 %2409 }
 0x5b8   : > { %11035 = vst [vmem:[#allocation226_spill] sm:$0xff] %v8375_v62 }
 0x5bb   : > { %v1742_v56 = vpop.permute.xlu1 %1741 }
 0x5bd   : > { %1847 = vadd.xlane.f32.xlu0 %v1846_v51  ;;  %v1612_v51 = vpop.permute.xlu2 %1611 }
 0x5bf   : > { %v1740_v21 = vpop.permute.xlu0 %1739 }
 0x5c4   : > { %1835 = vadd.xlane.f32.xlu2 %v1834_v53 }
 0x5c5   : > { %v8373_v53 = vpop.permute.xlu2 %2509 }
 0x5c6   : > { %11034 = vst [vmem:[#allocation225_spill] sm:$0xff] %v8373_v53 }
 0x5c7   : > { %v8383_v9 = vpop.permute.xlu0 %2507 }
 0x5c8   : > { %11038 = vst [vmem:[#allocation229_spill] sm:$0xff] %v8383_v9 }
 0x5cd   : > { %v8377_v38 = vpop.permute.xlu2 %2894 }
 0x5ce   : > { %11036 = vst [vmem:[#allocation227_spill] sm:$0xff] %v8377_v38 }
 0x5cf   : > { %v8390_v62 = vpop.permute.xlu0 %2892 }
 0x5d0   : > { %11041 = vst [vmem:[#allocation232_spill] sm:$0xff] %v8390_v62 }
 0x5d1   : > { %1769 = vrot.lane.b32.xlu0 %v1677_v39, %s6904_s20  ;;  %v8379_v39 = vpop.permute.xlu1 %2413 }
 0x5d2   : > { %11037 = vst [vmem:[#allocation228_spill] sm:$0xff] %v8379_v39  ;;  %v1843_v39 = vsel %vm1809_vm3, %v1736_v40, 0.0  ;;  %v1676_v40 = vmul.f32 %v1608_v59, %v8123_v5 }
 0x5d5   : > { %v1744_v6 = vpop.permute.xlu2 %1743 }
 0x5d7   : > { %v8396_v18 = vpop.permute.xlu0 %2990 }
 0x5d8   : > { %11043 = vst [vmem:[#allocation234_spill] sm:$0xff] %v8396_v18 }
 0x5d9   : > { %v1812_v34 = vpop.xlane.xlu1 %1811 }
 0x5dc   : > { %1841 = vadd.xlane.f32.xlu1 %v1840_v54  ;;  %1761 = vrot.lane.b32.xlu2 %v1673_v10, %s6904_s20  ;;  %v1855_v10 = vsel %vm1809_vm3, %v1744_v6, 0.0 }
 0x5dd   : > { %v8388_v53 = vpop.permute.xlu2 %2992 }
 0x5de   : > { %11040 = vst [vmem:[#allocation231_spill] sm:$0xff] %v8388_v53 }
 0x5df   : > { %v1614_v62 = vpop.permute.xlu0 %1613 }
 0x5e1   : > { %v8386_v54 = vpop.permute.xlu1 %2511 }
 0x5e2   : > { %11039 = vst [vmem:[#allocation230_spill] sm:$0xff] %v8386_v54 }
 0x5e5   : > { %v1815_v38 = vpop.xlane.xlu2 %1814 }
 0x5e9   : > { %v8393_v30 = vpop.permute.xlu1 %2896 }
 0x5ea   : > { %11042 = vst [vmem:[#allocation233_spill] sm:$0xff] %v8393_v30 }
 0x5ed   : > { %v8399_v6 = vpop.permute.xlu2 %2417 }
 0x5ee   : > { %11044 = vst [vmem:[#allocation235_spill] sm:$0xff] %v8399_v6 }
 0x5f5   : > { %1765 = vrot.lane.b32.xlu1 %v1675_v1, %s6904_s20  ;;  %v1907_v1 = vmul.f32 %v1815_v38, %v7507_v26  ;;  %v1821_v53 = vpop.xlane.xlu2 %1820  ;;  %v1849_v38 = vsel %vm1809_vm3, %v1740_v21, 0.0 }
 0x5fb   : > { %1856 = vadd.xlane.f32.xlu0 %v1855_v10  ;;  %v1616_v10 = vpop.permute.xlu1 %1615 }
 0x5fc   : > { %v1680_v9 = vmul.f32 %v1616_v10, %v8220_v42  ;;  %v1678_v10 = vmul.f32 %v1612_v51, %v8177_v32  ;;  %v1906_v51 = vmul.f32 %v1812_v34, %v7484_v57 }
 0x5fd   : > { %v1750_v59 = vpop.permute.xlu2 %1749 }
 0x5fe   : > { %v1864_v21 = vsel %vm1809_vm3, %v1750_v59, 0.0 }
 0x605   : > { %1844 = vadd.xlane.f32.xlu2 %v1843_v39  ;;  %v1909_v39 = vmul.f32 %v1821_v53, %v7559_v20  ;;  %v1852_v53 = vsel %vm1809_vm3, %v1742_v56, 0.0  ;;  %v1679_v56 = vmul.f32 %v1614_v62, %v8190_v48 }
 0x60f   : > { %1972 = vrot.lane.b32.xlu0 %v1907_v1, %s6901_s16  ;;  %v8408_v1 = vpop.permute.xlu0 %2415 }
 0x610   : > { %11045 = vst [vmem:[#allocation236_spill] sm:$0xff] %v8408_v1 }
 0x617   : > { %1775 = vrot.lane.b32.xlu0 %v1680_v9, %s6904_s20  ;;  %v1746_v6 = vpop.permute.xlu0 %1745 }
 0x61d   : > { %1767 = vrot.lane.b32.xlu2 %v1676_v40, %s6904_s20 }
 0x61f   : > { %1850 = vadd.xlane.f32.xlu1 %v1849_v38  ;;  %1976 = vrot.lane.b32.xlu0 %v1909_v39, %s6901_s16  ;;  %v8411_v30 = vpop.permute.xlu0 %2513 }
 0x620   : > { %11046 = vst [vmem:[#allocation237_spill] sm:$0xff] %v8411_v30 }
 0x627   : > { %v8414_v9 = vpop.permute.xlu0 %2898 }
 0x628   : > { %11047 = vst [vmem:[#allocation238_spill] sm:$0xff] %v8414_v9 }
 0x62f   : > { %v1818_v40 = vpop.xlane.xlu0 %1817 }
 0x630   : > { %v1908_v59 = vmul.f32 %v1818_v40, %v7521_v52 }
 0x637   : > { %v1752_v39 = vpop.permute.xlu0 %1751 }
 0x638   : > { %1771 = vrot.lane.b32.xlu1 %v1678_v10, %s6904_s20  ;;  %v1858_v10 = vsel %vm1809_vm3, %v1746_v6, 0.0 }
 0x63f   : > { %v1830_v38 = vpop.xlane.xlu0 %1829 }
 0x640   : > { %v1912_v1 = vmul.f32 %v1830_v38, %v7643_v43 }
 0x646   : > { %1853 = vadd.xlane.f32.xlu2 %v1852_v53  ;;  %v1827_v53 = vpop.xlane.xlu2 %1826 }
 0x649   : > { %1865 = vadd.xlane.f32.xlu0 %v1864_v21  ;;  %v8427_v21 = vpop.permute.xlu1 %2994 }
 0x64a   : > { %11048 = vst [vmem:[#allocation239_spill] sm:$0xff] %v8427_v21 }
 0x64e   : > { %v1756_v38 = vpop.permute.xlu2 %1755 }
 0x64f   : > { %v1873_v34 = vsel %vm1809_vm3, %v1756_v38, 0.0 }
 0x656   : > { %v1836_v38 = vpop.xlane.xlu2 %1835 }
 0x65d   : > { %1982 = vrot.lane.b32.xlu0 %v1912_v1, %s6901_s16  ;;  %v1748_v1 = vpop.permute.xlu1 %1747 }
 0x65e   : > { %1970 = vrot.lane.b32.xlu2 %v1906_v51, %s6901_s16  ;;  %v1758_v51 = vpop.permute.xlu0 %1757  ;;  %v1861_v6 = vsel %vm1809_vm3, %v1748_v1, 0.0  ;;  %v1762_v1 = vpop.permute.xlu2 %1761 }
 0x662   : > { %1859 = vadd.xlane.f32.xlu1 %v1858_v10 }
 0x665   : > { %v1824_v40 = vpop.xlane.xlu1 %1823 }
 0x666   : > { %1773 = vrot.lane.b32.xlu2 %v1679_v56, %s6904_s20  ;;  %v1839_v10 = vpop.xlane.xlu0 %1838  ;;  %v1867_v56 = vsel %vm1809_vm3, %v1752_v39, 0.0 }
 0x667   : > { %v1915_v62 = vmul.f32 %v1839_v10, %v7715_v22 }
 0x66d   : > { %v1754_v10 = vpop.permute.xlu1 %1753 }
 0x66e   : > { %v1764_v30 = vpop.permute.xlu0 %1763 }
 0x676   : > { %v1848_v39 = vpop.xlane.xlu0 %1847 }
 0x67b   : > { %1974 = vrot.lane.b32.xlu1 %v1908_v59, %s6901_s16  ;;  %v1910_v59 = vmul.f32 %v1824_v40, %v7579_v0  ;;  %v1918_v40 = vmul.f32 %v1848_v39, %v7778_v2 }
 0x687   : > { %1874 = vadd.xlane.f32.xlu0 %v1873_v34  ;;  %v1911_v34 = vmul.f32 %v1827_v53, %v7602_v13  ;;  %v1876_v53 = vsel %vm1809_vm3, %v1758_v51, 0.0 }
 0x68f   : > { %1862 = vadd.xlane.f32.xlu2 %v1861_v6  ;;  %v1882_v6 = vsel %vm1809_vm3, %v1762_v1, 0.0  ;;  %v1914_v1 = vmul.f32 %v1836_v38, %v7680_v60 }
 0x69b   : > { %1988 = vrot.lane.b32.xlu0 %v1915_v62, %s6901_s16  ;;  %v1870_v62 = vsel %vm1809_vm3, %v1754_v10, 0.0 }
 0x6a5   : > { %1868 = vadd.xlane.f32.xlu1 %v1867_v56  ;;  %v1833_v56 = vpop.xlane.xlu1 %1832 }
 0x6a7   : > { %1978 = vrot.lane.b32.xlu2 %v1910_v59, %s6901_s16  ;;  %v1913_v59 = vmul.f32 %v1833_v56, %v7669_v23  ;;  %v1770_v56 = vpop.permute.xlu0 %1769 }
 0x6ad   : > { %v1760_v39 = vpop.permute.xlu1 %1759 }
 0x6af   : > { %v1857_v38 = vpop.xlane.xlu0 %1856 }
 0x6be   : > { %1980 = vrot.lane.b32.xlu1 %v1911_v34, %s6901_s16  ;;  %v1845_v34 = vpop.xlane.xlu2 %1844 }
 0x6c5   : > { %1883 = vadd.xlane.f32.xlu0 %v1882_v6 }
 0x6c6   : > { %v1768_v6 = vpop.permute.xlu2 %1767 }
 0x6c7   : > { %v1891_v10 = vsel %vm1809_vm3, %v1768_v6, 0.0  ;;  %v1885_v6 = vsel %vm1809_vm3, %v1764_v30, 0.0 }
 0x6d0   : > { %1871 = vadd.xlane.f32.xlu2 %v1870_v62  ;;  %v1854_v62 = vpop.xlane.xlu2 %1853 }
 0x6d8   : > { %v1971_v9 = vpop.permute.xlu2 %1970 }
 0x6d9   : > { %1994 = vrot.lane.b32.xlu0 %v1918_v40, %s6901_s16  ;;  %v1879_v40 = vsel %vm1809_vm3, %v1760_v39, 0.0  ;;  %v8450_v51 = vsub.f32 %v7484_v57, %v1971_v9  ;;  %v1917_v9 = vmul.f32 %v1845_v34, %v7766_v31 }
 0x6db   : > { %11049 = vst [vmem:[#allocation240_spill] sm:$0xff] %v8450_v51 }
 0x6e0   : > { %v1774_v39 = vpop.permute.xlu2 %1773 }
 0x6e1   : > { %v1900_v21 = vsel %vm1809_vm3, %v1774_v39, 0.0 }
 0x6e8   : > { %1877 = vadd.xlane.f32.xlu1 %v1876_v53  ;;  %1984 = vrot.lane.b32.xlu2 %v1913_v59, %s6901_s16  ;;  %v1921_v59 = vmul.f32 %v1857_v38, %v7838_v47  ;;  %v1842_v53 = vpop.xlane.xlu1 %1841 }
 0x701   : > { %1986 = vrot.lane.b32.xlu1 %v1914_v1, %s6901_s16  ;;  %v1916_v1 = vmul.f32 %v1842_v53, %v7741_v36  ;;  %v1973_v53 = vpop.permute.xlu0 %1972 }
 0x703   : > { %1892 = vadd.xlane.f32.xlu0 %v1891_v10  ;;  %v1766_v10 = vpop.permute.xlu1 %1765 }
 0x711   : > { %1880 = vadd.xlane.f32.xlu2 %v1879_v40  ;;  %v1851_v40 = vpop.xlane.xlu1 %1850 }
 0x717   : > { %2708 = vrot.lane.b32.xlu0 %v8450_v51, %s6905_s25 }
 0x719   : > { %v1772_v38 = vpop.permute.xlu1 %1771 }
 0x71f   : > { %2000 = vrot.lane.b32.xlu0 %v1921_v59, %s6901_s16  ;;  %v1888_v59 = vsel %vm1809_vm3, %v1766_v10, 0.0  ;;  %v1894_v10 = vsel %vm1809_vm3, %v1770_v56, 0.0 }
 0x721   : > { %v1860_v54 = vpop.xlane.xlu1 %1859 }
 0x729   : > { %1990 = vrot.lane.b32.xlu2 %v1916_v1, %s6901_s16  ;;  %v8464_v1 = vsub.f32 %v7507_v26, %v1973_v53  ;;  %v1975_v30 = vpop.permute.xlu1 %1974 }
 0x72a   : > { %v8469_v34 = vsub.f32 %v7521_v52, %v1975_v30 }
 0x72b   : > { %1886 = vadd.xlane.f32.xlu1 %v1885_v6  ;;  %11050 = vst [vmem:[#allocation241_spill] sm:$0xff] %v8464_v1  ;;  %v1919_v6 = vmul.f32 %v1851_v40, %v7804_v41 }
 0x72c   : > { %11051 = vst [vmem:[#allocation242_spill] sm:$0xff] %v8469_v34 }
 0x744   : > { %1992 = vrot.lane.b32.xlu1 %v1917_v9, %s6901_s16 }
 0x749   : > { %1901 = vadd.xlane.f32.xlu0 %v1900_v21  ;;  %v1776_v21 = vpop.permute.xlu0 %1775 }
 0x751   : > { %v1977_v9 = vpop.permute.xlu0 %1976 }
 0x752   : > { %1889 = vadd.xlane.f32.xlu2 %v1888_v59  ;;  %v8479_v39 = vsub.f32 %v7559_v20, %v1977_v9  ;;  %v8483_v59 = vpop.xlane.xlu2 %1862 }
 0x754   : > { %11052 = vst [vmem:[#allocation243_spill] sm:$0xff] %v8479_v39 }
 0x759   : > { %v1866_v53 = vpop.xlane.xlu0 %1865 }
 0x75a   : > { %v1924_v40 = vmul.f32 %v1866_v53, %v7911_v19  ;;  %v1979_v30 = vpop.permute.xlu2 %1978 }
 0x75b   : > { %v8490_v56 = vsub.f32 %v7579_v0, %v1979_v30 }
 0x75d   : > { %2132 = vrot.lane.b32.xlu0 %v8464_v1, %s6899_s14  ;;  %11053 = vst [vmem:[#allocation244_spill] sm:$0xff] %v8490_v56 }
 0x761   : > { %v1983_v9 = vpop.permute.xlu0 %1982 }
 0x762   : > { %v8513_v30 = vpop.xlane.xlu2 %1871 }
 0x765   : > { %2230 = vrot.lane.b32.xlu0 %v8469_v34, %s6906_s21 }
 0x769   : > { %v1875_v53 = vpop.xlane.xlu0 %1874 }
 0x76a   : > { %1996 = vrot.lane.b32.xlu2 %v1919_v6, %s6901_s16  ;;  %v8487_v6 = vpop.xlane.xlu1 %1868  ;;  %v1985_v0 = vpop.permute.xlu2 %1984 }
 0x76d   : > { %2616 = vrot.lane.b32.xlu0 %v8469_v34, %s6900_s15 }
 0x76e   : > { %1895 = vadd.xlane.f32.xlu1 %v1894_v10  ;;  %v1920_v10 = vmul.f32 %v1854_v62, %v7825_v4 }
 0x771   : > { %v1989_v62 = vpop.permute.xlu0 %1988 }
 0x772   : > { %v1981_v20 = vpop.permute.xlu1 %1980 }
 0x773   : > { %v8497_v52 = vsub.f32 %v7602_v13, %v1981_v20  ;;  %v8509_v20 = vsub.f32 %v7643_v43, %v1983_v9  ;;  %v8522_v9 = vsub.f32 %v7669_v23, %v1985_v0  ;;  %v1922_v0 = vmul.f32 %v1860_v54, %v7874_v16 }
 0x774   : > { %v1903_v23 = vsel %vm1809_vm3, %v1776_v21, 0.0 }
 0x775   : > { %2714 = vrot.lane.b32.xlu0 %v8479_v39, %s6905_s25  ;;  %11054 = vst [vmem:[#allocation245_spill] sm:$0xff] %v8497_v52 }
 0x776   : > { %11055 = vst [vmem:[#allocation246_spill] sm:$0xff] %v8509_v20 }
 0x777   : > { %11056 = vst [vmem:[#allocation247_spill] sm:$0xff] %v8522_v9 }
 0x77a   : > { %v8519_v13 = vpop.xlane.xlu1 %1877 }
 0x77d   : > { %2006 = vrot.lane.b32.xlu0 %v1924_v40, %s6901_s16  ;;  %v1897_v40 = vsel %vm1809_vm3, %v1772_v38, 0.0  ;;  %v1927_v38 = vmul.f32 %v1875_v53, %v7984_v17 }
 0x782   : > { %v1987_v18 = vpop.permute.xlu1 %1986 }
 0x783   : > { %v8529_v26 = vsub.f32 %v7680_v60, %v1987_v18  ;;  %v8543_v18 = vsub.f32 %v7715_v22, %v1989_v62 }
 0x784   : > { %v8548_v60 = vpop.xlane.xlu2 %1880 }
 0x785   : > { %2138 = vrot.lane.b32.xlu0 %v8490_v56, %s6899_s14  ;;  %11057 = vst [vmem:[#allocation248_spill] sm:$0xff] %v8529_v26 }
 0x786   : > { %11058 = vst [vmem:[#allocation249_spill] sm:$0xff] %v8543_v18 }
 0x787   : > { %1998 = vrot.lane.b32.xlu1 %v1920_v10, %s6901_s16  ;;  %v1884_v10 = vpop.xlane.xlu0 %1883 }
 0x78c   : > { %v1991_v54 = vpop.permute.xlu2 %1990 }
 0x78d   : > { %2236 = vrot.lane.b32.xlu0 %v8497_v52, %s6906_s21  ;;  %v8560_v22 = vsub.f32 %v7741_v36, %v1991_v54  ;;  %v1923_v54 = vmul.f32 %v8483_v59, %v7896_v12 }
 0x78f   : > { %2130 = vrot.lane.b32.xlu1 %v8450_v51, %s6899_s14  ;;  %11059 = vst [vmem:[#allocation250_spill] sm:$0xff] %v8560_v22 }
 0x793   : > { %1898 = vadd.xlane.f32.xlu2 %v1897_v40  ;;  %v1995_v40 = vpop.permute.xlu0 %1994 }
 0x795   : > { %2622 = vrot.lane.b32.xlu0 %v8497_v52, %s6900_s15 }
 0x797   : > { %2228 = vrot.lane.b32.xlu1 %v8464_v1, %s6906_s21 }
 0x79b   : > { %v1893_v43 = vpop.xlane.xlu0 %1892 }
 0x79c   : > { %v1933_v59 = vmul.f32 %v1893_v43, %v8123_v5 }
 0x79d   : > { %2720 = vrot.lane.b32.xlu0 %v8509_v20, %s6905_s25 }
 0x79e   : > { %v8555_v62 = vpop.xlane.xlu1 %1886 }
 0x79f   : > { %2614 = vrot.lane.b32.xlu1 %v8464_v1, %s6900_s15 }
 0x7a3   : > { %v8535_v53 = vpop.permute.xlu0 %2708 }
 0x7a5   : > { %2012 = vrot.lane.b32.xlu0 %v1927_v38, %s6901_s16 }
 0x7ab   : > { %2226 = vrot.lane.b32.xlu2 %v8450_v51, %s6906_s21  ;;  %v2001_v38 = vpop.permute.xlu0 %2000 }
 0x7ad   : > { %2144 = vrot.lane.b32.xlu0 %v8522_v9, %s6899_s14 }
 0x7b3   : > { %2612 = vrot.lane.b32.xlu2 %v8450_v51, %s6900_s15  ;;  %v1930_v51 = vmul.f32 %v1884_v10, %v8054_v35 }
 0x7b5   : > { %2242 = vrot.lane.b32.xlu0 %v8529_v26, %s6906_s21 }
 0x7bb   : > { %2710 = vrot.lane.b32.xlu2 %v8464_v1, %s6905_s25 }
 0x7bc   : > { %v1902_v57 = vpop.xlane.xlu0 %1901 }
 0x7bd   : > { %2628 = vrot.lane.b32.xlu0 %v8529_v26, %s6900_s15 }
 0x7c3   : > { %2002 = vrot.lane.b32.xlu2 %v1922_v0, %s6901_s16 }
 0x7c5   : > { %2726 = vrot.lane.b32.xlu0 %v8543_v18, %s6905_s25  ;;  %v8594_v36 = vpop.xlane.xlu2 %1889 }
 0x7c9   : > { %1904 = vadd.xlane.f32.xlu1 %v1903_v23  ;;  %v1993_v23 = vpop.permute.xlu1 %1992 }
 0x7ca   : > { %v8567_v21 = vsub.f32 %v7766_v31, %v1993_v23  ;;  %v1925_v23 = vmul.f32 %v8487_v6, %v7949_v37  ;;  %v8589_v31 = vsub.f32 %v7778_v2, %v1995_v40 }
 0x7cb   : > { %2134 = vrot.lane.b32.xlu2 %v8469_v34, %s6899_s14 }
 0x7cc   : > { %11060 = vst [vmem:[#allocation251_spill] sm:$0xff] %v8567_v21 }
 0x7cd   : > { %2018 = vrot.lane.b32.xlu0 %v1930_v51, %s6901_s16  ;;  %11061 = vst [vmem:[#allocation252_spill] sm:$0xff] %v8589_v31  ;;  %v1997_v6 = vpop.permute.xlu2 %1996 }
 0x7cf   : > { %v8557_v0 = vpop.permute.xlu0 %2132 }
 0x7d3   : > { %2232 = vrot.lane.b32.xlu2 %v8479_v39, %s6906_s21 }
 0x7d5   : > { %2150 = vrot.lane.b32.xlu0 %v8560_v22, %s6899_s14 }
 0x7d7   : > { %v8569_v10 = vpop.permute.xlu0 %2230 }
 0x7db   : > { %2618 = vrot.lane.b32.xlu2 %v8479_v39, %s6900_s15 }
 0x7dd   : > { %2248 = vrot.lane.b32.xlu0 %v8567_v21, %s6906_s21 }
 0x7df   : > { %v8579_v51 = vpop.permute.xlu0 %2616 }
 0x7e1   : > { %v8604_v40 = vpop.xlane.xlu1 %1895 }
 0x7e2   : > { %2712 = vrot.lane.b32.xlu1 %v8469_v34, %s6905_s25 }
 0x7e3   : > { %2716 = vrot.lane.b32.xlu2 %v8490_v56, %s6905_s25 }
 0x7e5   : > { %2634 = vrot.lane.b32.xlu0 %v8567_v21, %s6900_s15 }
 0x7e7   : > { %v8596_v34 = vpop.permute.xlu0 %2714 }
 0x7ea   : > { %2004 = vrot.lane.b32.xlu1 %v1923_v54, %s6901_s16 }
 0x7eb   : > { %2008 = vrot.lane.b32.xlu2 %v1925_v23, %s6901_s16  ;;  %v8611_v23 = vsub.f32 %v7804_v41, %v1997_v6  ;;  %v1928_v41 = vmul.f32 %v8519_v13, %v8017_v44 }
 0x7ed   : > { %2732 = vrot.lane.b32.xlu0 %v8589_v31, %s6905_s25  ;;  %11062 = vst [vmem:[#allocation253_spill] sm:$0xff] %v8611_v23 }
 0x7ef   : > { %v8606_v54 = vpop.permute.xlu0 %2006 }
 0x7f2   : > { %2136 = vrot.lane.b32.xlu1 %v8479_v39, %s6899_s14 }
 0x7f3   : > { %2140 = vrot.lane.b32.xlu2 %v8497_v52, %s6899_s14 }
 0x7f5   : > { %2024 = vrot.lane.b32.xlu0 %v1933_v59, %s6901_s16 }
 0x7f7   : > { %v8619_v59 = vpop.permute.xlu0 %2138 }
 0x7f8   : > { %11063 = vst [vmem:[#allocation254_spill] sm:$0xff] %v8619_v59 }
 0x7f9   : > { %v1999_v43 = vpop.permute.xlu1 %1998 }
 0x7fa   : > { %2234 = vrot.lane.b32.xlu1 %v8490_v56, %s6906_s21  ;;  %v8622_v39 = vsub.f32 %v7825_v4, %v1999_v43  ;;  %v1926_v4 = vmul.f32 %v8513_v30, %v7971_v3  ;;  %v1936_v30 = vmul.f32 %v1902_v57, %v8190_v48 }
 0x7fb   : > { %2238 = vrot.lane.b32.xlu2 %v8509_v20, %s6906_s21 }
 0x7fc   : > { %11064 = vst [vmem:[#allocation255_spill] sm:$0xff] %v8622_v39 }
 0x7fd   : > { %2156 = vrot.lane.b32.xlu0 %v8611_v23, %s6899_s14 }
 0x802   : > { %2620 = vrot.lane.b32.xlu1 %v8490_v56, %s6900_s15  ;;  %v8634_v56 = vpop.permute.xlu0 %2236 }
 0x803   : > { %2624 = vrot.lane.b32.xlu2 %v8509_v20, %s6900_s15 }
 0x805   : > { %2254 = vrot.lane.b32.xlu0 %v8622_v39, %s6906_s21 }
 0x806   : > { %v8628_v6 = vpop.xlane.xlu2 %1898 }
 0x80a   : > { %2718 = vrot.lane.b32.xlu1 %v8497_v52, %s6905_s25  ;;  %v8646_v52 = vsub.f32 %v7838_v47, %v2001_v38  ;;  %v8653_v1 = vpop.permute.xlu0 %2622  ;;  %v8680_v47 = vpop.permute.xlu1 %2130 }
 0x80b   : > { %2722 = vrot.lane.b32.xlu2 %v8522_v9, %s6905_s25 }
 0x80c   : > { %11065 = vst [vmem:[#allocation256_spill] sm:$0xff] %v8646_v52 }
 0x80d   : > { %2640 = vrot.lane.b32.xlu0 %v8622_v39, %s6900_s15 }
 0x80e   : > { %v8638_v43 = vpop.permute.xlu2 %2226 }
 0x812   : > { %2010 = vrot.lane.b32.xlu1 %v1926_v4, %s6901_s16  ;;  %v8694_v48 = vpop.permute.xlu1 %2228 }
 0x813   : > { %2014 = vrot.lane.b32.xlu2 %v1928_v41, %s6901_s16  ;;  %v8663_v41 = vpop.permute.xlu0 %2720 }
 0x814   : > { %11066 = vst [vmem:[#allocation257_spill] sm:$0xff] %v8663_v41 }
 0x815   : > { %2738 = vrot.lane.b32.xlu0 %v8646_v52, %s6905_s25 }
 0x816   : > { %v8651_v2 = vpop.permute.xlu2 %2612 }
 0x81a   : > { %2142 = vrot.lane.b32.xlu1 %v8509_v20, %s6899_s14 }
 0x81b   : > { %2146 = vrot.lane.b32.xlu2 %v8529_v26, %s6899_s14  ;;  %v8676_v57 = vpop.permute.xlu0 %2012 }
 0x81d   : > { %2030 = vrot.lane.b32.xlu0 %v1936_v30, %s6901_s16 }
 0x81e   : > { %v8661_v4 = vpop.permute.xlu2 %2710 }
 0x822   : > { %2240 = vrot.lane.b32.xlu1 %v8522_v9, %s6906_s21 }
 0x823   : > { %2244 = vrot.lane.b32.xlu2 %v8543_v18, %s6906_s21 }
 0x826   : > { %v2003_v13 = vpop.permute.xlu2 %2002 }
 0x827   : > { %v8670_v38 = vsub.f32 %v7874_v16, %v2003_v13  ;;  %v8686_v13 = vpop.permute.xlu0 %2144  ;;  %v1931_v16 = vmul.f32 %v8555_v62, %v8088_v49 }
 0x829   : > { %11067 = vst [vmem:[#allocation258_spill] sm:$0xff] %v8670_v38  ;;  %2162 = vrot.lane.b32.xlu0 %v8670_v38, %s6899_s14 }
 0x82a   : > { %2626 = vrot.lane.b32.xlu1 %v8522_v9, %s6900_s15  ;;  %v1929_v9 = vmul.f32 %v8548_v60, %v8043_v29  ;;  %v8706_v60 = vpop.permute.xlu1 %2614 }
 0x82b   : > { %2630 = vrot.lane.b32.xlu2 %v8543_v18, %s6900_s15 }
 0x82e   : > { %v2135_v30 = vpop.permute.xlu2 %2134 }
 0x82f   : > { %v8700_v5 = vpop.permute.xlu0 %2242 }
 0x830   : > { %11068 = vst [vmem:[#allocation259_spill] sm:$0xff] %v8700_v5 }
 0x832   : > { %2724 = vrot.lane.b32.xlu1 %v8529_v26, %s6905_s25 }
 0x833   : > { %2728 = vrot.lane.b32.xlu2 %v8560_v22, %s6905_s25 }
 0x836   : > { %v8688_v20 = vpop.permute.xlu2 %2232 }
 0x837   : > { %v8710_v62 = vpop.permute.xlu0 %2628 }
 0x838   : > { %11070 = vst [vmem:[#allocation261_spill] sm:$0xff] %v8710_v62 }
 0x83a   : > { %2016 = vrot.lane.b32.xlu1 %v1929_v9, %s6901_s16 }
 0x83b   : > { %2020 = vrot.lane.b32.xlu2 %v1931_v16, %s6901_s16 }
 0x83c   : > { %v8716_v16 = vpop.xlane.xlu1 %1904 }
 0x83e   : > { %v8698_v26 = vpop.permute.xlu2 %2618 }
 0x842   : > { %2148 = vrot.lane.b32.xlu1 %v8543_v18, %s6899_s14  ;;  %v8720_v18 = vpop.permute.xlu0 %2726 }
 0x843   : > { %2152 = vrot.lane.b32.xlu2 %v8567_v21, %s6899_s14  ;;  %11071 = vst [vmem:[#allocation262_spill] sm:$0xff] %v8720_v18  ;;  %v1932_v18 = vmul.f32 %v8594_v36, %v8110_v61 }
 0x846   : > { %v8708_v41 = vpop.permute.xlu2 %2716 }
 0x847   : > { %11069 = vst [vmem:[#allocation260_spill] sm:$0xff] %v8708_v41 }
 0x84a   : > { %2246 = vrot.lane.b32.xlu1 %v8560_v22, %s6906_s21  ;;  %v8730_v35 = vpop.permute.xlu0 %2018 }
 0x84b   : > { %2250 = vrot.lane.b32.xlu2 %v8589_v31, %s6906_s21 }
 0x84e   : > { %v2009_v9 = vpop.permute.xlu2 %2008 }
 0x852   : > { %2632 = vrot.lane.b32.xlu1 %v8560_v22, %s6900_s15 }
 0x853   : > { %2636 = vrot.lane.b32.xlu2 %v8589_v31, %s6900_s15 }
 0x854   : > { %v2713_v49 = vpop.permute.xlu1 %2712 }
 0x855   : > { %v2806_v62 = vsel %vm2547_vm4, %v8579_v51, %v2713_v49  ;;  %v8759_v51 = vpop.permute.xlu0 %2150 }
 0x856   : > { %v8724_v59 = vpop.permute.xlu2 %2140 }
 0x85a   : > { %2730 = vrot.lane.b32.xlu1 %v8567_v21, %s6905_s25  ;;  %v1934_v21 = vmul.f32 %v8604_v40, %v8157_v25  ;;  %v2550_v40 = vsel %vm2547_vm4, %v7786_v33, %v7771_v24 }
 0x85b   : > { %2734 = vrot.lane.b32.xlu2 %v8611_v23, %s6905_s25 }
 0x85c   : > { %v2005_v41 = vpop.permute.xlu1 %2004 }
 0x85d   : > { %v8733_v5 = vsub.f32 %v7896_v12, %v2005_v41  ;;  %v3030_v41 = vsel %vm2322_vm5, %v7788_v27, %v7868_v11  ;;  %v2325_v12 = vsel %vm2322_vm5, %v2135_v30, %v8569_v10  ;;  %v6370_v27 = vunpack.i.l.bf16 %v7351_v45 }
 0x85e   : > { %v8735_v22 = vpop.permute.xlu2 %2238  ;;  %v8786_v10 = vsub.f32 %v7911_v19, %v8606_v54  ;;  %v2804_v30 = vsel %vm2547_vm4, %v8651_v2, %v8535_v53  ;;  %v2548_v54 = vsel %vm2547_vm4, %v7792_v46, %v7691_v63  ;;  %v11088_v19 = vld [vmem:[#allocation59_spill] sm:$0xff] }
 0x85f   : > { %11072 = vst [vmem:[#allocation263_spill] sm:$0xff] %v8733_v5  ;;  %2260 = vrot.lane.b32.xlu0 %v8733_v5, %s6906_s21 }
 0x860   : > { %11073 = vst [vmem:[#allocation264_spill] sm:$0xff] %v8735_v22  ;;  %v3062_v22 = vmul.f32 %v3030_v41, %v2806_v62  ;;  %v3028_v41 = vsel %vm2322_vm5, %v7703_v28, %v7726_v55  ;;  %v8811_v55 = vsub.f32 %v7949_v37, %v2009_v9 }
 0x861   : > { %11074 = vst [vmem:[#allocation265_spill] sm:$0xff] %v8786_v10 }
 0x862   : > { %2022 = vrot.lane.b32.xlu1 %v1932_v18, %s6901_s16  ;;  %v2582_v18 = vmul.f32 %v2550_v40, %v2325_v12  ;;  %v8776_v12 = vpop.permute.xlu0 %2248  ;;  %v2323_v40 = vsel %vm2322_vm5, %v8680_v47, %v8638_v43  ;;  %11075 = vst [vmem:[#allocation266_spill] sm:$0xff] %v8811_v55  ;;  %v6364_v43 = vunpack.i.l.bf16 %v7399_v50 }
 0x863   : > { %2026 = vrot.lane.b32.xlu2 %v1934_v21, %s6901_s16  ;;  %v2580_v2 = vmul.f32 %v2548_v54, %v2323_v40  ;;  %v1935_v40 = vmul.f32 %v8628_v6, %v8177_v32  ;;  %v2553_v6 = vsel %vm2547_vm4, %v7885_v8, %v7889_v15 }
 0x864   : > { %v8752_v36 = vpop.permute.xlu1 %2136  ;;  %v8763_v21 = vsub.f32 %v2582_v18, %v3062_v22  ;;  %v3060_v18 = vmul.f32 %v3028_v41, %v2804_v30  ;;  %v6530_v41 = vunpack.i.l.bf16 %v7546_v14 }
 0x866   : > { %v8757_v49 = vpop.permute.xlu2 %2624  ;;  %v3478_v24 = vmul.f32 %v6370_v27, %v8763_v21  ;;  %v3092_v28 = vsub.f32 %v2580_v2, %v3060_v18  ;;  %v3033_v2 = vsel %vm2322_vm5, %v7908_v7, %v7958_v58  ;;  %v11077_v58 = vld [vmem:[#allocation33_spill] sm:$0xff] }
 0x867   : > { %2646 = vrot.lane.b32.xlu0 %v8733_v5, %s6900_s15 }
 0x868   : > { %v3476_v46 = vmul.f32 %v6364_v43, %v3092_v28  ;;  %v4276_v18 = vmul.f32 %v6530_v41, %v3092_v28  ;;  %v2328_v43 = vsel %vm2322_vm5, %v8724_v59, %v8634_v56  ;;  %v6377_v56 = vunpack.i.h.bf16 %v11077_v58 }
 0x869   : > { %v1937_v41 = vmul.f32 %v8716_v16, %v8220_v42  ;;  %v11080_v16 = vld [vmem:[#allocation98_spill] sm:$0xff] }
 0x86a   : > { %2154 = vrot.lane.b32.xlu1 %v8589_v31, %s6899_s14  ;;  %v8806_v53 = vpop.permute.xlu0 %2634  ;;  %v11164_v31 = vld [vmem:[#allocation8_spill] sm:$0xff] }
 0x86b   : > { %2158 = vrot.lane.b32.xlu2 %v8622_v39, %s6899_s14 }
 0x86c   : > { %v8770_v11 = vpop.permute.xlu1 %2234 }
 0x86e   : > { %v8773_v33 = vpop.permute.xlu2 %2722 }
 0x86f   : > { %3544 = vrot.lane.b32.xlu0 %v3478_v24, %s6907_s22 }
 0x872   : > { %2252 = vrot.lane.b32.xlu1 %v8611_v23, %s6906_s21  ;;  %v8821_v24 = vpop.permute.xlu0 %2732 }
 0x873   : > { %2256 = vrot.lane.b32.xlu2 %v8646_v52, %s6906_s21 }
 0x874   : > { %v8782_v22 = vpop.permute.xlu1 %2620 }
 0x876   : > { %v8791_v62 = vpop.permute.xlu2 %2014 }
 0x877   : > { %2744 = vrot.lane.b32.xlu0 %v8786_v10, %s6905_s25 }
 0x87a   : > { %2638 = vrot.lane.b32.xlu1 %v8611_v23, %s6900_s15  ;;  %v8850_v28 = vpop.permute.xlu0 %2024 }
 0x87b   : > { %2642 = vrot.lane.b32.xlu2 %v8646_v52, %s6900_s15 }
 0x87c   : > { %v2719_v27 = vpop.permute.xlu1 %2718 }
 0x87d   : > { %v2809_v54 = vsel %vm2547_vm4, %v8653_v1, %v2719_v27  ;;  %v2585_v27 = vmul.f32 %v2553_v6, %v2328_v43 }
 0x87e   : > { %v8813_v47 = vpop.permute.xlu2 %2146 }
 0x87f   : > { %2168 = vrot.lane.b32.xlu0 %v8811_v55, %s6899_s14 }
 0x882   : > { %2736 = vrot.lane.b32.xlu1 %v8622_v39, %s6905_s25  ;;  %v11115_v39 = vld [vmem:[#allocation110_spill] sm:$0xff] }
 0x883   : > { %3540 = vrot.lane.b32.xlu2 %v3476_v46, %s6907_s22 }
 0x884   : > { %v2011_v63 = vpop.permute.xlu1 %2010 }
 0x885   : > { %v8824_v30 = vsub.f32 %v7971_v3, %v2011_v63  ;;  %v3065_v63 = vmul.f32 %v3033_v2, %v2809_v54  ;;  %v8874_v54 = vsub.f32 %v7984_v17, %v8676_v57  ;;  %v2805_v2 = vsel %vm2547_vm4, %v8706_v60, %v8661_v4  ;;  %v11081_v57 = vld [vmem:[#allocation93_spill] sm:$0xff] }
 0x886   : > { %v8826_v9 = vpop.permute.xlu2 %2244 }
 0x887   : > { %11076 = vst [vmem:[#allocation267_spill] sm:$0xff] %v8824_v30  ;;  %2266 = vrot.lane.b32.xlu0 %v8824_v30, %s6906_s21  ;;  %v8854_v7 = vsub.f32 %v2585_v27, %v3065_v63  ;;  %v11079_v63 = vld [vmem:[#allocation80_spill] sm:$0xff]  ;;  %v2324_v27 = vsel %vm2322_vm5, %v8557_v0, %v8694_v48  ;;  %v11083_v48 = vld [vmem:[#allocation119_spill] sm:$0xff]  ;;  %v11084_v0 = vld [vmem:[#allocation134_spill] sm:$0xff] }
 0x888   : > { %11078 = vst [vmem:[#allocation33_spill] sm:$0xff] %v8874_v54  ;;  %v3029_v6 = vsel %vm2322_vm5, %v11080_v16, %v11079_v63 }
 0x889   : > { %v3481_v8 = vmul.f32 %v6377_v56, %v8854_v7  ;;  %v3061_v56 = vmul.f32 %v3029_v6, %v2805_v2  ;;  %v3035_v2 = vsel %vm2322_vm5, %v11084_v0, %v11083_v48  ;;  %v6536_v48 = vunpack.i.l.bf16 %v11088_v19 }
 0x88a   : > { %2028 = vrot.lane.b32.xlu1 %v1935_v40, %s6901_s16  ;;  %v8867_v40 = vpop.permute.xlu0 %2156 }
 0x88b   : > { %4340 = vrot.lane.b32.xlu2 %v4276_v18, %s6907_s22 }
 0x88c   : > { %v8843_v46 = vpop.permute.xlu1 %2142 }
 0x88e   : > { %v8848_v1 = vpop.permute.xlu2 %2630 }
 0x88f   : > { %2652 = vrot.lane.b32.xlu0 %v8824_v30, %s6900_s15 }
 0x892   : > { %2160 = vrot.lane.b32.xlu1 %v8646_v52, %s6899_s14  ;;  %v8896_v60 = vpop.permute.xlu0 %2254  ;;  %v11116_v52 = vld [vmem:[#allocation102_spill] sm:$0xff] }
 0x893   : > { %2740 = vrot.lane.b32.xlu2 %v8670_v38, %s6905_s25 }
 0x894   : > { %v2241_v59 = vpop.permute.xlu1 %2240 }
 0x895   : > { %v2330_v16 = vsel %vm2322_vm5, %v8686_v13, %v2241_v59  ;;  %v4278_v59 = vmul.f32 %v6536_v48, %v8763_v21  ;;  %v11092_v48 = vld [vmem:[#allocation107_spill] sm:$0xff] }
 0x896   : > { %v8862_v15 = vpop.permute.xlu2 %2728 }
 0x897   : > { %3550 = vrot.lane.b32.xlu0 %v3481_v8, %s6907_s22  ;;  %v11082_v8 = vld [vmem:[#allocation85_spill] sm:$0xff] }
 0x89a   : > { %2258 = vrot.lane.b32.xlu1 %v8670_v38, %s6906_s21  ;;  %v8924_v0 = vpop.permute.xlu0 %2640 }
 0x89b   : > { %2032 = vrot.lane.b32.xlu2 %v1937_v41, %s6901_s16  ;;  %v2549_v41 = vsel %vm2547_vm4, %v11082_v8, %v11081_v57  ;;  %v11086_v57 = vld [vmem:[#allocation131_spill] sm:$0xff]  ;;  %v11087_v8 = vld [vmem:[#allocation120_spill] sm:$0xff] }
 0x89c   : > { %v2627_v18 = vpop.permute.xlu1 %2626  ;;  %v2581_v3 = vmul.f32 %v2549_v41, %v2324_v27  ;;  %v6365_v27 = vunpack.i.h.bf16 %v7399_v50  ;;  %v2555_v41 = vsel %vm2547_vm4, %v11087_v8, %v11086_v57  ;;  %v11089_v50 = vld [vmem:[#allocation77_spill] sm:$0xff]  ;;  %v2326_v8 = vsel %vm2322_vm5, %v8752_v36, %v8688_v20 }
 0x89d   : > { %v2811_v4 = vsel %vm2547_vm4, %v2627_v18, %v8773_v33  ;;  %v8907_v33 = vsub.f32 %v8017_v44, %v8791_v62  ;;  %v11095_v36 = vld [vmem:[#allocation261_spill] sm:$0xff] }
 0x89e   : > { %v8879_v43 = vpop.permute.xlu2 %2020  ;;  %v3093_v63 = vsub.f32 %v2581_v3, %v3061_v56  ;;  %v3067_v18 = vmul.f32 %v3035_v2, %v2811_v4  ;;  %v2587_v3 = vmul.f32 %v2555_v41, %v2330_v16  ;;  %v6594_v56 = vunpack.i.h.bf16 %v11089_v50 }
 0x89f   : > { %2750 = vrot.lane.b32.xlu0 %v8874_v54, %s6905_s25  ;;  %11085 = vst [vmem:[#allocation80_spill] sm:$0xff] %v8907_v33  ;;  %v6531_v16 = vunpack.i.h.bf16 %v7546_v14 }
 0x8a0   : > { %v3477_v13 = vmul.f32 %v6365_v27, %v3093_v63  ;;  %v8919_v62 = vsub.f32 %v2587_v3, %v3067_v18 }
 0x8a1   : > { %v4277_v21 = vmul.f32 %v6531_v16, %v3093_v63  ;;  %v11091_v63 = vld [vmem:[#allocation91_spill] sm:$0xff] }
 0x8a2   : > { %2644 = vrot.lane.b32.xlu1 %v8670_v38, %s6900_s15  ;;  %v4283_v2 = vmul.f32 %v6594_v56, %v8919_v62  ;;  %v8942_v14 = vpop.permute.xlu0 %2738  ;;  %v2551_v3 = vsel %vm2547_vm4, %v11092_v48, %v11091_v63  ;;  %v11093_v56 = vld [vmem:[#allocation92_spill] sm:$0xff]  ;;  %v11097_v63 = vld [vmem:[#allocation129_spill] sm:$0xff] }
 0x8a3   : > { %2164 = vrot.lane.b32.xlu2 %v8733_v5, %s6899_s14 }
 0x8a4   : > { %v2725_v6 = vpop.permute.xlu1 %2724 }
 0x8a6   : > { %v8913_v38 = vpop.permute.xlu2 %2152 }
 0x8a7   : > { %2174 = vrot.lane.b32.xlu0 %v8907_v33, %s6899_s14 }
 0x8aa   : > { %3542 = vrot.lane.b32.xlu1 %v3477_v13, %s6907_s22  ;;  %v2807_v13 = vsel %vm2547_vm4, %v8698_v26, %v8596_v34  ;;  %v11098_v26 = vld [vmem:[#allocation259_spill] sm:$0xff] }
 0x8ab   : > { %4344 = vrot.lane.b32.xlu2 %v4278_v59, %s6907_s22  ;;  %v2583_v59 = vmul.f32 %v2551_v3, %v2326_v8  ;;  %v2331_v34 = vsel %vm2322_vm5, %v8813_v47, %v11098_v26 }
 0x8ac   : > { %v2017_v4 = vpop.permute.xlu1 %2016 }
 0x8ad   : > { %v8935_v27 = vsub.f32 %v8043_v29, %v2017_v4  ;;  %v11094_v4 = vld [vmem:[#allocation95_spill] sm:$0xff] }
 0x8ae   : > { %v8928_v57 = vpop.permute.xlu2 %2250  ;;  %v3031_v20 = vsel %vm2322_vm5, %v11094_v4, %v11093_v56  ;;  %v11100_v4 = vld [vmem:[#allocation125_spill] sm:$0xff] }
 0x8af   : > { %4354 = vrot.lane.b32.xlu0 %v4283_v2, %s6907_s22  ;;  %11090 = vst [vmem:[#allocation98_spill] sm:$0xff] %v8935_v27  ;;  %v2812_v2 = vsel %vm2547_vm4, %v11095_v36, %v2725_v6  ;;  %v3063_v16 = vmul.f32 %v3031_v20, %v2807_v13  ;;  %v11099_v6 = vld [vmem:[#allocation126_spill] sm:$0xff]  ;;  %v6371_v20 = vunpack.i.h.bf16 %v7351_v45 }
 0x8b0   : > { %v2556_v36 = vsel %vm2547_vm4, %v11100_v4, %v11099_v6  ;;  %v11102_v6 = vld [vmem:[#allocation128_spill] sm:$0xff]  ;;  %v11103_v4 = vld [vmem:[#allocation147_spill] sm:$0xff] }
 0x8b1   : > { %v3095_v3 = vsub.f32 %v2583_v59, %v3063_v16  ;;  %v2588_v29 = vmul.f32 %v2556_v36, %v2331_v34  ;;  %v11101_v59 = vld [vmem:[#allocation36_spill] sm:$0xff]  ;;  %v2557_v36 = vsel %vm2547_vm4, %v11103_v4, %v11102_v6 }
 0x8b2   : > { %4342 = vrot.lane.b32.xlu1 %v4277_v21, %s6907_s22  ;;  %v11096_v21 = vld [vmem:[#allocation141_spill] sm:$0xff] }
 0x8b3   : > { %2262 = vrot.lane.b32.xlu2 %v8786_v10, %s6906_s21  ;;  %v3036_v48 = vsel %vm2322_vm5, %v11097_v63, %v11096_v21  ;;  %v3479_v21 = vmul.f32 %v6371_v20, %v3095_v3  ;;  %v8977_v63 = vpop.permute.xlu0 %2030 }
 0x8b4   : > { %v2149_v18 = vpop.permute.xlu1 %2148  ;;  %v3068_v56 = vmul.f32 %v3036_v48, %v2812_v2  ;;  %v6386_v2 = vunpack.i.l.bf16 %v11101_v59  ;;  %v6537_v48 = vunpack.i.h.bf16 %v11088_v19  ;;  %v11104_v19 = vld [vmem:[#allocation262_spill] sm:$0xff] }
 0x8b5   : > { %v2813_v20 = vsel %vm2547_vm4, %v8848_v1, %v11104_v19 }
 0x8b6   : > { %v8940_v41 = vpop.permute.xlu2 %2636  ;;  %v8979_v47 = vsub.f32 %v2588_v29, %v3068_v56  ;;  %v4279_v34 = vmul.f32 %v6537_v48, %v3095_v3  ;;  %v2332_v56 = vsel %vm2322_vm5, %v2149_v18, %v8826_v9  ;;  %v11105_v3 = vld [vmem:[#allocation139_spill] sm:$0xff]  ;;  %v11107_v9 = vld [vmem:[#allocation140_spill] sm:$0xff] }
 0x8b7   : > { %2272 = vrot.lane.b32.xlu0 %v8935_v27, %s6906_s21  ;;  %v11108_v18 = vld [vmem:[#allocation132_spill] sm:$0xff] }
 0x8b8   : > { %v3484_v45 = vmul.f32 %v6386_v2, %v8979_v47  ;;  %v9007_v2 = vsub.f32 %v11105_v3, %v8730_v35  ;;  %v3037_v48 = vsel %vm2322_vm5, %v11108_v18, %v11107_v9  ;;  %v11109_v35 = vld [vmem:[#allocation70_spill] sm:$0xff]  ;;  %v11112_v18 = vld [vmem:[#allocation101_spill] sm:$0xff] }
 0x8b9   : > { %v6583_v1 = vunpack.i.h.bf16 %v11109_v35 }
 0x8ba   : > { %2742 = vrot.lane.b32.xlu1 %v8733_v5, %s6905_s25  ;;  %11106 = vst [vmem:[#allocation93_spill] sm:$0xff] %v9007_v2  ;;  %v11114_v5 = vld [vmem:[#allocation254_spill] sm:$0xff] }
 0x8bb   : > { %2648 = vrot.lane.b32.xlu2 %v8786_v10, %s6900_s15  ;;  %v8992_v29 = vpop.permute.xlu0 %2162  ;;  %v2327_v44 = vsel %vm2322_vm5, %v11114_v5, %v8770_v11  ;;  %v11117_v5 = vld [vmem:[#allocation146_spill] sm:$0xff] }
 0x8bc   : > { %v8967_v8 = vpop.permute.xlu1 %2246  ;;  %v9052_v11 = vsub.f32 %v11117_v5, %v8879_v43  ;;  %v11126_v5 = vld [vmem:[#allocation111_spill] sm:$0xff] }
 0x8be   : > { %v8972_v13 = vpop.permute.xlu2 %2734  ;;  %11118 = vst [vmem:[#allocation85_spill] sm:$0xff] %v9052_v11 }
 0x8bf   : > { %2658 = vrot.lane.b32.xlu0 %v8935_v27, %s6900_s15 }
 0x8c2   : > { %2166 = vrot.lane.b32.xlu1 %v8786_v10, %s6899_s14  ;;  %v3069_v10 = vmul.f32 %v3037_v48, %v2813_v20  ;;  %v11113_v48 = vld [vmem:[#allocation113_spill] sm:$0xff] }
 0x8c3   : > { %3546 = vrot.lane.b32.xlu2 %v3479_v21, %s6907_s22  ;;  %v3032_v3 = vsel %vm2322_vm5, %v11113_v48, %v11112_v18 }
 0x8c4   : > { %v8985_v16 = vpop.permute.xlu1 %2632 }
 0x8c6   : > { %v8989_v26 = vpop.permute.xlu2 %2026 }
 0x8c7   : > { %3556 = vrot.lane.b32.xlu0 %v3484_v45, %s6907_s22  ;;  %v2589_v45 = vmul.f32 %v2557_v36, %v2332_v56  ;;  %v11110_v36 = vld [vmem:[#allocation260_spill] sm:$0xff] }
 0x8c8   : > { %v2808_v19 = vsel %vm2547_vm4, %v8782_v22, %v11110_v36  ;;  %v2552_v22 = vsel %vm2547_vm4, %v11116_v52, %v11115_v39 }
 0x8c9   : > { %v9016_v6 = vsub.f32 %v2589_v45, %v3069_v10  ;;  %v11111_v10 = vld [vmem:[#allocation61_spill] sm:$0xff]  ;;  %v3064_v17 = vmul.f32 %v3032_v3, %v2808_v19  ;;  %v2584_v37 = vmul.f32 %v2552_v22, %v2327_v44  ;;  %v6376_v3 = vunpack.i.l.bf16 %v11077_v58  ;;  %v11121_v58 = vld [vmem:[#allocation264_spill] sm:$0xff] }
 0x8ca   : > { %4346 = vrot.lane.b32.xlu1 %v4279_v34, %s6907_s22  ;;  %v6548_v45 = vunpack.i.h.bf16 %v11111_v10  ;;  %v2329_v43 = vsel %vm2322_vm5, %v8843_v46, %v11121_v58 }
 0x8cb   : > { %2746 = vrot.lane.b32.xlu2 %v8811_v55, %s6905_s25  ;;  %v4285_v20 = vmul.f32 %v6583_v1, %v9016_v6  ;;  %v3096_v18 = vsub.f32 %v2584_v37, %v3064_v17 }
 0x8cc   : > { %v2731_v21 = vpop.permute.xlu1 %2730  ;;  %v4281_v1 = vmul.f32 %v6548_v45, %v8854_v7  ;;  %v6547_v7 = vunpack.i.l.bf16 %v11111_v10  ;;  %v11123_v45 = vld [vmem:[#allocation127_spill] sm:$0xff] }
 0x8cd   : > { %v3480_v44 = vmul.f32 %v6376_v3, %v3096_v18  ;;  %v2815_v58 = vsel %vm2547_vm4, %v8806_v53, %v2731_v21 }
 0x8ce   : > { %v9012_v34 = vpop.permute.xlu2 %2158  ;;  %v4280_v3 = vmul.f32 %v6547_v7, %v3096_v18  ;;  %v2334_v18 = vsel %vm2322_vm5, %v8913_v38, %v8776_v12  ;;  %v11132_v38 = vld [vmem:[#allocation34_spill] sm:$0xff] }
 0x8cf   : > { %2756 = vrot.lane.b32.xlu0 %v9007_v2, %s6905_s25  ;;  %v6392_v12 = vunpack.i.h.bf16 %v11132_v38 }
 0x8d1   : > { %v9018_v4 = vpop.permute.xlu0 %2260 }
 0x8d2   : > { %2264 = vrot.lane.b32.xlu1 %v8811_v55, %s6906_s21 }
 0x8d3   : > { %2170 = vrot.lane.b32.xlu2 %v8824_v30, %s6899_s14 }
 0x8d4   : > { %v2023_v56 = vpop.permute.xlu1 %2022 }
 0x8d5   : > { %v9065_v37 = vsub.f32 %v8110_v61, %v2023_v56  ;;  %v11125_v61 = vld [vmem:[#allocation115_spill] sm:$0xff] }
 0x8d6   : > { %v9029_v9 = vpop.permute.xlu2 %2256  ;;  %v3034_v46 = vsel %vm2322_vm5, %v11126_v5, %v11125_v61  ;;  %v11129_v5 = vld [vmem:[#allocation152_spill] sm:$0xff] }
 0x8d7   : > { %4358 = vrot.lane.b32.xlu0 %v4285_v20, %s6907_s22  ;;  %11120 = vst [vmem:[#allocation134_spill] sm:$0xff] %v9065_v37  ;;  %v11122_v20 = vld [vmem:[#allocation108_spill] sm:$0xff] }
 0x8d8   : > { %v2554_v22 = vsel %vm2547_vm4, %v11123_v45, %v11122_v20  ;;  %v11127_v20 = vld [vmem:[#allocation157_spill] sm:$0xff]  ;;  %v11128_v45 = vld [vmem:[#allocation156_spill] sm:$0xff] }
 0x8d9   : > { %v9043_v36 = vpop.permute.xlu0 %2646 }
 0x8da   : > { %2650 = vrot.lane.b32.xlu1 %v8811_v55, %s6900_s15 }
 0x8db   : > { %4350 = vrot.lane.b32.xlu2 %v4281_v1, %s6907_s22  ;;  %v11124_v1 = vld [vmem:[#allocation257_spill] sm:$0xff] }
 0x8dc   : > { %v9048_v48 = vpop.permute.xlu1 %2154  ;;  %v2810_v56 = vsel %vm2547_vm4, %v8757_v49, %v11124_v1  ;;  %v3039_v49 = vsel %vm2322_vm5, %v11128_v45, %v11127_v20  ;;  %v11131_v1 = vld [vmem:[#allocation32_spill] sm:$0xff] }
 0x8dd   : > { %v3066_v55 = vmul.f32 %v3034_v46, %v2810_v56  ;;  %v3071_v61 = vmul.f32 %v3039_v49, %v2815_v58  ;;  %v6381_v56 = vunpack.i.l.bf16 %v11131_v1 }
 0x8de   : > { %v9055_v52 = vpop.permute.xlu2 %2642 }
 0x8df   : > { %2180 = vrot.lane.b32.xlu0 %v9052_v11, %s6899_s14 }
 0x8e1   : > { %v9059_v39 = vpop.permute.xlu0 %3544 }
 0x8e2   : > { %11119 = vst [vmem:[#allocation119_spill] sm:$0xff] %v9059_v39  ;;  %3548 = vrot.lane.b32.xlu1 %v3480_v44, %s6907_s22  ;;  %v2586_v44 = vmul.f32 %v2554_v22, %v2329_v43  ;;  %v11130_v22 = vld [vmem:[#allocation144_spill] sm:$0xff] }
 0x8e3   : > { %2268 = vrot.lane.b32.xlu2 %v8874_v54, %s6906_s21  ;;  %v2559_v53 = vsel %vm2547_vm4, %v11130_v22, %v11129_v5  ;;  %v6593_v22 = vunpack.i.l.bf16 %v11089_v50 }
 0x8e4   : > { %v2253_v17 = vpop.permute.xlu1 %2252  ;;  %v3098_v43 = vsub.f32 %v2586_v44, %v3066_v55 }
 0x8e6   : > { %v9071_v19 = vpop.permute.xlu2 %3540  ;;  %v3482_v46 = vmul.f32 %v6381_v56, %v3098_v43  ;;  %v4282_v56 = vmul.f32 %v6593_v22, %v3098_v43  ;;  %v9148_v43 = vsub.f32 %v8157_v25, %v8989_v26  ;;  %v11141_v26 = vld [vmem:[#allocation79_spill] sm:$0xff] }
 0x8e7   : > { %2278 = vrot.lane.b32.xlu0 %v9065_v37, %s6906_s21 }
 0x8e8   : > { %11137 = vst [vmem:[#allocation120_spill] sm:$0xff] %v9148_v43 }
 0x8e9   : > { %v9081_v10 = vpop.permute.xlu0 %2744 }
 0x8ea   : > { %4348 = vrot.lane.b32.xlu1 %v4280_v3, %s6907_s22  ;;  %v2591_v3 = vmul.f32 %v2559_v53, %v2334_v18 }
 0x8eb   : > { %2654 = vrot.lane.b32.xlu2 %v8874_v54, %s6900_s15 }
 0x8ec   : > { %v2639_v7 = vpop.permute.xlu1 %2638  ;;  %v9105_v20 = vsub.f32 %v2591_v3, %v3071_v61  ;;  %v11133_v61 = vld [vmem:[#allocation154_spill] sm:$0xff] }
 0x8ed   : > { %v9125_v5 = vsub.f32 %v11133_v61, %v8850_v28  ;;  %v11135_v28 = vld [vmem:[#allocation159_spill] sm:$0xff] }
 0x8ee   : > { %v9100_v21 = vpop.permute.xlu2 %4340  ;;  %v3487_v44 = vmul.f32 %v6392_v12, %v9105_v20  ;;  %v11136_v12 = vld [vmem:[#allocation169_spill] sm:$0xff] }
 0x8ef   : > { %2664 = vrot.lane.b32.xlu0 %v9065_v37, %s6900_s15  ;;  %11134 = vst [vmem:[#allocation131_spill] sm:$0xff] %v9125_v5  ;;  %v3041_v50 = vsel %vm2322_vm5, %v11136_v12, %v11135_v28 }
 0x8f1   : > { %v9107_v45 = vpop.permute.xlu0 %2168 }
 0x8f2   : > { %2748 = vrot.lane.b32.xlu1 %v8824_v30, %s6905_s25 }
 0x8f3   : > { %3552 = vrot.lane.b32.xlu2 %v3482_v46, %s6907_s22  ;;  %v2817_v46 = vsel %vm2547_vm4, %v2639_v7, %v8972_v13  ;;  %v11138_v13 = vld [vmem:[#allocation164_spill] sm:$0xff] }
 0x8f4   : > { %v2737_v55 = vpop.permute.xlu1 %2736  ;;  %v3073_v22 = vmul.f32 %v3041_v50, %v2817_v46  ;;  %v11139_v7 = vld [vmem:[#allocation160_spill] sm:$0xff] }
 0x8f5   : > { %v2818_v25 = vsel %vm2547_vm4, %v8924_v0, %v2737_v55  ;;  %v2814_v0 = vsel %vm2547_vm4, %v8985_v16, %v8862_v15  ;;  %v11151_v15 = vld [vmem:[#allocation149_spill] sm:$0xff]  ;;  %v11152_v16 = vld [vmem:[#allocation143_spill] sm:$0xff] }
 0x8f6   : > { %v9114_v58 = vpop.permute.xlu2 %2740 }
 0x8f7   : > { %3562 = vrot.lane.b32.xlu0 %v3487_v44, %s6907_s22  ;;  %v2336_v44 = vsel %vm2322_vm5, %v8867_v40, %v2253_v17  ;;  %v6623_v17 = vunpack.i.h.bf16 %v11141_v26 }
 0x8f9   : > { %v9117_v49 = vpop.permute.xlu0 %2266 }
 0x8fa   : > { %2172 = vrot.lane.b32.xlu1 %v8874_v54, %s6899_s14 }
 0x8fb   : > { %2752 = vrot.lane.b32.xlu2 %v8907_v33, %s6905_s25 }
 0x8fc   : > { %v2029_v18 = vpop.permute.xlu1 %2028 }
 0x8fe   : > { %v9128_v53 = vpop.permute.xlu2 %2032 }
 0x8ff   : > { %2762 = vrot.lane.b32.xlu0 %v9125_v5, %s6905_s25 }
 0x901   : > { %v9132_v3 = vpop.permute.xlu0 %2652 }
 0x902   : > { %4352 = vrot.lane.b32.xlu1 %v4282_v56, %s6907_s22  ;;  %v2561_v56 = vsel %vm2547_vm4, %v11139_v7, %v11138_v13  ;;  %v6382_v13 = vunpack.i.h.bf16 %v11131_v1  ;;  %v11144_v1 = vld [vmem:[#allocation172_spill] sm:$0xff] }
 0x903   : > { %2176 = vrot.lane.b32.xlu2 %v8935_v27, %s6899_s14  ;;  %v2593_v54 = vmul.f32 %v2561_v56, %v2336_v44  ;;  %v6387_v56 = vunpack.i.h.bf16 %v11101_v59 }
 0x904   : > { %v9144_v61 = vpop.permute.xlu1 %2160 }
 0x905   : > { %v9157_v28 = vsub.f32 %v2593_v54, %v3073_v22  ;;  %v9181_v22 = vsub.f32 %v8177_v32, %v2029_v18  ;;  %v11145_v18 = vld [vmem:[#allocation171_spill] sm:$0xff]  ;;  %v2337_v32 = vsel %vm2322_vm5, %v9012_v34, %v8896_v60 }
 0x906   : > { %v9153_v30 = vpop.permute.xlu2 %2164  ;;  %v3042_v59 = vsel %vm2322_vm5, %v11145_v18, %v11144_v1  ;;  %v11149_v1 = vld [vmem:[#allocation153_spill] sm:$0xff] }
 0x907   : > { %2186 = vrot.lane.b32.xlu0 %v9148_v43, %s6899_s14  ;;  %v4289_v12 = vmul.f32 %v6623_v17, %v9157_v28  ;;  %11142 = vst [vmem:[#allocation77_spill] sm:$0xff] %v9181_v22  ;;  %v3483_v17 = vmul.f32 %v6382_v13, %v8919_v62  ;;  %v11146_v13 = vld [vmem:[#allocation167_spill] sm:$0xff] }
 0x909   : > { %v9159_v40 = vpop.permute.xlu0 %3550 }
 0x90a   : > { %11140 = vst [vmem:[#allocation59_spill] sm:$0xff] %v9159_v40  ;;  %2270 = vrot.lane.b32.xlu1 %v8907_v33, %s6906_s21 }
 0x90b   : > { %2274 = vrot.lane.b32.xlu2 %v9007_v2, %s6906_s21 }
 0x90c   : > { %v9166_v46 = vpop.permute.xlu1 %2258 }
 0x90e   : > { %v9169_v50 = vpop.permute.xlu2 %4344 }
 0x90f   : > { %4366 = vrot.lane.b32.xlu0 %v4289_v12, %s6907_s22  ;;  %v3485_v12 = vmul.f32 %v6387_v56, %v9016_v6  ;;  %v3074_v6 = vmul.f32 %v3042_v59, %v2818_v25  ;;  %v11147_v56 = vld [vmem:[#allocation163_spill] sm:$0xff]  ;;  %v2333_v25 = vsel %vm2322_vm5, %v8759_v51, %v8967_v8 }
 0x910   : > { %v2562_v40 = vsel %vm2547_vm4, %v11147_v56, %v11146_v13 }
 0x911   : > { %v9172_v54 = vpop.permute.xlu0 %2750 }
 0x912   : > { %2656 = vrot.lane.b32.xlu1 %v8907_v33, %s6900_s15 }
 0x913   : > { %2660 = vrot.lane.b32.xlu2 %v9007_v2, %s6900_s15 }
 0x914   : > { %v9178_v44 = vpop.permute.xlu1 %2644 }
 0x916   : > { %v9184_v7 = vpop.permute.xlu2 %2262 }
 0x917   : > { %2284 = vrot.lane.b32.xlu0 %v9181_v22, %s6906_s21 }
 0x919   : > { %v9191_v33 = vpop.permute.xlu0 %2174 }
 0x91a   : > { %11143 = vst [vmem:[#allocation91_spill] sm:$0xff] %v9191_v33  ;;  %3554 = vrot.lane.b32.xlu1 %v3483_v17, %s6907_s22  ;;  %v2594_v17 = vmul.f32 %v2562_v40, %v2337_v32  ;;  %v2558_v32 = vsel %vm2547_vm4, %v11152_v16, %v11151_v15  ;;  %v11153_v40 = vld [vmem:[#allocation39_spill] sm:$0xff]  ;;  %v2816_v33 = vsel %vm2547_vm4, %v8940_v41, %v8821_v24  ;;  %v11172_v24 = vld [vmem:[#allocation180_spill] sm:$0xff] }
 0x91b   : > { %3558 = vrot.lane.b32.xlu2 %v3485_v12, %s6907_s22  ;;  %v11148_v12 = vld [vmem:[#allocation142_spill] sm:$0xff]  ;;  %v6401_v13 = vunpack.i.l.bf16 %v11153_v40  ;;  %v2590_v56 = vmul.f32 %v2558_v32, %v2333_v25  ;;  %v2340_v41 = vsel %vm2322_vm5, %v9153_v30, %v9018_v4 }
 0x91c   : > { %v9203_v62 = vpop.permute.xlu1 %3542  ;;  %v3038_v60 = vsel %vm2322_vm5, %v11149_v1, %v11148_v12  ;;  %v9221_v18 = vsub.f32 %v2594_v17, %v3074_v6  ;;  %v6582_v6 = vunpack.i.l.bf16 %v11109_v35  ;;  %v11155_v17 = vld [vmem:[#allocation64_spill] sm:$0xff] }
 0x91d   : > { %v3070_v34 = vmul.f32 %v3038_v60, %v2814_v0  ;;  %v6605_v1 = vunpack.i.l.bf16 %v11155_v17 }
 0x91e   : > { %v9211_v55 = vpop.permute.xlu2 %2648  ;;  %v3490_v8 = vmul.f32 %v6401_v13, %v9221_v18  ;;  %v4284_v60 = vmul.f32 %v6582_v6, %v8979_v47 }
 0x91f   : > { %2670 = vrot.lane.b32.xlu0 %v9181_v22, %s6900_s15  ;;  %v3102_v51 = vsub.f32 %v2590_v56, %v3070_v34  ;;  %v11156_v34 = vld [vmem:[#allocation168_spill] sm:$0xff]  ;;  %v9262_v56 = vsub.f32 %v8220_v42, %v9128_v53 }
 0x920   : > { %v9246_v32 = vsub.f32 %v11156_v34, %v8977_v63 }
 0x921   : > { %v9223_v59 = vpop.permute.xlu0 %4354  ;;  %v4286_v15 = vmul.f32 %v6605_v1, %v3102_v51  ;;  %11158 = vst [vmem:[#allocation261_spill] sm:$0xff] %v9262_v56 }
 0x922   : > { %11150 = vst [vmem:[#allocation107_spill] sm:$0xff] %v9223_v59  ;;  %2754 = vrot.lane.b32.xlu1 %v8935_v27, %s6905_s25 }
 0x923   : > { %2758 = vrot.lane.b32.xlu2 %v9052_v11, %s6905_s25  ;;  %11157 = vst [vmem:[#allocation95_spill] sm:$0xff] %v9246_v32 }
 0x924   : > { %v4343_v12 = vpop.permute.xlu1 %4342 }
 0x926   : > { %v9235_v0 = vpop.permute.xlu2 %3546 }
 0x927   : > { %11154 = vst [vmem:[#allocation92_spill] sm:$0xff] %v9235_v0  ;;  %3568 = vrot.lane.b32.xlu0 %v3490_v8, %s6907_s22  ;;  %v11159_v8 = vld [vmem:[#allocation46_spill] sm:$0xff]  ;;  %v2335_v0 = vsel %vm2322_vm5, %v9048_v48, %v8928_v57  ;;  %v11169_v48 = vld [vmem:[#allocation155_spill] sm:$0xff] }
 0x928   : > { %v6559_v6 = vunpack.i.h.bf16 %v11159_v8  ;;  %v11168_v57 = vld [vmem:[#allocation158_spill] sm:$0xff] }
 0x929   : > { %v9240_v16 = vpop.permute.xlu0 %2272 }
 0x92a   : > { %4356 = vrot.lane.b32.xlu1 %v4284_v60, %s6907_s22  ;;  %v6558_v60 = vunpack.i.l.bf16 %v11159_v8  ;;  %v11165_v8 = vld [vmem:[#allocation150_spill] sm:$0xff] }
 0x92b   : > { %4360 = vrot.lane.b32.xlu2 %v4286_v15, %s6907_s22  ;;  %v11161_v15 = vld [vmem:[#allocation241_spill] sm:$0xff] }
 0x92c   : > { %v2743_v25 = vpop.permute.xlu1 %2742  ;;  %v4117_v34 = vmul.f32 %v6559_v6, %v11161_v15  ;;  %v11166_v6 = vld [vmem:[#allocation162_spill] sm:$0xff] }
 0x92d   : > { %v2560_v23 = vsel %vm2547_vm4, %v11166_v6, %v11165_v8  ;;  %v11170_v8 = vld [vmem:[#allocation81_spill] sm:$0xff] }
 0x92e   : > { %v9248_v35 = vpop.permute.xlu2 %2746  ;;  %v4437_v27 = vadd.f32 %v4343_v12, %v4117_v34  ;;  %v11167_v12 = vld [vmem:[#allocation84_spill] sm:$0xff] }
 0x92f   : > { %2768 = vrot.lane.b32.xlu0 %v9246_v32, %s6905_s25 }
 0x930   : > { %v4757_v34 = vadd.f32 %v11167_v12, %v4437_v27 }
 0x931   : > { %v9252_v13 = vpop.permute.xlu0 %2658 }
 0x932   : > { %2178 = vrot.lane.b32.xlu1 %v9007_v2, %s6899_s14  ;;  %v11162_v2 = vld [vmem:[#allocation240_spill] sm:$0xff] }
 0x933   : > { %2182 = vrot.lane.b32.xlu2 %v9065_v37, %s6899_s14  ;;  %v4116_v42 = vmul.f32 %v6558_v60, %v11162_v2  ;;  %v2592_v60 = vmul.f32 %v2560_v23, %v2335_v0  ;;  %v11171_v23 = vld [vmem:[#allocation187_spill] sm:$0xff] }
 0x934   : > { %v9258_v47 = vpop.permute.xlu1 %2166  ;;  %v3045_v27 = vsel %vm2322_vm5, %v11172_v24, %v11171_v23 }
 0x935   : > { %v4436_v39 = vadd.f32 %v9100_v21, %v4116_v42  ;;  %v2821_v42 = vsel %vm2547_vm4, %v9043_v36, %v2743_v25 }
 0x936   : > { %v9264_v63 = vpop.permute.xlu2 %2170  ;;  %v3077_v12 = vmul.f32 %v3045_v27, %v2821_v42 }
 0x937   : > { %2192 = vrot.lane.b32.xlu0 %v9262_v56, %s6899_s14  ;;  %v4756_v6 = vadd.f32 %v11170_v8, %v4436_v39  ;;  %v11174_v39 = vld [vmem:[#allocation179_spill] sm:$0xff]  ;;  %v11175_v8 = vld [vmem:[#allocation22_spill] sm:$0xff] }
 0x939   : > { %v9269_v1 = vpop.permute.xlu0 %3556  ;;  %v6668_v25 = vpack.i.bf16 %v4757_v34, %v4756_v6  ;;  %v11177_v34 = vld [vmem:[#allocation37_spill] sm:$0xff]  ;;  %v11179_v6 = vld [vmem:[#allocation178_spill] sm:$0xff] }
 0x93a   : > { %11160 = vst [vmem:[#allocation141_spill] sm:$0xff] %v9269_v1  ;;  %2276 = vrot.lane.b32.xlu1 %v9052_v11, %s6906_s21  ;;  %v6407_v42 = vunpack.i.h.bf16 %v11177_v34 }
 0x93b   : > { %2280 = vrot.lane.b32.xlu2 %v9125_v5, %s6906_s21 }
 0x93c   : > { %v9277_v53 = vpop.permute.xlu1 %4346 }
 0x93e   : > { %v9283_v1 = vpop.permute.xlu2 %4350 }
 0x93f   : > { %11163 = vst [vmem:[#allocation129_spill] sm:$0xff] %v9283_v1  ;;  %6664 = vperm.xlu0 %6589, %v11164_v31   ;;  %v3040_v1 = vsel %vm2322_vm5, %v11169_v48, %v11168_v57 }
 0x940   : > { %v3072_v21 = vmul.f32 %v3040_v1, %v2816_v33  ;;  %v6391_v33 = vunpack.i.l.bf16 %v11132_v38  ;;  %v11173_v1 = vld [vmem:[#allocation177_spill] sm:$0xff]  ;;  %v2338_v38 = vsel %vm2322_vm5, %v9144_v61, %v9029_v9  ;;  %v11180_v9 = vld [vmem:[#allocation174_spill] sm:$0xff] }
 0x941   : > { %v9294_v59 = vpop.permute.xlu0 %2756  ;;  %v2565_v57 = vsel %vm2547_vm4, %v11174_v39, %v11173_v1  ;;  %v11181_v61 = vld [vmem:[#allocation170_spill] sm:$0xff] }
 0x942   : > { %2662 = vrot.lane.b32.xlu1 %v9052_v11, %s6900_s15  ;;  %v3104_v36 = vsub.f32 %v2592_v60, %v3072_v21  ;;  %v6396_v11 = vunpack.i.l.bf16 %v11175_v8  ;;  %v2597_v23 = vmul.f32 %v2565_v57, %v2340_v41  ;;  %v3486_v30 = vmul.f32 %v6391_v33, %v3102_v51  ;;  %v11178_v21 = vld [vmem:[#allocation166_spill] sm:$0xff] }
 0x943   : > { %2666 = vrot.lane.b32.xlu2 %v9125_v5, %s6900_s15  ;;  %v2563_v27 = vsel %vm2547_vm4, %v11179_v6, %v11178_v21 }
 0x944   : > { %v9312_v0 = vpop.permute.xlu1 %2264  ;;  %v3488_v4 = vmul.f32 %v6396_v11, %v3104_v36  ;;  %v9322_v24 = vsub.f32 %v2597_v23, %v3077_v12  ;;  %v2819_v11 = vsel %vm2547_vm4, %v9055_v52, %v8942_v14  ;;  %v2595_v41 = vmul.f32 %v2563_v27, %v2338_v38  ;;  %v11182_v14 = vld [vmem:[#allocation83_spill] sm:$0xff] }
 0x945   : > { %v3043_v12 = vsel %vm2322_vm5, %v11181_v61, %v11180_v9  ;;  %v6640_v52 = vunpack.i.h.bf16 %v11182_v14  ;;  %v11187_v61 = vld [vmem:[#allocation189_spill] sm:$0xff] }
 0x946   : > { %v9318_v48 = vpop.permute.xlu2 %2268  ;;  %11176 = vst [vmem:[#allocation259_spill] sm:$0xff] %v9322_v24  ;;  %v3075_v1 = vmul.f32 %v3043_v12, %v2819_v11  ;;  %v11188_v12 = vld [vmem:[#allocation191_spill] sm:$0xff] }
 0x947   : > { %6669 = vrot.lane.b32.xlu0 %v6668_v25, %s6908_s23  ;;  %v3493_v25 = vmul.f32 %v6407_v42, %v9322_v24 }
 0x948   : > { %v3107_v39 = vsub.f32 %v2595_v41, %v3075_v1  ;;  %v11185_v41 = vld [vmem:[#allocation199_spill] sm:$0xff]  ;;  %v2568_v1 = vsel %vm2547_vm4, %v11188_v12, %v11187_v61 }
 0x949   : > { %v9324_v60 = vpop.permute.xlu0 %4358  ;;  %v11195_v61 = vld [vmem:[#allocation67_spill] sm:$0xff] }
 0x94a   : > { %3560 = vrot.lane.b32.xlu1 %v3486_v30, %s6907_s22  ;;  %v4291_v30 = vmul.f32 %v6640_v52, %v3107_v39  ;;  %v6628_v12 = vunpack.i.l.bf16 %v11195_v61 }
 0x94b   : > { %3564 = vrot.lane.b32.xlu2 %v3488_v4, %s6907_s22  ;;  %v6606_v4 = vunpack.i.h.bf16 %v11155_v17 }
 0x94c   : > { %v9338_v51 = vpop.permute.xlu1 %2650 }
 0x94d   : > { %v4287_v42 = vmul.f32 %v6606_v4, %v9105_v20  ;;  %v2343_v20 = vsel %vm2322_vm5, %v9264_v63, %v9117_v49  ;;  %v11189_v63 = vld [vmem:[#allocation42_spill] sm:$0xff] }
 0x94e   : > { %v9344_v33 = vpop.permute.xlu2 %2654  ;;  %v2600_v4 = vmul.f32 %v2568_v1, %v2343_v20  ;;  %v6402_v20 = vunpack.i.h.bf16 %v11153_v40  ;;  %v6397_v1 = vunpack.i.h.bf16 %v11175_v8  ;;  %v11200_v8 = vld [vmem:[#allocation88_spill] sm:$0xff] }
 0x94f   : > { %3574 = vrot.lane.b32.xlu0 %v3493_v25, %s6907_s22  ;;  %v11186_v25 = vld [vmem:[#allocation192_spill] sm:$0xff] }
 0x950   : > { %v3048_v9 = vsel %vm2322_vm5, %v11186_v25, %v11185_v41 }
 0x951   : > { %v9347_v57 = vpop.permute.xlu0 %2180 }
 0x952   : > { %2760 = vrot.lane.b32.xlu1 %v9065_v37, %s6905_s25 }
 0x953   : > { %2764 = vrot.lane.b32.xlu2 %v9148_v43, %s6905_s25 }
 0x954   : > { %v9354_v23 = vpop.permute.xlu1 %3548 }
 0x955   : > { %11183 = vst [vmem:[#allocation126_spill] sm:$0xff] %v9354_v23 }
 0x956   : > { %v9357_v38 = vpop.permute.xlu2 %3552 }
 0x957   : > { %11184 = vst [vmem:[#allocation125_spill] sm:$0xff] %v9357_v38  ;;  %4370 = vrot.lane.b32.xlu0 %v4291_v30, %s6907_s22  ;;  %v6622_v30 = vunpack.i.l.bf16 %v11141_v26 }
 0x959   : > { %v9361_v21 = vpop.permute.xlu0 %2278  ;;  %v4288_v37 = vmul.f32 %v6622_v30, %v3104_v36 }
 0x95a   : > { %4362 = vrot.lane.b32.xlu1 %v4287_v42, %s6907_s22 }
 0x95b   : > { %2188 = vrot.lane.b32.xlu2 %v9181_v22, %s6899_s14 }
 0x95c   : > { %v9366_v6 = vpop.permute.xlu1 %4348 }
 0x95e   : > { %v9368_v27 = vpop.permute.xlu2 %2752 }
 0x961   : > { %v9370_v11 = vpop.permute.xlu0 %2664 }
 0x962   : > { %2184 = vrot.lane.b32.xlu1 %v9125_v5, %s6899_s14  ;;  %v6416_v5 = vunpack.i.l.bf16 %v11189_v63 }
 0x963   : > { %2286 = vrot.lane.b32.xlu2 %v9246_v32, %s6906_s21 }
 0x964   : > { %v2749_v17 = vpop.permute.xlu1 %2748 }
 0x965   : > { %v2824_v52 = vsel %vm2547_vm4, %v9132_v3, %v2749_v17  ;;  %v3491_v17 = vmul.f32 %v6402_v20, %v3107_v39  ;;  %v11194_v39 = vmov 35   ;;  %v3489_v20 = vmul.f32 %v6397_v1, %v9157_v28 }
 0x966   : > { %v3080_v42 = vmul.f32 %v3048_v9, %v2824_v52  ;;  %v2177_v49 = vpop.permute.xlu2 %2176  ;;  %v2341_v52 = vsel %vm2322_vm5, %v9258_v47, %v9184_v7  ;;  %v11204_v1 = vmov 33  }
 0x968   : > { %v9389_v38 = vsub.f32 %v2600_v4, %v3080_v42  ;;  %v11197_v4 = vld [vmem:[#allocation181_spill] sm:$0xff]  ;;  %v11198_v42 = vld [vmem:[#allocation190_spill] sm:$0xff] }
 0x969   : > { %v9391_v23 = vpop.permute.xlu0 %3562 }
 0x96a   : > { %11190 = vst [vmem:[#allocation36_spill] sm:$0xff] %v9389_v38  ;;  %v3496_v41 = vmul.f32 %v6416_v5, %v9389_v38  ;;  %4364 = vrot.lane.b32.xlu1 %v4288_v37, %s6907_s22  ;;  %v11192_v37 = vld [vmem:[#allocation7_spill] sm:$0xff]  ;;  %v4608_v38 = vmul.f32 %v6628_v12, %v11200_v8 }
 0x96b   : > { %11191 = vst [vmem:[#allocation128_spill] sm:$0xff] %v9391_v23  ;;  %2672 = vrot.lane.b32.xlu2 %v9246_v32, %s6900_s15 }
 0x96c   : > { %v2173_v3 = vpop.permute.xlu1 %2172  ;;  %3580 = vrot.lane.b32.xlu0 %v3496_v41, %s6907_s22  ;;  %v2566_v41 = vsel %vm2547_vm4, %v11198_v42, %v11197_v4 }
 0x96e   : > { %v9398_v26 = vpop.permute.xlu2 %2274 }
 0x971   : > { %v9401_v36 = vpop.permute.xlu0 %2762 }
 0x972   : > { %2282 = vrot.lane.b32.xlu1 %v9148_v43, %s6906_s21 }
 0x973   : > { %3570 = vrot.lane.b32.xlu2 %v3491_v17, %s6907_s22  ;;  %v2822_v17 = vsel %vm2547_vm4, %v9211_v55, %v9081_v10  ;;  %v11205_v55 = vld [vmem:[#allocation25_spill] sm:$0xff] }
 0x974   : > { %v9406_v5 = vpop.permute.xlu1 %4352  ;;  %6694 = vperm.xlu0 %6589, %v11192_v37  }
 0x976   : > { %v9409_v25 = vpop.permute.xlu2 %2660 }
 0x979   : > { %v9411_v9 = vpop.permute.xlu0 %2186 }
 0x97a   : > { %11193 = vst [vmem:[#allocation147_spill] sm:$0xff] %v9411_v9  ;;  %2668 = vrot.lane.b32.xlu1 %v9148_v43, %s6900_s15  ;;  %v2598_v43 = vmul.f32 %v2566_v41, %v2341_v52  ;;  %v6411_v52 = vunpack.i.l.bf16 %v11205_v55  ;;  %v11222_v9 = vld [vmem:[#allocation195_spill] sm:$0xff] }
 0x97b   : > { %2770 = vrot.lane.b32.xlu2 %v9262_v56, %s6905_s25 }
 0x97c   : > { %v9417_v40 = vpop.permute.xlu1 %2270  ;;  %6703 = vset.pattern.permute.xlu0 %v11194_v39  ;;  %v11202_v39 = vld [vmem:[#allocation182_spill] sm:$0xff] }
 0x97d   : > { %6705 = vperm.xlu0 %6703, %v11192_v37   ;;  %v11201_v37 = vld [vmem:[#allocation184_spill] sm:$0xff] }
 0x97e   : > { %v9426_v30 = vpop.permute.xlu2 %3558  ;;  %v3046_v7 = vsel %vm2322_vm5, %v11202_v39, %v11201_v37 }
 0x97f   : > { %11196 = vst [vmem:[#allocation262_spill] sm:$0xff] %v9426_v30  ;;  %v3078_v47 = vmul.f32 %v3046_v7, %v2822_v17  ;;  %v2346_v7 = vsel %vm2322_vm5, %v2177_v49, %v9240_v16  ;;  %v11212_v30 = vld [vmem:[#allocation201_spill] sm:$0xff]  ;;  %v6237_v49 = vld [vmem:[%s10593_s6 + $0x8] sm:$0xff] }
 0x980   : > { %5071 = vmatpush.bf16.msra.mxu1 %v6237_v49  ;;  %v11224_v49 = vld [vmem:[#allocation5_spill] sm:$0xff] }
 0x981   : > { %v9435_v23 = vpop.permute.xlu0 %4366  ;;  %v9445_v28 = vsub.f32 %v2598_v43, %v3078_v47  ;;  %v11208_v43 = vld [vmem:[#allocation47_spill] sm:$0xff] }
 0x982   : > { %11199 = vst [vmem:[#allocation140_spill] sm:$0xff] %v9435_v23  ;;  %3566 = vrot.lane.b32.xlu1 %v3489_v20, %s6907_s22  ;;  %v6470_v39 = vunpack.i.h.bf16 %v11208_v43  ;;  %v11209_v20 = vld [vmem:[#allocation76_spill] sm:$0xff]  ;;  %v11216_v23 = vld [vmem:[#allocation193_spill] sm:$0xff] }
 0x983   : > { %4684 = vrot.lane.b32.xlu2 %v4608_v38, %s6901_s16  ;;  %11203 = vst [vmem:[#allocation132_spill] sm:$0xff] %v9445_v28  ;;  %v3494_v12 = vmul.f32 %v6411_v52, %v9445_v28  ;;  %v11210_v52 = vld [vmem:[#allocation211_spill] sm:$0xff] }
 0x984   : > { %v9443_v4 = vpop.permute.xlu1 %2656  ;;  %v3805_v17 = vmul.f32 %v6470_v39, %v11209_v20 }
 0x985   : > { %6714 = vset.pattern.permute.xlu0 %v11204_v1 }
 0x986   : > { %v9448_v10 = vpop.permute.xlu2 %2758 }
 0x989   : > { %v9452_v42 = vpop.permute.xlu0 %2284 }
 0x98a   : > { %2766 = vrot.lane.b32.xlu1 %v9181_v22, %s6905_s25 }
 0x98b   : > { %3576 = vrot.lane.b32.xlu2 %v3494_v12, %s6907_s22  ;;  %v11211_v12 = vld [vmem:[#allocation204_spill] sm:$0xff] }
 0x98c   : > { %v9457_v38 = vpop.permute.xlu1 %3554  ;;  %v3051_v22 = vsel %vm2322_vm5, %v11211_v12, %v11210_v52  ;;  %v11215_v12 = vld [vmem:[#allocation40_spill] sm:$0xff] }
 0x98d   : > { %11206 = vst [vmem:[#allocation70_spill] sm:$0xff] %v9457_v38  ;;  %v11213_v38 = vld [vmem:[#allocation203_spill] sm:$0xff]  ;;  %v6422_v28 = vunpack.i.h.bf16 %v11215_v12 }
 0x98e   : > { %v9459_v37 = vpop.permute.xlu2 %4360  ;;  %v2571_v43 = vsel %vm2547_vm4, %v11213_v38, %v11212_v30  ;;  %v11217_v30 = vld [vmem:[#allocation202_spill] sm:$0xff] }
 0x98f   : > { %11207 = vst [vmem:[#allocation260_spill] sm:$0xff] %v9459_v37  ;;  %v2603_v20 = vmul.f32 %v2571_v43, %v2346_v7  ;;  %v2569_v38 = vsel %vm2547_vm4, %v11217_v30, %v11216_v23  ;;  %v6417_v30 = vunpack.i.h.bf16 %v11189_v63  ;;  %v2820_v63 = vsel %vm2547_vm4, %v9178_v44, %v9114_v58  ;;  %v11232_v58 = vld [vmem:[#allocation175_spill] sm:$0xff] }
 0x991   : > { %v9462_v41 = vpop.permute.xlu0 %2670 }
 0x992   : > { %2190 = vrot.lane.b32.xlu1 %v9246_v32, %s6899_s14  ;;  %v2344_v32 = vsel %vm2322_vm5, %v2173_v3, %v9318_v48  ;;  %v11219_v3 = vld [vmem:[#allocation249_spill] sm:$0xff] }
 0x993   : > { %3878 = vrot.lane.b32.xlu2 %v3805_v17, %s6901_s16  ;;  %v11214_v17 = vld [vmem:[#allocation69_spill] sm:$0xff] }
 0x994   : > { %v2755_v47 = vpop.permute.xlu1 %2754  ;;  %v6635_v52 = vunpack.i.h.bf16 %v11214_v17 }
 0x995   : > { %v2827_v39 = vsel %vm2547_vm4, %v9252_v13, %v2755_v47  ;;  %v2825_v13 = vsel %vm2547_vm4, %v9344_v33, %v9172_v54  ;;  %v2601_v47 = vmul.f32 %v2569_v38, %v2344_v32  ;;  %v6236_v54 = vld [vmem:[%s10593_s6] sm:$0xff]  ;;  %v11225_v38 = vld [vmem:[#allocation135_spill] sm:$0xff] }
 0x996   : > { %v3083_v37 = vmul.f32 %v3051_v22, %v2827_v39  ;;  %v9480_v16 = vpop.permute.xlu2 %2182  ;;  %v6634_v22 = vunpack.i.l.bf16 %v11214_v17  ;;  %v4125_v7 = vmul.f32 %v6635_v52, %v11219_v3  ;;  %v11221_v39 = vld [vmem:[#allocation196_spill] sm:$0xff]  ;;  %5072 = vmatpush.bf16.msra.mxu1 %v6236_v54 }
 0x997   : > { %v3049_v24 = vsel %vm2322_vm5, %v11222_v9, %v11221_v39 }
 0x998   : > { %v9493_v48 = vsub.f32 %v2603_v20, %v3083_v37  ;;  %v4445_v33 = vadd.f32 %v9324_v60, %v4125_v7  ;;  %v3081_v37 = vmul.f32 %v3049_v24, %v2825_v13  ;;  %v11223_v20 = vld [vmem:[#allocation248_spill] sm:$0xff] }
 0x999   : > { %v9497_v43 = vpop.permute.xlu0 %3568  ;;  %v4124_v32 = vmul.f32 %v6634_v22, %v11223_v20 }
 0x99a   : > { %11218 = vst [vmem:[#allocation61_spill] sm:$0xff] %v9493_v48  ;;  %v3499_v23 = vmul.f32 %v6422_v28, %v9493_v48  ;;  %2288 = vrot.lane.b32.xlu1 %v9262_v56, %s6906_s21  ;;  %v9512_v9 = vsub.f32 %v2601_v47, %v3081_v37  ;;  %v4765_v39 = vadd.f32 %v11225_v38, %v4445_v33  ;;  %v11227_v47 = vld [vmem:[#allocation72_spill] sm:$0xff]  ;;  %v11229_v37 = vld [vmem:[#allocation185_spill] sm:$0xff] }
 0x99b   : > { %11220 = vst [vmem:[#allocation101_spill] sm:$0xff] %v9497_v43  ;;  %6684 = vperm.xlu2 %6657, %v11224_v49   ;;  %v11226_v43 = vld [vmem:[#allocation136_spill] sm:$0xff]  ;;  %v2339_v49 = vsel %vm2322_vm5, %v8992_v29, %v9166_v46 }
 0x99c   : > { %v4357_v17 = vpop.permute.xlu1 %4356  ;;  %3586 = vrot.lane.b32.xlu0 %v3499_v23, %s6907_s22  ;;  %v3497_v24 = vmul.f32 %v6417_v30, %v9512_v9  ;;  %v6645_v23 = vunpack.i.l.bf16 %v11227_v47  ;;  %v11228_v33 = vld [vmem:[#allocation176_spill] sm:$0xff]  ;;  %v11230_v30 = vld [vmem:[#allocation90_spill] sm:$0xff] }
 0x99d   : > { %v4444_v28 = vadd.f32 %v4357_v17, %v4124_v32  ;;  %v3044_v32 = vsel %vm2322_vm5, %v11229_v37, %v11228_v33  ;;  %v11234_v29 = vld [vmem:[#allocation68_spill] sm:$0xff]  ;;  %v11235_v33 = vld [vmem:[#allocation243_spill] sm:$0xff] }
 0x99e   : > { %v9514_v52 = vpop.permute.xlu2 %2280  ;;  %v6577_v46 = vunpack.i.h.bf16 %v11234_v29 }
 0x99f   : > { %v4764_v60 = vadd.f32 %v11226_v43, %v4444_v28  ;;  %v6629_v43 = vunpack.i.h.bf16 %v11195_v61  ;;  %v3076_v28 = vmul.f32 %v3044_v32, %v2820_v63 }
 0x9a0   : > { %v4119_v37 = vmul.f32 %v6577_v46, %v11235_v33 }
 0x9a1   : > { %v6709_v13 = vpack.i.bf16 %v4765_v39, %v4764_v60  ;;  %v9520_v22 = vpop.permute.xlu0 %2768  ;;  %v4609_v38 = vmul.f32 %v6629_v43, %v11230_v30  ;;  %v11231_v39 = vld [vmem:[#allocation183_spill] sm:$0xff]  ;;  %v11233_v60 = vld [vmem:[#allocation94_spill] sm:$0xff]  ;;  %v6406_v43 = vunpack.i.l.bf16 %v11177_v34 }
 0x9a2   : > { %2674 = vrot.lane.b32.xlu1 %v9262_v56, %s6900_s15  ;;  %v2564_v44 = vsel %vm2547_vm4, %v11232_v58, %v11231_v39  ;;  %v11238_v58 = vld [vmem:[#allocation35_spill] sm:$0xff]  ;;  %v11241_v34 = vld [vmem:[#allocation242_spill] sm:$0xff]  ;;  %v4439_v46 = vadd.f32 %v9277_v53, %v4119_v37 }
 0x9a3   : > { %3582 = vrot.lane.b32.xlu2 %v3497_v24, %s6907_s22  ;;  %v4610_v24 = vmul.f32 %v6645_v23, %v11233_v60  ;;  %v11242_v60 = vld [vmem:[#allocation82_spill] sm:$0xff] }
 0x9a4   : > { %v2179_v7 = vpop.permute.xlu1 %2178  ;;  %6710 = vrot.lane.b32.xlu0 %v6709_v13, %s6908_s23  ;;  %v2596_v13 = vmul.f32 %v2564_v44, %v2339_v49  ;;  %v11237_v49 = vld [vmem:[#allocation12_spill] sm:$0xff]  ;;  %v11239_v44 = vld [vmem:[#allocation205_spill] sm:$0xff] }
 0x9a5   : > { %v2347_v23 = vsel %vm2322_vm5, %v2179_v7, %v9398_v26  ;;  %v6281_v39 = vunpack.i.l.bf16 %v11237_v49  ;;  %v2828_v26 = vsel %vm2547_vm4, %v9409_v25, %v9294_v59 }
 0x9a6   : > { %v2667_v54 = vpop.permute.xlu2 %2666 }
 0x9a7   : > { %v9539_v17 = vsel %vm2547_vm4, %v2667_v54, %v9401_v36  ;;  %v9551_v36 = vsub.f32 %v2596_v13, %v3076_v28  ;;  %v6576_v54 = vunpack.i.l.bf16 %v11234_v29  ;;  %v6474_v28 = vunpack.i.l.bf16 %v11238_v58 }
 0x9a8   : > { %v3316_v7 = vmul.f32 %v6281_v39, %v11162_v2 }
 0x9a9   : > { %v9545_v61 = vpop.permute.xlu0 %2192  ;;  %v4118_v56 = vmul.f32 %v6576_v54, %v11241_v34  ;;  %v3492_v29 = vmul.f32 %v6406_v43, %v9551_v36  ;;  %v3806_v30 = vmul.f32 %v6474_v28, %v11242_v60 }
 0x9aa   : > { %4686 = vrot.lane.b32.xlu1 %v4609_v38, %s6901_s16  ;;  %v6282_v38 = vunpack.i.h.bf16 %v11237_v49  ;;  %v3636_v53 = vadd.f32 %v9071_v19, %v3316_v7  ;;  %v11250_v19 = vld [vmem:[#allocation100_spill] sm:$0xff] }
 0x9ab   : > { %4688 = vrot.lane.b32.xlu2 %v4610_v24, %s6901_s16  ;;  %v11240_v24 = vld [vmem:[#allocation214_spill] sm:$0xff]  ;;  %v4438_v43 = vadd.f32 %v9169_v50, %v4118_v56  ;;  %v11248_v50 = vld [vmem:[#allocation28_spill] sm:$0xff] }
 0x9ac   : > { %v9553_v63 = vpop.permute.xlu1 %2276  ;;  %v2572_v13 = vsel %vm2547_vm4, %v11240_v24, %v11239_v44  ;;  %v3317_v49 = vmul.f32 %v6282_v38, %v11161_v15  ;;  %v11243_v44 = vld [vmem:[#allocation208_spill] sm:$0xff]  ;;  %v11244_v24 = vld [vmem:[#allocation207_spill] sm:$0xff]  ;;  %v11247_v38 = vld [vmem:[#allocation105_spill] sm:$0xff]  ;;  %v6426_v56 = vunpack.i.l.bf16 %v11248_v50 }
 0x9ad   : > { %v2604_v48 = vmul.f32 %v2572_v13, %v2347_v23  ;;  %v3052_v54 = vsel %vm2322_vm5, %v11244_v24, %v11243_v44  ;;  %v11245_v15 = vld [vmem:[#allocation96_spill] sm:$0xff]  ;;  %v4758_v39 = vadd.f32 %v11247_v38, %v4438_v43  ;;  %v11249_v13 = vld [vmem:[#allocation78_spill] sm:$0xff] }
 0x9ae   : > { %v9560_v32 = vpop.permute.xlu2 %3564  ;;  %v3637_v59 = vadd.f32 %v9203_v62, %v3317_v49  ;;  %v3084_v2 = vmul.f32 %v3052_v54, %v2828_v26  ;;  %v4759_v25 = vadd.f32 %v11245_v15, %v4439_v46  ;;  %v11252_v24 = vld [vmem:[#allocation50_spill] sm:$0xff] }
 0x9af   : > { %11236 = vst [vmem:[#allocation113_spill] sm:$0xff] %v9560_v32 }
 0x9b0   : > { %v9590_v23 = vsub.f32 %v2604_v48, %v3084_v2  ;;  %v3957_v7 = vadd.f32 %v11250_v19, %v3637_v59  ;;  %v6673_v62 = vpack.i.bf16 %v4759_v25, %v4758_v39  ;;  %v11251_v48 = vld [vmem:[#allocation48_spill] sm:$0xff]  ;;  %v2349_v25 = vsel %vm2322_vm5, %v9480_v16, %v9361_v21  ;;  %v11253_v39 = vld [vmem:[#allocation223_spill] sm:$0xff] }
 0x9b1   : > { %v9576_v32 = vpop.permute.xlu0 %6664  ;;  %v11256_v19 = vld [vmem:[#allocation215_spill] sm:$0xff] }
 0x9b2   : > { %3572 = vrot.lane.b32.xlu1 %v3492_v29, %s6907_s22  ;;  %11246 = vst [vmem:[#allocation254_spill] sm:$0xff] %v9590_v23  ;;  %v3956_v29 = vadd.f32 %v11249_v13, %v3636_v53  ;;  %v3500_v26 = vmul.f32 %v6426_v56, %v9590_v23  ;;  %v4918_v54 = vsel %vm4916_vm7, %v11252_v24, %v3957_v7  ;;  %v11254_v56 = vld [vmem:[#allocation216_spill] sm:$0xff] }
 0x9b3   : > { %3880 = vrot.lane.b32.xlu2 %v3806_v30, %s6901_s16  ;;  %v3054_v13 = vsel %vm2322_vm5, %v11254_v56, %v11253_v39  ;;  %v2342_v24 = vsel %vm2322_vm5, %v9107_v45, %v9312_v0  ;;  %v11263_v39 = vld [vmem:[#allocation63_spill] sm:$0xff]  ;;  %v11354_v23 = vld [vmem:[#allocation116_spill] sm:$0xff] }
 0x9b4   : > { %v9588_v37 = vpop.permute.xlu1 %2662  ;;  %v4917_v44 = vsel %vm4916_vm7, %v11251_v48, %v3956_v29  ;;  %v11255_v29 = vld [vmem:[#allocation213_spill] sm:$0xff]  ;;  %v6599_v45 = vunpack.i.l.bf16 %v11263_v39 }
 0x9b5   : > { %v2574_v7 = vsel %vm2547_vm4, %v11256_v19, %v11255_v29  ;;  %v11258_v48 = vld [vmem:[#allocation197_spill] sm:$0xff]  ;;  %v11264_v29 = vld [vmem:[#allocation244_spill] sm:$0xff] }
 0x9b6   : > { %v9593_v28 = vpop.permute.xlu2 %2764  ;;  %v4120_v19 = vmul.f32 %v6599_v45, %v11264_v29 }
 0x9b9   : > { %v6670_v30 = vpop.permute.xlu0 %6669 }
 0x9ba   : > { %v6672_v46 = vunpack.i.h.bf16 %v6670_v30  ;;  %v6671_v49 = vunpack.i.l.bf16 %v6670_v30  ;;  %6674 = vrot.lane.b32.xlu1 %v6673_v62, %s6908_s23  ;;  %v2823_v62 = vsel %vm2547_vm4, %v9338_v51, %v9248_v35  ;;  %v6639_v30 = vunpack.i.l.bf16 %v11182_v14  ;;  %v11261_v14 = vld [vmem:[#allocation194_spill] sm:$0xff] }
 0x9bb   : > { %3588 = vrot.lane.b32.xlu2 %v3500_v26, %s6907_s22 }
 0x9bc   : > { %v4950_v43 = vsel %vm4949_vm6, %v4917_v44, %v6671_v49  ;;  %v4951_v53 = vsel %vm4949_vm6, %v4918_v54, %v6672_v46  ;;  %v9607_v59 = vpop.permute.xlu1 %3560  ;;  %v2606_v46 = vmul.f32 %v2574_v7, %v2349_v25  ;;  %v11257_v49 = vld [vmem:[#allocation188_spill] sm:$0xff]  ;;  %v11259_v54 = vld [vmem:[#allocation45_spill] sm:$0xff]  ;;  %v4290_v35 = vmul.f32 %v6639_v30, %v9221_v18 }
 0x9bd   : > { %v4986_v2 = vpack.c.bf16 %v4951_v53, %v4950_v43  ;;  %v3047_v44 = vsel %vm2322_vm5, %v11258_v48, %v11257_v49  ;;  %v6431_v43 = vunpack.i.l.bf16 %v11259_v54  ;;  %v11262_v53 = vld [vmem:[#allocation186_spill] sm:$0xff]  ;;  %v6412_v18 = vunpack.i.h.bf16 %v11205_v55  ;;  %v11266_v49 = vld [vmem:[#allocation129_spill] sm:$0xff]  ;;  %v11267_v55 = vld [vmem:[#allocation103_spill] sm:$0xff] }
 0x9be   : > { %v9609_v15 = vpop.permute.xlu2 %2188  ;;  %v3079_v51 = vmul.f32 %v3047_v44, %v2823_v62 }
 0x9bf   : > { %6104 = vmatmul.msk.bf16.vlgmr.msra.gmra.mxu1 %vm5016_vm8, %v4986_v2  ;;  %v2567_v2 = vsel %vm2547_vm4, %v11262_v53, %v11261_v14  ;;  %v11271_v14 = vld [vmem:[#allocation220_spill] sm:$0xff]  ;;  %v11272_v53 = vld [vmem:[#allocation219_spill] sm:$0xff] }
 0x9c0   : > { %v2599_v25 = vmul.f32 %v2567_v2, %v2342_v24  ;;  %v3055_v2 = vsel %vm2322_vm5, %v11272_v53, %v11271_v14  ;;  %v11280_v14 = vld [vmem:[#allocation107_spill] sm:$0xff] }
 0x9c2   : > { %6679 = vperm.xlu1 %6607, %v11164_v31   ;;  %v9647_v0 = vsub.f32 %v2599_v25, %v3079_v51  ;;  %v11270_v51 = vld [vmem:[#allocation226_spill] sm:$0xff] }
 0x9c3   : > { %v11273_v25 = vld [vmem:[#allocation122_spill] sm:$0xff] }
 0x9c4   : > { %v2761_v38 = vpop.permute.xlu1 %2760 }
 0x9c5   : > { %v2830_v26 = vsel %vm2547_vm4, %v9370_v11, %v2761_v38 }
 0x9c6   : > { %v3086_v21 = vmul.f32 %v3054_v13, %v2830_v26  ;;  %v9628_v16 = vpop.permute.xlu2 %2286  ;;  %v6600_v13 = vunpack.i.h.bf16 %v11263_v39  ;;  %v11265_v26 = vld [vmem:[#allocation245_spill] sm:$0xff]  ;;  %v3087_v39 = vmul.f32 %v3055_v2, %v9539_v17  ;;  %v6646_v17 = vunpack.i.h.bf16 %v11227_v47  ;;  %v11281_v2 = vld [vmem:[#allocation118_spill] sm:$0xff] }
 0x9c7   : > { %v2826_v47 = vsel %vm2547_vm4, %v9443_v4, %v9368_v27 }
 0x9c8   : > { %v9638_v11 = vsub.f32 %v2606_v46, %v3086_v21  ;;  %v4121_v30 = vmul.f32 %v6600_v13, %v11265_v26  ;;  %v3495_v46 = vmul.f32 %v6412_v18, %v9647_v0  ;;  %v4440_v21 = vadd.f32 %v9366_v6, %v4120_v19  ;;  %v11274_v18 = vld [vmem:[#allocation74_spill] sm:$0xff] }
 0x9c9   : > { %v6655_v13 = vunpack.i.l.bf16 %v11274_v18 }
 0x9ca   : > { %11260 = vst [vmem:[#allocation110_spill] sm:$0xff] %v9638_v11  ;;  %v3502_v38 = vmul.f32 %v6431_v43, %v9638_v11  ;;  %4368 = vrot.lane.b32.xlu1 %v4290_v35, %s6907_s22  ;;  %v4441_v48 = vadd.f32 %v11266_v49, %v4121_v30  ;;  %v4760_v44 = vadd.f32 %v11267_v55, %v4440_v21  ;;  %v11268_v43 = vld [vmem:[#allocation2_spill] sm:$0xff]  ;;  %v11269_v35 = vld [vmem:[#allocation217_spill] sm:$0xff]  ;;  %v11275_v30 = vld [vmem:[#allocation104_spill] sm:$0xff] }
 0x9cb   : > { %6725 = vset.pattern.permute.xlu1 %v11204_v1  ;;  %v11276_v21 = vld [vmem:[#allocation65_spill] sm:$0xff] }
 0x9cc   : > { %v9649_v56 = vpop.permute.xlu1 %4362  ;;  %3592 = vrot.lane.b32.xlu0 %v3502_v38, %s6907_s22  ;;  %v4761_v38 = vadd.f32 %v11273_v25, %v4441_v48  ;;  %v6617_v49 = vunpack.i.l.bf16 %v11276_v21  ;;  %v11277_v48 = vld [vmem:[#allocation246_spill] sm:$0xff] }
 0x9ce   : > { %v2673_v7 = vpop.permute.xlu2 %2672  ;;  %v6688_v19 = vpack.i.bf16 %v4761_v38, %v4760_v44  ;;  %v11282_v38 = vld [vmem:[#allocation123_spill] sm:$0xff] }
 0x9cf   : > { %v9657_v62 = vsel %vm2547_vm4, %v2673_v7, %v9520_v22  ;;  %v2575_v22 = vsel %vm2547_vm4, %v11270_v51, %v11269_v35  ;;  %v11279_v51 = vld [vmem:[#allocation97_spill] sm:$0xff] }
 0x9d2   : > { %3578 = vrot.lane.b32.xlu1 %v3495_v46, %s6907_s22  ;;  %v4612_v46 = vmul.f32 %v6655_v13, %v11275_v30  ;;  %v11284_v13 = vld [vmem:[#allocation209_spill] sm:$0xff] }
 0x9d4   : > { %v2185_v24 = vpop.permute.xlu1 %2184  ;;  %6716 = vperm.xlu0 %6714, %v11268_v43   ;;  %v11278_v43 = vld [vmem:[#allocation247_spill] sm:$0xff] }
 0x9d5   : > { %v2350_v6 = vsel %vm2322_vm5, %v2185_v24, %v9514_v52  ;;  %v6618_v52 = vunpack.i.h.bf16 %v11276_v21  ;;  %v4122_v24 = vmul.f32 %v6617_v49, %v11277_v48 }
 0x9d6   : > { %v2607_v45 = vmul.f32 %v2575_v22, %v2350_v6  ;;  %v4611_v22 = vmul.f32 %v6646_v17, %v11279_v51  ;;  %v11287_v17 = vld [vmem:[#allocation198_spill] sm:$0xff] }
 0x9d7   : > { %v4123_v44 = vmul.f32 %v6618_v52, %v11278_v43  ;;  %v4442_v35 = vadd.f32 %v9406_v5, %v4122_v24  ;;  %v11286_v52 = vld [vmem:[#allocation206_spill] sm:$0xff] }
 0x9d8   : > { %v9677_v7 = vsub.f32 %v2607_v45, %v3087_v39  ;;  %v11283_v45 = vld [vmem:[#allocation200_spill] sm:$0xff]  ;;  %v2570_v24 = vsel %vm2547_vm4, %v11287_v17, %v11286_v52 }
 0x9d9   : > { %v4443_v53 = vadd.f32 %v11280_v14, %v4123_v44  ;;  %v4762_v6 = vadd.f32 %v11281_v2, %v4442_v35  ;;  %v3050_v5 = vsel %vm2322_vm5, %v11284_v13, %v11283_v45  ;;  %v6421_v35 = vunpack.i.l.bf16 %v11215_v12  ;;  %v11288_v2 = vld [vmem:[#allocation212_spill] sm:$0xff]  ;;  %v11291_v13 = vld [vmem:[#allocation218_spill] sm:$0xff] }
 0x9da   : > { %6689 = vrot.lane.b32.xlu1 %v6688_v19, %s6908_s23  ;;  %v11285_v19 = vld [vmem:[#allocation91_spill] sm:$0xff]  ;;  %v3082_v49 = vmul.f32 %v3050_v5, %v2826_v47  ;;  %v2348_v12 = vsel %vm2322_vm5, %v9347_v57, %v9553_v63  ;;  %v11292_v5 = vld [vmem:[#allocation210_spill] sm:$0xff]  ;;  %v11296_v63 = vld [vmem:[#allocation225_spill] sm:$0xff] }
 0x9db   : > { %v4763_v39 = vadd.f32 %v11282_v38, %v4443_v53  ;;  %v6475_v53 = vunpack.i.h.bf16 %v11238_v58  ;;  %v11297_v52 = vld [vmem:[#allocation228_spill] sm:$0xff] }
 0x9dc   : > { %v9682_v55 = vpop.permute.xlu1 %4364  ;;  %4692 = vrot.lane.b32.xlu0 %v4612_v46, %s6901_s16  ;;  %v2345_v46 = vsel %vm2322_vm5, %v11285_v19, %v9417_v40  ;;  %v2829_v40 = vsel %vm2547_vm4, %v9588_v37, %v9448_v10  ;;  %v2573_v19 = vsel %vm2547_vm4, %v11292_v5, %v11291_v13  ;;  %v2352_v10 = vsel %vm2322_vm5, %v9609_v15, %v9452_v42  ;;  %v11299_v15 = vld [vmem:[#allocation43_spill] sm:$0xff] }
 0x9dd   : > { %v6698_v21 = vpack.i.bf16 %v4763_v39, %v4762_v6  ;;  %v2602_v44 = vmul.f32 %v2570_v24, %v2345_v46  ;;  %v11289_v6 = vld [vmem:[#allocation221_spill] sm:$0xff]  ;;  %v11290_v39 = vld [vmem:[#allocation87_spill] sm:$0xff]  ;;  %v2605_v46 = vmul.f32 %v2573_v19, %v2348_v12  ;;  %v2577_v17 = vsel %vm2547_vm4, %v11297_v52, %v11296_v63  ;;  %v11302_v12 = vld [vmem:[#allocation236_spill] sm:$0xff] }
 0x9de   : > { %v3053_v47 = vsel %vm2322_vm5, %v11289_v6, %v11288_v2  ;;  %v3807_v45 = vmul.f32 %v6475_v53, %v11290_v39  ;;  %v11307_v63 = vld [vmem:[#allocation3_spill] sm:$0xff] }
 0x9df   : > { %v9710_v27 = vsub.f32 %v2602_v44, %v3082_v49  ;;  %v3085_v38 = vmul.f32 %v3053_v47, %v2829_v40  ;;  %v11295_v49 = vld [vmem:[#allocation227_spill] sm:$0xff]  ;;  %v6427_v44 = vunpack.i.h.bf16 %v11248_v50  ;;  %v6437_v40 = vunpack.i.h.bf16 %v11299_v15 }
 0x9e1   : > { %v9735_v58 = vsub.f32 %v2605_v46, %v3085_v38  ;;  %v11303_v38 = vld [vmem:[#allocation231_spill] sm:$0xff]  ;;  %v9764_v46 = vpop.permute.xlu2 %3570 }
 0x9e2   : > { %4690 = vrot.lane.b32.xlu1 %v4611_v22, %s6901_s16  ;;  %v3498_v22 = vmul.f32 %v6421_v35, %v9710_v27  ;;  %v2609_v35 = vmul.f32 %v2577_v17, %v2352_v10  ;;  %11305 = vst [vmem:[#allocation127_spill] sm:$0xff] %v9764_v46  ;;  %v11353_v46 = vld [vmem:[#allocation112_spill] sm:$0xff] }
 0x9e3   : > { %11293 = vst [vmem:[#allocation102_spill] sm:$0xff] %v9735_v58  ;;  %v3501_v53 = vmul.f32 %v6427_v44, %v9735_v58 }
 0x9e4   : > { %v9694_v25 = vpop.permute.xlu1 %2282 }
 0x9ea   : > { %6699 = vrot.lane.b32.xlu1 %v6698_v21, %s6908_s23  ;;  %v11294_v21 = vld [vmem:[#allocation234_spill] sm:$0xff] }
 0x9eb   : > { %v3057_v57 = vsel %vm2322_vm5, %v11295_v49, %v11294_v21 }
 0x9ec   : > { %v2669_v4 = vpop.permute.xlu1 %2668 }
 0x9f2   : > { %3584 = vrot.lane.b32.xlu1 %v3498_v22, %s6907_s22  ;;  %v9746_v22 = vpop.permute.xlu0 %3574 }
 0x9f3   : > { %11298 = vst [vmem:[#allocation264_spill] sm:$0xff] %v9746_v22 }
 0x9f4   : > { %v9715_v14 = vpop.permute.xlu1 %3566 }
 0x9fa   : > { %3882 = vrot.lane.b32.xlu1 %v3807_v45, %s6901_s16  ;;  %v11304_v45 = vld [vmem:[#allocation233_spill] sm:$0xff]  ;;  %v9767_v49 = vpop.permute.xlu0 %4370 }
 0x9fb   : > { %v3058_v13 = vsel %vm2322_vm5, %v11304_v45, %v11303_v38  ;;  %v11314_v38 = vld [vmem:[#allocation232_spill] sm:$0xff] }
 0x9fc   : > { %v2767_v37 = vpop.permute.xlu1 %2766  ;;  %v3090_v19 = vmul.f32 %v3058_v13, %v9657_v62  ;;  %v11309_v62 = vld [vmem:[#allocation259_spill] sm:$0xff] }
 0x9fd   : > { %v2833_v24 = vsel %vm2547_vm4, %v9462_v41, %v2767_v37  ;;  %v11301_v41 = vld [vmem:[#allocation230_spill] sm:$0xff]  ;;  %v11306_v37 = vld [vmem:[#allocation51_spill] sm:$0xff] }
 0x9fe   : > { %v3089_v42 = vmul.f32 %v3057_v57, %v2833_v24  ;;  %v2578_v50 = vsel %vm2547_vm4, %v11302_v12, %v11301_v41  ;;  %v6479_v21 = vunpack.i.l.bf16 %v11306_v37  ;;  %v11315_v13 = vld [vmem:[#allocation147_spill] sm:$0xff] }
 0xa00   : > { %v9750_v2 = vsub.f32 %v2609_v35, %v3089_v42  ;;  %v3808_v52 = vmul.f32 %v6479_v21, %v11200_v8  ;;  %v2771_v42 = vpop.permute.xlu2 %2770  ;;  %v11317_v21 = vld [vmem:[#allocation222_spill] sm:$0xff] }
 0xa02   : > { %11300 = vst [vmem:[#allocation108_spill] sm:$0xff] %v9750_v2  ;;  %v3505_v6 = vmul.f32 %v6437_v40, %v9750_v2  ;;  %3590 = vrot.lane.b32.xlu1 %v3501_v53, %s6907_s22  ;;  %v9778_v35 = vpop.permute.xlu0 %3580  ;;  %v11311_v40 = vmov 34  }
 0xa03   : > { %11310 = vst [vmem:[#allocation257_spill] sm:$0xff] %v9778_v35  ;;  %v11320_v35 = vld [vmem:[#allocation4_spill] sm:$0xff] }
 0xa04   : > { %v2191_v47 = vpop.permute.xlu1 %2190  ;;  %3598 = vrot.lane.b32.xlu0 %v3505_v6, %s6907_s22  ;;  %v2832_v6 = vsel %vm2547_vm4, %v2669_v4, %v9593_v28  ;;  %v11319_v28 = vld [vmem:[#allocation252_spill] sm:$0xff] }
 0xa05   : > { %v2353_v5 = vsel %vm2322_vm5, %v2191_v47, %v9628_v16  ;;  %v11308_v16 = vld [vmem:[#allocation86_spill] sm:$0xff]  ;;  %v11312_v47 = vld [vmem:[#allocation75_spill] sm:$0xff] }
 0xa06   : > { %v2610_v10 = vmul.f32 %v2578_v50, %v2353_v5  ;;  %v6651_v24 = vunpack.i.h.bf16 %v11308_v16  ;;  %v6662_v41 = vunpack.i.h.bf16 %v11312_v47  ;;  %v6661_v12 = vunpack.i.l.bf16 %v11312_v47  ;;  %v11313_v50 = vld [vmem:[#allocation224_spill] sm:$0xff] }
 0xa07   : > { %v3056_v45 = vsel %vm2322_vm5, %v11314_v38, %v11313_v50  ;;  %v2351_v5 = vsel %vm2322_vm5, %v11315_v13, %v9694_v25  ;;  %v11321_v50 = vld [vmem:[#allocation140_spill] sm:$0xff] }
 0xa08   : > { %v9769_v57 = vsub.f32 %v2610_v10, %v3090_v19  ;;  %v4293_v44 = vmul.f32 %v6651_v24, %v11309_v62  ;;  %v3088_v19 = vmul.f32 %v3056_v45, %v2832_v6  ;;  %v11316_v10 = vld [vmem:[#allocation229_spill] sm:$0xff]  ;;  %v4128_v4 = vmul.f32 %v6661_v12, %v11319_v28  ;;  %v4685_v47 = vpop.permute.xlu2 %4684 }
 0xa0a   : > { %6727 = vperm.xlu1 %6725, %v11307_v63   ;;  %v2576_v63 = vsel %vm2547_vm4, %v11317_v21, %v11316_v10  ;;  %v4448_v2 = vadd.f32 %v9682_v55, %v4128_v4  ;;  %v6436_v10 = vunpack.i.l.bf16 %v11299_v15  ;;  %v6239_v55 = vld [vmem:[%s10593_s6 + $0x18] sm:$0xff] }
 0xa0b   : > { %v2608_v62 = vmul.f32 %v2576_v63, %v2351_v5  ;;  %v11323_v5 = vld [vmem:[#allocation18_spill] sm:$0xff]  ;;  %5275 = vmatpush.bf16.msra.mxu2 %v6239_v55 }
 0xa0c   : > { %v9773_v17 = vpop.permute.xlu1 %2288  ;;  %3884 = vrot.lane.b32.xlu0 %v3808_v52, %s6901_s16  ;;  %v11318_v52 = vld [vmem:[#allocation253_spill] sm:$0xff]  ;;  %v4768_v45 = vadd.f32 %v4685_v47, %v4448_v2  ;;  %v6288_v21 = vunpack.i.h.bf16 %v11323_v5  ;;  %v6287_v63 = vunpack.i.l.bf16 %v11323_v5  ;;  %v6667_v2 = vunpack.i.h.bf16 %v9576_v32  ;;  %v11326_v47 = vld [vmem:[#allocation119_spill] sm:$0xff] }
 0xa0d   : > { %v4129_v24 = vmul.f32 %v6662_v41, %v11318_v52  ;;  %v9802_v25 = vsub.f32 %v2608_v62, %v3088_v19  ;;  %v11324_v19 = vmov 35   ;;  %v6666_v5 = vunpack.i.l.bf16 %v9576_v32 }
 0xa0e   : > { %v3318_v15 = vmul.f32 %v6287_v63, %v11241_v34  ;;  %v11328_v34 = vld [vmem:[#allocation89_spill] sm:$0xff]  ;;  %v2354_v32 = vsel %vm2322_vm5, %v9545_v61, %v9773_v17 }
 0xa0f   : > { %v4449_v38 = vadd.f32 %v11321_v50, %v4129_v24  ;;  %11322 = vst [vmem:[#allocation115_spill] sm:$0xff] %v9802_v25  ;;  %v3504_v12 = vmul.f32 %v6436_v10, %v9802_v25  ;;  %v3319_v24 = vmul.f32 %v6288_v21, %v11235_v33  ;;  %v11329_v10 = vld [vmem:[#allocation99_spill] sm:$0xff] }
 0xa10   : > { %v3638_v50 = vadd.f32 %v11326_v47, %v3318_v15  ;;  %v11333_v47 = vld [vmem:[#allocation58_spill] sm:$0xff] }
 0xa12   : > { %4374 = vrot.lane.b32.xlu1 %v4293_v44, %s6907_s22  ;;  %v9797_v44 = vpop.permute.xlu0 %6694  ;;  %v3958_v33 = vadd.f32 %v11328_v34, %v3638_v50 }
 0xa13   : > { %6731 = vset.pattern.permute.xlu1 %v11311_v40 }
 0xa14   : > { %v2675_v53 = vpop.permute.xlu1 %2674 }
 0xa15   : > { %v2835_v55 = vsel %vm2547_vm4, %v2675_v53, %v2771_v42  ;;  %v11336_v53 = vld [vmem:[#allocation132_spill] sm:$0xff] }
 0xa16   : > { %v4294_v34 = vmul.f32 %v6666_v5, %v11336_v53  ;;  %v11341_v5 = vld [vmem:[#allocation30_spill] sm:$0xff] }
 0xa1a   : > { %6733 = vperm.xlu1 %6731, %v11320_v35   ;;  %v9817_v4 = vpop.permute.xlu0 %6705 }
 0xa1c   : > { %v4687_v6 = vpop.permute.xlu1 %4686 }
 0xa1d   : > { %v4769_v13 = vadd.f32 %v4687_v6, %v4449_v38  ;;  %v11327_v38 = vld [vmem:[#allocation92_spill] sm:$0xff] }
 0xa1e   : > { %v3639_v6 = vadd.f32 %v11327_v38, %v3319_v24  ;;  %v11334_v38 = vld [vmem:[#allocation239_spill] sm:$0xff] }
 0xa1f   : > { %v6743_v41 = vpack.i.bf16 %v4769_v13, %v4768_v45  ;;  %v6238_v45 = vld [vmem:[%s10593_s6 + $0x10] sm:$0xff]  ;;  %v4295_v13 = vmul.f32 %v6667_v2, %v9647_v0  ;;  %v11332_v2 = vld [vmem:[#allocation53_spill] sm:$0xff] }
 0xa20   : > { %5276 = vmatpush.bf16.msra.mxu2 %v6238_v45  ;;  %v4919_v24 = vsel %vm4916_vm7, %v11332_v2, %v3958_v33  ;;  %v11337_v33 = vld [vmem:[#allocation237_spill] sm:$0xff]  ;;  %v11338_v2 = vld [vmem:[#allocation235_spill] sm:$0xff] }
 0xa21   : > { %6744 = vrot.lane.b32.xlu0 %v6743_v41, %s6908_s23  ;;  %v3959_v41 = vadd.f32 %v11329_v10, %v3639_v6  ;;  %v11335_v6 = vld [vmem:[#allocation238_spill] sm:$0xff] }
 0xa22   : > { %3596 = vrot.lane.b32.xlu1 %v3504_v12, %s6907_s22  ;;  %v9831_v12 = vpop.permute.xlu2 %3576  ;;  %v9834_v21 = vpop.permute.xlu0 %3586  ;;  %v3059_v45 = vsel %vm2322_vm5, %v11335_v6, %v11334_v38 }
 0xa23   : > { %6737 = vset.pattern.permute.xlu1 %v11324_v19  ;;  %11330 = vst [vmem:[#allocation157_spill] sm:$0xff] %v9831_v12  ;;  %v4920_v50 = vsel %vm4916_vm7, %v11333_v47, %v3959_v41  ;;  %v3091_v10 = vmul.f32 %v3059_v45, %v2835_v55  ;;  %v2579_v41 = vsel %vm2547_vm4, %v11338_v2, %v11337_v33  ;;  %v11339_v47 = vld [vmem:[#allocation7_spill] sm:$0xff]  ;;  %v6442_v55 = vunpack.i.h.bf16 %v11341_v5 }
 0xa24   : > { %v9819_v62 = vpop.permute.xlu1 %3572  ;;  %11331 = vst [vmem:[#allocation156_spill] sm:$0xff] %v9834_v21  ;;  %v2611_v21 = vmul.f32 %v2579_v41, %v2354_v32  ;;  %v9876_v32 = vld [vmem:[%s10594_s7] ss:$0 sm:$0xff] }
 0xa25   : > { %11325 = vst [vmem:[#allocation111_spill] sm:$0xff] %v9819_v62 }
 0xa26   : > { %v9857_v61 = vsub.f32 %v2611_v21, %v3091_v10 }
 0xa28   : > { %11340 = vst [vmem:[#allocation152_spill] sm:$0xff] %v9857_v61 }
 0xa29   : > { %4378 = vrot.lane.b32.xlu0 %v4295_v13, %s6907_s22 }
 0xa2a   : > { %6739 = vperm.xlu1 %6737, %v11320_v35  }
 0xa2c   : > { %v6675_v63 = vpop.permute.xlu1 %6674 }
 0xa2d   : > { %v6677_v15 = vunpack.i.h.bf16 %v6675_v63  ;;  %v6676_v0 = vunpack.i.l.bf16 %v6675_v63 }
 0xa2f   : > { %v4952_v13 = vsel %vm4949_vm6, %v4919_v24, %v6676_v0  ;;  %v4953_v42 = vsel %vm4949_vm6, %v4920_v50, %v6677_v15  ;;  %v9862_v15 = vpop.permute.xlu2 %3878  ;;  %v9864_v0 = vpop.permute.xlu0 %6710  ;;  %v3507_v24 = vmul.f32 %v6442_v55, %v9857_v61  ;;  %v11342_v50 = vld [vmem:[#allocation10_spill] sm:$0xff]  ;;  %v11349_v61 = vld [vmem:[#allocation59_spill] sm:$0xff] }
 0xa30   : > { %v4987_v63 = vpack.c.bf16 %v4953_v42, %v4952_v13  ;;  %v11344_v42 = vld [vmem:[#allocation117_spill] sm:$0xff] }
 0xa31   : > { %6765 = vperm.xlu0 %6714, %v11339_v47  }
 0xa32   : > { %4376 = vrot.lane.b32.xlu1 %v4294_v34, %s6907_s22  ;;  %6105 = vmatmul.msk.bf16.gmra.mxu1 %vm5016_vm8, %v4987_v63  ;;  %v11345_v34 = vld [vmem:[#allocation16_spill] sm:$0xff]  ;;  %v11346_v63 = vld [vmem:[#allocation9_spill] sm:$0xff] }
 0xa33   : > { %6851 = vset.pattern.permute.xlu1 %v11204_v1  ;;  %v6293_v10 = vunpack.i.l.bf16 %v11345_v34 }
 0xa34   : > { %v9859_v17 = vpop.permute.xlu1 %6679 }
 0xa35   : > { %v6682_v38 = vunpack.i.h.bf16 %v9859_v17  ;;  %v3320_v41 = vmul.f32 %v6293_v10, %v11264_v29  ;;  %v11351_v29 = vld [vmem:[#allocation251_spill] sm:$0xff] }
 0xa37   : > { %v6685_v13 = vpop.permute.xlu2 %6684  ;;  %v4615_v53 = vmul.f32 %v6682_v38, %v11344_v42  ;;  %v11348_v38 = vld [vmem:[#allocation49_spill] sm:$0xff] }
 0xa38   : > { %v6687_v8 = vunpack.i.h.bf16 %v6685_v13 }
 0xa39   : > { %6769 = vset.pattern.permute.xlu0 %v11311_v40  ;;  %v6294_v40 = vunpack.i.h.bf16 %v11345_v34  ;;  %v11350_v34 = vld [vmem:[#allocation126_spill] sm:$0xff] }
 0xa3a   : > { %6771 = vperm.xlu0 %6769, %v11342_v50   ;;  %3602 = vrot.lane.b32.xlu1 %v3507_v24, %s6907_s22  ;;  %v3640_v62 = vadd.f32 %v11350_v34, %v3320_v41  ;;  %v11358_v41 = vld [vmem:[#allocation148_spill] sm:$0xff]  ;;  %v11360_v34 = vld [vmem:[#allocation62_spill] sm:$0xff] }
 0xa3b   : > { %v3321_v2 = vmul.f32 %v6294_v40, %v11265_v26 }
 0xa3c   : > { %v4369_v21 = vpop.permute.xlu1 %4368  ;;  %v5074_v6 = vpop.f32.mrf.mxu1  ;;  %v3960_v42 = vadd.f32 %v11354_v23, %v3640_v62 }
 0xa3d   : > { %v5075_v33 = vadd.f32 %v9876_v32, %v5074_v6  ;;  %v3641_v12 = vadd.f32 %v11349_v61, %v3321_v2  ;;  %v11356_v2 = vld [vmem:[#allocation6_spill] sm:$0xff] }
 0xa3e   : > { %v9871_v45 = vpop.permute.xlu0 %3592 }
 0xa3f   : > { %11343 = vst [vmem:[#allocation144_spill] sm:$0xff] %v9871_v45  ;;  %v6485_v45 = vunpack.i.h.bf16 %v11348_v38  ;;  %v5154_v25 = vmax.f32 %v5075_v33, 0.0  ;;  %v9897_v61 = vpop.permute.xlu2 %3582  ;;  %v6686_v33 = vunpack.i.l.bf16 %v6685_v13  ;;  %v11362_v13 = vld [vmem:[#allocation256_spill] sm:$0xff] }
 0xa40   : > { %11355 = vst [vmem:[#allocation34_spill] sm:$0xff] %v9897_v61  ;;  %v4131_v61 = vmul.f32 %v6687_v8, %v11362_v13 }
 0xa41   : > { %v3811_v26 = vmul.f32 %v6485_v45, %v11279_v51  ;;  %v11357_v45 = vld [vmem:[#allocation260_spill] sm:$0xff] }
 0xa42   : > { %6776 = vperm.xlu0 %6769, %v11346_v63   ;;  %4698 = vrot.lane.b32.xlu1 %v4615_v53, %s6901_s16  ;;  %v4451_v8 = vadd.f32 %v9767_v49, %v4131_v61 }
 0xa44   : > { %v9886_v47 = vpop.permute.xlu1 %3578  ;;  %v5076_v55 = vpop.f32.mrf.mxu1 }
 0xa45   : > { %11347 = vst [vmem:[#allocation32_spill] sm:$0xff] %v9886_v47  ;;  %v5077_v24 = vadd.f32 %v9876_v32, %v5076_v55  ;;  %v11352_v47 = vld [vmem:[#allocation250_spill] sm:$0xff]  ;;  %v3961_v55 = vadd.f32 %v11353_v46, %v3641_v12  ;;  %v11359_v46 = vld [vmem:[#allocation145_spill] sm:$0xff] }
 0xa46   : > { %v6717_v22 = vpop.permute.xlu0 %6716 }
 0xa47   : > { %v5155_v53 = vmax.f32 %v5077_v24, 0.0  ;;  %v6719_v11 = vunpack.i.h.bf16 %v6717_v22  ;;  %v6718_v6 = vunpack.i.l.bf16 %v6717_v22 }
 0xa49   : > { %v5191_v40 = vpack.c.bf16 %v5155_v53, %v5154_v25  ;;  %v4127_v10 = vmul.f32 %v6719_v11, %v11351_v29  ;;  %v4126_v58 = vmul.f32 %v6718_v6, %v11352_v47  ;;  %v4922_v53 = vsel %vm4916_vm7, %v11360_v34, %v3961_v55  ;;  %v11361_v6 = vld [vmem:[#allocation60_spill] sm:$0xff]  ;;  %v11366_v34 = vld [vmem:[#allocation125_spill] sm:$0xff] }
 0xa4a   : > { %6791 = vperm.xlu0 %6769, %v11356_v2   ;;  %3890 = vrot.lane.b32.xlu1 %v3811_v26, %s6901_s16  ;;  %v4921_v26 = vsel %vm4916_vm7, %v11361_v6, %v3960_v42  ;;  %v11367_v6 = vld [vmem:[#allocation70_spill] sm:$0xff] }
 0xa4b   : > { %v4447_v22 = vadd.f32 %v9649_v56, %v4127_v10  ;;  %v4446_v25 = vadd.f32 %v11357_v45, %v4126_v58  ;;  %6132 = vmatmul.msk.bf16.vlgmr.msra.gmra.mxu2 %vm5016_vm8, %v5191_v40  ;;  %v11363_v56 = vld [vmem:[#allocation255_spill] sm:$0xff] }
 0xa4c   : > { %v6690_v11 = vpop.permute.xlu1 %6689  ;;  %v4130_v10 = vmul.f32 %v6686_v33, %v11363_v56 }
 0xa4d   : > { %v4767_v24 = vadd.f32 %v11358_v41, %v4447_v22  ;;  %v4766_v12 = vadd.f32 %v11359_v46, %v4446_v25  ;;  %v6692_v23 = vunpack.i.h.bf16 %v6690_v11  ;;  %v6691_v62 = vunpack.i.l.bf16 %v6690_v11  ;;  %v11364_v25 = vld [vmem:[#allocation20_spill] sm:$0xff]  ;;  %v11365_v46 = vld [vmem:[#allocation11_spill] sm:$0xff] }
 0xa4e   : > { %v4450_v41 = vadd.f32 %v4369_v21, %v4130_v10  ;;  %v6299_v11 = vunpack.i.h.bf16 %v11364_v25  ;;  %v6298_v55 = vunpack.i.l.bf16 %v11364_v25  ;;  %v6650_v21 = vunpack.i.l.bf16 %v11308_v16 }
 0xa4f   : > { %v4954_v58 = vsel %vm4949_vm6, %v4921_v26, %v6691_v62  ;;  %v4955_v40 = vsel %vm4949_vm6, %v4922_v53, %v6692_v23  ;;  %v6720_v45 = vpack.i.bf16 %v4767_v24, %v4766_v12  ;;  %v4689_v23 = vpop.permute.xlu2 %4688  ;;  %v6697_v16 = vunpack.i.h.bf16 %v9797_v44 }
 0xa50   : > { %v4988_v22 = vpack.c.bf16 %v4955_v40, %v4954_v58  ;;  %v3322_v42 = vmul.f32 %v6298_v55, %v11277_v48  ;;  %v3323_v33 = vmul.f32 %v6299_v11, %v11278_v43  ;;  %v4770_v12 = vadd.f32 %v4689_v23, %v4450_v41  ;;  %v11368_v48 = vld [vmem:[#allocation114_spill] sm:$0xff]  ;;  %v11371_v11 = vld [vmem:[#allocation71_spill] sm:$0xff] }
 0xa51   : > { %6721 = vrot.lane.b32.xlu2 %v6720_v45, %s6908_s23  ;;  %v4292_v10 = vmul.f32 %v6650_v21, %v9551_v36  ;;  %v11369_v43 = vld [vmem:[#allocation138_spill] sm:$0xff]  ;;  %v6432_v40 = vunpack.i.h.bf16 %v11259_v54 }
 0xa52   : > { %6806 = vperm.xlu0 %6769, %v11365_v46   ;;  %6106 = vmatmul.msk.bf16.gmra.mxu1 %vm5016_vm8, %v4988_v22  ;;  %v3642_v53 = vadd.f32 %v11366_v34, %v3322_v42  ;;  %v3643_v26 = vadd.f32 %v11367_v6, %v3323_v33  ;;  %v11370_v41 = vld [vmem:[#allocation66_spill] sm:$0xff]  ;;  %v4297_v42 = vmul.f32 %v6697_v16, %v9512_v9  ;;  %v11373_v9 = vld [vmem:[#allocation141_spill] sm:$0xff]  ;;  %v6713_v16 = vunpack.i.h.bf16 %v9864_v0 }
 0xa53   : > { %v11374_v6 = vld [vmem:[#allocation262_spill] sm:$0xff] }
 0xa54   : > { %v4691_v24 = vpop.permute.xlu1 %4690  ;;  %v3962_v49 = vadd.f32 %v11368_v48, %v3642_v53  ;;  %v3963_v61 = vadd.f32 %v11369_v43, %v3643_v26  ;;  %v6656_v53 = vunpack.i.h.bf16 %v11274_v18  ;;  %v11376_v48 = vld [vmem:[#allocation106_spill] sm:$0xff]  ;;  %v11377_v43 = vld [vmem:[#allocation133_spill] sm:$0xff] }
 0xa55   : > { %v4771_v62 = vadd.f32 %v4691_v24, %v4451_v8  ;;  %v3503_v8 = vmul.f32 %v6432_v40, %v9677_v7  ;;  %v6712_v40 = vunpack.i.l.bf16 %v9864_v0 }
 0xa56   : > { %v4923_v25 = vsel %vm4916_vm7, %v11370_v41, %v3962_v49  ;;  %v4924_v55 = vsel %vm4916_vm7, %v11371_v11, %v3963_v61  ;;  %v4613_v49 = vmul.f32 %v6656_v53, %v11376_v48  ;;  %v11381_v11 = vld [vmem:[#allocation41_spill] sm:$0xff]  ;;  %v11385_v53 = vld [vmem:[#allocation94_spill] sm:$0xff] }
 0xa57   : > { %v6759_v58 = vpack.i.bf16 %v4771_v62, %v4770_v12  ;;  %v6708_v12 = vunpack.i.h.bf16 %v9817_v4 }
 0xa59   : > { %4372 = vrot.lane.b32.xlu2 %v4292_v10, %s6907_s22  ;;  %6760 = vrot.lane.b32.xlu1 %v6759_v58, %s6908_s23  ;;  %v11375_v10 = vld [vmem:[#allocation124_spill] sm:$0xff] }
 0xa5a   : > { %6810 = vset.pattern.permute.xlu0 %v11204_v1  ;;  %v4617_v58 = vmul.f32 %v6708_v12, %v11375_v10  ;;  %v6681_v12 = vunpack.i.l.bf16 %v9859_v17 }
 0xa5b   : > { %6812 = vperm.xlu0 %6810, %v11320_v35   ;;  %v11372_v35 = vld [vmem:[#allocation19_spill] sm:$0xff] }
 0xa5c   : > { %v6700_v45 = vpop.permute.xlu1 %6699  ;;  %v6303_v23 = vunpack.i.l.bf16 %v11372_v35  ;;  %v6304_v24 = vunpack.i.h.bf16 %v11372_v35  ;;  %v11383_v35 = vld [vmem:[#allocation130_spill] sm:$0xff] }
 0xa5d   : > { %v6702_v22 = vunpack.i.h.bf16 %v6700_v45  ;;  %v6701_v36 = vunpack.i.l.bf16 %v6700_v45  ;;  %v11379_v45 = vld [vmem:[#allocation76_spill] sm:$0xff] }
 0xa5e   : > { %v3324_v21 = vmul.f32 %v6303_v23, %v11223_v20  ;;  %v3325_v34 = vmul.f32 %v6304_v24, %v11219_v3  ;;  %v11378_v3 = vld [vmem:[#allocation73_spill] sm:$0xff] }
 0xa5f   : > { %v4957_v1 = vsel %vm4949_vm6, %v4924_v55, %v6702_v22  ;;  %v4956_v33 = vsel %vm4949_vm6, %v4923_v25, %v6701_v36  ;;  %v11380_v36 = vld [vmem:[#allocation38_spill] sm:$0xff]  ;;  %v6504_v55 = vunpack.i.l.bf16 %v11381_v11 }
 0xa60   : > { %v4989_v54 = vpack.c.bf16 %v4957_v1, %v4956_v33  ;;  %v3644_v62 = vadd.f32 %v11373_v9, %v3324_v21  ;;  %v3645_v26 = vadd.f32 %v11374_v6, %v3325_v34  ;;  %v6490_v41 = vunpack.i.h.bf16 %v11380_v36 }
 0xa61   : > { %3594 = vrot.lane.b32.xlu2 %v3503_v8, %s6907_s22  ;;  %4382 = vrot.lane.b32.xlu1 %v4297_v42, %s6907_s22  ;;  %v11382_v8 = vld [vmem:[#allocation90_spill] sm:$0xff]  ;;  %v3818_v23 = vmul.f32 %v6504_v55, %v11383_v35 }
 0xa62   : > { %6107 = vmatmul.msk.bf16.gmra.mxu1 %vm5016_vm8, %v4989_v54  ;;  %v3964_v20 = vadd.f32 %v11377_v43, %v3644_v62  ;;  %v3965_v61 = vadd.f32 %v9862_v15, %v3645_v26  ;;  %v6480_v15 = vunpack.i.h.bf16 %v11306_v37  ;;  %v3813_v1 = vmul.f32 %v6490_v41, %v11376_v48  ;;  %v11384_v62 = vld [vmem:[#allocation109_spill] sm:$0xff] }
 0xa63   : > { %6817 = vperm.xlu0 %6810, %v11342_v50   ;;  %v6441_v37 = vunpack.i.l.bf16 %v11341_v5  ;;  %v4614_v34 = vmul.f32 %v6681_v12, %v11384_v62  ;;  %v6484_v5 = vunpack.i.l.bf16 %v11348_v38  ;;  %v11389_v41 = vld [vmem:[#allocation121_spill] sm:$0xff] }
 0xa64   : > { %v4925_v18 = vsel %vm4916_vm7, %v11378_v3, %v3964_v20  ;;  %v4926_v22 = vsel %vm4916_vm7, %v11379_v45, %v3965_v61  ;;  %v3809_v42 = vmul.f32 %v6480_v15, %v11382_v8  ;;  %v9977_v54 = vpop.permute.xlu1 %3584  ;;  %v4693_v20 = vpop.permute.xlu0 %4692  ;;  %v11387_v61 = vld [vmem:[#allocation13_spill] sm:$0xff] }
 0xa65   : > { %v4959_v25 = vsel %vm4949_vm6, %v4926_v22, %v6713_v16  ;;  %v4958_v0 = vsel %vm4949_vm6, %v4925_v18, %v6712_v40  ;;  %v3506_v24 = vmul.f32 %v6441_v37, %v9769_v57  ;;  %v3810_v6 = vmul.f32 %v6484_v5, %v11385_v53 }
 0xa66   : > { %v4990_v33 = vpack.c.bf16 %v4959_v25, %v4958_v0  ;;  %v6308_v38 = vunpack.i.l.bf16 %v11387_v61  ;;  %v6707_v16 = vunpack.i.l.bf16 %v9817_v4 }
 0xa68   : > { %v3326_v18 = vmul.f32 %v6308_v38, %v11352_v47  ;;  %v4616_v15 = vmul.f32 %v6707_v16, %v11389_v41 }
 0xa69   : > { %4694 = vrot.lane.b32.xlu2 %v4613_v49, %s6901_s16  ;;  %4702 = vrot.lane.b32.xlu1 %v4617_v58, %s6901_s16  ;;  %v6696_v58 = vunpack.i.l.bf16 %v9797_v44  ;;  %v11386_v49 = vld [vmem:[#allocation36_spill] sm:$0xff] }
 0xa6a   : > { %v11388_v44 = vld [vmem:[#allocation128_spill] sm:$0xff]  ;;  %v3646_v22 = vadd.f32 %v9607_v59, %v3326_v18 }
 0xa6b   : > { %6832 = vperm.xlu0 %6810, %v11346_v63   ;;  %v4296_v43 = vmul.f32 %v6696_v58, %v11386_v49  ;;  %v6240_v58 = vld [vmem:[%s10593_s6 + $0x20] sm:$0xff] }
 0xa6c   : > { %v3883_v21 = vpop.permute.xlu1 %3882 }
 0xa71   : > { %3886 = vrot.lane.b32.xlu2 %v3809_v42, %s6901_s16  ;;  %3894 = vrot.lane.b32.xlu1 %v3813_v1, %s6901_s16 }
 0xa72   : > { %6108 = vmatmul.msk.bf16.gmra.mxu1 %vm5016_vm8, %v4990_v33  ;;  %v6489_v33 = vunpack.i.l.bf16 %v11380_v36 }
 0xa73   : > { %3904 = vrot.lane.b32.xlu0 %v3818_v23, %s6901_s16 }
 0xa74   : > { %v9988_v9 = vpop.permute.xlu1 %3590  ;;  %v3812_v12 = vmul.f32 %v6489_v33, %v11275_v30  ;;  %v11392_v33 = vld [vmem:[#allocation23_spill] sm:$0xff] }
 0xa76   : > { %v10012_v25 = vpop.permute.xlu0 %3598 }
 0xa79   : > { %3600 = vrot.lane.b32.xlu2 %v3506_v24, %s6907_s22 }
 0xa7b   : > { %6842 = vperm.xlu0 %6810, %v11356_v2  }
 0xa7c   : > { %v6728_v26 = vpop.permute.xlu1 %6727 }
 0xa7d   : > { %v6729_v49 = vunpack.i.l.bf16 %v6728_v26 }
 0xa7e   : > { %v3885_v36 = vpop.permute.xlu0 %3884 }
 0xa81   : > { %6749 = vperm.xlu2 %6657, %v11164_v31   ;;  %v3881_v31 = vpop.permute.xlu2 %3880 }
 0xa82   : > { %v3966_v0 = vadd.f32 %v3881_v31, %v3646_v22 }
 0xa83   : > { %6872 = vset.pattern.permute.xlu0 %v11324_v19 }
 0xa84   : > { %v4375_v17 = vpop.permute.xlu1 %4374  ;;  %v4927_v47 = vsel %vm4916_vm7, %v11242_v60, %v3966_v0  ;;  %v6241_v60 = vld [vmem:[%s10593_s6 + $0x28] sm:$0xff] }
 0xa85   : > { %5479 = vmatpush.bf16.msra.mxu3 %v6241_v60 }
 0xa89   : > { %4696 = vrot.lane.b32.xlu2 %v4614_v34, %s6901_s16  ;;  %v10003_v40 = vpop.permute.xlu2 %3588  ;;  %5480 = vmatpush.bf16.msra.mxu3 %v6240_v58 }
 0xa8a   : > { %6753 = vset.pattern.permute.xlu2 %v11324_v19  ;;  %v6309_v19 = vunpack.i.h.bf16 %v11387_v61 }
 0xa8c   : > { %v10005_v3 = vpop.permute.xlu1 %6733 }
 0xa8d   : > { %v6735_v38 = vunpack.i.l.bf16 %v10005_v3 }
 0xa8f   : > { %v4298_v22 = vmul.f32 %v6735_v38, %v9710_v27  ;;  %v11395_v38 = vld [vmem:[#allocation88_spill] sm:$0xff] }
 0xa91   : > { %3888 = vrot.lane.b32.xlu2 %v3810_v6, %s6901_s16 }
 0xa94   : > { %v10020_v59 = vpop.permute.xlu1 %3596 }
 0xa99   : > { %6755 = vperm.xlu2 %6753, %v11342_v50   ;;  %v3327_v50 = vmul.f32 %v6309_v19, %v11351_v29 }
 0xa9b   : > { %v3647_v45 = vadd.f32 %v11388_v44, %v3327_v50  ;;  %v6730_v50 = vunpack.i.h.bf16 %v6728_v26  ;;  %v11390_v44 = vld [vmem:[#allocation258_spill] sm:$0xff] }
 0xa9c   : > { %v6740_v6 = vpop.permute.xlu1 %6739 }
 0xa9d   : > { %v3967_v55 = vadd.f32 %v3883_v21, %v3647_v45  ;;  %v4132_v45 = vmul.f32 %v6729_v49, %v11390_v44  ;;  %v11394_v49 = vld [vmem:[#allocation54_spill] sm:$0xff] }
 0xa9f   : > { %v4928_v29 = vsel %vm4916_vm7, %v11290_v39, %v3967_v55 }
 0xaa1   : > { %4380 = vrot.lane.b32.xlu2 %v4296_v43, %s6907_s22  ;;  %v6745_v43 = vpop.permute.xlu0 %6744 }
 0xaa9   : > { %4700 = vrot.lane.b32.xlu2 %v4616_v15, %s6901_s16  ;;  %v11391_v15 = vld [vmem:[#allocation263_spill] sm:$0xff]  ;;  %v10047_v26 = vpop.permute.xlu0 %4378 }
 0xaaa   : > { %v4133_v0 = vmul.f32 %v6730_v50, %v11391_v15  ;;  %v11396_v50 = vld [vmem:[#allocation61_spill] sm:$0xff] }
 0xaab   : > { %v6722_v4 = vpop.permute.xlu2 %6721 }
 0xaac   : > { %v6724_v42 = vunpack.i.h.bf16 %v6722_v4  ;;  %v6723_v1 = vunpack.i.l.bf16 %v6722_v4  ;;  %v4453_v55 = vadd.f32 %v4375_v17, %v4133_v0  ;;  %v10044_v4 = vpop.permute.xlu1 %4376 }
 0xaae   : > { %v4960_v23 = vsel %vm4949_vm6, %v4927_v47, %v6723_v1  ;;  %v4961_v37 = vsel %vm4949_vm6, %v4928_v29, %v6724_v42  ;;  %v6741_v42 = vunpack.i.l.bf16 %v6740_v6  ;;  %v6313_v47 = vunpack.i.l.bf16 %v11392_v33 }
 0xaaf   : > { %v4991_v24 = vpack.c.bf16 %v4961_v37, %v4960_v23  ;;  %v5079_v21 = vpop.f32.mrf.mxu1  ;;  %v6314_v37 = vunpack.i.h.bf16 %v11392_v33  ;;  %v11397_v33 = vld [vmem:[#allocation137_spill] sm:$0xff] }
 0xab0   : > { %v5080_v39 = vadd.f32 %v9876_v32, %v5079_v21  ;;  %v3328_v27 = vmul.f32 %v6313_v47, %v11319_v28  ;;  %v4618_v21 = vmul.f32 %v6741_v42, %v11383_v35  ;;  %v6742_v42 = vunpack.i.h.bf16 %v6740_v6 }
 0xab1   : > { %3892 = vrot.lane.b32.xlu2 %v3812_v12, %s6901_s16  ;;  %6109 = vmatmul.msk.bf16.gmra.mxu1 %vm5016_vm8, %v4991_v24  ;;  %v11393_v12 = vld [vmem:[#allocation113_spill] sm:$0xff]  ;;  %v3329_v17 = vmul.f32 %v6314_v37, %v11318_v52 }
 0xab2   : > { %v5156_v61 = vmax.f32 %v5080_v39, 0.0  ;;  %v4619_v47 = vmul.f32 %v6742_v42, %v11397_v33  ;;  %v11402_v42 = vld [vmem:[#allocation21_spill] sm:$0xff] }
 0xab3   : > { %v4373_v34 = vpop.permute.xlu2 %4372  ;;  %v3649_v60 = vadd.f32 %v9715_v14, %v3329_v17 }
 0xab4   : > { %v10058_v58 = vpop.permute.xlu1 %3602 }
 0xab7   : > { %v5081_v5 = vpop.f32.mrf.mxu1 }
 0xab8   : > { %v5082_v31 = vadd.f32 %v9876_v32, %v5081_v5  ;;  %v6746_v5 = vunpack.i.l.bf16 %v6745_v43 }
 0xab9   : > { %6781 = vperm.xlu2 %6753, %v11346_v63   ;;  %v4452_v63 = vadd.f32 %v4373_v34, %v4132_v45  ;;  %v3648_v34 = vadd.f32 %v11393_v12, %v3328_v27  ;;  %v10064_v45 = vpop.permute.xlu0 %6765 }
 0xaba   : > { %v5157_v19 = vmax.f32 %v5082_v31, 0.0 }
 0xabb   : > { %v10037_v16 = vpop.permute.xlu2 %3594  ;;  %v4772_v29 = vadd.f32 %v4693_v20, %v4452_v63  ;;  %v3968_v39 = vadd.f32 %v3885_v36, %v3648_v34  ;;  %v6736_v20 = vunpack.i.h.bf16 %v10005_v3 }
 0xabc   : > { %v5192_v18 = vpack.c.bf16 %v5157_v19, %v5156_v61  ;;  %v6494_v61 = vunpack.i.l.bf16 %v11394_v49  ;;  %v6747_v19 = vunpack.i.h.bf16 %v6745_v43 }
 0xabd   : > { %v4929_v52 = vsel %vm4916_vm7, %v11395_v38, %v3968_v39  ;;  %v11398_v38 = vld [vmem:[#allocation266_spill] sm:$0xff] }
 0xabe   : > { %6133 = vmatmul.msk.bf16.gmra.mxu2 %vm5016_vm8, %v5192_v18  ;;  %v4299_v18 = vmul.f32 %v6736_v20, %v11396_v50  ;;  %v4962_v3 = vsel %vm4949_vm6, %v4929_v52, %v6746_v5  ;;  %v3814_v63 = vmul.f32 %v6494_v61, %v11384_v62  ;;  %v11399_v50 = vld [vmem:[#allocation265_spill] sm:$0xff] }
 0xac1   : > { %4384 = vrot.lane.b32.xlu2 %v4298_v22, %s6907_s22 }
 0xac3   : > { %v4695_v1 = vpop.permute.xlu2 %4694 }
 0xac4   : > { %v4773_v23 = vadd.f32 %v4695_v1, %v4453_v55  ;;  %v10075_v55 = vld [vmem:[%s10594_s7 + $0x1] ss:$0 sm:$0xff] }
 0xac6   : > { %v6785_v24 = vpack.i.bf16 %v4773_v23, %v4772_v29  ;;  %v4699_v29 = vpop.permute.xlu1 %4698 }
 0xac8   : > { %6786 = vrot.lane.b32.xlu1 %v6785_v24, %s6908_s23 }
 0xac9   : > { %4704 = vrot.lane.b32.xlu2 %v4618_v21, %s6901_s16  ;;  %v6772_v21 = vpop.permute.xlu0 %6771 }
 0xaca   : > { %v6773_v39 = vunpack.i.l.bf16 %v6772_v21 }
 0xacb   : > { %v3887_v31 = vpop.permute.xlu2 %3886 }
 0xacc   : > { %v3969_v28 = vadd.f32 %v3887_v31, %v3649_v60  ;;  %v6495_v31 = vunpack.i.h.bf16 %v11394_v49 }
 0xace   : > { %v4930_v14 = vsel %vm4916_vm7, %v11382_v8, %v3969_v28  ;;  %v5278_v36 = vpop.f32.mrf.mxu2 }
 0xacf   : > { %v4963_v22 = vsel %vm4949_vm6, %v4930_v14, %v6747_v19  ;;  %v5084_v0 = vpop.f32.mrf.mxu1  ;;  %v5279_v1 = vadd.f32 %v10075_v55, %v5278_v36  ;;  %v11400_v14 = vld [vmem:[#allocation117_spill] sm:$0xff]  ;;  %v11401_v36 = vld [vmem:[#allocation254_spill] sm:$0xff] }
 0xad0   : > { %4386 = vrot.lane.b32.xlu1 %v4299_v18, %s6907_s22  ;;  %v4992_v43 = vpack.c.bf16 %v4963_v22, %v4962_v3  ;;  %v5085_v23 = vadd.f32 %v9876_v32, %v5084_v0  ;;  %v4300_v3 = vmul.f32 %v6773_v39, %v11401_v36  ;;  %v3891_v0 = vpop.permute.xlu1 %3890  ;;  %v11404_v39 = vld [vmem:[#allocation101_spill] sm:$0xff] }
 0xad1   : > { %3896 = vrot.lane.b32.xlu2 %v3814_v63, %s6901_s16  ;;  %v5358_v6 = vmax.f32 %v5279_v1, 0.0  ;;  %v6319_v1 = vunpack.i.h.bf16 %v11402_v42 }
 0xad2   : > { %6110 = vmatmul.msk.bf16.gmra.mxu1 %vm5016_vm8, %v4992_v43  ;;  %v5158_v17 = vmax.f32 %v5085_v23, 0.0 }
 0xad3   : > { %v10079_v8 = vpop.permute.xlu2 %3600 }
 0xad6   : > { %v5280_v37 = vpop.f32.mrf.mxu2 }
 0xad7   : > { %v5281_v27 = vadd.f32 %v10075_v55, %v5280_v37  ;;  %v5086_v24 = vpop.f32.mrf.mxu1  ;;  %v6318_v37 = vunpack.i.l.bf16 %v11402_v42 }
 0xad8   : > { %v5087_v12 = vadd.f32 %v9876_v32, %v5086_v24  ;;  %4706 = vrot.lane.b32.xlu1 %v4619_v47, %s6901_s16 }
 0xad9   : > { %v5359_v34 = vmax.f32 %v5281_v27, 0.0  ;;  %6796 = vperm.xlu2 %6753, %v11356_v2   ;;  %v3815_v2 = vmul.f32 %v6495_v31, %v11400_v14  ;;  %v3331_v27 = vmul.f32 %v6319_v1, %v11362_v13  ;;  %v11406_v1 = vld [vmem:[#allocation146_spill] sm:$0xff] }
 0xada   : > { %v5159_v60 = vmax.f32 %v5087_v12, 0.0 }
 0xadb   : > { %v5395_v20 = vpack.c.bf16 %v5359_v34, %v5358_v6  ;;  %v6750_v5 = vpop.permute.xlu2 %6749  ;;  %v11403_v34 = vld [vmem:[#allocation127_spill] sm:$0xff] }
 0xadc   : > { %v5193_v28 = vpack.c.bf16 %v5159_v60, %v5158_v17  ;;  %v6752_v61 = vunpack.i.h.bf16 %v6750_v5  ;;  %v6751_v19 = vunpack.i.l.bf16 %v6750_v5  ;;  %v3651_v17 = vadd.f32 %v11403_v34, %v3331_v27  ;;  %v6761_v60 = vpop.permute.xlu1 %6760 }
 0xadd   : > { %6160 = vmatmul.msk.bf16.vlgmr.msra.gmra.mxu3 %vm5016_vm8, %v5395_v20  ;;  %v6763_v13 = vunpack.i.h.bf16 %v6761_v60 }
 0xade   : > { %v4135_v52 = vmul.f32 %v6752_v61, %v11398_v38  ;;  %v4134_v18 = vmul.f32 %v6751_v19, %v11399_v50  ;;  %6134 = vmatmul.msk.bf16.gmra.mxu2 %vm5016_vm8, %v5193_v28  ;;  %v3971_v5 = vadd.f32 %v3891_v0, %v3651_v17 }
 0xadf   : > { %v5089_v22 = vpop.f32.mrf.mxu1 }
 0xae0   : > { %v4455_v63 = vadd.f32 %v10047_v26, %v4135_v52  ;;  %3898 = vrot.lane.b32.xlu1 %v3815_v2, %s6901_s16  ;;  %v4454_v49 = vadd.f32 %v10044_v4, %v4134_v18  ;;  %v5090_v24 = vadd.f32 %v9876_v32, %v5089_v22  ;;  %v3330_v26 = vmul.f32 %v6318_v37, %v11363_v56  ;;  %v11405_v56 = vld [vmem:[#allocation102_spill] sm:$0xff] }
 0xae1   : > { %4388 = vrot.lane.b32.xlu2 %v4300_v3, %s6907_s22  ;;  %v6762_v18 = vunpack.i.l.bf16 %v6761_v60  ;;  %v4932_v36 = vsel %vm4916_vm7, %v11279_v51, %v3971_v5 }
 0xae2   : > { %v4775_v23 = vadd.f32 %v4699_v29, %v4455_v63  ;;  %v3650_v20 = vadd.f32 %v11404_v39, %v3330_v26  ;;  %v6774_v29 = vunpack.i.h.bf16 %v6772_v21  ;;  %v5160_v31 = vmax.f32 %v5090_v24, 0.0 }
 0xae3   : > { %v4697_v43 = vpop.permute.xlu2 %4696  ;;  %v4965_v21 = vsel %vm4949_vm6, %v4932_v36, %v6763_v13  ;;  %v6767_v39 = vunpack.i.l.bf16 %v10064_v45  ;;  %v11410_v13 = vld [vmem:[#allocation267_spill] sm:$0xff] }
 0xae4   : > { %v4774_v47 = vadd.f32 %v4697_v43, %v4454_v49  ;;  %v4301_v2 = vmul.f32 %v6774_v29, %v11405_v56  ;;  %v4383_v37 = vpop.permute.xlu1 %4382 }
 0xae6   : > { %v6800_v12 = vpack.i.bf16 %v4775_v23, %v4774_v47 }
 0xae7   : > { %v5091_v6 = vpop.f32.mrf.mxu1 }
 0xae8   : > { %v5092_v4 = vadd.f32 %v9876_v32, %v5091_v6  ;;  %6801 = vrot.lane.b32.xlu1 %v6800_v12, %s6908_s23  ;;  %v11408_v6 = vld [vmem:[#allocation52_spill] sm:$0xff] }
 0xae9   : > { %v6500_v34 = vunpack.i.h.bf16 %v11408_v6  ;;  %v6499_v60 = vunpack.i.l.bf16 %v11408_v6 }
 0xaea   : > { %v5161_v28 = vmax.f32 %v5092_v4, 0.0  ;;  %v6768_v4 = vunpack.i.h.bf16 %v10064_v45 }
 0xaeb   : > { %v3889_v61 = vpop.permute.xlu2 %3888  ;;  %v3816_v29 = vmul.f32 %v6499_v60, %v11389_v41  ;;  %v3817_v5 = vmul.f32 %v6500_v34, %v11375_v10  ;;  %v11414_v60 = vld [vmem:[#allocation115_spill] sm:$0xff] }
 0xaec   : > { %v5194_v19 = vpack.c.bf16 %v5161_v28, %v5160_v31  ;;  %v3970_v52 = vadd.f32 %v3889_v61, %v3650_v20  ;;  %v11409_v31 = vld [vmem:[#allocation33_spill] sm:$0xff]  ;;  %v4136_v61 = vmul.f32 %v6767_v39, %v11410_v13 }
 0xaed   : > { %v4137_v28 = vmul.f32 %v6768_v4, %v11409_v31 }
 0xaee   : > { %v4931_v3 = vsel %vm4916_vm7, %v11385_v53, %v3970_v52  ;;  %6135 = vmatmul.msk.bf16.gmra.mxu2 %vm5016_vm8, %v5194_v19  ;;  %v11407_v53 = vld [vmem:[#allocation139_spill] sm:$0xff]  ;;  %v4703_v19 = vpop.permute.xlu1 %4702 }
 0xaef   : > { %v4964_v22 = vsel %vm4949_vm6, %v4931_v3, %v6762_v18  ;;  %v5094_v0 = vpop.f32.mrf.mxu1  ;;  %v4457_v52 = vadd.f32 %v4383_v37, %v4137_v28  ;;  %v6777_v3 = vpop.permute.xlu0 %6776 }
 0xaf0   : > { %4390 = vrot.lane.b32.xlu1 %v4301_v2, %s6907_s22  ;;  %v4993_v63 = vpack.c.bf16 %v4965_v21, %v4964_v22  ;;  %v5095_v51 = vadd.f32 %v9876_v32, %v5094_v0  ;;  %v6779_v21 = vunpack.i.h.bf16 %v6777_v3  ;;  %v6778_v22 = vunpack.i.l.bf16 %v6777_v3  ;;  %v11417_v3 = vld [vmem:[#allocation111_spill] sm:$0xff] }
 0xaf1   : > { %v4777_v45 = vadd.f32 %v4703_v19, %v4457_v52 }
 0xaf2   : > { %6111 = vmatmul.msk.bf16.gmra.mxu1 %vm5016_vm8, %v4993_v63  ;;  %v5162_v12 = vmax.f32 %v5095_v51, 0.0  ;;  %v4303_v63 = vmul.f32 %v6779_v21, %v9677_v7  ;;  %v6505_v7 = vunpack.i.h.bf16 %v11381_v11 }
 0xaf3   : > { %v6756_v49 = vpop.permute.xlu2 %6755 }
 0xaf4   : > { %v6758_v43 = vunpack.i.h.bf16 %v6756_v49  ;;  %v6757_v42 = vunpack.i.l.bf16 %v6756_v49  ;;  %v11411_v49 = vld [vmem:[#allocation110_spill] sm:$0xff] }
 0xaf6   : > { %v4621_v47 = vmul.f32 %v6758_v43, %v11406_v1  ;;  %v4620_v23 = vmul.f32 %v6757_v42, %v11407_v53  ;;  %v4302_v43 = vmul.f32 %v6778_v22, %v11411_v49  ;;  %v3895_v28 = vpop.permute.xlu1 %3894 }
 0xaf7   : > { %v5096_v27 = vpop.f32.mrf.mxu1  ;;  %v10147_v6 = vpop.permute.xlu0 %6791 }
 0xaf8   : > { %v5097_v24 = vadd.f32 %v9876_v32, %v5096_v27  ;;  %4708 = vrot.lane.b32.xlu2 %v4620_v23, %s6901_s16  ;;  %4710 = vrot.lane.b32.xlu1 %v4621_v47, %s6901_s16  ;;  %v11412_v23 = vld [vmem:[#allocation154_spill] sm:$0xff]  ;;  %v11413_v27 = vld [vmem:[#allocation151_spill] sm:$0xff]  ;;  %v6793_v34 = vunpack.i.l.bf16 %v10147_v6 }
 0xafa   : > { %v5163_v26 = vmax.f32 %v5097_v24, 0.0  ;;  %v4304_v4 = vmul.f32 %v6793_v34, %v11414_v60 }
 0xafb   : > { %v4381_v17 = vpop.permute.xlu2 %4380 }
 0xafc   : > { %v5195_v20 = vpack.c.bf16 %v5163_v26, %v5162_v12  ;;  %v4456_v18 = vadd.f32 %v4381_v17, %v4136_v61  ;;  %v3819_v26 = vmul.f32 %v6505_v7, %v11397_v33 }
 0xafe   : > { %6136 = vmatmul.msk.bf16.gmra.mxu2 %vm5016_vm8, %v5195_v20 }
 0xaff   : > { %v10162_v22 = vpop.permute.xlu0 %6806 }
 0xb00   : > { %3900 = vrot.lane.b32.xlu2 %v3816_v29, %s6901_s16  ;;  %3902 = vrot.lane.b32.xlu1 %v3817_v5, %s6901_s16  ;;  %v11415_v29 = vld [vmem:[#allocation14_spill] sm:$0xff] }
 0xb01   : > { %v6324_v5 = vunpack.i.h.bf16 %v11415_v29  ;;  %v6323_v11 = vunpack.i.l.bf16 %v11415_v29 }
 0xb03   : > { %v4701_v56 = vpop.permute.xlu2 %4700  ;;  %v3333_v19 = vmul.f32 %v6324_v5, %v11391_v15  ;;  %v3332_v52 = vmul.f32 %v6323_v11, %v11390_v44 }
 0xb04   : > { %v4776_v2 = vadd.f32 %v4701_v56, %v4456_v18 }
 0xb05   : > { %v3652_v21 = vadd.f32 %v11417_v3, %v3332_v52 }
 0xb06   : > { %v6826_v36 = vpack.i.bf16 %v4777_v45, %v4776_v2  ;;  %v11416_v2 = vld [vmem:[#allocation264_spill] sm:$0xff] }
 0xb08   : > { %6822 = vperm.xlu2 %6753, %v11365_v46   ;;  %6827 = vrot.lane.b32.xlu1 %v6826_v36, %s6908_s23  ;;  %v3653_v36 = vadd.f32 %v11416_v2, %v3333_v19  ;;  %v6813_v19 = vpop.permute.xlu0 %6812  ;;  %v6243_v2 = vld [vmem:[%s10595_s8 + $0x8] sm:$0xff] }
 0xb09   : > { %5684 = vmatpush.bf16.msra.mxu0 %v6243_v2 }
 0xb0a   : > { %v3973_v15 = vadd.f32 %v3895_v28, %v3653_v36  ;;  %v11421_v36 = vld [vmem:[#allocation80_spill] sm:$0xff] }
 0xb0b   : > { %v3893_v0 = vpop.permute.xlu2 %3892 }
 0xb0c   : > { %v4934_v29 = vsel %vm4916_vm7, %v11376_v48, %v3973_v15  ;;  %v6808_v48 = vunpack.i.l.bf16 %v10162_v22 }
 0xb10   : > { %4392 = vrot.lane.b32.xlu2 %v4302_v43, %s6907_s22  ;;  %4394 = vrot.lane.b32.xlu1 %v4303_v63, %s6907_s22  ;;  %v11418_v63 = vld [vmem:[#allocation165_spill] sm:$0xff] }
 0xb11   : > { %v11419_v43 = vld [vmem:[#allocation161_spill] sm:$0xff] }
 0xb13   : > { %v6782_v42 = vpop.permute.xlu2 %6781 }
 0xb14   : > { %v6784_v51 = vunpack.i.h.bf16 %v6782_v42  ;;  %v6783_v47 = vunpack.i.l.bf16 %v6782_v42 }
 0xb16   : > { %v4623_v37 = vmul.f32 %v6784_v51, %v11412_v23  ;;  %v4622_v24 = vmul.f32 %v6783_v47, %v11413_v27 }
 0xb18   : > { %4712 = vrot.lane.b32.xlu2 %v4622_v24, %s6901_s16  ;;  %4714 = vrot.lane.b32.xlu1 %v4623_v37, %s6901_s16  ;;  %v3972_v37 = vadd.f32 %v3893_v0, %v3652_v21  ;;  %v11422_v21 = vld [vmem:[#allocation98_spill] sm:$0xff] }
 0xb1a   : > { %v4933_v5 = vsel %vm4916_vm7, %v11275_v30, %v3972_v37  ;;  %v6814_v30 = vunpack.i.l.bf16 %v6813_v19 }
 0xb1b   : > { %v4385_v12 = vpop.permute.xlu2 %4384 }
 0xb1c   : > { %v4138_v3 = vmul.f32 %v6814_v30, %v11421_v36 }
 0xb20   : > { %3906 = vrot.lane.b32.xlu2 %v3819_v26, %s6901_s16 }
 0xb23   : > { %v4705_v17 = vpop.permute.xlu2 %4704 }
 0xb28   : > { %4396 = vrot.lane.b32.xlu2 %v4304_v4, %s6907_s22  ;;  %v11420_v4 = vld [vmem:[#allocation56_spill] sm:$0xff] }
 0xb2b   : > { %v10153_v39 = vpop.permute.xlu2 %3896 }
 0xb2e   : > { %v5099_v20 = vpop.f32.mrf.mxu1 }
 0xb2f   : > { %v5100_v45 = vadd.f32 %v9876_v32, %v5099_v20  ;;  %v6510_v20 = vunpack.i.h.bf16 %v11420_v4 }
 0xb31   : > { %v5164_v44 = vmax.f32 %v5100_v45, 0.0  ;;  %v4306_v45 = vmul.f32 %v6808_v48, %v9769_v57  ;;  %v11424_v48 = vld [vmem:[#allocation108_spill] sm:$0xff] }
 0xb33   : > { %v6797_v61 = vpop.permute.xlu2 %6796 }
 0xb34   : > { %v6799_v18 = vunpack.i.h.bf16 %v6797_v61  ;;  %v6798_v56 = vunpack.i.l.bf16 %v6797_v61  ;;  %v3821_v61 = vmul.f32 %v6510_v20, %v11406_v1 }
 0xb36   : > { %v4625_v49 = vmul.f32 %v6799_v18, %v11418_v63  ;;  %v4624_v42 = vmul.f32 %v6798_v56, %v11419_v43  ;;  %v5101_v51 = vpop.f32.mrf.mxu1  ;;  %v6815_v56 = vunpack.i.h.bf16 %v6813_v19 }
 0xb37   : > { %v5102_v47 = vadd.f32 %v9876_v32, %v5101_v51  ;;  %v4458_v51 = vadd.f32 %v4385_v12, %v4138_v3 }
 0xb38   : > { %4716 = vrot.lane.b32.xlu0 %v4624_v42, %s6901_s16  ;;  %4718 = vrot.lane.b32.xlu2 %v4625_v49, %s6901_s16  ;;  %v4139_v49 = vmul.f32 %v6815_v56, %v11422_v21  ;;  %v11425_v56 = vld [vmem:[#allocation157_spill] sm:$0xff] }
 0xb39   : > { %v5165_v24 = vmax.f32 %v5102_v47, 0.0 }
 0xb3a   : > { %v6787_v7 = vpop.permute.xlu1 %6786 }
 0xb3b   : > { %v5196_v26 = vpack.c.bf16 %v5165_v24, %v5164_v44  ;;  %v6789_v34 = vunpack.i.h.bf16 %v6787_v7  ;;  %v6788_v60 = vunpack.i.l.bf16 %v6787_v7  ;;  %v10189_v37 = vpop.permute.xlu2 %4388  ;;  %v6242_v24 = vld [vmem:[%s10595_s8] sm:$0xff]  ;;  %v4778_v7 = vadd.f32 %v4705_v17, %v4458_v51 }
 0xb3c   : > { %5685 = vmatpush.bf16.msra.mxu0 %v6242_v24 }
 0xb3d   : > { %v4966_v0 = vsel %vm4949_vm6, %v4933_v5, %v6788_v60  ;;  %v4967_v11 = vsel %vm4949_vm6, %v4934_v29, %v6789_v34  ;;  %6137 = vmatmul.msk.bf16.gmra.mxu2 %vm5016_vm8, %v5196_v26  ;;  %v6794_v5 = vunpack.i.h.bf16 %v10147_v6 }
 0xb3e   : > { %v4994_v28 = vpack.c.bf16 %v4967_v11, %v4966_v0  ;;  %v11423_v0 = vld [vmem:[#allocation26_spill] sm:$0xff] }
 0xb3f   : > { %v6329_v11 = vunpack.i.h.bf16 %v11423_v0 }
 0xb40   : > { %3910 = vrot.lane.b32.xlu0 %v3821_v61, %s6901_s16  ;;  %6112 = vmatmul.msk.bf16.gmra.mxu1 %vm5016_vm8, %v4994_v28  ;;  %v6328_v28 = vunpack.i.l.bf16 %v11423_v0 }
 0xb41   : > { %v5283_v52 = vpop.f32.mrf.mxu2 }
 0xb42   : > { %v4387_v18 = vpop.permute.xlu1 %4386  ;;  %v5284_v42 = vadd.f32 %v10075_v55, %v5283_v52  ;;  %v3334_v17 = vmul.f32 %v6328_v28, %v11399_v50  ;;  %v3335_v52 = vmul.f32 %v6329_v11, %v11398_v38  ;;  %v10225_v11 = vld [vmem:[%s10594_s7 + $0x2] ss:$0 sm:$0xff] }
 0xb43   : > { %v4459_v47 = vadd.f32 %v4387_v18, %v4139_v49  ;;  %v4305_v18 = vmul.f32 %v6794_v5, %v11424_v48 }
 0xb44   : > { %v5360_v34 = vmax.f32 %v5284_v42, 0.0  ;;  %v3654_v30 = vadd.f32 %v11425_v56, %v3334_v17  ;;  %v11429_v56 = vld [vmem:[#allocation85_spill] sm:$0xff] }
 0xb46   : > { %v3974_v49 = vadd.f32 %v10153_v39, %v3654_v30 }
 0xb48   : > { %4400 = vrot.lane.b32.xlu0 %v4306_v45, %s6907_s22  ;;  %v11426_v45 = vld [vmem:[#allocation32_spill] sm:$0xff] }
 0xb49   : > { %v5285_v15 = vpop.f32.mrf.mxu2  ;;  %v3655_v2 = vadd.f32 %v11426_v45, %v3335_v52  ;;  %v11428_v52 = vld [vmem:[#allocation93_spill] sm:$0xff] }
 0xb4a   : > { %v5286_v57 = vadd.f32 %v10075_v55, %v5285_v15  ;;  %v4707_v44 = vpop.permute.xlu1 %4706 }
 0xb4b   : > { %v4779_v26 = vadd.f32 %v4707_v44, %v4459_v47 }
 0xb4c   : > { %v5361_v60 = vmax.f32 %v5286_v57, 0.0  ;;  %v6509_v57 = vunpack.i.l.bf16 %v11420_v4  ;;  %v6818_v4 = vpop.permute.xlu0 %6817 }
 0xb4d   : > { %v6836_v20 = vpack.i.bf16 %v4779_v26, %v4778_v7  ;;  %v4935_v7 = vsel %vm4916_vm7, %v11384_v62, %v3974_v49  ;;  %v6819_v0 = vunpack.i.l.bf16 %v6818_v4 }
 0xb4e   : > { %v5396_v29 = vpack.c.bf16 %v5361_v60, %v5360_v34  ;;  %v3820_v60 = vmul.f32 %v6509_v57, %v11407_v53 }
 0xb4f   : > { %6837 = vrot.lane.b32.xlu1 %v6836_v20, %s6908_s23  ;;  %v5104_v12 = vpop.f32.mrf.mxu1  ;;  %v4140_v48 = vmul.f32 %v6819_v0, %v11428_v52 }
 0xb50   : > { %6161 = vmatmul.msk.bf16.gmra.mxu3 %vm5016_vm8, %v5396_v29  ;;  %v5105_v3 = vadd.f32 %v9876_v32, %v5104_v12 }
 0xb52   : > { %v4709_v61 = vpop.permute.xlu2 %4708  ;;  %v3899_v19 = vpop.permute.xlu1 %3898  ;;  %v5166_v47 = vmax.f32 %v5105_v3, 0.0  ;;  %v4460_v3 = vadd.f32 %v10189_v37, %v4140_v48 }
 0xb53   : > { %v3975_v42 = vadd.f32 %v3899_v19, %v3655_v2  ;;  %v11427_v19 = vld [vmem:[#allocation173_spill] sm:$0xff] }
 0xb55   : > { %v4936_v26 = vsel %vm4916_vm7, %v11400_v14, %v3975_v42  ;;  %v6820_v14 = vunpack.i.h.bf16 %v6818_v4  ;;  %v6809_v4 = vunpack.i.h.bf16 %v10162_v22  ;;  %v10255_v22 = vld [vmem:[%s10594_s7] ss:$0 sm:$0xff] }
 0xb57   : > { %4398 = vrot.lane.b32.xlu1 %v4305_v18, %s6907_s22  ;;  %v5106_v6 = vpop.f32.mrf.mxu1  ;;  %v4141_v30 = vmul.f32 %v6820_v14, %v11429_v56 }
 0xb58   : > { %v5107_v51 = vadd.f32 %v9876_v32, %v5106_v6 }
 0xb5a   : > { %v5167_v50 = vmax.f32 %v5107_v51, 0.0  ;;  %v10209_v15 = vpop.permute.xlu2 %3900  ;;  %v6802_v38 = vpop.permute.xlu1 %6801 }
 0xb5b   : > { %v6804_v44 = vunpack.i.h.bf16 %v6802_v38  ;;  %v6803_v24 = vunpack.i.l.bf16 %v6802_v38  ;;  %v4780_v38 = vadd.f32 %v4709_v61, %v4460_v3  ;;  %v11431_v61 = vld [vmem:[#allocation24_spill] sm:$0xff] }
 0xb5c   : > { %v5197_v34 = vpack.c.bf16 %v5167_v50, %v5166_v47 }
 0xb5d   : > { %v4969_v39 = vsel %vm4949_vm6, %v4936_v26, %v6804_v44  ;;  %v4968_v32 = vsel %vm4949_vm6, %v4935_v7, %v6803_v24 }
 0xb5e   : > { %v4995_v20 = vpack.c.bf16 %v4969_v39, %v4968_v32  ;;  %6138 = vmatmul.msk.bf16.gmra.mxu2 %vm5016_vm8, %v5197_v34 }
 0xb5f   : > { %3908 = vrot.lane.b32.xlu1 %v3820_v60, %s6901_s16 }
 0xb60   : > { %6113 = vmatmul.msk.bf16.gmra.mxu1 %vm5016_vm8, %v4995_v20  ;;  %v5482_v29 = vpop.f32.mrf.mxu3  ;;  %v6333_v20 = vunpack.i.l.bf16 %v11431_v61 }
 0xb61   : > { %v5288_v62 = vpop.f32.mrf.mxu2  ;;  %v5483_v18 = vadd.f32 %v10225_v11, %v5482_v29 }
 0xb62   : > { %v6823_v12 = vpop.permute.xlu2 %6822  ;;  %v4391_v5 = vpop.permute.xlu1 %4390  ;;  %v5289_v45 = vadd.f32 %v10075_v55, %v5288_v62  ;;  %v6334_v62 = vunpack.i.h.bf16 %v11431_v61  ;;  %v3336_v0 = vmul.f32 %v6333_v20, %v11410_v13 }
 0xb63   : > { %v6825_v28 = vunpack.i.h.bf16 %v6823_v12  ;;  %v6824_v6 = vunpack.i.l.bf16 %v6823_v12  ;;  %v4461_v49 = vadd.f32 %v4391_v5, %v4141_v30  ;;  %v5562_v57 = vmax.f32 %v5483_v18, 0.0  ;;  %v11432_v5 = vld [vmem:[#allocation55_spill] sm:$0xff]  ;;  %v11434_v18 = vld [vmem:[#allocation152_spill] sm:$0xff] }
 0xb64   : > { %v5362_v7 = vmax.f32 %v5289_v45, 0.0  ;;  %v6515_v14 = vunpack.i.h.bf16 %v11432_v5  ;;  %v4307_v30 = vmul.f32 %v6809_v4, %v11434_v18 }
 0xb65   : > { %v4627_v17 = vmul.f32 %v6825_v28, %v11427_v19  ;;  %v3337_v28 = vmul.f32 %v6334_v62, %v11409_v31 }
 0xb66   : > { %v3823_v45 = vmul.f32 %v6515_v14, %v11412_v23 }
 0xb67   : > { %4722 = vrot.lane.b32.xlu0 %v4627_v17, %s6901_s16  ;;  %6853 = vperm.xlu1 %6851, %v11365_v46   ;;  %v11430_v46 = vld [vmem:[#allocation168_spill] sm:$0xff]  ;;  %v11433_v17 = vld [vmem:[#allocation257_spill] sm:$0xff] }
 0xb68   : > { %v5484_v2 = vpop.f32.mrf.mxu3  ;;  %v4626_v34 = vmul.f32 %v6824_v6, %v11430_v46  ;;  %v3656_v48 = vadd.f32 %v11433_v17, %v3336_v0  ;;  %v11437_v17 = vld [vmem:[#allocation57_spill] sm:$0xff] }
 0xb69   : > { %v5485_v42 = vadd.f32 %v10225_v11, %v5484_v2  ;;  %v5290_v51 = vpop.f32.mrf.mxu2  ;;  %v11435_v2 = vld [vmem:[#allocation34_spill] sm:$0xff] }
 0xb6a   : > { %v5291_v47 = vadd.f32 %v10075_v55, %v5290_v51  ;;  %v4711_v50 = vpop.permute.xlu1 %4710  ;;  %v3657_v3 = vadd.f32 %v11435_v2, %v3337_v28 }
 0xb6b   : > { %v5563_v44 = vmax.f32 %v5485_v42, 0.0  ;;  %v4781_v24 = vadd.f32 %v4711_v50, %v4461_v49  ;;  %v3976_v49 = vadd.f32 %v10209_v15, %v3656_v48  ;;  %v11436_v50 = vld [vmem:[#allocation44_spill] sm:$0xff]  ;;  %v6514_v15 = vunpack.i.l.bf16 %v11432_v5 }
 0xb6c   : > { %v5363_v26 = vmax.f32 %v5291_v47, 0.0  ;;  %v6519_v28 = vunpack.i.l.bf16 %v11436_v50  ;;  %v6525_v48 = vunpack.i.h.bf16 %v11437_v17 }
 0xb6d   : > { %v5598_v39 = vpack.c.bf16 %v5563_v44, %v5562_v57  ;;  %v6846_v32 = vpack.i.bf16 %v4781_v24, %v4780_v38  ;;  %v6520_v38 = vunpack.i.h.bf16 %v11436_v50  ;;  %v3822_v62 = vmul.f32 %v6514_v15, %v11413_v27 }
 0xb6e   : > { %v5397_v60 = vpack.c.bf16 %v5363_v26, %v5362_v7  ;;  %v4937_v26 = vsel %vm4916_vm7, %v11389_v41, %v3976_v49  ;;  %v3824_v2 = vmul.f32 %v6519_v28, %v11419_v43  ;;  %v11439_v49 = vld [vmem:[#allocation131_spill] sm:$0xff] }
 0xb6f   : > { %4720 = vrot.lane.b32.xlu1 %v4626_v34, %s6901_s16  ;;  %6847 = vrot.lane.b32.xlu2 %v6846_v32, %s6908_s23  ;;  %v5109_v37 = vpop.f32.mrf.mxu1 }
 0xb70   : > { %6184 = vmatmul.msk.bf16.vlgmr.msra.gmra.mxu0 %vm5016_vm8, %v5598_v39  ;;  %6162 = vmatmul.msk.bf16.gmra.mxu3 %vm5016_vm8, %v5397_v60  ;;  %v5110_v6 = vadd.f32 %v10255_v22, %v5109_v37 }
 0xb71   : > { %v5293_v29 = vpop.f32.mrf.mxu2 }
 0xb72   : > { %v3903_v12 = vpop.permute.xlu1 %3902  ;;  %v5294_v13 = vadd.f32 %v10075_v55, %v5293_v29  ;;  %v5168_v57 = vmax.f32 %v5110_v6, 0.0  ;;  %v3825_v29 = vmul.f32 %v6520_v38, %v11418_v63 }
 0xb73   : > { %v3977_v42 = vadd.f32 %v3903_v12, %v3657_v3  ;;  %v4393_v12 = vpop.permute.xlu2 %4392  ;;  %v11438_v3 = vld [vmem:[#allocation134_spill] sm:$0xff] }
 0xb74   : > { %v5364_v32 = vmax.f32 %v5294_v13, 0.0 }
 0xb75   : > { %v4938_v60 = vsel %vm4916_vm7, %v11375_v10, %v3977_v42  ;;  %v6833_v10 = vpop.permute.xlu0 %6832 }
 0xb76   : > { %v6835_v18 = vunpack.i.h.bf16 %v6833_v10 }
 0xb77   : > { %3914 = vrot.lane.b32.xlu1 %v3823_v45, %s6901_s16  ;;  %4402 = vrot.lane.b32.xlu2 %v4307_v30, %s6907_s22  ;;  %v5111_v31 = vpop.f32.mrf.mxu1  ;;  %v6834_v30 = vunpack.i.l.bf16 %v6833_v10  ;;  %v3827_v45 = vmul.f32 %v6525_v48, %v11427_v19 }
 0xb78   : > { %v5112_v51 = vadd.f32 %v10255_v22, %v5111_v31  ;;  %v4143_v31 = vmul.f32 %v6835_v18, %v11439_v49 }
 0xb79   : > { %v5295_v47 = vpop.f32.mrf.mxu2  ;;  %v4142_v6 = vmul.f32 %v6834_v30, %v11438_v3 }
 0xb7a   : > { %v5169_v44 = vmax.f32 %v5112_v51, 0.0  ;;  %v5296_v24 = vadd.f32 %v10075_v55, %v5295_v47  ;;  %v6828_v7 = vpop.permute.xlu1 %6827 }
 0xb7b   : > { %v6830_v34 = vunpack.i.h.bf16 %v6828_v7  ;;  %v6829_v39 = vunpack.i.l.bf16 %v6828_v7  ;;  %v4713_v13 = vpop.permute.xlu2 %4712  ;;  %v4462_v51 = vadd.f32 %v4393_v12, %v4142_v6 }
 0xb7c   : > { %v5198_v37 = vpack.c.bf16 %v5169_v44, %v5168_v57  ;;  %v5365_v61 = vmax.f32 %v5296_v24, 0.0  ;;  %v6524_v44 = vunpack.i.l.bf16 %v11437_v17 }
 0xb7d   : > { %v4971_v20 = vsel %vm4949_vm6, %v4938_v60, %v6830_v34  ;;  %v4970_v4 = vsel %vm4949_vm6, %v4937_v26, %v6829_v39  ;;  %v4782_v24 = vadd.f32 %v4713_v13, %v4462_v51  ;;  %v3905_v60 = vpop.permute.xlu0 %3904 }
 0xb7e   : > { %v5398_v5 = vpack.c.bf16 %v5365_v61, %v5364_v32  ;;  %v4996_v14 = vpack.c.bf16 %v4971_v20, %v4970_v4  ;;  %6139 = vmatmul.msk.bf16.gmra.mxu2 %vm5016_vm8, %v5198_v37  ;;  %v3826_v39 = vmul.f32 %v6524_v44, %v11430_v46  ;;  %v11440_v61 = vld [vmem:[#allocation15_spill] sm:$0xff] }
 0xb7f   : > { %3918 = vrot.lane.b32.xlu1 %v3825_v29, %s6901_s16  ;;  %3912 = vrot.lane.b32.xlu2 %v3822_v62, %s6901_s16  ;;  %v6339_v20 = vunpack.i.h.bf16 %v11440_v61  ;;  %v6338_v4 = vunpack.i.l.bf16 %v11440_v61 }
 0xb80   : > { %6114 = vmatmul.msk.bf16.gmra.mxu1 %vm5016_vm8, %v4996_v14  ;;  %6163 = vmatmul.msk.bf16.gmra.mxu3 %vm5016_vm8, %v5398_v5  ;;  %v11441_v5 = vld [vmem:[#allocation156_spill] sm:$0xff] }
 0xb81   : > { %v5298_v41 = vpop.f32.mrf.mxu2  ;;  %v3339_v29 = vmul.f32 %v6339_v20, %v11422_v21  ;;  %v3338_v62 = vmul.f32 %v6338_v4, %v11421_v36 }
 0xb82   : > { %v4395_v0 = vpop.permute.xlu1 %4394  ;;  %v5299_v42 = vadd.f32 %v10075_v55, %v5298_v41 }
 0xb83   : > { %v4463_v47 = vadd.f32 %v4395_v0, %v4143_v31  ;;  %v3907_v37 = vpop.permute.xlu2 %3906  ;;  %v3659_v14 = vadd.f32 %v11441_v5, %v3339_v29  ;;  %v3658_v10 = vadd.f32 %v9977_v54, %v3338_v62 }
 0xb84   : > { %v5366_v15 = vmax.f32 %v5299_v42, 0.0 }
 0xb85   : > { %v6843_v12 = vpop.permute.xlu0 %6842  ;;  %v3978_v28 = vadd.f32 %v3905_v60, %v3658_v10  ;;  %v3979_v17 = vadd.f32 %v3907_v37, %v3659_v14 }
 0xb86   : > { %v6845_v6 = vunpack.i.h.bf16 %v6843_v12  ;;  %v6844_v31 = vunpack.i.l.bf16 %v6843_v12 }
 0xb87   : > { %3922 = vrot.lane.b32.xlu1 %v3827_v45, %s6901_s16  ;;  %3916 = vrot.lane.b32.xlu2 %v3824_v2, %s6901_s16  ;;  %v4939_v2 = vsel %vm4916_vm7, %v11383_v35, %v3978_v28  ;;  %v4940_v36 = vsel %vm4916_vm7, %v11397_v33, %v3979_v17  ;;  %v11442_v35 = vld [vmem:[#allocation120_spill] sm:$0xff] }
 0xb88   : > { %v4144_v44 = vmul.f32 %v6844_v31, %v11442_v35 }
 0xb89   : > { %v5300_v50 = vpop.f32.mrf.mxu2 }
 0xb8a   : > { %v5301_v38 = vadd.f32 %v10075_v55, %v5300_v50  ;;  %v4715_v57 = vpop.permute.xlu1 %4714 }
 0xb8b   : > { %v4783_v7 = vadd.f32 %v4715_v57, %v4463_v47  ;;  %v4397_v0 = vpop.permute.xlu2 %4396 }
 0xb8c   : > { %v5367_v26 = vmax.f32 %v5301_v38, 0.0  ;;  %v4464_v37 = vadd.f32 %v4397_v0, %v4144_v44  ;;  %v11446_v44 = vld [vmem:[#allocation95_spill] sm:$0xff] }
 0xb8d   : > { %v6857_v34 = vpack.i.bf16 %v4783_v7, %v4782_v24 }
 0xb8e   : > { %v5399_v32 = vpack.c.bf16 %v5367_v26, %v5366_v15  ;;  %v11443_v15 = vld [vmem:[#allocation77_spill] sm:$0xff] }
 0xb8f   : > { %3920 = vrot.lane.b32.xlu2 %v3826_v39, %s6901_s16  ;;  %6858 = vrot.lane.b32.xlu0 %v6857_v34, %s6908_s23  ;;  %v4145_v26 = vmul.f32 %v6845_v6, %v11443_v15  ;;  %s5863_s16 = sshll.u32 %s11452_s17, 3 }
 0xb90   : > { %6164 = vmatmul.msk.bf16.gmra.mxu3 %vm5016_vm8, %v5399_v32  ;;  %v11444_v32 = vld [vmem:[#allocation29_spill] sm:$0xff]  ;;  %s10349_s19 = scalar_lea.vmem %s10597_s10, %s5863_s16 }
 0xb91   : > { %v6344_v60 = vunpack.i.h.bf16 %v11444_v32  ;;  %v6343_v62 = vunpack.i.l.bf16 %v11444_v32 }
 0xb93   : > { %v4719_v50 = vpop.permute.xlu2 %4718  ;;  %v3341_v12 = vmul.f32 %v6344_v60, %v11429_v56  ;;  %v3340_v28 = vmul.f32 %v6343_v62, %v11428_v52 }
 0xb95   : > { %v3661_v17 = vadd.f32 %v9988_v9, %v3341_v12 }
 0xbaa   : > { %v4717_v21 = vpop.permute.xlu0 %4716 }
 0xbab   : > { %v4784_v5 = vadd.f32 %v4717_v21, %v4464_v37 }
 0xbb2   : > { %v3911_v10 = vpop.permute.xlu0 %3910 }
 0xbbd   : > { %v5114_v41 = vpop.f32.mrf.mxu1 }
 0xbbe   : > { %v5115_v13 = vadd.f32 %v10255_v22, %v5114_v41 }
 0xbc0   : > { %v5303_v48 = vpop.f32.mrf.mxu2  ;;  %v5170_v33 = vmax.f32 %v5115_v13, 0.0 }
 0xbc1   : > { %v6838_v18 = vpop.permute.xlu1 %6837  ;;  %v5304_v57 = vadd.f32 %v10075_v55, %v5303_v48 }
 0xbc2   : > { %v6840_v30 = vunpack.i.h.bf16 %v6838_v18  ;;  %v6839_v45 = vunpack.i.l.bf16 %v6838_v18  ;;  %v3660_v18 = vadd.f32 %v10003_v40, %v3340_v28  ;;  %v4401_v40 = vpop.permute.xlu0 %4400 }
 0xbc3   : > { %v5368_v4 = vmax.f32 %v5304_v57, 0.0 }
 0xbc4   : > { %v4972_v54 = vsel %vm4949_vm6, %v4939_v2, %v6839_v45  ;;  %v4973_v42 = vsel %vm4949_vm6, %v4940_v36, %v6840_v30  ;;  %v3981_v30 = vadd.f32 %v3911_v10, %v3661_v17 }
 0xbc5   : > { %v4997_v51 = vpack.c.bf16 %v4973_v42, %v4972_v54  ;;  %v5116_v47 = vpop.f32.mrf.mxu1 }
 0xbc6   : > { %v5117_v38 = vadd.f32 %v10255_v22, %v5116_v47  ;;  %v4942_v21 = vsel %vm4916_vm7, %v11406_v1, %v3981_v30  ;;  %v11445_v1 = vld [vmem:[#allocation261_spill] sm:$0xff] }
 0xbc7   : > { %6115 = vmatmul.msk.bf16.gmra.mxu1 %vm5016_vm8, %v4997_v51 }
 0xbc8   : > { %v5171_v24 = vmax.f32 %v5117_v38, 0.0  ;;  %v5305_v7 = vpop.f32.mrf.mxu2 }
 0xbc9   : > { %v5306_v34 = vadd.f32 %v10075_v55, %v5305_v7  ;;  %v4399_v39 = vpop.permute.xlu1 %4398  ;;  %v6848_v48 = vpop.permute.xlu2 %6847 }
 0xbca   : > { %v5199_v61 = vpack.c.bf16 %v5171_v24, %v5170_v33  ;;  %v4465_v20 = vadd.f32 %v4399_v39, %v4145_v26  ;;  %v6850_v56 = vunpack.i.h.bf16 %v6848_v48  ;;  %v6849_v6 = vunpack.i.l.bf16 %v6848_v48 }
 0xbcb   : > { %v5369_v29 = vmax.f32 %v5306_v34, 0.0 }
 0xbcc   : > { %v4785_v14 = vadd.f32 %v4719_v50, %v4465_v20  ;;  %6140 = vmatmul.msk.bf16.gmra.mxu2 %vm5016_vm8, %v5199_v61  ;;  %v4975_v52 = vsel %vm4949_vm6, %v4942_v21, %v6850_v56 }
 0xbcd   : > { %v5400_v41 = vpack.c.bf16 %v5369_v29, %v5368_v4 }
 0xbce   : > { %v6862_v0 = vpack.i.bf16 %v4785_v14, %v4784_v5 }
 0xbcf   : > { %6165 = vmatmul.msk.bf16.gmra.mxu3 %vm5016_vm8, %v5400_v41 }
 0xbd0   : > { %6863 = vrot.lane.b32.xlu0 %v6862_v0, %s6908_s23  ;;  %v10343_v0 = vld [vmem:[%s10596_s9] ss:$0 sm:$0xff] }
 0xbd1   : > { %v3909_v45 = vpop.permute.xlu1 %3908  ;;  %v4403_v24 = vpop.permute.xlu2 %4402 }
 0xbd2   : > { %v3980_v2 = vadd.f32 %v3909_v45, %v3660_v18 }
 0xbd3   : > { %v5487_v36 = vpop.f32.mrf.mxu3 }
 0xbd4   : > { %v4941_v9 = vsel %vm4916_vm7, %v11407_v53, %v3980_v2  ;;  %v5488_v54 = vadd.f32 %v10225_v11, %v5487_v36 }
 0xbd5   : > { %v4974_v31 = vsel %vm4949_vm6, %v4941_v9, %v6849_v6  ;;  %v11447_v9 = vld [vmem:[#allocation27_spill] sm:$0xff] }
 0xbd6   : > { %v4998_v13 = vpack.c.bf16 %v4975_v52, %v4974_v31  ;;  %v5564_v7 = vmax.f32 %v5488_v54, 0.0  ;;  %v6349_v52 = vunpack.i.h.bf16 %v11447_v9  ;;  %v6348_v31 = vunpack.i.l.bf16 %v11447_v9 }
 0xbd8   : > { %6116 = vmatmul.msk.bf16.gmra.mxu1 %vm5016_vm8, %v4998_v13  ;;  %v3343_v54 = vmul.f32 %v6349_v52, %v11439_v49 }
 0xbd9   : > { %v6854_v42 = vpop.permute.xlu1 %6853  ;;  %v4723_v37 = vpop.permute.xlu0 %4722 }
 0xbda   : > { %v6856_v51 = vunpack.i.h.bf16 %v6854_v42  ;;  %v6855_v47 = vunpack.i.l.bf16 %v6854_v42 }
 0xbdb   : > { %v5489_v50 = vpop.f32.mrf.mxu3 }
 0xbdc   : > { %v5490_v38 = vadd.f32 %v10225_v11, %v5489_v50  ;;  %v4147_v57 = vmul.f32 %v6856_v51, %v11445_v1  ;;  %v4146_v53 = vmul.f32 %v6855_v47, %v11446_v44  ;;  %v3913_v51 = vpop.permute.xlu2 %3912 }
 0xbdd   : > { %v5119_v33 = vpop.f32.mrf.mxu1 }
 0xbde   : > { %v5565_v26 = vmax.f32 %v5490_v38, 0.0  ;;  %v4467_v34 = vadd.f32 %v4403_v24, %v4147_v57  ;;  %v4466_v32 = vadd.f32 %v4401_v40, %v4146_v53  ;;  %v5120_v29 = vadd.f32 %v10255_v22, %v5119_v33  ;;  %v11448_v38 = vld [vmem:[#allocation144_spill] sm:$0xff] }
 0xbdf   : > { %v3342_v40 = vmul.f32 %v6348_v31, %v11438_v3  ;;  %v3663_v53 = vadd.f32 %v10037_v16, %v3343_v54  ;;  %v11449_v54 = vld [vmem:[#allocation17_spill] sm:$0xff] }
 0xbe0   : > { %v5599_v39 = vpack.c.bf16 %v5565_v26, %v5564_v7  ;;  %v4787_v4 = vadd.f32 %v4723_v37, %v4467_v34  ;;  %v5172_v14 = vmax.f32 %v5120_v29, 0.0 }
 0xbe1   : > { %v5308_v60 = vpop.f32.mrf.mxu2  ;;  %v4721_v61 = vpop.permute.xlu1 %4720  ;;  %v3662_v57 = vadd.f32 %v11448_v38, %v3342_v40 }
 0xbe2   : > { %6185 = vmatmul.msk.bf16.gmra.mxu0 %vm5016_vm8, %v5599_v39  ;;  %v4786_v20 = vadd.f32 %v4721_v61, %v4466_v32  ;;  %v5309_v10 = vadd.f32 %v10075_v55, %v5308_v60 }
 0xbe3   : > { %v3982_v26 = vadd.f32 %v3913_v51, %v3662_v57  ;;  %v6353_v51 = vunpack.i.l.bf16 %v11449_v54 }
 0xbe4   : > { %v6867_v62 = vpack.i.bf16 %v4787_v4, %v4786_v20  ;;  %v5370_v18 = vmax.f32 %v5309_v10, 0.0  ;;  %v3917_v38 = vpop.permute.xlu2 %3916 }
 0xbe5   : > { %v5121_v12 = vpop.f32.mrf.mxu1  ;;  %v4943_v49 = vsel %vm4916_vm7, %v11413_v27, %v3982_v26 }
 0xbe6   : > { %v5122_v5 = vadd.f32 %v10255_v22, %v5121_v12  ;;  %6868 = vrot.lane.b32.xlu0 %v6867_v62, %s6908_s23 }
 0xbe8   : > { %v5173_v41 = vmax.f32 %v5122_v5, 0.0 }
 0xbe9   : > { %v5310_v28 = vpop.f32.mrf.mxu2  ;;  %v3915_v47 = vpop.permute.xlu1 %3914 }
 0xbea   : > { %v5200_v17 = vpack.c.bf16 %v5173_v41, %v5172_v14  ;;  %v5311_v48 = vadd.f32 %v10075_v55, %v5310_v28  ;;  %v3983_v34 = vadd.f32 %v3915_v47, %v3663_v53 }
 0xbec   : > { %v5371_v30 = vmax.f32 %v5311_v48, 0.0  ;;  %6141 = vmatmul.msk.bf16.gmra.mxu2 %vm5016_vm8, %v5200_v17  ;;  %v4944_v61 = vsel %vm4916_vm7, %v11412_v23, %v3983_v34 }
 0xbed   : > { %v5687_v56 = vpop.f32.mrf.mxu0 }
 0xbee   : > { %v5401_v45 = vpack.c.bf16 %v5371_v30, %v5370_v18  ;;  %v5688_v2 = vadd.f32 %v10343_v0, %v5687_v56 }
 0xbf0   : > { %5767 = vst.msk [vmem:[%s10349_s19] sm:$0xff] %vm1809_vm3, %v5688_v2  ;;  %6166 = vmatmul.msk.bf16.gmra.mxu3 %vm5016_vm8, %v5401_v45 }
 0xbf1   : > { %v3919_v57 = vpop.permute.xlu1 %3918 }
 0xbf3   : > { %v5492_v6 = vpop.f32.mrf.mxu3 }
 0xbf4   : > { %v5493_v13 = vadd.f32 %v10225_v11, %v5492_v6 }
 0xbf5   : > { %v5689_v36 = vpop.f32.mrf.mxu0 }
 0xbf6   : > { %v5690_v21 = vadd.f32 %v10343_v0, %v5689_v36  ;;  %v5566_v24 = vmax.f32 %v5493_v13, 0.0 }
 0xbf8   : > { %5768 = vst.msk [vmem:[%s10349_s19 + $0x8] sm:$0xff] %vm1809_vm3, %v5690_v21 }
 0xbfb   : > { %v5494_v42 = vpop.f32.mrf.mxu3 }
 0xbfc   : > { %v5495_v50 = vadd.f32 %v10225_v11, %v5494_v42  ;;  %v6354_v42 = vunpack.i.h.bf16 %v11449_v54 }
 0xbfd   : > { %v5124_v33 = vpop.f32.mrf.mxu1 }
 0xbfe   : > { %v5567_v7 = vmax.f32 %v5495_v50, 0.0  ;;  %v5125_v16 = vadd.f32 %v10255_v22, %v5124_v33  ;;  %v3345_v47 = vmul.f32 %v6354_v42, %v11443_v15  ;;  %v3344_v50 = vmul.f32 %v6353_v51, %v11442_v35 }
 0xc00   : > { %v5600_v39 = vpack.c.bf16 %v5567_v7, %v5566_v24  ;;  %v5174_v14 = vmax.f32 %v5125_v16, 0.0  ;;  %v3665_v53 = vadd.f32 %v10012_v25, %v3345_v47  ;;  %v3664_v33 = vadd.f32 %v10020_v59, %v3344_v50 }
 0xc01   : > { %v6859_v32 = vpop.permute.xlu0 %6858  ;;  %v5313_v60 = vpop.f32.mrf.mxu2 }
 0xc02   : > { %v6861_v3 = vunpack.i.h.bf16 %v6859_v32  ;;  %v6860_v37 = vunpack.i.l.bf16 %v6859_v32  ;;  %6186 = vmatmul.msk.bf16.gmra.mxu0 %vm5016_vm8, %v5600_v39  ;;  %v5314_v10 = vadd.f32 %v10075_v55, %v5313_v60  ;;  %v3984_v24 = vadd.f32 %v3917_v38, %v3664_v33 }
 0xc03   : > { %v5497_v20 = vpop.f32.mrf.mxu3  ;;  %v3985_v7 = vadd.f32 %v3919_v57, %v3665_v53 }
 0xc04   : > { %v4976_v4 = vsel %vm4949_vm6, %v4943_v49, %v6860_v37  ;;  %v4977_v29 = vsel %vm4949_vm6, %v4944_v61, %v6861_v3  ;;  %v5498_v23 = vadd.f32 %v10225_v11, %v5497_v20  ;;  %v5372_v18 = vmax.f32 %v5314_v10, 0.0  ;;  %v3923_v10 = vpop.permute.xlu1 %3922 }
 0xc05   : > { %v4999_v62 = vpack.c.bf16 %v4977_v29, %v4976_v4  ;;  %v5126_v12 = vpop.f32.mrf.mxu1  ;;  %v4945_v32 = vsel %vm4916_vm7, %v11419_v43, %v3984_v24  ;;  %v4946_v60 = vsel %vm4916_vm7, %v11418_v63, %v3985_v7  ;;  %v11450_v43 = vld [vmem:[#allocation31_spill] sm:$0xff] }
 0xc06   : > { %v5127_v5 = vadd.f32 %v10255_v22, %v5126_v12  ;;  %v5568_v45 = vmax.f32 %v5498_v23, 0.0  ;;  %v6359_v4 = vunpack.i.h.bf16 %v11450_v43  ;;  %v6358_v63 = vunpack.i.l.bf16 %v11450_v43 }
 0xc07   : > { %6117 = vmatmul.msk.bf16.gmra.mxu1 %vm5016_vm8, %v4999_v62 }
 0xc08   : > { %v5175_v27 = vmax.f32 %v5127_v5, 0.0  ;;  %v3347_v12 = vmul.f32 %v6359_v4, %v11445_v1  ;;  %v3346_v5 = vmul.f32 %v6358_v63, %v11446_v44 }
 0xc09   : > { %v5315_v41 = vpop.f32.mrf.mxu2 }
 0xc0a   : > { %v5201_v28 = vpack.c.bf16 %v5175_v27, %v5174_v14  ;;  %v5316_v17 = vadd.f32 %v10075_v55, %v5315_v41  ;;  %v3921_v14 = vpop.permute.xlu2 %3920  ;;  %v3667_v27 = vadd.f32 %v10058_v58, %v3347_v12  ;;  %v3666_v41 = vadd.f32 %v10079_v8, %v3346_v5 }
 0xc0b   : > { %v5499_v48 = vpop.f32.mrf.mxu3 }
 0xc0c   : > { %v5373_v30 = vmax.f32 %v5316_v17, 0.0  ;;  %v5500_v56 = vadd.f32 %v10225_v11, %v5499_v48  ;;  %6142 = vmatmul.msk.bf16.gmra.mxu2 %vm5016_vm8, %v5201_v28  ;;  %v10411_v28 = vld [vmem:[%s10594_s7 + $0x1] ss:$0 sm:$0xff]  ;;  %v3986_v48 = vadd.f32 %v3921_v14, %v3666_v41  ;;  %v3987_v1 = vadd.f32 %v3923_v10, %v3667_v27 }
 0xc0e   : > { %v5402_v2 = vpack.c.bf16 %v5373_v30, %v5372_v18  ;;  %v5569_v6 = vmax.f32 %v5500_v56, 0.0 }
 0xc10   : > { %v5601_v36 = vpack.c.bf16 %v5569_v6, %v5568_v45  ;;  %6167 = vmatmul.msk.bf16.gmra.mxu3 %vm5016_vm8, %v5402_v2 }
 0xc12   : > { %6187 = vmatmul.msk.bf16.gmra.mxu0 %vm5016_vm8, %v5601_v36  ;;  %v4947_v36 = vsel %vm4916_vm7, %v11430_v46, %v3986_v48 }
 0xc13   : > { %v5502_v21 = vpop.f32.mrf.mxu3 }
 0xc14   : > { %v5503_v9 = vadd.f32 %v10225_v11, %v5502_v21  ;;  %v4948_v21 = vsel %vm4916_vm7, %v11427_v19, %v3987_v1 }
 0xc16   : > { %v5570_v31 = vmax.f32 %v5503_v9, 0.0 }
 0xc1b   : > { %v5504_v52 = vpop.f32.mrf.mxu3 }
 0xc1c   : > { %v5505_v55 = vadd.f32 %v10225_v11, %v5504_v52 }
 0xc1e   : > { %v5571_v13 = vmax.f32 %v5505_v55, 0.0 }
 0xc20   : > { %v5602_v40 = vpack.c.bf16 %v5571_v13, %v5570_v31 }
 0xc22   : > { %6188 = vmatmul.msk.bf16.gmra.mxu0 %vm5016_vm8, %v5602_v40 }
 0xc42   : > { %v6864_v26 = vpop.permute.xlu0 %6863 }
 0xc43   : > { %v6866_v34 = vunpack.i.h.bf16 %v6864_v26  ;;  %v6865_v39 = vunpack.i.l.bf16 %v6864_v26 }
 0xc44   : > { %v5129_v15 = vpop.f32.mrf.mxu1 }
 0xc45   : > { %v4978_v35 = vsel %vm4949_vm6, %v4945_v32, %v6865_v39  ;;  %v4979_v3 = vsel %vm4949_vm6, %v4946_v60, %v6866_v34  ;;  %v5130_v25 = vadd.f32 %v10255_v22, %v5129_v15 }
 0xc46   : > { %v5000_v37 = vpack.c.bf16 %v4979_v3, %v4978_v35 }
 0xc47   : > { %v5176_v61 = vmax.f32 %v5130_v25, 0.0 }
 0xc48   : > { %6118 = vmatmul.msk.bf16.gmra.mxu1 %vm5016_vm8, %v5000_v37 }
 0xc4c   : > { %v5131_v59 = vpop.f32.mrf.mxu1 }
 0xc4d   : > { %v5132_v49 = vadd.f32 %v10255_v22, %v5131_v59 }
 0xc4f   : > { %v5177_v20 = vmax.f32 %v5132_v49, 0.0  ;;  %v5318_v16 = vpop.f32.mrf.mxu2 }
 0xc50   : > { %v5319_v17 = vadd.f32 %v10411_v28, %v5318_v16 }
 0xc51   : > { %v5202_v29 = vpack.c.bf16 %v5177_v20, %v5176_v61 }
 0xc52   : > { %v5507_v62 = vpop.f32.mrf.mxu3  ;;  %v5374_v45 = vmax.f32 %v5319_v17, 0.0 }
 0xc53   : > { %6143 = vmatmul.msk.bf16.gmra.mxu2 %vm5016_vm8, %v5202_v29  ;;  %v5508_v30 = vadd.f32 %v10225_v11, %v5507_v62 }
 0xc55   : > { %v5134_v23 = vpop.f32.mrf.mxu1  ;;  %v5572_v40 = vmax.f32 %v5508_v30, 0.0 }
 0xc56   : > { %v5135_v52 = vadd.f32 %v10255_v22, %v5134_v23 }
 0xc57   : > { %v5320_v18 = vpop.f32.mrf.mxu2 }
 0xc58   : > { %v5321_v44 = vadd.f32 %v10411_v28, %v5320_v18  ;;  %v6869_v56 = vpop.permute.xlu0 %6868  ;;  %v5178_v50 = vmax.f32 %v5135_v52, 0.0 }
 0xc59   : > { %v6871_v2 = vunpack.i.h.bf16 %v6869_v56  ;;  %v6870_v8 = vunpack.i.l.bf16 %v6869_v56 }
 0xc5a   : > { %v5375_v58 = vmax.f32 %v5321_v44, 0.0  ;;  %v5509_v6 = vpop.f32.mrf.mxu3 }
 0xc5b   : > { %v5510_v9 = vadd.f32 %v10225_v11, %v5509_v6  ;;  %v4981_v31 = vsel %vm4949_vm6, %v4948_v21, %v6871_v2  ;;  %v4980_v13 = vsel %vm4949_vm6, %v4947_v36, %v6870_v8 }
 0xc5c   : > { %v5403_v55 = vpack.c.bf16 %v5375_v58, %v5374_v45  ;;  %v5001_v54 = vpack.c.bf16 %v4981_v31, %v4980_v13 }
 0xc5d   : > { %v5573_v42 = vmax.f32 %v5510_v9, 0.0  ;;  %v5136_v51 = vpop.f32.mrf.mxu1 }
 0xc5e   : > { %v5137_v46 = vadd.f32 %v10255_v22, %v5136_v51  ;;  %6168 = vmatmul.msk.bf16.gmra.mxu3 %vm5016_vm8, %v5403_v55  ;;  %6119 = vmatmul.msk.bf16.gmra.mxu1 %vm5016_vm8, %v5001_v54 }
 0xc5f   : > { %v5603_v19 = vpack.c.bf16 %v5573_v42, %v5572_v40  ;;  %v5692_v47 = vpop.f32.mrf.mxu0 }
 0xc60   : > { %v5179_v38 = vmax.f32 %v5137_v46, 0.0  ;;  %v5693_v57 = vadd.f32 %v10343_v0, %v5692_v47 }
 0xc61   : > { %6189 = vmatmul.msk.bf16.gmra.mxu0 %vm5016_vm8, %v5603_v19 }
 0xc62   : > { %v5203_v53 = vpack.c.bf16 %v5179_v38, %v5178_v50  ;;  %5769 = vst.msk [vmem:[%s10349_s19 + $0x10] sm:$0xff] %vm1809_vm3, %v5693_v57 }
 0xc64   : > { %6144 = vmatmul.msk.bf16.gmra.mxu2 %vm5016_vm8, %v5203_v53 }
 0xc67   : > { %v5694_v33 = vpop.f32.mrf.mxu0 }
 0xc68   : > { %v5695_v24 = vadd.f32 %v10343_v0, %v5694_v33 }
 0xc6a   : > { %5770 = vst.msk [vmem:[%s10349_s19 + $0x18] sm:$0xff] %vm1809_vm3, %v5695_v24 }
 0xc6f   : > { %v5323_v7 = vpop.f32.mrf.mxu2 }
 0xc70   : > { %v5324_v34 = vadd.f32 %v10411_v28, %v5323_v7 }
 0xc72   : > { %v5376_v60 = vmax.f32 %v5324_v34, 0.0 }
 0xc73   : > { %v5512_v26 = vpop.f32.mrf.mxu3 }
 0xc74   : > { %v5513_v15 = vadd.f32 %v10225_v11, %v5512_v26 }
 0xc76   : > { %v5574_v59 = vmax.f32 %v5513_v15, 0.0 }
 0xc77   : > { %v5325_v39 = vpop.f32.mrf.mxu2 }
 0xc78   : > { %v5326_v32 = vadd.f32 %v10411_v28, %v5325_v39 }
 0xc7a   : > { %v5377_v35 = vmax.f32 %v5326_v32, 0.0 }
 0xc7b   : > { %v5514_v3 = vpop.f32.mrf.mxu3 }
 0xc7c   : > { %v5404_v37 = vpack.c.bf16 %v5377_v35, %v5376_v60  ;;  %v5515_v25 = vadd.f32 %v10225_v11, %v5514_v3 }
 0xc7e   : > { %v5575_v49 = vmax.f32 %v5515_v25, 0.0  ;;  %6169 = vmatmul.msk.bf16.gmra.mxu3 %vm5016_vm8, %v5404_v37 }
 0xc7f   : > { %v5697_v61 = vpop.f32.mrf.mxu0 }
 0xc80   : > { %v5604_v20 = vpack.c.bf16 %v5575_v49, %v5574_v59  ;;  %v5698_v16 = vadd.f32 %v10343_v0, %v5697_v61 }
 0xc82   : > { %5771 = vst.msk [vmem:[%s10349_s19 + $0x20] sm:$0xff] %vm1809_vm3, %v5698_v16  ;;  %6190 = vmatmul.msk.bf16.gmra.mxu0 %vm5016_vm8, %v5604_v20 }
 0xc84   : > { %v5139_v43 = vpop.f32.mrf.mxu1 }
 0xc85   : > { %v5140_v29 = vadd.f32 %v10255_v22, %v5139_v43 }
 0xc87   : > { %v5699_v4 = vpop.f32.mrf.mxu0  ;;  %v5180_v5 = vmax.f32 %v5140_v29, 0.0 }
 0xc88   : > { %v5700_v63 = vadd.f32 %v10343_v0, %v5699_v4 }
 0xc8a   : > { %5772 = vst.msk [vmem:[%s10349_s19 + $0x28] sm:$0xff] %vm1809_vm3, %v5700_v63 }
 0xc8c   : > { %v5141_v62 = vpop.f32.mrf.mxu1 }
 0xc8d   : > { %v5142_v12 = vadd.f32 %v10255_v22, %v5141_v62 }
 0xc8f   : > { %v5181_v14 = vmax.f32 %v5142_v12, 0.0  ;;  %v5328_v10 = vpop.f32.mrf.mxu2  ;;  %v5702_v27 = vpop.f32.mrf.mxu0 }
 0xc90   : > { %v5703_v41 = vadd.f32 %v10343_v0, %v5702_v27  ;;  %v5329_v48 = vadd.f32 %v10411_v28, %v5328_v10 }
 0xc91   : > { %v5204_v23 = vpack.c.bf16 %v5181_v14, %v5180_v5 }
 0xc92   : > { %5773 = vst.msk [vmem:[%s10349_s19 + $0x30] sm:$0xff] %vm1809_vm3, %v5703_v41  ;;  %v5378_v56 = vmax.f32 %v5329_v48, 0.0 }
 0xc93   : > { %6145 = vmatmul.msk.bf16.gmra.mxu2 %vm5016_vm8, %v5204_v23  ;;  %v5517_v17 = vpop.f32.mrf.mxu3 }
 0xc94   : > { %v5518_v45 = vadd.f32 %v10225_v11, %v5517_v17 }
 0xc96   : > { %v5576_v36 = vmax.f32 %v5518_v45, 0.0 }
 0xc97   : > { %v5330_v1 = vpop.f32.mrf.mxu2  ;;  %v5704_v18 = vpop.f32.mrf.mxu0 }
 0xc98   : > { %v5331_v44 = vadd.f32 %v10411_v28, %v5330_v1  ;;  %v5705_v30 = vadd.f32 %v10343_v0, %v5704_v18 }
 0xc9a   : > { %v5379_v58 = vmax.f32 %v5331_v44, 0.0  ;;  %5774 = vst.msk [vmem:[%s10349_s19 + $0x38] sm:$0xff] %vm1809_vm3, %v5705_v30 }
 0xc9b   : > { %v5519_v2 = vpop.f32.mrf.mxu3 }
 0xc9c   : > { %v5405_v8 = vpack.c.bf16 %v5379_v58, %v5378_v56  ;;  %v5520_v6 = vadd.f32 %v10225_v11, %v5519_v2 }
 0xc9e   : > { %v5577_v21 = vmax.f32 %v5520_v6, 0.0  ;;  %6170 = vmatmul.msk.bf16.gmra.mxu3 %vm5016_vm8, %v5405_v8 }
 0xc9f   : > { %v5707_v9 = vpop.f32.mrf.mxu0 }
 0xca0   : > { %v5605_v52 = vpack.c.bf16 %v5577_v21, %v5576_v36  ;;  %v5708_v55 = vadd.f32 %v10343_v0, %v5707_v9 }
 0xca2   : > { %5775 = vst.msk [vmem:[%s10349_s19 + $0x40] sm:$0xff] %vm1809_vm3, %v5708_v55  ;;  %6191 = vmatmul.msk.bf16.gmra.mxu0 %vm5016_vm8, %v5605_v52 }
 0xca7   : > { %v5709_v31 = vpop.f32.mrf.mxu0 }
 0xca8   : > { %v5710_v13 = vadd.f32 %v10343_v0, %v5709_v31 }
 0xcaa   : > { %5776 = vst.msk [vmem:[%s10349_s19 + $0x48] sm:$0xff] %vm1809_vm3, %v5710_v13 }
 0xcc5   : > { %v5144_v40 = vpop.f32.mrf.mxu1 }
 0xcc6   : > { %v5145_v54 = vadd.f32 %v10255_v22, %v5144_v40 }
 0xcc8   : > { %v5182_v46 = vmax.f32 %v5145_v54, 0.0 }
 0xccd   : > { %v5146_v42 = vpop.f32.mrf.mxu1 }
 0xcce   : > { %v5147_v51 = vadd.f32 %v10255_v22, %v5146_v42 }
 0xcd0   : > { %v5183_v19 = vmax.f32 %v5147_v51, 0.0 }
 0xcd2   : > { %v5205_v47 = vpack.c.bf16 %v5183_v19, %v5182_v46 }
 0xcd4   : > { %6146 = vmatmul.msk.bf16.gmra.mxu2 %vm5016_vm8, %v5205_v47 }
 0xcd6   : > { %v5333_v50 = vpop.f32.mrf.mxu2 }
 0xcd7   : > { %v5334_v57 = vadd.f32 %v10411_v28, %v5333_v50 }
 0xcd9   : > { %v5380_v26 = vmax.f32 %v5334_v57, 0.0 }
 0xcdb   : > { %v5149_v38 = vpop.f32.mrf.mxu1 }
 0xcdc   : > { %v5150_v32 = vadd.f32 %v10255_v22, %v5149_v38 }
 0xcde   : > { %v5335_v53 = vpop.f32.mrf.mxu2  ;;  %v5712_v33 = vpop.f32.mrf.mxu0  ;;  %v5184_v37 = vmax.f32 %v5150_v32, 0.0  ;;  %v10517_v32 = vld [vmem:[%s10594_s7 + $0x2] ss:$0 sm:$0xff] }
 0xcdf   : > { %v5336_v24 = vadd.f32 %v10411_v28, %v5335_v53  ;;  %v5713_v7 = vadd.f32 %v10343_v0, %v5712_v33 }
 0xce1   : > { %v5381_v34 = vmax.f32 %v5336_v24, 0.0  ;;  %5777 = vst.msk [vmem:[%s10349_s19 + $0x50] sm:$0xff] %vm1809_vm3, %v5713_v7  ;;  %v5522_v39 = vpop.f32.mrf.mxu3 }
 0xce2   : > { %v5523_v61 = vadd.f32 %v10225_v11, %v5522_v39 }
 0xce3   : > { %v5406_v60 = vpack.c.bf16 %v5381_v34, %v5380_v26  ;;  %v5151_v15 = vpop.f32.mrf.mxu1 }
 0xce4   : > { %v5152_v35 = vadd.f32 %v10255_v22, %v5151_v15  ;;  %v5578_v22 = vmax.f32 %v5523_v61, 0.0 }
 0xce5   : > { %6171 = vmatmul.msk.bf16.gmra.mxu3 %vm5016_vm8, %v5406_v60 }
 0xce6   : > { %v5714_v3 = vpop.f32.mrf.mxu0  ;;  %v5185_v25 = vmax.f32 %v5152_v35, 0.0 }
 0xce7   : > { %v5715_v59 = vadd.f32 %v10343_v0, %v5714_v3  ;;  %v5338_v49 = vpop.f32.mrf.mxu2 }
 0xce8   : > { %v5206_v20 = vpack.c.bf16 %v5185_v25, %v5184_v37  ;;  %v5339_v63 = vadd.f32 %v10411_v28, %v5338_v49 }
 0xce9   : > { %5778 = vst.msk [vmem:[%s10349_s19 + $0x58] sm:$0xff] %vm1809_vm3, %v5715_v59  ;;  %v5524_v16 = vpop.f32.mrf.mxu3 }
 0xcea   : > { %v5525_v43 = vadd.f32 %v10225_v11, %v5524_v16  ;;  %6147 = vmatmul.msk.bf16.gmra.mxu2 %vm5016_vm8, %v5206_v20  ;;  %v5382_v5 = vmax.f32 %v5339_v63, 0.0 }
 0xcec   : > { %v5579_v4 = vmax.f32 %v5525_v43, 0.0 }
 0xcee   : > { %v5606_v29 = vpack.c.bf16 %v5579_v4, %v5578_v22 }
 0xcef   : > { %v5340_v62 = vpop.f32.mrf.mxu2 }
 0xcf0   : > { %v5341_v12 = vadd.f32 %v10411_v28, %v5340_v62  ;;  %6192 = vmatmul.msk.bf16.gmra.mxu0 %vm5016_vm8, %v5606_v29 }
 0xcf2   : > { %v5383_v14 = vmax.f32 %v5341_v12, 0.0 }
 0xcf4   : > { %v5407_v10 = vpack.c.bf16 %v5383_v14, %v5382_v5 }
 0xcf6   : > { %6172 = vmatmul.msk.bf16.gmra.mxu3 %vm5016_vm8, %v5407_v10 }
 0xcff   : > { %v5717_v27 = vpop.f32.mrf.mxu0 }
 0xd00   : > { %v5718_v41 = vadd.f32 %v10343_v0, %v5717_v27 }
 0xd01   : > { %v5527_v23 = vpop.f32.mrf.mxu3 }
 0xd02   : > { %5779 = vst.msk [vmem:[%s10349_s19 + $0x60] sm:$0xff] %vm1809_vm3, %v5718_v41  ;;  %v5528_v48 = vadd.f32 %v10225_v11, %v5527_v23 }
 0xd04   : > { %v5580_v30 = vmax.f32 %v5528_v48, 0.0 }
 0xd07   : > { %v5719_v17 = vpop.f32.mrf.mxu0 }
 0xd08   : > { %v5720_v1 = vadd.f32 %v10343_v0, %v5719_v17 }
 0xd09   : > { %v5529_v18 = vpop.f32.mrf.mxu3 }
 0xd0a   : > { %5780 = vst.msk [vmem:[%s10349_s19 + $0x68] sm:$0xff] %vm1809_vm3, %v5720_v1  ;;  %v5530_v44 = vadd.f32 %v10225_v11, %v5529_v18 }
 0xd0c   : > { %v5581_v56 = vmax.f32 %v5530_v44, 0.0 }
 0xd0e   : > { %v5607_v45 = vpack.c.bf16 %v5581_v56, %v5580_v30 }
 0xd10   : > { %6193 = vmatmul.msk.bf16.gmra.mxu0 %vm5016_vm8, %v5607_v45 }
 0xd16   : > { %v5343_v58 = vpop.f32.mrf.mxu2 }
 0xd17   : > { %v5344_v2 = vadd.f32 %v10411_v28, %v5343_v58 }
 0xd19   : > { %v5384_v9 = vmax.f32 %v5344_v2, 0.0 }
 0xd1e   : > { %v5345_v8 = vpop.f32.mrf.mxu2 }
 0xd1f   : > { %v5346_v6 = vadd.f32 %v10411_v28, %v5345_v8  ;;  %v5722_v36 = vpop.f32.mrf.mxu0 }
 0xd20   : > { %v5723_v21 = vadd.f32 %v10343_v0, %v5722_v36 }
 0xd21   : > { %v5385_v52 = vmax.f32 %v5346_v6, 0.0  ;;  %v5532_v55 = vpop.f32.mrf.mxu3 }
 0xd22   : > { %5781 = vst.msk [vmem:[%s10349_s19 + $0x70] sm:$0xff] %vm1809_vm3, %v5723_v21  ;;  %v5533_v40 = vadd.f32 %v10225_v11, %v5532_v55 }
 0xd23   : > { %v5408_v31 = vpack.c.bf16 %v5385_v52, %v5384_v9 }
 0xd24   : > { %v5582_v46 = vmax.f32 %v5533_v40, 0.0 }
 0xd25   : > { %6173 = vmatmul.msk.bf16.gmra.mxu3 %vm5016_vm8, %v5408_v31 }
 0xd27   : > { %v5724_v13 = vpop.f32.mrf.mxu0 }
 0xd28   : > { %v5725_v54 = vadd.f32 %v10343_v0, %v5724_v13 }
 0xd29   : > { %v5534_v42 = vpop.f32.mrf.mxu3 }
 0xd2a   : > { %5782 = vst.msk [vmem:[%s10349_s19 + $0x78] sm:$0xff] %vm1809_vm3, %v5725_v54  ;;  %v5535_v51 = vadd.f32 %v10225_v11, %v5534_v42 }
 0xd2c   : > { %v5583_v19 = vmax.f32 %v5535_v51, 0.0 }
 0xd2e   : > { %v5608_v47 = vpack.c.bf16 %v5583_v19, %v5582_v46 }
 0xd30   : > { %6194 = vmatmul.msk.bf16.gmra.mxu0 %vm5016_vm8, %v5608_v47 }
 0xd57   : > { %v5348_v50 = vpop.f32.mrf.mxu2 }
 0xd58   : > { %v5349_v38 = vadd.f32 %v10411_v28, %v5348_v50 }
 0xd5a   : > { %v5386_v33 = vmax.f32 %v5349_v38, 0.0 }
 0xd5f   : > { %v5350_v57 = vpop.f32.mrf.mxu2 }
 0xd60   : > { %v5351_v53 = vadd.f32 %v10411_v28, %v5350_v57 }
 0xd62   : > { %v5387_v24 = vmax.f32 %v5351_v53, 0.0 }
 0xd64   : > { %v5409_v7 = vpack.c.bf16 %v5387_v24, %v5386_v33 }
 0xd66   : > { %6174 = vmatmul.msk.bf16.gmra.mxu3 %vm5016_vm8, %v5409_v7 }
 0xd68   : > { %v5537_v26 = vpop.f32.mrf.mxu3 }
 0xd69   : > { %v5538_v60 = vadd.f32 %v10517_v32, %v5537_v26 }
 0xd6b   : > { %v5584_v3 = vmax.f32 %v5538_v60, 0.0 }
 0xd6d   : > { %v5727_v34 = vpop.f32.mrf.mxu0  ;;  %v5353_v11 = vpop.f32.mrf.mxu2 }
 0xd6e   : > { %v5728_v39 = vadd.f32 %v10343_v0, %v5727_v34  ;;  %v5354_v25 = vadd.f32 %v10411_v28, %v5353_v11 }
 0xd70   : > { %5783 = vst.msk [vmem:[%s10349_s19 + $0x80] sm:$0xff] %vm1809_vm3, %v5728_v39  ;;  %v5539_v15 = vpop.f32.mrf.mxu3  ;;  %v5388_v43 = vmax.f32 %v5354_v25, 0.0 }
 0xd71   : > { %v5540_v35 = vadd.f32 %v10517_v32, %v5539_v15 }
 0xd73   : > { %v5585_v37 = vmax.f32 %v5540_v35, 0.0 }
 0xd75   : > { %v5609_v59 = vpack.c.bf16 %v5585_v37, %v5584_v3  ;;  %v5729_v49 = vpop.f32.mrf.mxu0  ;;  %v5355_v61 = vpop.f32.mrf.mxu2 }
 0xd76   : > { %v5730_v20 = vadd.f32 %v10343_v0, %v5729_v49  ;;  %v5356_v16 = vadd.f32 %v10411_v28, %v5355_v61 }
 0xd77   : > { %6195 = vmatmul.msk.bf16.gmra.mxu0 %vm5016_vm8, %v5609_v59 }
 0xd78   : > { %5784 = vst.msk [vmem:[%s10349_s19 + $0x88] sm:$0xff] %vm1809_vm3, %v5730_v20  ;;  %v5389_v22 = vmax.f32 %v5356_v16, 0.0 }
 0xd79   : > { %v5542_v4 = vpop.f32.mrf.mxu3 }
 0xd7a   : > { %v5410_v63 = vpack.c.bf16 %v5389_v22, %v5388_v43  ;;  %v5543_v29 = vadd.f32 %v10517_v32, %v5542_v4 }
 0xd7c   : > { %6175 = vmatmul.msk.bf16.gmra.mxu3 %vm5016_vm8, %v5410_v63  ;;  %v5586_v5 = vmax.f32 %v5543_v29, 0.0 }
 0xd81   : > { %v5544_v62 = vpop.f32.mrf.mxu3 }
 0xd82   : > { %v5545_v12 = vadd.f32 %v10517_v32, %v5544_v62 }
 0xd84   : > { %v5587_v28 = vmax.f32 %v5545_v12, 0.0 }
 0xd86   : > { %v5610_v14 = vpack.c.bf16 %v5587_v28, %v5586_v5 }
 0xd88   : > { %6196 = vmatmul.msk.bf16.gmra.mxu0 %vm5016_vm8, %v5610_v14 }
 0xd8d   : > { %v5732_v10 = vpop.f32.mrf.mxu0 }
 0xd8e   : > { %v5733_v27 = vadd.f32 %v10343_v0, %v5732_v10 }
 0xd90   : > { %5785 = vst.msk [vmem:[%s10349_s19 + $0x90] sm:$0xff] %vm1809_vm3, %v5733_v27 }
 0xd95   : > { %v5734_v41 = vpop.f32.mrf.mxu0 }
 0xd96   : > { %v5735_v23 = vadd.f32 %v10343_v0, %v5734_v41 }
 0xd98   : > { %5786 = vst.msk [vmem:[%s10349_s19 + $0x98] sm:$0xff] %vm1809_vm3, %v5735_v23 }
 0xda8   : > { %v5547_v17 = vpop.f32.mrf.mxu3 }
 0xda9   : > { %v5548_v18 = vadd.f32 %v10517_v32, %v5547_v17 }
 0xdab   : > { %v5588_v56 = vmax.f32 %v5548_v18, 0.0 }
 0xdad   : > { %v5737_v48 = vpop.f32.mrf.mxu0 }
 0xdae   : > { %v5738_v1 = vadd.f32 %v10343_v0, %v5737_v48 }
 0xdb0   : > { %5787 = vst.msk [vmem:[%s10349_s19 + $0xa0] sm:$0xff] %vm1809_vm3, %v5738_v1  ;;  %v5549_v44 = vpop.f32.mrf.mxu3 }
 0xdb1   : > { %v5550_v30 = vadd.f32 %v10517_v32, %v5549_v44 }
 0xdb3   : > { %v5589_v45 = vmax.f32 %v5550_v30, 0.0 }
 0xdb5   : > { %v5611_v58 = vpack.c.bf16 %v5589_v45, %v5588_v56  ;;  %v5739_v2 = vpop.f32.mrf.mxu0 }
 0xdb6   : > { %v5740_v8 = vadd.f32 %v10343_v0, %v5739_v2 }
 0xdb7   : > { %6197 = vmatmul.msk.bf16.gmra.mxu0 %vm5016_vm8, %v5611_v58 }
 0xdb8   : > { %5788 = vst.msk [vmem:[%s10349_s19 + $0xa8] sm:$0xff] %vm1809_vm3, %v5740_v8 }
 0xde9   : > { %v5552_v6 = vpop.f32.mrf.mxu3 }
 0xdea   : > { %v5553_v36 = vadd.f32 %v10517_v32, %v5552_v6 }
 0xdec   : > { %v5590_v52 = vmax.f32 %v5553_v36, 0.0 }
 0xdf1   : > { %v5554_v21 = vpop.f32.mrf.mxu3 }
 0xdf2   : > { %v5555_v9 = vadd.f32 %v10517_v32, %v5554_v21 }
 0xdf4   : > { %v5591_v55 = vmax.f32 %v5555_v9, 0.0  ;;  %v5742_v31 = vpop.f32.mrf.mxu0 }
 0xdf5   : > { %v5743_v13 = vadd.f32 %v10343_v0, %v5742_v31 }
 0xdf6   : > { %v5612_v40 = vpack.c.bf16 %v5591_v55, %v5590_v52 }
 0xdf7   : > { %5789 = vst.msk [vmem:[%s10349_s19 + $0xb0] sm:$0xff] %vm1809_vm3, %v5743_v13 }
 0xdf8   : > { %6198 = vmatmul.msk.bf16.gmra.mxu0 %vm5016_vm8, %v5612_v40 }
 0xdfc   : > { %v5744_v54 = vpop.f32.mrf.mxu0 }
 0xdfd   : > { %v5745_v42 = vadd.f32 %v10343_v0, %v5744_v54 }
 0xdff   : > { %5790 = vst.msk [vmem:[%s10349_s19 + $0xb8] sm:$0xff] %vm1809_vm3, %v5745_v42  ;;  %v5557_v51 = vpop.f32.mrf.mxu3 }
 0xe00   : > { %v5558_v47 = vadd.f32 %v10517_v32, %v5557_v51 }
 0xe02   : > { %v5592_v57 = vmax.f32 %v5558_v47, 0.0 }
 0xe05   : > { %v5747_v46 = vpop.f32.mrf.mxu0 }
 0xe06   : > { %v5748_v19 = vadd.f32 %v10343_v0, %v5747_v46 }
 0xe07   : > { %v5559_v50 = vpop.f32.mrf.mxu3 }
 0xe08   : > { %5791 = vst.msk [vmem:[%s10349_s19 + $0xc0] sm:$0xff] %vm1809_vm3, %v5748_v19  ;;  %v5560_v38 = vadd.f32 %v10517_v32, %v5559_v50 }
 0xe0a   : > { %v5593_v53 = vmax.f32 %v5560_v38, 0.0 }
 0xe0c   : > { %v5613_v33 = vpack.c.bf16 %v5593_v53, %v5592_v57 }
 0xe0d   : > { %v5749_v24 = vpop.f32.mrf.mxu0 }
 0xe0e   : > { %v5750_v7 = vadd.f32 %v10343_v0, %v5749_v24  ;;  %6199 = vmatmul.msk.bf16.gmra.mxu0 %vm5016_vm8, %v5613_v33 }
 0xe10   : > { %5792 = vst.msk [vmem:[%s10349_s19 + $0xc8] sm:$0xff] %vm1809_vm3, %v5750_v7 }
 0xe34   : > { %v5752_v26 = vpop.f32.mrf.mxu0 }
 0xe35   : > { %v5753_v34 = vadd.f32 %v10343_v0, %v5752_v26 }
 0xe37   : > { %5793 = vst.msk [vmem:[%s10349_s19 + $0xd0] sm:$0xff] %vm1809_vm3, %v5753_v34 }
 0xe3c   : > { %v5754_v11 = vpop.f32.mrf.mxu0 }
 0xe3d   : > { %v5755_v39 = vadd.f32 %v10343_v0, %v5754_v11 }
 0xe3f   : > { %5794 = vst.msk [vmem:[%s10349_s19 + $0xd8] sm:$0xff] %vm1809_vm3, %v5755_v39 }
 0xe75   : > { %v5757_v32 = vpop.f32.mrf.mxu0 }
 0xe76   : > { %v5758_v60 = vadd.f32 %v10343_v0, %v5757_v32 }
 0xe78   : > { %5795 = vst.msk [vmem:[%s10349_s19 + $0xe0] sm:$0xff] %vm1809_vm3, %v5758_v60 }
 0xe7d   : > { %v5759_v15 = vpop.f32.mrf.mxu0 }
 0xe7e   : > { %v5760_v35 = vadd.f32 %v10343_v0, %v5759_v15 }
 0xe80   : > { %5796 = vst.msk [vmem:[%s10349_s19 + $0xe8] sm:$0xff] %vm1809_vm3, %v5760_v35 }
 0xe8b   : > { %v5762_v3 = vpop.f32.mrf.mxu0 }
 0xe8c   : > { %v5763_v37 = vadd.f32 %v10343_v0, %v5762_v3 }
 0xe8e   : > { %5797 = vst.msk [vmem:[%s10349_s19 + $0xf0] sm:$0xff] %vm1809_vm3, %v5763_v37 }
 0xe93   : > { %v5764_v25 = vpop.f32.mrf.mxu0 }
 0xe94   : > { %v5765_v59 = vadd.f32 %v10343_v0, %v5764_v25 }
 0xe96   : > { %5798 = vst.msk [vmem:[%s10349_s19 + $0xf8] sm:$0xff] %vm1809_vm3, %v5765_v59 }
 0xe97 PF: > { %s20_s13 = sadd.s32 1, %s6891_s13  }
 0xe98   : > { %p17_p4 = scmp.ge.s32.totalorder %s20_s13, 6  }
 0xe9a   :  { %19 = sbr.rel (!%p17_p4) target bundleno = 1 (0x1), region = 94 }

</bundles_post_ra>
